<compile_context>
chip_gen: v6e
topology: v6e:2x2x1
jax: 0.10.0
libtpu: 0.0.40
codegen_flags: <defaults>
</compile_context>

<pallas_src>
import numpy as np
import jax
import jax.numpy as jnp
from jax.experimental import pallas as pl
from jax.experimental.pallas import tpu as pltpu


def _upsample_kernel(x_ref, s_ref, o_ref):
    # (B, Hin*Win) @ (Hin*Win, Hout*Wout) -> (B, Hout*Wout)
    # One-hot columns => exact gather at HIGHEST precision.
    o_ref[...] = jnp.dot(
        x_ref[...],
        s_ref[...],
        precision=jax.lax.Precision.HIGHEST,
        preferred_element_type=jnp.float32,
    )


def _nearest_kron_matrix(hin, win, hout, wout):
    # PyTorch 'nearest': src = floor(dst * in / out)
    ridx = np.floor(np.arange(hout) * hin / hout).astype(np.int64)
    cidx = np.floor(np.arange(wout) * win / wout).astype(np.int64)
    sh_t = (np.arange(hin)[:, None] == ridx[None, :]).astype(np.float32)  # (Hin, Hout)
    sw = (np.arange(win)[:, None] == cidx[None, :]).astype(np.float32)    # (Win, Wout)
    # S[h*Win + w, ho*Wout + wo] = [ridx[ho] == h] * [cidx[wo] == w]
    return jnp.asarray(np.kron(sh_t, sw))                                  # (Hin*Win, Hout*Wout)


def _choose_plane_block(num_planes, hw_in, hw_out,
                        block_budget_bytes=8 * 1024 * 1024):
    """Planes per grid step.

    Prefer a multiple of 8 that divides num_planes, keeps the double-buffered
    f32 input+output blocks under the budget, and leaves >= 2 grid steps (so
    the "parallel" axis can be sharded across the 2 TensorCores on v7x).
    Fall back to a single full-extent block (always layout-legal, since a
    block dim equal to the full array dim is allowed) for small plane counts.
    """
    per_plane = 2 * 4 * (hw_in + hw_out)  # double-buffered f32 input + output
    cap = max(1, block_budget_bytes // per_plane)
    best = None
    b = 8
    while b <= min(cap, num_planes // 2):
        if num_planes % b == 0:
            best = b
        b += 8
    return best if best is not None else num_planes


def complex_upsample2d(x, size, mode="nearest"):
    """x: complex64 array of shape (N, C, Hin, Win).  Returns (N, C, size, size)."""
    if mode != "nearest":
        raise NotImplementedError("only mode='nearest' is implemented")

    n, c, hin, win = x.shape
    hout = wout = int(size)
    num_planes = 2 * n * c          # real planes then imag planes
    hw_in = hin * win
    hw_out = hout * wout

    # Split complex -> float32 planes once (single fused XLA pass) and flatten
    # the spatial dims so the kernel sees lane-dense 2D tiles.
    planes = jnp.concatenate(
        [jnp.real(x).astype(jnp.float32), jnp.imag(x).astype(jnp.float32)],
        axis=0,
    ).reshape(num_planes, hw_in)

    s_big = _nearest_kron_matrix(hin, win, hout, wout)   # (Hin*Win, Hout*Wout)

    bplanes = _choose_plane_block(num_planes, hw_in, hw_out)
    grid = (num_planes // bplanes,)

    # VMEM budget: resident S + double-buffered in/out blocks, plus headroom.
    vmem_bytes = 4 * hw_in * hw_out + 2 * 4 * bplanes * (hw_in + hw_out)
    vmem_limit = min(96 * 1024 * 1024, max(32 * 1024 * 1024, 2 * vmem_bytes))

    out_flat = pl.pallas_call(
        _upsample_kernel,
        out_shape=jax.ShapeDtypeStruct((num_planes, hw_out), jnp.float32),
        grid_spec=pltpu.PrefetchScalarGridSpec(
            num_scalar_prefetch=0,
            grid=grid,
            in_specs=[
                pl.BlockSpec((bplanes, hw_in), lambda i: (i, 0)),
                # Constant block index -> fetched once, resident in VMEM.
                pl.BlockSpec((hw_in, hw_out), lambda i: (0, 0)),
            ],
            out_specs=pl.BlockSpec((bplanes, hw_out), lambda i: (i, 0)),
        ),
        compiler_params=pltpu.CompilerParams(
            dimension_semantics=("parallel",),
            vmem_limit_bytes=vmem_limit,
        ),
    )(planes, s_big)

    # Free (contiguous) reshape back to planes, then recombine to complex64.
    out = out_flat.reshape(2, n, c, hout, wout)
    return jax.lax.complex(out[0], out[1])


def _reference(x, size):
    # Pure-JAX reference mirroring the PyTorch forward (mag/phase upsample).
    n, c, hin, win = x.shape
    ridx = np.floor(np.arange(size) * hin / size).astype(np.int64)
    cidx = np.floor(np.arange(size) * win / size).astype(np.int64)
    mag = jnp.abs(x)
    phase = jnp.arctan2(jnp.imag(x), jnp.real(x))
    mag_u = mag[:, :, ridx][:, :, :, cidx]
    ph_u = phase[:, :, ridx][:, :, :, cidx]
    return (mag_u * jnp.exp(1j * ph_u)).astype(jnp.complex64)


if __name__ == "__main__":
    key = jax.random.PRNGKey(0)
    k1, k2 = jax.random.split(key)
    N, C, H, W = 2, 4, 16, 16
    SIZE = 32
    xr = jax.random.normal(k1, (N, C, H, W), dtype=jnp.float32)
    xi = jax.random.normal(k2, (N, C, H, W), dtype=jnp.float32)
    x = (xr + 1j * xi).astype(jnp.complex64)

    fn = jax.jit(complex_upsample2d, static_argnums=1)
    out = fn(x, SIZE)
    out = jax.block_until_ready(out)

    ref = _reference(x, SIZE)
    assert out.shape == (N, C, SIZE, SIZE)
    assert out.dtype == jnp.complex64
    np.testing.assert_allclose(np.asarray(out), np.asarray(ref), rtol=1e-4, atol=1e-4)

    print("KERNEL_OK")
</pallas_src>

<mosaic_0001>
module attributes {stable_mosaic.version = 11 : i64} {
  func.func @_upsample_kernel(%arg0: i32, %arg1: memref<8x256xf32, #tpu.memory_space<vmem>>, %arg2: memref<256x1024xf32, #tpu.memory_space<vmem>>, %arg3: memref<8x1024xf32, #tpu.memory_space<vmem>>) attributes {dimension_semantics = [#tpu.dimension_semantics<parallel>], iteration_bounds = array<i64: 2>, scalar_prefetch = 0 : i64, scratch_operands = 0 : i64, tpu.core_type = #tpu.core_type<tc>, window_params = [{transform_indices = @transform_0, window_bounds = array<i64: 8, 256>}, {pipeline_mode = #tpu.pipeline_mode<synchronous>, transform_indices = @transform_1, window_bounds = array<i64: 256, 1024>}, {transform_indices = @transform_2, window_bounds = array<i64: 8, 1024>}]} {
    %c0 = arith.constant 0 : index
    %c0_0 = arith.constant 0 : index
    %0 = vector.load %arg1[%c0, %c0_0] : memref<8x256xf32, #tpu.memory_space<vmem>>, vector<8x256xf32>
    %c0_1 = arith.constant 0 : index
    %c0_2 = arith.constant 0 : index
    %1 = vector.load %arg2[%c0_1, %c0_2] : memref<256x1024xf32, #tpu.memory_space<vmem>>, vector<256x1024xf32>
    %cst = arith.constant dense<0.000000e+00> : vector<8x1024xf32>
    %2 = tpu.matmul %0, %1, %cst {dimension_numbers = #tpu.dot_dimension_numbers<[1], [0], [0], [1], [0, 0, 1, 1], [], []>, precision = #tpu.contract_precision<fp32>} : vector<8x256xf32>, vector<256x1024xf32>, vector<8x1024xf32> -> vector<8x1024xf32>
    %c0_3 = arith.constant 0 : index
    %c0_4 = arith.constant 0 : index
    %3 = vector.load %arg3[%c0_3, %c0_4] : memref<8x1024xf32, #tpu.memory_space<vmem>>, vector<8x1024xf32>
    tpu.vector_store %arg3[%c0_3, %c0_4], %2 {strides = array<i32>} : memref<8x1024xf32, #tpu.memory_space<vmem>>, vector<8x1024xf32>,
    return
  }
  func.func @transform_0(%arg0: i32) -> (i32, i32) {
    %c0_i32 = arith.constant 0 : i32
    %c0_i32_0 = arith.constant 0 : i32
    return %arg0, %c0_i32 : i32, i32
  }
  func.func @transform_1(%arg0: i32) -> (i32, i32) {
    %c0_i32 = arith.constant 0 : i32
    %c0_i32_0 = arith.constant 0 : i32
    %c0_i32_1 = arith.constant 0 : i32
    return %c0_i32, %c0_i32_0 : i32, i32
  }
  func.func @transform_2(%arg0: i32) -> (i32, i32) {
    %c0_i32 = arith.constant 0 : i32
    %c0_i32_0 = arith.constant 0 : i32
    return %arg0, %c0_i32 : i32, i32
  }
}

</mosaic_0001>

<bundles_post_ra>
// kernel: custom-call
= control target key start
LH: loop header
LB: loop body
LE: loop exit
PB: predicated region body
PF: predicated region fallthrough
CT: control target
= control target key end

     0   :  { %2 = vsyncpa [#allocation0], 0  ;;  %s47_s0 = inlined_call_operand.hbm [shape: c64[2,4,16,16], index: 0, kind: input, shape index: {}]   ;;  %s48_s1 = inlined_call_operand.vmem [shape: f32[2,4,16,16], index: 1, kind: output, shape index: {}]  }
   0x1   :  { %s3_s8 = sshll.u32 %s48_s1, 4  ;;  %s4_s8 = int_to_ptr.vmem [resolvable:$true] %s3_s8 }
   0x2   :  { %s17_s9 = scalar_lea.vmem %s4_s8, 2048  ;;  %p22_p1 = scmp.lt.s32.totalorder %s4_s8, %s4_s8 }
   0x3   :  { %p18_p0 = scmp.ne.s32.totalorder %s4_s8, %s17_s9  ;;  %p23_p2 = scmp.lt.s32.totalorder %s17_s9, %s17_s9 }
   0x5   :  { %p24_p3 = por %p23_p2, %p22_p1 }
   0x7   :  { %p25_p4 = pnand %p24_p3, %p18_p0 }
   0x9   :  { %28 = shalt.err (!%p25_p4)  }
   0xa   :  { %6 = dma.hbm_to_vmem [thread:$0]  %s47_s0, 2048, %s4_s8, [#allocation0] }
   0xb   :  { %29 = dma.done.wait [#allocation0], 2048  }
   0xc   :  { %30 = vsyncadd [#allocation0], 4294965248 }
   0xd   :  { %8 = vsyncpa [#allocation0], 1 }

// kernel: custom-call.1
= control target key start
LH: loop header
LB: loop body
LE: loop exit
PB: predicated region body
PF: predicated region fallthrough
CT: control target
= control target key end

     0   :  { %s51_s0 = inlined_call_operand.hbm [shape: c64[2,4,16,16], index: 0, kind: input, shape index: {}]   ;;  %s52_s1 = inlined_call_operand.vmem [shape: f32[2,4,16,16], index: 1, kind: output, shape index: {}]  }
   0x1   :  { %s2_s8 = scalar_lea.hbm %s51_s0, 2048 }
   0x2   :  { %3 = vsyncpa [#allocation0], 0  ;;  %s4_s11 = sshll.u32 %s52_s1, 4  ;;  %s5_s11 = int_to_ptr.vmem [resolvable:$true] %s4_s11 }
   0x3   :  { %s20_s12 = scalar_lea.vmem %s5_s11, 2048  ;;  %p25_p1 = scmp.lt.s32.totalorder %s5_s11, %s5_s11 }
   0x4   :  { %p21_p0 = scmp.ne.s32.totalorder %s5_s11, %s20_s12  ;;  %p26_p2 = scmp.lt.s32.totalorder %s20_s12, %s20_s12 }
   0x6   :  { %p27_p3 = por %p26_p2, %p25_p1 }
   0x8   :  { %p28_p4 = pnand %p27_p3, %p21_p0 }
   0xa   :  { %31 = shalt.err (!%p28_p4)  }
   0xb   :  { %7 = dma.hbm_to_vmem [thread:$0]  %s2_s8, 2048, %s5_s11, [#allocation0] }
   0xc   :  { %33 = dma.done.wait [#allocation0], 2048  }
   0xd   :  { %34 = vsyncadd [#allocation0], 4294965248 }
   0xe   :  { %9 = vsyncpa [#allocation0], 1 }

// kernel: squeeze.2
= control target key start
LH: loop header
LB: loop body
LE: loop exit
PB: predicated region body
PF: predicated region fallthrough
CT: control target
= control target key end

     0   :  { %vm154_vm0 = vcmask 1047556   ;;  %s549_s14 = smov 96   ;;  %s550_s26 = smov 64   ;;  %vm3_vm1 = vcmask 261120   ;;  %s1128_s0 = inlined_call_operand.vmem [shape: f32[8,1024], index: 0, kind: input, shape index: {}]   ;;  %s1129_s1 = inlined_call_operand.vmem [shape: f32[2,4,32,32], index: 1, kind: output, shape index: {}]  }
   0x1   :  { %v484_v0 = vld [vmem:[%s1128_s0 + $0x2] ss:$8 sm:$0xf]   ;;  %v152_v3 = vld [vmem:[%s1128_s0] ss:$8 sm:$0xf]  }
   0x2   :  { %v485_v1 = vld [vmem:[%s1128_s0 + $0x2] ss:$8 sm:$0xf0]   ;;  %v153_v4 = vld [vmem:[%s1128_s0] ss:$8 sm:$0xf0]  }
   0x3   :  { %v177_v2 = vsel %vm154_vm0, %v485_v1, %v484_v0  ;;  %v155_v5 = vsel %vm154_vm0, %v153_v4, %v152_v3  ;;  %v487_v6 = vld [vmem:[%s1128_s0 + $0x3] ss:$8 sm:$0xf]   ;;  %v481_v9 = vld [vmem:[%s1128_s0 + $0x1] ss:$8 sm:$0xf]  }
   0x4   :  { %178 = vrot.lane.b32.xlu1 %v177_v2, %s549_s14  ;;  %v488_v7 = vld [vmem:[%s1128_s0 + $0x3] ss:$8 sm:$0xf0]   ;;  %156 = vrot.lane.b32.xlu0 %v155_v5, %s549_s14  ;;  %v482_v10 = vld [vmem:[%s1128_s0 + $0x1] ss:$8 sm:$0xf0]  }
   0x5   :  { %v188_v8 = vsel %vm154_vm0, %v488_v7, %v487_v6  ;;  %v166_v11 = vsel %vm154_vm0, %v482_v10, %v481_v9  ;;  %v493_v12 = vld [vmem:[%s1128_s0 + $0x5] ss:$8 sm:$0xf]   ;;  %v490_v14 = vld [vmem:[%s1128_s0 + $0x4] ss:$8 sm:$0xf]  }
   0x6   :  { %v494_v13 = vld [vmem:[%s1128_s0 + $0x5] ss:$8 sm:$0xf0]   ;;  %v491_v15 = vld [vmem:[%s1128_s0 + $0x4] ss:$8 sm:$0xf0]  }
   0x7   :  { %v210_v16 = vsel %vm154_vm0, %v494_v13, %v493_v12  ;;  %v199_v17 = vsel %vm154_vm0, %v491_v15, %v490_v14  ;;  %v499_v18 = vld [vmem:[%s1128_s0 + $0x7] ss:$8 sm:$0xf]   ;;  %v496_v20 = vld [vmem:[%s1128_s0 + $0x6] ss:$8 sm:$0xf]  }
   0x8   :  { %189 = vrot.lane.b32.xlu1 %v188_v8, %s549_s14  ;;  %167 = vrot.lane.b32.xlu0 %v166_v11, %s549_s14  ;;  %v500_v19 = vld [vmem:[%s1128_s0 + $0x7] ss:$8 sm:$0xf0]   ;;  %v497_v21 = vld [vmem:[%s1128_s0 + $0x6] ss:$8 sm:$0xf0]  }
   0x9   :  { %v232_v22 = vsel %vm154_vm0, %v500_v19, %v499_v18  ;;  %v221_v23 = vsel %vm154_vm0, %v497_v21, %v496_v20  ;;  %v503_v24 = vld [vmem:[%s1128_s0 + $0x1] ss:$8 sm:$0xf]   ;;  %v238_v26 = vld [vmem:[%s1128_s0] ss:$8 sm:$0xf]  }
   0xa   :  { %v504_v25 = vld [vmem:[%s1128_s0 + $0x1] ss:$8 sm:$0xf0]   ;;  %v239_v27 = vld [vmem:[%s1128_s0] ss:$8 sm:$0xf0]  }
   0xb   :  { %v252_v28 = vsel %vm154_vm0, %v504_v25, %v503_v24  ;;  %v241_v29 = vsel %vm154_vm0, %v239_v27, %v238_v26  ;;  %v509_v30 = vld [vmem:[%s1128_s0 + $0x3] ss:$8 sm:$0xf]   ;;  %v506_v32 = vld [vmem:[%s1128_s0 + $0x2] ss:$8 sm:$0xf]  }
   0xc   :  { %211 = vrot.lane.b32.xlu1 %v210_v16, %s549_s14  ;;  %200 = vrot.lane.b32.xlu0 %v199_v17, %s549_s14  ;;  %v510_v31 = vld [vmem:[%s1128_s0 + $0x3] ss:$8 sm:$0xf0]   ;;  %v507_v33 = vld [vmem:[%s1128_s0 + $0x2] ss:$8 sm:$0xf0]  }
   0xd   :  { %v274_v34 = vsel %vm154_vm0, %v510_v31, %v509_v30  ;;  %v263_v35 = vsel %vm154_vm0, %v507_v33, %v506_v32  ;;  %v515_v36 = vld [vmem:[%s1128_s0 + $0x5] ss:$8 sm:$0xf]   ;;  %v512_v38 = vld [vmem:[%s1128_s0 + $0x4] ss:$8 sm:$0xf]  }
   0xe   :  { %v516_v37 = vld [vmem:[%s1128_s0 + $0x5] ss:$8 sm:$0xf0]   ;;  %v513_v39 = vld [vmem:[%s1128_s0 + $0x4] ss:$8 sm:$0xf0]  }
   0xf   :  { %v296_v40 = vsel %vm154_vm0, %v516_v37, %v515_v36  ;;  %v285_v41 = vsel %vm154_vm0, %v513_v39, %v512_v38  ;;  %v521_v42 = vld [vmem:[%s1128_s0 + $0x7] ss:$8 sm:$0xf]   ;;  %v518_v44 = vld [vmem:[%s1128_s0 + $0x6] ss:$8 sm:$0xf]  }
  0x10   :  { %233 = vrot.lane.b32.xlu1 %v232_v22, %s549_s14  ;;  %222 = vrot.lane.b32.xlu0 %v221_v23, %s549_s14  ;;  %v522_v43 = vld [vmem:[%s1128_s0 + $0x7] ss:$8 sm:$0xf0]   ;;  %v519_v45 = vld [vmem:[%s1128_s0 + $0x6] ss:$8 sm:$0xf0]  }
  0x11   :  { %v318_v46 = vsel %vm154_vm0, %v522_v43, %v521_v42  ;;  %v307_v47 = vsel %vm154_vm0, %v519_v45, %v518_v44  ;;  %v525_v48 = vld [vmem:[%s1128_s0 + $0x1] ss:$8 sm:$0xf]   ;;  %v324_v50 = vld [vmem:[%s1128_s0] ss:$8 sm:$0xf]  }
  0x12   :  { %v526_v49 = vld [vmem:[%s1128_s0 + $0x1] ss:$8 sm:$0xf0]   ;;  %v325_v51 = vld [vmem:[%s1128_s0] ss:$8 sm:$0xf0]  }
  0x13   :  { %v338_v52 = vsel %vm154_vm0, %v526_v49, %v525_v48  ;;  %v531_v53 = vld [vmem:[%s1128_s0 + $0x3] ss:$8 sm:$0xf]   ;;  %v327_v55 = vsel %vm154_vm0, %v325_v51, %v324_v50  ;;  %v705_v56 = vld [vmem:[%s1128_s0 + $0x2] ss:$8 sm:$0xf]  }
  0x14   :  { %253 = vrot.lane.b32.xlu1 %v252_v28, %s550_s26  ;;  %242 = vrot.lane.b32.xlu0 %v241_v29, %s550_s26  ;;  %v532_v54 = vld [vmem:[%s1128_s0 + $0x3] ss:$8 sm:$0xf0]   ;;  %v710_v57 = vld [vmem:[%s1128_s0 + $0x2] ss:$8 sm:$0xf0]  }
  0x15   :  { %v2_v58 = vld [vmem:[%s1128_s0] sm:$0xff]   ;;  %v417_v59 = vld [vmem:[%s1128_s0 + $0x8] sm:$0xff]   ;;  %v426_v60 = vld [vmem:[%s1128_s0 + $0x10] sm:$0xff]   ;;  %s551_s7 = smov 32   ;;  %v360_v0 = vsel %vm154_vm0, %v532_v54, %v531_v53  ;;  %v349_v3 = vsel %vm154_vm0, %v710_v57, %v705_v56 }
  0x16   :  { %4 = vst.msk [vmem:[%s1129_s1] sm:$0x1] %vm3_vm1, %v2_v58   ;;  %410 = vst.msk [vmem:[%s1129_s1 + $0x1f] sm:$0x2] %vm3_vm1, %v2_v58   ;;  %v435_v61 = vld [vmem:[%s1128_s0 + $0x18] sm:$0xff]   ;;  %v444_v62 = vld [vmem:[%s1128_s0 + $0x20] sm:$0xff]  }
  0x17   :  { %411 = vst.msk [vmem:[%s1129_s1 + $0x3e] sm:$0x4] %vm3_vm1, %v2_v58   ;;  %412 = vst.msk [vmem:[%s1129_s1 + $0x5d] sm:$0x8] %vm3_vm1, %v2_v58   ;;  %v453_v63 = vld [vmem:[%s1128_s0 + $0x28] sm:$0xff]   ;;  %v462_v1 = vld [vmem:[%s1128_s0 + $0x30] sm:$0xff]  }
  0x18   :  { %275 = vrot.lane.b32.xlu1 %v274_v34, %s550_s26  ;;  %264 = vrot.lane.b32.xlu0 %v263_v35, %s550_s26  ;;  %413 = vst.msk [vmem:[%s1129_s1 + $0x7c] sm:$0x10] %vm3_vm1, %v2_v58   ;;  %414 = vst.msk [vmem:[%s1129_s1 + $0x9b] sm:$0x20] %vm3_vm1, %v2_v58  }
  0x19   :  { %415 = vst.msk [vmem:[%s1129_s1 + $0xba] sm:$0x40] %vm3_vm1, %v2_v58   ;;  %416 = vst.msk [vmem:[%s1129_s1 + $0xd9] sm:$0x80] %vm3_vm1, %v2_v58   ;;  %v471_v2 = vld [vmem:[%s1128_s0 + $0x38] sm:$0xff]  }
  0x1a   :  { %418 = vst.msk [vmem:[%s1129_s1 + $0x4] sm:$0x1] %vm3_vm1, %v417_v59   ;;  %419 = vst.msk [vmem:[%s1129_s1 + $0x23] sm:$0x2] %vm3_vm1, %v417_v59  }
  0x1b   :  { %420 = vst.msk [vmem:[%s1129_s1 + $0x42] sm:$0x4] %vm3_vm1, %v417_v59   ;;  %421 = vst.msk [vmem:[%s1129_s1 + $0x61] sm:$0x8] %vm3_vm1, %v417_v59  }
  0x1c   :  { %297 = vrot.lane.b32.xlu1 %v296_v40, %s550_s26  ;;  %286 = vrot.lane.b32.xlu0 %v285_v41, %s550_s26  ;;  %422 = vst.msk [vmem:[%s1129_s1 + $0x80] sm:$0x10] %vm3_vm1, %v417_v59   ;;  %423 = vst.msk [vmem:[%s1129_s1 + $0x9f] sm:$0x20] %vm3_vm1, %v417_v59  }
  0x1d   :  { %424 = vst.msk [vmem:[%s1129_s1 + $0xbe] sm:$0x40] %vm3_vm1, %v417_v59   ;;  %425 = vst.msk [vmem:[%s1129_s1 + $0xdd] sm:$0x80] %vm3_vm1, %v417_v59  }
  0x1e   :  { %427 = vst.msk [vmem:[%s1129_s1 + $0x8] sm:$0x1] %vm3_vm1, %v426_v60   ;;  %428 = vst.msk [vmem:[%s1129_s1 + $0x27] sm:$0x2] %vm3_vm1, %v426_v60  }
  0x1f   :  { %429 = vst.msk [vmem:[%s1129_s1 + $0x46] sm:$0x4] %vm3_vm1, %v426_v60   ;;  %430 = vst.msk [vmem:[%s1129_s1 + $0x65] sm:$0x8] %vm3_vm1, %v426_v60  }
  0x20   :  { %319 = vrot.lane.b32.xlu1 %v318_v46, %s550_s26  ;;  %308 = vrot.lane.b32.xlu0 %v307_v47, %s550_s26  ;;  %431 = vst.msk [vmem:[%s1129_s1 + $0x84] sm:$0x10] %vm3_vm1, %v426_v60   ;;  %432 = vst.msk [vmem:[%s1129_s1 + $0xa3] sm:$0x20] %vm3_vm1, %v426_v60  }
  0x21   :  { %433 = vst.msk [vmem:[%s1129_s1 + $0xc2] sm:$0x40] %vm3_vm1, %v426_v60   ;;  %434 = vst.msk [vmem:[%s1129_s1 + $0xe1] sm:$0x80] %vm3_vm1, %v426_v60  }
  0x22   :  { %436 = vst.msk [vmem:[%s1129_s1 + $0xc] sm:$0x1] %vm3_vm1, %v435_v61   ;;  %437 = vst.msk [vmem:[%s1129_s1 + $0x2b] sm:$0x2] %vm3_vm1, %v435_v61  }
  0x23   :  { %438 = vst.msk [vmem:[%s1129_s1 + $0x4a] sm:$0x4] %vm3_vm1, %v435_v61   ;;  %439 = vst.msk [vmem:[%s1129_s1 + $0x69] sm:$0x8] %vm3_vm1, %v435_v61  }
  0x24   :  { %339 = vrot.lane.b32.xlu1 %v338_v52, %s551_s7  ;;  %328 = vrot.lane.b32.xlu0 %v327_v55, %s551_s7  ;;  %440 = vst.msk [vmem:[%s1129_s1 + $0x88] sm:$0x10] %vm3_vm1, %v435_v61   ;;  %441 = vst.msk [vmem:[%s1129_s1 + $0xa7] sm:$0x20] %vm3_vm1, %v435_v61  }
  0x25   :  { %442 = vst.msk [vmem:[%s1129_s1 + $0xc6] sm:$0x40] %vm3_vm1, %v435_v61   ;;  %443 = vst.msk [vmem:[%s1129_s1 + $0xe5] sm:$0x80] %vm3_vm1, %v435_v61  }
  0x26   :  { %445 = vst.msk [vmem:[%s1129_s1 + $0x10] sm:$0x1] %vm3_vm1, %v444_v62   ;;  %446 = vst.msk [vmem:[%s1129_s1 + $0x2f] sm:$0x2] %vm3_vm1, %v444_v62  }
  0x27   :  { %447 = vst.msk [vmem:[%s1129_s1 + $0x4e] sm:$0x4] %vm3_vm1, %v444_v62   ;;  %448 = vst.msk [vmem:[%s1129_s1 + $0x6d] sm:$0x8] %vm3_vm1, %v444_v62  }
  0x28   :  { %449 = vst.msk [vmem:[%s1129_s1 + $0x8c] sm:$0x10] %vm3_vm1, %v444_v62   ;;  %450 = vst.msk [vmem:[%s1129_s1 + $0xab] sm:$0x20] %vm3_vm1, %v444_v62   ;;  %361 = vrot.lane.b32.xlu1 %v360_v0, %s551_s7  ;;  %350 = vrot.lane.b32.xlu0 %v349_v3, %s551_s7 }
  0x29   :  { %451 = vst.msk [vmem:[%s1129_s1 + $0xca] sm:$0x40] %vm3_vm1, %v444_v62   ;;  %452 = vst.msk [vmem:[%s1129_s1 + $0xe9] sm:$0x80] %vm3_vm1, %v444_v62  }
  0x2a   :  { %454 = vst.msk [vmem:[%s1129_s1 + $0x14] sm:$0x1] %vm3_vm1, %v453_v63   ;;  %455 = vst.msk [vmem:[%s1129_s1 + $0x33] sm:$0x2] %vm3_vm1, %v453_v63  }
  0x2b   :  { %456 = vst.msk [vmem:[%s1129_s1 + $0x52] sm:$0x4] %vm3_vm1, %v453_v63   ;;  %457 = vst.msk [vmem:[%s1129_s1 + $0x71] sm:$0x8] %vm3_vm1, %v453_v63  }
  0x2c   :  { %458 = vst.msk [vmem:[%s1129_s1 + $0x90] sm:$0x10] %vm3_vm1, %v453_v63   ;;  %459 = vst.msk [vmem:[%s1129_s1 + $0xaf] sm:$0x20] %vm3_vm1, %v453_v63  }
  0x2d   :  { %460 = vst.msk [vmem:[%s1129_s1 + $0xce] sm:$0x40] %vm3_vm1, %v453_v63   ;;  %461 = vst.msk [vmem:[%s1129_s1 + $0xed] sm:$0x80] %vm3_vm1, %v453_v63  }
  0x2e   :  { %v537_v4 = vld [vmem:[%s1128_s0 + $0x5] ss:$8 sm:$0xf]   ;;  %463 = vst.msk [vmem:[%s1129_s1 + $0x18] sm:$0x1] %vm3_vm1, %v462_v1  }
  0x2f   :  { %v538_v5 = vld [vmem:[%s1128_s0 + $0x5] ss:$8 sm:$0xf0]   ;;  %464 = vst.msk [vmem:[%s1129_s1 + $0x37] sm:$0x2] %vm3_vm1, %v462_v1  }
  0x30   :  { %465 = vst.msk [vmem:[%s1129_s1 + $0x56] sm:$0x4] %vm3_vm1, %v462_v1   ;;  %466 = vst.msk [vmem:[%s1129_s1 + $0x75] sm:$0x8] %vm3_vm1, %v462_v1   ;;  %v382_v8 = vsel %vm154_vm0, %v538_v5, %v537_v4 }
  0x31   :  { %467 = vst.msk [vmem:[%s1129_s1 + $0x94] sm:$0x10] %vm3_vm1, %v462_v1   ;;  %468 = vst.msk [vmem:[%s1129_s1 + $0xb3] sm:$0x20] %vm3_vm1, %v462_v1   ;;  %383 = vrot.lane.b32.xlu1 %v382_v8, %s551_s7 }
  0x32   :  { %469 = vst.msk [vmem:[%s1129_s1 + $0xd2] sm:$0x40] %vm3_vm1, %v462_v1   ;;  %470 = vst.msk [vmem:[%s1129_s1 + $0xf1] sm:$0x80] %vm3_vm1, %v462_v1  }
  0x33   :  { %472 = vst.msk [vmem:[%s1129_s1 + $0x1c] sm:$0x1] %vm3_vm1, %v471_v2   ;;  %473 = vst.msk [vmem:[%s1129_s1 + $0x3b] sm:$0x2] %vm3_vm1, %v471_v2  }
  0x34   :  { %474 = vst.msk [vmem:[%s1129_s1 + $0x5a] sm:$0x4] %vm3_vm1, %v471_v2   ;;  %475 = vst.msk [vmem:[%s1129_s1 + $0x79] sm:$0x8] %vm3_vm1, %v471_v2  }
  0x35   :  { %476 = vst.msk [vmem:[%s1129_s1 + $0x98] sm:$0x10] %vm3_vm1, %v471_v2   ;;  %477 = vst.msk [vmem:[%s1129_s1 + $0xb7] sm:$0x20] %vm3_vm1, %v471_v2  }
  0x36   :  { %478 = vst.msk [vmem:[%s1129_s1 + $0xd6] sm:$0x40] %vm3_vm1, %v471_v2   ;;  %479 = vst.msk [vmem:[%s1129_s1 + $0xf5] sm:$0x80] %vm3_vm1, %v471_v2  }
  0x37   :  { %v534_v6 = vld [vmem:[%s1128_s0 + $0x4] ss:$8 sm:$0xf]   ;;  %v543_v10 = vld [vmem:[%s1128_s0 + $0x7] ss:$8 sm:$0xf]  }
  0x38   :  { %v535_v7 = vld [vmem:[%s1128_s0 + $0x4] ss:$8 sm:$0xf0]   ;;  %v544_v11 = vld [vmem:[%s1128_s0 + $0x7] ss:$8 sm:$0xf0]  }
  0x39   :  { %v371_v9 = vsel %vm154_vm0, %v535_v7, %v534_v6  ;;  %v540_v12 = vld [vmem:[%s1128_s0 + $0x6] ss:$8 sm:$0xf]   ;;  %v404_v14 = vsel %vm154_vm0, %v544_v11, %v543_v10 }
  0x3a   :  { %v541_v13 = vld [vmem:[%s1128_s0 + $0x6] ss:$8 sm:$0xf0]   ;;  %372 = vrot.lane.b32.xlu0 %v371_v9, %s551_s7  ;;  %405 = vrot.lane.b32.xlu1 %v404_v14, %s551_s7 }
  0x3b   :  { %v393_v15 = vsel %vm154_vm0, %v541_v13, %v540_v12 }
  0x3e   :  { %394 = vrot.lane.b32.xlu0 %v393_v15, %s551_s7 }
  0x76   :  { %v179_v16 = vpop.permute.xlu1 %178   ;;  %v157_v17 = vpop.permute.xlu0 %156  }
  0x77   :  { %486 = vst.msk [vmem:[%s1129_s1 + $0x41] ss:$4 sm:$0xff] %vm3_vm1, %v179_v16   ;;  %480 = vst.msk [vmem:[%s1129_s1 + $0x1] ss:$4 sm:$0xff] %vm3_vm1, %v157_v17  }
  0x7a   :  { %v190_v18 = vpop.permute.xlu1 %189   ;;  %v168_v19 = vpop.permute.xlu0 %167  }
  0x7b   :  { %489 = vst.msk [vmem:[%s1129_s1 + $0x61] ss:$4 sm:$0xff] %vm3_vm1, %v190_v18   ;;  %483 = vst.msk [vmem:[%s1129_s1 + $0x21] ss:$4 sm:$0xff] %vm3_vm1, %v168_v19  }
  0x7e   :  { %v212_v20 = vpop.permute.xlu1 %211   ;;  %v201_v21 = vpop.permute.xlu0 %200  }
  0x7f   :  { %495 = vst.msk [vmem:[%s1129_s1 + $0xa1] ss:$4 sm:$0xff] %vm3_vm1, %v212_v20   ;;  %492 = vst.msk [vmem:[%s1129_s1 + $0x81] ss:$4 sm:$0xff] %vm3_vm1, %v201_v21  }
  0x82   :  { %v234_v22 = vpop.permute.xlu1 %233   ;;  %v223_v23 = vpop.permute.xlu0 %222  }
  0x83   :  { %501 = vst.msk [vmem:[%s1129_s1 + $0xe1] ss:$4 sm:$0xff] %vm3_vm1, %v234_v22   ;;  %498 = vst.msk [vmem:[%s1129_s1 + $0xc1] ss:$4 sm:$0xff] %vm3_vm1, %v223_v23  }
  0x86   :  { %v254_v24 = vpop.permute.xlu1 %253   ;;  %v243_v25 = vpop.permute.xlu0 %242  }
  0x87   :  { %505 = vst.msk [vmem:[%s1129_s1 + $0x22] ss:$4 sm:$0xff] %vm3_vm1, %v254_v24   ;;  %502 = vst.msk [vmem:[%s1129_s1 + $0x2] ss:$4 sm:$0xff] %vm3_vm1, %v243_v25  }
  0x8a   :  { %v276_v26 = vpop.permute.xlu1 %275   ;;  %v265_v27 = vpop.permute.xlu0 %264  }
  0x8b   :  { %511 = vst.msk [vmem:[%s1129_s1 + $0x62] ss:$4 sm:$0xff] %vm3_vm1, %v276_v26   ;;  %508 = vst.msk [vmem:[%s1129_s1 + $0x42] ss:$4 sm:$0xff] %vm3_vm1, %v265_v27  }
  0x8e   :  { %v298_v28 = vpop.permute.xlu1 %297   ;;  %v287_v29 = vpop.permute.xlu0 %286  }
  0x8f   :  { %517 = vst.msk [vmem:[%s1129_s1 + $0xa2] ss:$4 sm:$0xff] %vm3_vm1, %v298_v28   ;;  %514 = vst.msk [vmem:[%s1129_s1 + $0x82] ss:$4 sm:$0xff] %vm3_vm1, %v287_v29  }
  0x92   :  { %v320_v30 = vpop.permute.xlu1 %319   ;;  %v309_v31 = vpop.permute.xlu0 %308  }
  0x93   :  { %523 = vst.msk [vmem:[%s1129_s1 + $0xe2] ss:$4 sm:$0xff] %vm3_vm1, %v320_v30   ;;  %520 = vst.msk [vmem:[%s1129_s1 + $0xc2] ss:$4 sm:$0xff] %vm3_vm1, %v309_v31  }
  0x96   :  { %v340_v32 = vpop.permute.xlu1 %339   ;;  %v329_v33 = vpop.permute.xlu0 %328  }
  0x97   :  { %527 = vst.msk [vmem:[%s1129_s1 + $0x23] ss:$4 sm:$0xff] %vm3_vm1, %v340_v32   ;;  %524 = vst.msk [vmem:[%s1129_s1 + $0x3] ss:$4 sm:$0xff] %vm3_vm1, %v329_v33  }
  0x9a   :  { %v362_v34 = vpop.permute.xlu1 %361   ;;  %v351_v35 = vpop.permute.xlu0 %350  }
  0x9b   :  { %533 = vst.msk [vmem:[%s1129_s1 + $0x63] ss:$4 sm:$0xff] %vm3_vm1, %v362_v34   ;;  %530 = vst.msk [vmem:[%s1129_s1 + $0x43] ss:$4 sm:$0xff] %vm3_vm1, %v351_v35  }
  0xa3   :  { %v384_v36 = vpop.permute.xlu1 %383  }
  0xa4   :  { %539 = vst.msk [vmem:[%s1129_s1 + $0xa3] ss:$4 sm:$0xff] %vm3_vm1, %v384_v36  }
  0xac   :  { %v373_v37 = vpop.permute.xlu0 %372   ;;  %v406_v38 = vpop.permute.xlu1 %405  }
  0xad   :  { %536 = vst.msk [vmem:[%s1129_s1 + $0x83] ss:$4 sm:$0xff] %vm3_vm1, %v373_v37   ;;  %545 = vst.msk [vmem:[%s1129_s1 + $0xe3] ss:$4 sm:$0xff] %vm3_vm1, %v406_v38  }
  0xb0   :  { %v395_v39 = vpop.permute.xlu0 %394  }
  0xb1   :  { %542 = vst.msk [vmem:[%s1129_s1 + $0xc3] ss:$4 sm:$0xff] %vm3_vm1, %v395_v39  }

// kernel: custom-call.2
= control target key start
LH: loop header
LB: loop body
LE: loop exit
PB: predicated region body
PF: predicated region fallthrough
CT: control target
= control target key end

     0   :  { %s92_s0 = inlined_call_operand.vmem [shape: f32[2,4,32,32], index: 0, kind: input, shape index: {}]   ;;  %s93_s1 = inlined_call_operand.vmem [shape: f32[2,4,32,32], index: 1, kind: input, shape index: {}]   ;;  %s94_s2 = inlined_call_operand.hbm [shape: c64[2,4,32,32], index: 2, kind: output, shape index: {}]  }
   0x1   :  { %s3_s11 = scalar_lea.hbm %s94_s2, 4096 }
   0x2   :  { %4 = vsyncpa [#allocation0], 0  ;;  %s5_s14 = sshll.u32 %s92_s0, 4  ;;  %s6_s14 = int_to_ptr.vmem [resolvable:$true] %s5_s14 }
   0x3   :  { %s18_s15 = scalar_lea.vmem %s6_s14, 4096  ;;  %p23_p1 = scmp.lt.s32.totalorder %s6_s14, %s6_s14 }
   0x4   :  { %p19_p0 = scmp.ne.s32.totalorder %s6_s14, %s18_s15  ;;  %p24_p2 = scmp.lt.s32.totalorder %s18_s15, %s18_s15 }
   0x6   :  { %p25_p3 = por %p24_p2, %p23_p1 }
   0x8   :  { %p26_p4 = pnand %p25_p3, %p19_p0 }
   0xa   :  { %29 = shalt.err (!%p26_p4)  }
   0xb   :  { %8 = dma.vmem_to_hbm [thread:$0]  %s6_s14, 4096, %s94_s2, [#allocation0] }
   0xc   :  { %61 = dma.done.wait [#allocation0], 4096  }
   0xd   :  { %62 = vsyncadd [#allocation0], 4294963200 }
   0xe   :  { %10 = vsyncpa [#allocation0], 1 }
   0xf   :  { %11 = vsyncpa [#allocation1], 0  ;;  %s12_s0 = sshll.u32 %s93_s1, 4  ;;  %s13_s0 = int_to_ptr.vmem [resolvable:$true] %s12_s0 }
  0x10   :  { %s38_s20 = scalar_lea.vmem %s13_s0, 4096  ;;  %p43_p6 = scmp.lt.s32.totalorder %s13_s0, %s13_s0 }
  0x11   :  { %p39_p5 = scmp.ne.s32.totalorder %s13_s0, %s38_s20  ;;  %p44_p7 = scmp.lt.s32.totalorder %s38_s20, %s38_s20 }
  0x13   :  { %p45_p8 = por %p44_p7, %p43_p6 }
  0x15   :  { %p46_p9 = pnand %p45_p8, %p39_p5 }
  0x17   :  { %49 = shalt.err (!%p46_p9)  }
  0x18   :  { %15 = dma.vmem_to_hbm [thread:$0]  %s13_s0, 4096, %s3_s11, [#allocation1] }
  0x19   :  { %63 = dma.done.wait [#allocation1], 4096  }
  0x1a   :  { %64 = vsyncadd [#allocation1], 4294963200 }
  0x1b   :  { %17 = vsyncpa [#allocation1], 1 }

// kernel: complex_upsample2d.1
= control target key start
LH: loop header
LB: loop body
LE: loop exit
PB: predicated region body
PF: predicated region fallthrough
CT: control target
= control target key end

     0   :  { %7 = vsyncpa [#allocation3], 0  ;;  %s5720_s9 = smov 0   ;;  %s10539_s0 = inlined_call_operand.vmem [shape: f32[16,256], index: 0, kind: input, shape index: {}]   ;;  %s10540_s1 = inlined_call_operand.hbm [shape: f32[256,1024], index: 1, kind: input, shape index: {}]   ;;  %s10541_s2 = inlined_call_operand.vmem [shape: f32[16,1024], index: 2, kind: output, shape index: {}]  }
   0x1 LB: > { %s5726_s10 = sadd.s32 4294967295, %s5700_s9   ;;  %p5630_p0 = scmp.ge.s32.totalorder %s5700_s9, 1  ;;  %s5700_s9 = sphi %s5720_s9, %s13_s9  }
   0x2   : > { %p91_p1 = scmp.lt.s32.totalorder %s5700_s9, 3  ;;  %s5702_s11 = smov [#allocation2]  }
   0x3   : > { %s103_s12 = sshll.u32 %s5702_s11, 4  ;;  %p5651_p3 = scmp.eq.s32.totalorder %s5726_s10, 0  ;;  %s104_s12 = int_to_ptr.vmem [resolvable:$true] %s103_s12 }
   0x4   : > { %p5730_p2 = pnand %p5630_p0, %p91_p1  ;;  %s5675_s14 = scalar_lea.vmem %s104_s12, 32768 }
   0x5   : > { %p5676_p7 = scmp.ne.s32.totalorder %s104_s12, %s5675_s14  ;;  %p5683_p10 = scmp.lt.s32.totalorder %s104_s12, %s104_s12 }
   0x6   : > { %p5647_p4 = pneg %p5730_p2  ;;  %p5684_p11 = scmp.lt.s32.totalorder %s5675_s14, %s5675_s14 }
   0x8   : > { %p5648_p5 = pnand %p5651_p3, %p5647_p4  ;;  %p5685_p12 = por %p5684_p11, %p5683_p10 }
   0xa   : > { %p5666_p6 = pneg %p5648_p5 }
   0xc   : > { %p5678_p8 = pnand %p5676_p7, %p5666_p6 }
   0xe   : > { %p5679_p9 = pneg %p5678_p8 }
  0x10   : > { %p5686_p13 = pnand %p5685_p12, %p5679_p9 }
  0x12   : > { %5689 = shalt.err (!%p5686_p13)
}
  0x13   : > { %s5703_s15 = smov 1024   ;;  %s5704_s16 = smov 64  }
  0x14   : > { %5650 = dma.hbm_to_vmem [thread:$0]  (!%p5648_p5), %s10540_s1, 32768, %s104_s12, [#allocation3], %s5703_s15, %s5703_s15, %s5704_s16  }
  0x15   : > { %127 = sbr.rel (%p5730_p2) target bundleno = 1067 (0x42b), region = 28 }
  0x1a   : > { %5695 = dma.done.wait (%p5651_p3), [#allocation3], 32768  }
  0x1b   : > { %5697 = vsyncadd (%p5651_p3), [#allocation3], 4294934528  ;;  %v282_v0 = vld [vmem:[#allocation2 + $0x3c8] sm:$0xff]  ;;  %v281_v1 = vld [vmem:[#allocation2 + $0x3c0] sm:$0xff]  ;;  %p149_p0 = scmp.lt.s32.totalorder %s5726_s10, 1 }
  0x1c   : > { %v274_v2 = vld [vmem:[#allocation2 + $0x388] sm:$0xff]  ;;  %v5748_v3 = vand.u32 4294901760, %v282_v0  ;;  %v5750_v4 = vand.u32 4294901760, %v281_v1  ;;  %v273_v6 = vld [vmem:[#allocation2 + $0x380] sm:$0xff] }
  0x1d   : > { %v5752_v5 = vand.u32 4294901760, %v274_v2  ;;  %v266_v7 = vld [vmem:[#allocation2 + $0x348] sm:$0xff]  ;;  %v265_v8 = vld [vmem:[#allocation2 + $0x340] sm:$0xff]  ;;  %v5754_v9 = vand.u32 4294901760, %v273_v6  ;;  %s12990_s10 = smov (!%p149_p0, %s5726_s10), 1 }
  0x1e   : > { %v5756_v10 = vand.u32 4294901760, %v266_v7  ;;  %v5758_v11 = vand.u32 4294901760, %v265_v8  ;;  %v258_v12 = vld [vmem:[#allocation2 + $0x308] sm:$0xff]  ;;  %v257_v13 = vld [vmem:[#allocation2 + $0x300] sm:$0xff]  ;;  %418 = vmatprep.subr.mxu0 %v5748_v3  ;;  %v5768_v18 = vsub.f32 %v282_v0, %v5748_v3  ;;  %v5781_v23 = vsub.f32 %v281_v1, %v5750_v4  ;;  %s5641_s19 = sshll.u32 %s12990_s10, 4  ;;  %s5642_s23 = sshll.u32 %s12990_s10, 6 }
  0x1f   : > { %v250_v14 = vld [vmem:[#allocation2 + $0x2c8] sm:$0xff]  ;;  %v5761_v15 = vand.u32 4294901760, %v258_v12  ;;  %v5763_v16 = vand.u32 4294901760, %v257_v13  ;;  %v5770_v19 = vld [vmem:[#allocation2 + $0x2c0] sm:$0xff]  ;;  %420 = vmatpush1.msra.mxu0 %v5750_v4  ;;  %v5787_v25 = vsub.f32 %v274_v2, %v5752_v5  ;;  %v5801_v31 = vsub.f32 %v273_v6, %v5754_v9  ;;  %s153_s22 = scalar_lea.vmem %s10539_s0, %s5641_s19  ;;  %s8345_s26 = scalar_lea.vmem %s10541_s2, %s5642_s23 }
  0x20   : > { %v5765_v17 = vand.u32 4294901760, %v250_v14  ;;  %v5772_v20 = vld [vmem:[#allocation2 + $0x288] sm:$0xff]  ;;  %v5774_v21 = vld [vmem:[#allocation2 + $0x280] sm:$0xff]  ;;  %v5778_v22 = vand.u32 4294901760, %v5770_v19  ;;  %422 = vmatprep.subr.mxu0 %v5752_v5  ;;  %v10555_v29 = vand.u32 4294901760, %v5768_v18  ;;  %v10553_v33 = vand.u32 4294901760, %v5781_v23 }
  0x21   : > { %v5784_v24 = vand.u32 4294901760, %v5772_v20  ;;  %v5789_v26 = vld [vmem:[#allocation2 + $0x248] sm:$0xff]  ;;  %v5791_v27 = vld [vmem:[#allocation2 + $0x240] sm:$0xff]  ;;  %v5798_v30 = vand.u32 4294901760, %v5774_v21  ;;  %424 = vmatpush1.msra.mxu0 %v5754_v9  ;;  %v10552_v34 = vand.u32 4294901760, %v5787_v25  ;;  %v5810_v35 = vsub.f32 %v266_v7, %v5756_v10 }
  0x22   : > { %v5793_v28 = vld [vmem:[#allocation2 + $0x208] sm:$0xff]  ;;  %v5804_v32 = vand.u32 4294901760, %v5789_v26  ;;  %v5813_v36 = vand.u32 4294901760, %v5791_v27  ;;  %v5815_v37 = vld [vmem:[#allocation2 + $0x200] sm:$0xff]  ;;  %426 = vmatprep.subr.mxu0 %v5756_v10  ;;  %v565_v38 = vsub.f32 %v5768_v18, %v10555_v29  ;;  %v10550_v39 = vand.u32 4294901760, %v5801_v31 }
  0x23   : > { %11370 = vst [vmem:[#allocation5_spill] sm:$0xff] %v5784_v24  ;;  %11371 = vst [vmem:[#allocation6_spill] sm:$0xff] %v5798_v30  ;;  %v5823_v40 = vsub.f32 %v265_v8, %v5758_v11  ;;  %v5826_v41 = vand.u32 4294901760, %v5793_v28  ;;  %428 = vmatpush1.msra.mxu0 %v5758_v11  ;;  %v571_v42 = vsub.f32 %v5781_v23, %v10553_v33  ;;  %v10548_v44 = vand.u32 4294901760, %v5810_v35  ;;  %v5839_v46 = vld [vmem:[#allocation2 + $0x1c8] sm:$0xff]  ;;  %v5849_v51 = vld [vmem:[#allocation2 + $0x1c0] sm:$0xff] }
  0x24   : > { %11372 = vst [vmem:[#allocation7_spill] sm:$0xff] %v5804_v32  ;;  %11373 = vst [vmem:[#allocation8_spill] sm:$0xff] %v5813_v36  ;;  %v577_v43 = vsub.f32 %v5787_v25, %v10552_v34  ;;  %v5837_v45 = vsub.f32 %v258_v12, %v5761_v15  ;;  %430 = vmatprep.subr.mxu0 %v5761_v15  ;;  %v566_v47 = vand.u32 4294901760, %v565_v38  ;;  %v5847_v50 = vand.u32 4294901760, %v5815_v37  ;;  %v5856_v56 = vld [vmem:[#allocation2 + $0x188] sm:$0xff]  ;;  %v5868_v61 = vld [vmem:[#allocation2 + $0x180] sm:$0xff] }
  0x25   : > { %11374 = vst [vmem:[#allocation9_spill] sm:$0xff] %v5826_v41  ;;  %v583_v48 = vsub.f32 %v5801_v31, %v10550_v39  ;;  %v10547_v49 = vand.u32 4294901760, %v5823_v40  ;;  %432 = vmatpush1.msra.mxu0 %v5763_v16  ;;  %v572_v52 = vand.u32 4294901760, %v571_v42  ;;  %v589_v54 = vsub.f32 %v5810_v35, %v10548_v44  ;;  %v5880_v2 = vld [vmem:[#allocation2 + $0x148] sm:$0xff]  ;;  %v5981_v34 = vld [vmem:[#allocation2 + $0x80] sm:$0xff] }
  0x26   : > { %11375 = vst [vmem:[#allocation10_spill] sm:$0xff] %v5847_v50  ;;  %v578_v53 = vand.u32 4294901760, %v577_v43  ;;  %v10545_v55 = vand.u32 4294901760, %v5837_v45  ;;  %434 = vmatprep.subr.mxu0 %v5765_v17  ;;  %567 = vmatprep.subr.mxu1 %v566_v47  ;;  %v5863_v59 = vsub.f32 %v257_v13, %v5763_v16  ;;  %v5866_v60 = vand.u32 4294901760, %v5839_v46  ;;  %v5891_v13 = vld [vmem:[#allocation2 + $0x140] sm:$0xff]  ;;  %v5971_v39 = vld [vmem:[#allocation2 + $0x88] sm:$0xff] }
  0x27   : > { %v584_v57 = vand.u32 4294901760, %v583_v48  ;;  %v595_v58 = vsub.f32 %v5823_v40, %v10547_v49  ;;  %436 = vmatpush1.msra.mxu0 %v5778_v22  ;;  %573 = vmatpush1.msra.mxu1 %v572_v52  ;;  %v590_v62 = vand.u32 4294901760, %v589_v54  ;;  %v5875_v0 = vsub.f32 %v250_v14, %v5765_v17  ;;  %v5958_v49 = vld [vmem:[#allocation2 + $0xc0] sm:$0xff] }
  0x28   : > { %11376 = vst [vmem:[#allocation11_spill] sm:$0xff] %v5866_v60  ;;  %v601_v63 = vsub.f32 %v5837_v45, %v10545_v55  ;;  %v5878_v1 = vand.u32 4294901760, %v5849_v51  ;;  %438 = vmatprep.subr.mxu0 %v5784_v24  ;;  %579 = vmatprep.subr.mxu1 %v578_v53  ;;  %v10543_v7 = vand.u32 4294901760, %v5863_v59  ;;  %v5886_v8 = vsub.f32 %v5770_v19, %v5778_v22 }
  0x29   : > { %v596_v6 = vand.u32 4294901760, %v595_v58  ;;  %v5889_v12 = vand.u32 4294901760, %v5856_v56  ;;  %440 = vmatpush1.msra.mxu0 %v5798_v30  ;;  %585 = vmatpush1.msra.mxu1 %v584_v57  ;;  %v10542_v38 = vand.u32 4294901760, %v5875_v0  ;;  %v5897_v42 = vsub.f32 %v5772_v20, %v5784_v24  ;;  %v5914_v20 = vld [vmem:[#allocation2 + $0x108] sm:$0xff] }
  0x2a   : > { %11377 = vst [vmem:[#allocation12_spill] sm:$0xff] %v5878_v1  ;;  %v602_v14 = vand.u32 4294901760, %v601_v63  ;;  %v5900_v43 = vand.u32 4294901760, %v5868_v61  ;;  %442 = vmatprep.subr.mxu0 %v5804_v32  ;;  %591 = vmatprep.subr.mxu1 %v590_v62  ;;  %v607_v19 = vsub.f32 %v5863_v59, %v10543_v7  ;;  %v10544_v47 = vand.u32 4294901760, %v5886_v8 }
  0x2b   : > { %11378 = vst [vmem:[#allocation13_spill] sm:$0xff] %v5889_v12  ;;  %v5909_v48 = vsub.f32 %v5774_v21, %v5798_v30  ;;  %v5912_v52 = vand.u32 4294901760, %v5880_v2  ;;  %444 = vmatpush1.msra.mxu0 %v5813_v36  ;;  %597 = vmatpush1.msra.mxu1 %v596_v6  ;;  %v613_v53 = vsub.f32 %v5875_v0, %v10542_v38  ;;  %v10546_v54 = vand.u32 4294901760, %v5897_v42  ;;  %v5937_v38 = vld [vmem:[#allocation2 + $0x100] sm:$0xff] }
  0x2c   : > { %11379 = vst [vmem:[#allocation14_spill] sm:$0xff] %v5900_v43  ;;  %v5923_v57 = vsub.f32 %v5789_v26, %v5804_v32  ;;  %v5926_v21 = vand.u32 4294901760, %v5891_v13  ;;  %446 = vmatprep.subr.mxu0 %v5826_v41  ;;  %603 = vmatprep.subr.mxu1 %v602_v14  ;;  %v608_v58 = vand.u32 4294901760, %v607_v19  ;;  %v619_v62 = vsub.f32 %v5886_v8, %v10544_v47  ;;  %v5947_v47 = vld [vmem:[#allocation2 + $0xc8] sm:$0xff] }
  0x2d   : > { %11380 = vst [vmem:[#allocation15_spill] sm:$0xff] %v5912_v52  ;;  %v10549_v63 = vand.u32 4294901760, %v5909_v48  ;;  %v5935_v6 = vsub.f32 %v5791_v27, %v5813_v36  ;;  %448 = vmatpush1.msra.mxu0 %v5847_v50  ;;  %v614_v26 = vand.u32 4294901760, %v613_v53  ;;  %v625_v14 = vsub.f32 %v5897_v42, %v10546_v54  ;;  %v6061_v36 = vld [vmem:[#allocation2 + $0x7c8] sm:$0xff] }
  0x2e   : > { %11381 = vst [vmem:[#allocation16_spill] sm:$0xff] %v5926_v21  ;;  %v10551_v19 = vand.u32 4294901760, %v5923_v57  ;;  %v5945_v7 = vand.u32 4294901760, %v5914_v20  ;;  %609 = vmatpush1.msra.mxu1 %v608_v58  ;;  %450 = vmatprep.subr.mxu0 %v5866_v60  ;;  %v620_v27 = vand.u32 4294901760, %v619_v62  ;;  %v5956_v54 = vsub.f32 %v5793_v28, %v5826_v41 }
  0x2f   : > { %v631_v55 = vsub.f32 %v5909_v48, %v10549_v63  ;;  %v10554_v53 = vand.u32 4294901760, %v5935_v6  ;;  %615 = vmatprep.subr.mxu1 %v614_v26  ;;  %452 = vmatpush1.msra.mxu0 %v5878_v1  ;;  %v626_v44 = vand.u32 4294901760, %v625_v14  ;;  %v5965_v62 = vand.u32 4294901760, %v5937_v38 }
  0x30   : > { %11382 = vst [vmem:[#allocation17_spill] sm:$0xff] %v5945_v7  ;;  %v637_v58 = vsub.f32 %v5923_v57, %v10551_v19  ;;  %v5969_v63 = vsub.f32 %v5815_v37, %v5847_v50  ;;  %621 = vmatpush1.msra.mxu1 %v620_v27  ;;  %454 = vmatprep.subr.mxu0 %v5889_v12  ;;  %v10558_v14 = vand.u32 4294901760, %v5956_v54  ;;  %v5979_v19 = vand.u32 4294901760, %v5947_v47 }
  0x31   : > { %11383 = vst [vmem:[#allocation18_spill] sm:$0xff] %v5965_v62  ;;  %v632_v28 = vand.u32 4294901760, %v631_v55  ;;  %v643_v26 = vsub.f32 %v5935_v6, %v10554_v53  ;;  %627 = vmatprep.subr.mxu1 %v626_v44  ;;  %456 = vmatpush1.msra.mxu0 %v5900_v43  ;;  %v5987_v55 = vsub.f32 %v5839_v46, %v5866_v60  ;;  %v5990_v33 = vand.u32 4294901760, %v5958_v49  ;;  %v5992_v53 = vld [vmem:[#allocation2 + $0x48] sm:$0xff] }
  0x32   : > { %11384 = vst [vmem:[#allocation19_spill] sm:$0xff] %v5979_v19  ;;  %v638_v37 = vand.u32 4294901760, %v637_v58  ;;  %v10561_v27 = vand.u32 4294901760, %v5969_v63  ;;  %458 = vmatprep.subr.mxu0 %v5912_v52  ;;  %v649_v44 = vsub.f32 %v5956_v54, %v10558_v14  ;;  %v6000_v58 = vsub.f32 %v5849_v51, %v5878_v1  ;;  %v6017_v51 = vld [vmem:[#allocation2 + $0x40] sm:$0xff] }
  0x33   : > { %11385 = vst [vmem:[#allocation20_spill] sm:$0xff] %v5990_v33  ;;  %633 = vmatpush1.msra.mxu1 %v632_v28  ;;  %v644_v29 = vand.u32 4294901760, %v643_v26  ;;  %v6003_v46 = vand.u32 4294901760, %v5971_v39  ;;  %460 = vmatpush1.msra.mxu0 %v5926_v21  ;;  %v6012_v60 = vsub.f32 %v5856_v56, %v5889_v12  ;;  %v6015_v14 = vand.u32 4294901760, %v5981_v34  ;;  %v6028_v56 = vld [vmem:[#allocation2 + $0x8] sm:$0xff] }
  0x34   : > { %639 = vmatprep.subr.mxu1 %v638_v37  ;;  %v655_v28 = vsub.f32 %v5969_v63, %v10561_v27  ;;  %462 = vmatprep.subr.mxu0 %v5945_v7  ;;  %v650_v37 = vand.u32 4294901760, %v649_v44  ;;  %v6023_v27 = vsub.f32 %v5868_v61, %v5900_v43  ;;  %v6026_v26 = vand.u32 4294901760, %v5992_v53  ;;  %v6051_v44 = vld [vmem:[#allocation2] sm:$0xff] }
  0x35   : > { %11386 = vst [vmem:[#allocation21_spill] sm:$0xff] %v6003_v46  ;;  %11387 = vst [vmem:[#allocation22_spill] sm:$0xff] %v6015_v14  ;;  %645 = vmatpush1.msra.mxu1 %v644_v29  ;;  %464 = vmatpush1.msra.mxu0 %v5965_v62  ;;  %v11390_v50 = vand.u32 4294901760, %v5987_v55  ;;  %v6037_v1 = vsub.f32 %v5880_v2, %v5912_v52  ;;  %v11392_v61 = vand.u32 4294901760, %v6000_v58  ;;  %v6059_v41 = vand.u32 4294901760, %v6028_v56 }
  0x36   : > { %11388 = vst [vmem:[#allocation23_spill] sm:$0xff] %v6023_v27  ;;  %11389 = vst [vmem:[#allocation24_spill] sm:$0xff] %v6026_v26  ;;  %v656_v12 = vand.u32 4294901760, %v655_v28  ;;  %651 = vmatprep.subr.mxu1 %v650_v37  ;;  %466 = vmatprep.subr.mxu0 %v5979_v19  ;;  %v6045_v28 = vand.u32 4294901760, %v6017_v51  ;;  %v11395_v37 = vand.u32 4294901760, %v6012_v60  ;;  %v6079_v24 = vand.u32 4294901760, %v6051_v44 }
  0x37   : > { %v661_v29 = vsub.f32 %v5987_v55, %v11390_v50  ;;  %11391 = vst [vmem:[#allocation25_spill] sm:$0xff] %v6037_v1  ;;  %v667_v43 = vsub.f32 %v6000_v58, %v11392_v61  ;;  %v6049_v50 = vsub.f32 %v5891_v13, %v5926_v21  ;;  %468 = vmatpush1.msra.mxu0 %v5990_v33  ;;  %11396 = vst [vmem:[#allocation28_spill] sm:$0xff] %v6059_v41 }
  0x38   : > { %11393 = vst [vmem:[#allocation26_spill] sm:$0xff] %v6045_v28  ;;  %657 = vmatpush1.msra.mxu1 %v656_v12  ;;  %v673_v52 = vsub.f32 %v6012_v60, %v11395_v37  ;;  %470 = vmatprep.subr.mxu0 %v6003_v46  ;;  %v11397_v13 = vand.u32 4294901760, %v6023_v27  ;;  %v6070_v21 = vsub.f32 %v5914_v20, %v5945_v7  ;;  %v6072_v37 = vld [vmem:[#allocation2 + $0x7c0] sm:$0xff]  ;;  %11400 = vst [vmem:[#allocation30_spill] sm:$0xff] %v6079_v24 }
  0x39   : > { %11394 = vst [vmem:[#allocation27_spill] sm:$0xff] %v6049_v50  ;;  %v662_v2 = vand.u32 4294901760, %v661_v29  ;;  %v668_v32 = vand.u32 4294901760, %v667_v43  ;;  %472 = vmatpush1.msra.mxu0 %v6015_v14  ;;  %v11399_v43 = vand.u32 4294901760, %v6037_v1  ;;  %v6085_v29 = vld [vmem:[#allocation2 + $0x788] sm:$0xff] }
  0x3a   : > { %v679_v12 = vsub.f32 %v6023_v27, %v11397_v13  ;;  %11398 = vst [vmem:[#allocation29_spill] sm:$0xff] %v6070_v21  ;;  %v674_v61 = vand.u32 4294901760, %v673_v52  ;;  %v6083_v13 = vsub.f32 %v5937_v38, %v5965_v62  ;;  %474 = vmatprep.subr.mxu0 %v6026_v26  ;;  %v11402_v52 = vand.u32 4294901760, %v6049_v50 }
  0x3b   : > { %663 = vmatprep.subr.mxu1 %v662_v2  ;;  %v685_v30 = vsub.f32 %v6037_v1, %v11399_v43  ;;  %v6093_v43 = vand.u32 4294901760, %v6061_v36  ;;  %v6095_v1 = vld [vmem:[#allocation2 + $0x780] sm:$0xff]  ;;  %476 = vmatpush1.msra.mxu0 %v6045_v28  ;;  %v6104_v62 = vand.u32 4294901760, %v6072_v37 }
  0x3c   : > { %11401 = vst [vmem:[#allocation31_spill] sm:$0xff] %v6083_v13  ;;  %669 = vmatpush1.msra.mxu1 %v668_v32  ;;  %v680_v20 = vand.u32 4294901760, %v679_v12  ;;  %v691_v2 = vsub.f32 %v6049_v50, %v11402_v52  ;;  %v6101_v12 = vsub.f32 %v5947_v47, %v5979_v19  ;;  %v6106_v52 = vld [vmem:[#allocation2 + $0x748] sm:$0xff]  ;;  %478 = vmatprep.subr.mxu0 %v6059_v41  ;;  %v6117_v47 = vand.u32 4294901760, %v6085_v29 }
  0x3d   : > { %11403 = vst [vmem:[#allocation32_spill] sm:$0xff] %v6093_v43  ;;  %675 = vmatprep.subr.mxu1 %v674_v61  ;;  %v686_v38 = vand.u32 4294901760, %v685_v30  ;;  %11405 = vst [vmem:[#allocation34_spill] sm:$0xff] %v6104_v62  ;;  %v11406_v61 = vand.u32 4294901760, %v6070_v21  ;;  %v6114_v32 = vsub.f32 %v5958_v49, %v5990_v33  ;;  %480 = vmatpush1.msra.mxu0 %v6079_v24  ;;  %v11409_v19 = vand.u32 4294901760, %v6083_v13  ;;  %v6131_v49 = vld [vmem:[#allocation2 + $0x740] sm:$0xff] }
  0x3e   : > { %11404 = vst [vmem:[#allocation33_spill] sm:$0xff] %v6101_v12  ;;  %681 = vmatpush1.msra.mxu1 %v680_v20  ;;  %v692_v7 = vand.u32 4294901760, %v691_v2  ;;  %11408 = vst [vmem:[#allocation36_spill] sm:$0xff] %v6117_v47  ;;  %v6126_v50 = vsub.f32 %v5971_v39, %v6003_v46  ;;  %482 = vmatprep.subr.mxu0 %v6093_v43  ;;  %v6140_v2 = vand.u32 4294901760, %v6106_v52  ;;  %v6142_v39 = vld [vmem:[#allocation2 + $0x708] sm:$0xff] }
  0x3f   : > { %v697_v30 = vsub.f32 %v6070_v21, %v11406_v61  ;;  %11407 = vst [vmem:[#allocation35_spill] sm:$0xff] %v6114_v32  ;;  %687 = vmatprep.subr.mxu1 %v686_v38  ;;  %v703_v20 = vsub.f32 %v6083_v13, %v11409_v19  ;;  %v6129_v61 = vand.u32 4294901760, %v6095_v1  ;;  %v10604_v38 = vand.u32 4294901760, %v6114_v32  ;;  %484 = vmatpush2.msra.mxu0 %v6104_v62 }
  0x40   : > { %11410 = vst [vmem:[#allocation37_spill] sm:$0xff] %v6126_v50  ;;  %693 = vmatpush1.msra.mxu1 %v692_v7  ;;  %v6137_v19 = vsub.f32 %v5981_v34, %v6015_v14  ;;  %11413 = vst [vmem:[#allocation40_spill] sm:$0xff] %v6140_v2  ;;  %v11414_v13 = vand.u32 4294901760, %v6101_v12  ;;  %486 = vmatprep.subr.mxu0 %v6117_v47  ;;  %v6159_v14 = vand.u32 4294901760, %v6131_v49  ;;  %v6165_v7 = vld [vmem:[#allocation2 + $0x700] sm:$0xff] }
  0x41   : > { %11411 = vst [vmem:[#allocation38_spill] sm:$0xff] %v6129_v61  ;;  %v698_v33 = vand.u32 4294901760, %v697_v30  ;;  %v704_v46 = vand.u32 4294901760, %v703_v20  ;;  %v6151_v30 = vsub.f32 %v5992_v53, %v6026_v26  ;;  %v715_v34 = vsub.f32 %v6114_v32, %v10604_v38  ;;  %488 = vmatpush2.msra.mxu0 %v6129_v61  ;;  %v6175_v32 = vld [vmem:[#allocation2 + $0x6c8] sm:$0xff] }
  0x42   : > { %11412 = vst [vmem:[#allocation39_spill] sm:$0xff] %v6137_v19  ;;  %v709_v21 = vsub.f32 %v6101_v12, %v11414_v13  ;;  %11416 = vst [vmem:[#allocation42_spill] sm:$0xff] %v6159_v14  ;;  %v6163_v13 = vsub.f32 %v6017_v51, %v6045_v28  ;;  %v6173_v20 = vand.u32 4294901760, %v6142_v39  ;;  %v11420_v51 = vand.u32 4294901760, %v6137_v19  ;;  %490 = vmatprep.subr.mxu0 %v6140_v2 }
  0x43   : > { %11415 = vst [vmem:[#allocation41_spill] sm:$0xff] %v6151_v30  ;;  %699 = vmatprep.subr.mxu1 %v698_v33  ;;  %v11418_v33 = vand.u32 4294901760, %v6126_v50  ;;  %v716_v12 = vand.u32 4294901760, %v715_v34  ;;  %492 = vmatpush2.msra.mxu0 %v6159_v14 }
  0x44   : > { %11417 = vst [vmem:[#allocation43_spill] sm:$0xff] %v6163_v13  ;;  %705 = vmatpush1.msra.mxu1 %v704_v46  ;;  %v710_v53 = vand.u32 4294901760, %v709_v21  ;;  %11419 = vst [vmem:[#allocation44_spill] sm:$0xff] %v6173_v20  ;;  %v727_v28 = vsub.f32 %v6137_v19, %v11420_v51  ;;  %v6184_v46 = vsub.f32 %v6028_v56, %v6059_v41  ;;  %v6193_v51 = vand.u32 4294901760, %v6165_v7  ;;  %v6199_v19 = vld [vmem:[#allocation2 + $0x688] sm:$0xff] }
  0x45   : > { %v721_v26 = vsub.f32 %v6126_v50, %v11418_v33  ;;  %v6186_v33 = vld [vmem:[#allocation2 + $0x6c0] sm:$0xff]  ;;  %v11422_v50 = vand.u32 4294901760, %v6151_v30  ;;  %v6197_v21 = vsub.f32 %v6051_v44, %v6079_v24  ;;  %494 = vmatprep.subr.mxu0 %v6173_v20  ;;  %v6207_v41 = vand.u32 4294901760, %v6175_v32  ;;  %v6220_v24 = vld [vmem:[#allocation2 + $0x648] sm:$0xff] }
  0x46   : > { %11421 = vst [vmem:[#allocation45_spill] sm:$0xff] %v6184_v46  ;;  %711 = vmatprep.subr.mxu1 %v710_v53  ;;  %11423 = vst [vmem:[#allocation46_spill] sm:$0xff] %v6193_v51  ;;  %v728_v56 = vand.u32 4294901760, %v727_v28  ;;  %v11425_v53 = vand.u32 4294901760, %v6163_v13  ;;  %496 = vmatpush2.msra.mxu0 %v6193_v51  ;;  %v6215_v28 = vsub.f32 %v6061_v36, %v6093_v43  ;;  %v6231_v36 = vand.u32 4294901760, %v6199_v19 }
  0x47   : > { %v722_v38 = vand.u32 4294901760, %v721_v26  ;;  %v733_v34 = vsub.f32 %v6151_v30, %v11422_v50  ;;  %11424 = vst [vmem:[#allocation47_spill] sm:$0xff] %v6197_v21  ;;  %717 = vmatpush1.msra.mxu1 %v716_v12  ;;  %11426 = vst [vmem:[#allocation48_spill] sm:$0xff] %v6207_v41  ;;  %v6209_v30 = vld [vmem:[#allocation2 + $0x680] sm:$0xff]  ;;  %v10627_v12 = vand.u32 4294901760, %v6197_v21  ;;  %498 = vmatprep.subr.mxu0 %v6207_v41 }
  0x48   : > { %v739_v26 = vsub.f32 %v6163_v13, %v11425_v53  ;;  %11427 = vst [vmem:[#allocation49_spill] sm:$0xff] %v6215_v28  ;;  %v6218_v53 = vand.u32 4294901760, %v6186_v33  ;;  %v11429_v13 = vand.u32 4294901760, %v6184_v46  ;;  %11431 = vst [vmem:[#allocation52_spill] sm:$0xff] %v6231_v36 }
  0x49   : > { %723 = vmatprep.subr.mxu1 %v722_v38  ;;  %v734_v44 = vand.u32 4294901760, %v733_v34  ;;  %v6228_v34 = vsub.f32 %v6072_v37, %v6104_v62  ;;  %v751_v43 = vsub.f32 %v6197_v21, %v10627_v12  ;;  %v6245_v37 = vld [vmem:[#allocation2 + $0x640] sm:$0xff]  ;;  %v6251_v12 = vsub.f32 %v6095_v1, %v6129_v61 }
  0x4a   : > { %11428 = vst [vmem:[#allocation50_spill] sm:$0xff] %v6218_v53  ;;  %729 = vmatpush1.msra.mxu1 %v728_v56  ;;  %v740_v50 = vand.u32 4294901760, %v739_v26  ;;  %v745_v38 = vsub.f32 %v6184_v46, %v11429_v13  ;;  %500 = vmatpush2.msra.mxu0 %v6218_v53  ;;  %v6240_v13 = vsub.f32 %v6085_v29, %v6117_v47  ;;  %v6243_v26 = vand.u32 4294901760, %v6209_v30  ;;  %v6256_v29 = vld [vmem:[#allocation2 + $0x608] sm:$0xff] }
  0x4b   : > { %11430 = vst [vmem:[#allocation51_spill] sm:$0xff] %v6228_v34  ;;  %735 = vmatprep.subr.mxu1 %v734_v44  ;;  %v10638_v44 = vand.u32 4294901760, %v6228_v34  ;;  %502 = vmatprep.subr.mxu0 %v6231_v36  ;;  %11434 = vst [vmem:[#allocation55_spill] sm:$0xff] %v6251_v12  ;;  %v6254_v56 = vand.u32 4294901760, %v6220_v24  ;;  %v752_v47 = vand.u32 4294901760, %v751_v43  ;;  %v11436_v21 = vand.u32 4294901760, %v6215_v28 }
  0x4c   : > { %11432 = vst [vmem:[#allocation53_spill] sm:$0xff] %v6240_v13  ;;  %11433 = vst [vmem:[#allocation54_spill] sm:$0xff] %v6243_v26  ;;  %741 = vmatpush1.msra.mxu1 %v740_v50  ;;  %v746_v62 = vand.u32 4294901760, %v745_v38  ;;  %504 = vmatpush2.msra.mxu0 %v6243_v26  ;;  %v6265_v38 = vsub.f32 %v6106_v52, %v6140_v2  ;;  %v6273_v43 = vand.u32 4294901760, %v6245_v37  ;;  %v6279_v50 = vld [vmem:[#allocation2 + $0x600] sm:$0xff]  ;;  %v6286_v61 = vand.u32 4294901760, %v6256_v29 }
  0x4d   : > { %11435 = vst [vmem:[#allocation56_spill] sm:$0xff] %v6254_v56  ;;  %v757_v46 = vsub.f32 %v6215_v28, %v11436_v21  ;;  %v763_v1 = vsub.f32 %v6228_v34, %v10638_v44  ;;  %506 = vmatprep.subr.mxu0 %v6254_v56  ;;  %v6277_v21 = vsub.f32 %v6131_v49, %v6159_v14  ;;  %v6288_v34 = vld [vmem:[#allocation2 + $0x5c8] sm:$0xff]  ;;  %v11442_v27 = vand.u32 4294901760, %v6251_v12 }
  0x4e   : > { %11437 = vst [vmem:[#allocation57_spill] sm:$0xff] %v6265_v38  ;;  %747 = vmatprep.subr.mxu1 %v746_v62  ;;  %11438 = vst [vmem:[#allocation58_spill] sm:$0xff] %v6273_v43  ;;  %v11440_v62 = vand.u32 4294901760, %v6240_v13  ;;  %508 = vmatpush2.msra.mxu0 %v6273_v43  ;;  %v11444_v14 = vand.u32 4294901760, %v6265_v38 }
  0x4f   : > { %11439 = vst [vmem:[#allocation59_spill] sm:$0xff] %v6277_v21  ;;  %753 = vmatpush1.msra.mxu1 %v752_v47  ;;  %v758_v52 = vand.u32 4294901760, %v757_v46  ;;  %11441 = vst [vmem:[#allocation60_spill] sm:$0xff] %v6286_v61  ;;  %v764_v28 = vand.u32 4294901760, %v763_v1  ;;  %v775_v49 = vsub.f32 %v6251_v12, %v11442_v27  ;;  %v6297_v46 = vsub.f32 %v6142_v39, %v6173_v20  ;;  %v6312_v12 = vld [vmem:[#allocation2 + $0x588] sm:$0xff] }
  0x50   : > { %v769_v2 = vsub.f32 %v6240_v13, %v11440_v62  ;;  %v6299_v62 = vld [vmem:[#allocation2 + $0x5c0] sm:$0xff]  ;;  %v781_v1 = vsub.f32 %v6265_v38, %v11444_v14  ;;  %510 = vmatprep.subr.mxu0 %v6286_v61  ;;  %v6306_v27 = vand.u32 4294901760, %v6279_v50  ;;  %v6310_v47 = vsub.f32 %v6165_v7, %v6193_v51 }
  0x51   : > { %11443 = vst [vmem:[#allocation61_spill] sm:$0xff] %v6297_v46  ;;  %759 = vmatprep.subr.mxu1 %v758_v52  ;;  %v776_v39 = vand.u32 4294901760, %v775_v49  ;;  %v11447_v52 = vand.u32 4294901760, %v6277_v21  ;;  %v6319_v14 = vand.u32 4294901760, %v6288_v34  ;;  %v6321_v38 = vld [vmem:[#allocation2 + $0x580] sm:$0xff]  ;;  %v6330_v49 = vand.u32 4294901760, %v6299_v62 }
  0x52   : > { %v770_v44 = vand.u32 4294901760, %v769_v2  ;;  %11445 = vst [vmem:[#allocation62_spill] sm:$0xff] %v6306_v27  ;;  %11446 = vst [vmem:[#allocation63_spill] sm:$0xff] %v6310_v47  ;;  %765 = vmatpush2.msra.mxu1 %v764_v28  ;;  %v782_v13 = vand.u32 4294901760, %v781_v1  ;;  %512 = vmatpush2.msra.mxu0 %v6306_v27  ;;  %v10661_v7 = vand.u32 4294901760, %v6310_v47  ;;  %v6327_v28 = vsub.f32 %v6175_v32, %v6207_v41 }
  0x53   : > { %v787_v2 = vsub.f32 %v6277_v21, %v11447_v52  ;;  %11448 = vst [vmem:[#allocation64_spill] sm:$0xff] %v6319_v14  ;;  %11450 = vst [vmem:[#allocation66_spill] sm:$0xff] %v6330_v49  ;;  %v6332_v52 = vld [vmem:[#allocation2 + $0x548] sm:$0xff]  ;;  %v11451_v51 = vand.u32 4294901760, %v6297_v46  ;;  %514 = vmatprep.subr.mxu0 %v6319_v14  ;;  %v6340_v1 = vsub.f32 %v6186_v33, %v6218_v53  ;;  %v6343_v32 = vand.u32 4294901760, %v6312_v12  ;;  %v6357_v33 = vld [vmem:[#allocation2 + $0x540] sm:$0xff] }
  0x54   : > { %771 = vmatprep.subr.mxu1 %v770_v44  ;;  %11449 = vst [vmem:[#allocation65_spill] sm:$0xff] %v6327_v28  ;;  %v799_v41 = vsub.f32 %v6310_v47, %v10661_v7  ;;  %516 = vmatpush2.msra.mxu0 %v6330_v49  ;;  %v6364_v7 = vsub.f32 %v6209_v30, %v6243_v26  ;;  %v11458_v47 = vand.u32 4294901760, %v6327_v28  ;;  %v6392_v26 = vld [vmem:[#allocation2 + $0x500] sm:$0xff] }
  0x55   : > { %777 = vmatpush2.msra.mxu1 %v776_v39  ;;  %v788_v20 = vand.u32 4294901760, %v787_v2  ;;  %v793_v44 = vsub.f32 %v6297_v46, %v11451_v51  ;;  %11452 = vst [vmem:[#allocation67_spill] sm:$0xff] %v6340_v1  ;;  %11453 = vst [vmem:[#allocation68_spill] sm:$0xff] %v6343_v32  ;;  %v6352_v51 = vsub.f32 %v6199_v19, %v6231_v36  ;;  %v6355_v2 = vand.u32 4294901760, %v6321_v38  ;;  %v6369_v19 = vld [vmem:[#allocation2 + $0x508] sm:$0xff] }
  0x56   : > { %783 = vmatprep.subr.mxu1 %v782_v13  ;;  %v10672_v53 = vand.u32 4294901760, %v6340_v1  ;;  %518 = vmatprep.subr.mxu0 %v6343_v32  ;;  %11456 = vst [vmem:[#allocation71_spill] sm:$0xff] %v6364_v7  ;;  %v6367_v39 = vand.u32 4294901760, %v6332_v52  ;;  %v800_v36 = vand.u32 4294901760, %v799_v41  ;;  %v805_v46 = vsub.f32 %v6327_v28, %v11458_v47 }
  0x57   : > { %11454 = vst [vmem:[#allocation69_spill] sm:$0xff] %v6352_v51  ;;  %11455 = vst [vmem:[#allocation70_spill] sm:$0xff] %v6355_v2  ;;  %789 = vmatpush2.msra.mxu1 %v788_v20  ;;  %v794_v13 = vand.u32 4294901760, %v793_v44  ;;  %520 = vmatpush2.msra.mxu0 %v6355_v2  ;;  %v6378_v30 = vsub.f32 %v6220_v24, %v6254_v56  ;;  %v6386_v47 = vand.u32 4294901760, %v6357_v33  ;;  %v6399_v41 = vand.u32 4294901760, %v6369_v19 }
  0x58   : > { %11457 = vst [vmem:[#allocation72_spill] sm:$0xff] %v6367_v39  ;;  %v811_v44 = vsub.f32 %v6340_v1, %v10672_v53  ;;  %522 = vmatprep.subr.mxu0 %v6367_v39  ;;  %v6390_v20 = vsub.f32 %v6245_v37, %v6273_v43  ;;  %v806_v24 = vand.u32 4294901760, %v805_v46  ;;  %v6401_v1 = vld [vmem:[#allocation2 + $0x4c8] sm:$0xff]  ;;  %v11464_v43 = vand.u32 4294901760, %v6364_v7  ;;  %v6417_v53 = vld [vmem:[#allocation2 + $0x4c0] sm:$0xff] }
  0x59   : > { %11459 = vst [vmem:[#allocation73_spill] sm:$0xff] %v6378_v30  ;;  %795 = vmatprep.subr.mxu1 %v794_v13  ;;  %11460 = vst [vmem:[#allocation74_spill] sm:$0xff] %v6386_v47  ;;  %v11462_v13 = vand.u32 4294901760, %v6352_v51  ;;  %524 = vmatpush2.msra.mxu0 %v6386_v47  ;;  %v11466_v28 = vand.u32 4294901760, %v6378_v30  ;;  %v6428_v46 = vsub.f32 %v6279_v50, %v6306_v27 }
  0x5a   : > { %11461 = vst [vmem:[#allocation75_spill] sm:$0xff] %v6390_v20  ;;  %801 = vmatpush2.msra.mxu1 %v800_v36  ;;  %11463 = vst [vmem:[#allocation76_spill] sm:$0xff] %v6399_v41  ;;  %v812_v37 = vand.u32 4294901760, %v811_v44  ;;  %v823_v36 = vsub.f32 %v6364_v7, %v11464_v43  ;;  %526 = vmatprep.subr.mxu0 %v6399_v41  ;;  %v6424_v43 = vand.u32 4294901760, %v6392_v26  ;;  %v6439_v7 = vld [vmem:[#allocation2 + $0x480] sm:$0xff] }
  0x5b   : > { %v817_v56 = vsub.f32 %v6352_v51, %v11462_v13  ;;  %v6415_v13 = vsub.f32 %v6256_v29, %v6286_v61  ;;  %807 = vmatprep.subr.mxu1 %v806_v24  ;;  %v829_v44 = vsub.f32 %v6378_v30, %v11466_v28  ;;  %11468 = vst [vmem:[#allocation79_spill] sm:$0xff] %v6428_v46  ;;  %v6430_v29 = vld [vmem:[#allocation2 + $0x488] sm:$0xff]  ;;  %v6437_v30 = vand.u32 4294901760, %v6401_v1 }
  0x5c   : > { %11467 = vst [vmem:[#allocation78_spill] sm:$0xff] %v6424_v43  ;;  %813 = vmatpush2.msra.mxu1 %v812_v37  ;;  %v824_v61 = vand.u32 4294901760, %v823_v36  ;;  %528 = vmatpush2.msra.mxu0 %v6424_v43  ;;  %v10695_v50 = vand.u32 4294901760, %v6428_v46  ;;  %v6445_v37 = vsub.f32 %v6288_v34, %v6319_v14  ;;  %v6448_v36 = vand.u32 4294901760, %v6417_v53 }
  0x5d   : > { %11465 = vst [vmem:[#allocation77_spill] sm:$0xff] %v6415_v13  ;;  %v818_v51 = vand.u32 4294901760, %v817_v56  ;;  %v11469_v56 = vand.u32 4294901760, %v6390_v20  ;;  %v830_v21 = vand.u32 4294901760, %v829_v44  ;;  %v11471_v27 = vand.u32 4294901760, %v6415_v13  ;;  %530 = vmatprep.subr.mxu0 %v6437_v30 }
  0x5e   : > { %11470 = vst [vmem:[#allocation80_spill] sm:$0xff] %v6445_v37  ;;  %v6459_v44 = vsub.f32 %v6299_v62, %v6330_v49  ;;  %v6462_v34 = vand.u32 4294901760, %v6430_v29  ;;  %v847_v14 = vsub.f32 %v6428_v46, %v10695_v50  ;;  %532 = vmatpush2.msra.mxu0 %v6448_v36  ;;  %v6476_v62 = vld [vmem:[#allocation2 + $0x440] sm:$0xff]  ;;  %v6482_v50 = vsub.f32 %v6321_v38, %v6355_v2 }
  0x5f   : > { %v835_v24 = vsub.f32 %v6390_v20, %v11469_v56  ;;  %819 = vmatprep.subr.mxu1 %v818_v51  ;;  %v6450_v56 = vld [vmem:[#allocation2 + $0x448] sm:$0xff]  ;;  %v841_v51 = vsub.f32 %v6415_v13, %v11471_v27  ;;  %v6471_v27 = vsub.f32 %v6312_v12, %v6343_v32  ;;  %v6499_v38 = vsub.f32 %v6332_v52, %v6367_v39 }
  0x60   : > { %825 = vmatpush2.msra.mxu1 %v824_v61  ;;  %11472 = vst [vmem:[#allocation81_spill] sm:$0xff] %v6459_v44  ;;  %11473 = vst [vmem:[#allocation82_spill] sm:$0xff] %v6462_v34  ;;  %534 = vmatprep.subr.mxu0 %v6462_v34  ;;  %v6485_v61 = vand.u32 4294901760, %v6450_v56  ;;  %v6487_v12 = vld [vmem:[#allocation2 + $0x408] sm:$0xff]  ;;  %v848_v32 = vand.u32 4294901760, %v847_v14  ;;  %v11480_v2 = vand.u32 4294901760, %v6459_v44 }
  0x61   : > { %v836_v28 = vand.u32 4294901760, %v835_v24  ;;  %831 = vmatprep.subr.mxu1 %v830_v21  ;;  %11474 = vst [vmem:[#allocation83_spill] sm:$0xff] %v6471_v27  ;;  %v6474_v24 = vand.u32 4294901760, %v6439_v7  ;;  %v842_v49 = vand.u32 4294901760, %v841_v51  ;;  %11476 = vst [vmem:[#allocation85_spill] sm:$0xff] %v6482_v50  ;;  %v6507_v14 = vand.u32 4294901760, %v6476_v62 }
  0x62   : > { %11477 = vst [vmem:[#allocation86_spill] sm:$0xff] %v6485_v61  ;;  %11479 = vst [vmem:[#allocation87_spill] sm:$0xff] %v6499_v38  ;;  %v859_v46 = vsub.f32 %v6459_v44, %v11480_v2  ;;  %v6513_v21 = vld [vmem:[#allocation2 + $0x400] sm:$0xff]  ;;  %v6520_v13 = vand.u32 4294901760, %v6487_v12  ;;  %v160_v44 = vld [vmem:[%s153_s22 + $0x8] sm:$0xff]  ;;  %v11483_v20 = vand.u32 4294901760, %v6482_v50 }
  0x63   : > { %11475 = vst [vmem:[#allocation84_spill] sm:$0xff] %v6474_v24  ;;  %837 = vmatpush2.msra.mxu1 %v836_v28  ;;  %v11478_v28 = vand.u32 4294901760, %v6445_v37  ;;  %536 = vmatpush2.msra.mxu0 %v6474_v24 }
  0x64   : > { %843 = vmatprep.subr.mxu1 %v842_v49  ;;  %538 = vmatprep.subr.mxu0 %v6485_v61  ;;  %v11482_v49 = vand.u32 4294901760, %v6471_v27 }
  0x65   : > { %v853_v51 = vsub.f32 %v6445_v37, %v11478_v28  ;;  %v6511_v28 = vsub.f32 %v6357_v33, %v6386_v47  ;;  %849 = vmatpush2.msra.mxu1 %v848_v32  ;;  %v860_v37 = vand.u32 4294901760, %v859_v46  ;;  %v871_v33 = vsub.f32 %v6482_v50, %v11483_v20  ;;  %540 = vmatpush2.msra.mxu0 %v6507_v14 }
  0x66   : > { %v865_v39 = vsub.f32 %v6471_v27, %v11482_v49  ;;  %v159_v49 = vld [vmem:[%s153_s22] sm:$0xff]  ;;  %v11485_v47 = vand.u32 4294901760, %v6499_v38  ;;  %542 = vmatprep.subr.mxu0 %v6520_v13  ;;  %v6536_v46 = vand.u32 4294901760, %v6513_v21  ;;  %v6540_v20 = vsub.f32 %v6392_v26, %v6424_v43 }
  0x67   : > { %11481 = vst [vmem:[#allocation88_spill] sm:$0xff] %v6511_v28  ;;  %v854_v52 = vand.u32 4294901760, %v853_v51  ;;  %v6529_v51 = vsub.f32 %v6369_v19, %v6399_v41  ;;  %v872_v32 = vand.u32 4294901760, %v871_v33  ;;  %v11487_v19 = vand.u32 4294901760, %v6511_v28 }
  0x68   : > { %v866_v2 = vand.u32 4294901760, %v865_v39  ;;  %v877_v27 = vsub.f32 %v6499_v38, %v11485_v47  ;;  %11486 = vst [vmem:[#allocation90_spill] sm:$0xff] %v6540_v20  ;;  %v6546_v41 = vand.u32 4294901760, %v160_v44  ;;  %544 = vmatpush2.msra.mxu0 %v6536_v46  ;;  %v10722_v38 = vand.u32 4294901760, %v6540_v20 }
  0x69   : > { %11484 = vst [vmem:[#allocation89_spill] sm:$0xff] %v6529_v51  ;;  %855 = vmatprep.subr.mxu1 %v854_v52  ;;  %v883_v52 = vsub.f32 %v6511_v28, %v11487_v19  ;;  %v10723_v39 = vand.u32 4294901760, %v6529_v51  ;;  %v6552_v26 = vsub.f32 %v6401_v1, %v6437_v30  ;;  %957 = vmatprep.subr.mxu0 %v5768_v18 }
  0x6a   : > { %861 = vmatpush2.msra.mxu1 %v860_v37  ;;  %11488 = vst [vmem:[#allocation91_spill] sm:$0xff] %v6546_v41  ;;  %v878_v47 = vand.u32 4294901760, %v877_v27  ;;  %v6554_v37 = vand.u32 4294901760, %v159_v49  ;;  %v6560_v43 = vsub.f32 %v160_v44, %v6546_v41  ;;  %v6565_v27 = vsub.f32 %v6417_v53, %v6448_v36  ;;  %947 = vmatprep.mubr.f32.mxu1 %v6546_v41 }
  0x6b   : > { %867 = vmatprep.subr.mxu1 %v866_v2  ;;  %11489 = vst [vmem:[#allocation92_spill] sm:$0xff] %v6552_v26  ;;  %v884_v33 = vand.u32 4294901760, %v883_v52  ;;  %v889_v19 = vsub.f32 %v6529_v51, %v10723_v39  ;;  %v895_v1 = vsub.f32 %v6540_v20, %v10722_v38  ;;  %v10726_v2 = vand.u32 4294901760, %v6552_v26 }
  0x6c   : > { %11490 = vst [vmem:[#allocation93_spill] sm:$0xff] %v6554_v37  ;;  %873 = vmatpush2.msra.mxu1 %v872_v32  ;;  %11491 = vst [vmem:[#allocation94_spill] sm:$0xff] %v6560_v43  ;;  %v6572_v32 = vsub.f32 %v159_v49, %v6554_v37  ;;  %v6576_v44 = vsub.f32 %v6430_v29, %v6462_v34  ;;  %v6580_v53 = vand.u32 4294901760, %v6560_v43 }
  0x6d   : > { %11492 = vst [vmem:[#allocation95_spill] sm:$0xff] %v6565_v27  ;;  %879 = vmatprep.subr.mxu1 %v878_v47  ;;  %v890_v52 = vand.u32 4294901760, %v889_v19  ;;  %v10731_v47 = vand.u32 4294901760, %v6565_v27  ;;  %v6585_v38 = vsub.f32 %v6439_v7, %v6474_v24  ;;  %v896_v39 = vand.u32 4294901760, %v895_v1 }
  0x6e   : > { %11493 = vst [vmem:[#allocation96_spill] sm:$0xff] %v6572_v32  ;;  %11494 = vst [vmem:[#allocation97_spill] sm:$0xff] %v6576_v44  ;;  %885 = vmatpush2.msra.mxu1 %v884_v33  ;;  %v901_v49 = vsub.f32 %v6552_v26, %v10726_v2  ;;  %v6591_v29 = vand.u32 4294901760, %v6572_v32  ;;  %v10738_v33 = vand.u32 4294901760, %v6576_v44  ;;  %v548_v19 = vsub.f32 %v6560_v43, %v6580_v53 }
  0x6f   : > { %11495 = vst [vmem:[#allocation98_spill] sm:$0xff] %v6580_v53  ;;  %891 = vmatprep.subr.mxu1 %v890_v52  ;;  %v907_v41 = vsub.f32 %v6565_v27, %v10731_v47  ;;  %v6602_v1 = vsub.f32 %v6450_v56, %v6485_v61  ;;  %v6611_v53 = vsub.f32 %v6476_v62, %v6507_v14  ;;  %v11500_v34 = vand.u32 4294901760, %v6585_v38 }
  0x70   : > { %11496 = vst [vmem:[#allocation99_spill] sm:$0xff] %v6591_v29  ;;  %897 = vmatpush2.msra.mxu1 %v896_v39  ;;  %v902_v2 = vand.u32 4294901760, %v901_v49  ;;  %v554_v24 = vsub.f32 %v6572_v32, %v6591_v29  ;;  %v913_v52 = vsub.f32 %v6576_v44, %v10738_v33  ;;  %v6613_v47 = vand.u32 4294901760, %v548_v19 }
  0x71   : > { %11497 = vst [vmem:[#allocation100_spill] sm:$0xff] %v6602_v1  ;;  %11498 = vst [vmem:[#allocation101_spill] sm:$0xff] %v6611_v53  ;;  %v908_v7 = vand.u32 4294901760, %v907_v41  ;;  %v919_v56 = vsub.f32 %v6585_v38, %v11500_v34  ;;  %v10742_v39 = vand.u32 4294901760, %v6602_v1  ;;  %v10741_v61 = vand.u32 4294901760, %v6611_v53 }
  0x72   : > { %11499 = vst [vmem:[#allocation102_spill] sm:$0xff] %v6613_v47  ;;  %903 = vmatprep.subr.mxu1 %v902_v2  ;;  %v6619_v49 = vand.u32 4294901760, %v554_v24  ;;  %v914_v29 = vand.u32 4294901760, %v913_v52  ;;  %v6624_v33 = vsub.f32 %v6487_v12, %v6520_v13  ;;  %550 = vmatprep.mubr.f32.mxu0 %v6613_v47  ;;  %v6632_v62 = vsub.f32 %v6513_v21, %v6536_v46  ;;  %v11518_v47 = vld [vmem:[#allocation37_spill] sm:$0xff] }
  0x73   : > { %909 = vmatpush2.msra.mxu1 %v908_v7  ;;  %v920_v41 = vand.u32 4294901760, %v919_v56  ;;  %v925_v34 = vsub.f32 %v6602_v1, %v10742_v39  ;;  %v931_v24 = vsub.f32 %v6611_v53, %v10741_v61  ;;  %v11514_v61 = vld [vmem:[#allocation33_spill] sm:$0xff]  ;;  %v11515_v39 = vld [vmem:[#allocation11_spill] sm:$0xff] }
  0x74   : > { %11501 = vst [vmem:[#allocation103_spill] sm:$0xff] %v6619_v49  ;;  %11502 = vst [vmem:[#allocation104_spill] sm:$0xff] %v6632_v62  ;;  %556 = vmatmul.mubr.f32.vlgmr.msra.gmra.mxu0 %v6619_v49  ;;  %915 = vmatprep.subr.mxu1 %v914_v29  ;;  %v10740_v12 = vand.u32 4294901760, %v6624_v33  ;;  %v10739_v19 = vand.u32 4294901760, %v6632_v62  ;;  %v11517_v49 = vld [vmem:[#allocation12_spill] sm:$0xff] }
  0x75   : > { %960 = vmatpush1.msra.mxu0 %v5781_v23  ;;  %921 = vmatpush2.msra.mxu1 %v920_v41  ;;  %v926_v2 = vand.u32 4294901760, %v925_v34  ;;  %v932_v7 = vand.u32 4294901760, %v931_v24  ;;  %v11503_v41 = vld [vmem:[#allocation5_spill] sm:$0xff]  ;;  %v11504_v34 = vld [vmem:[#allocation23_spill] sm:$0xff]  ;;  %v11505_v24 = vld [vmem:[#allocation6_spill] sm:$0xff] }
  0x76   : > { %963 = vmatprep.subr.mxu0 %v5787_v25  ;;  %v937_v21 = vsub.f32 %v6624_v33, %v10740_v12  ;;  %1149 = vmatprep.mubr.f32.mxu0 %v6560_v43  ;;  %v943_v29 = vsub.f32 %v6632_v62, %v10739_v19  ;;  %v11512_v19 = vld [vmem:[#allocation31_spill] sm:$0xff]  ;;  %v11513_v12 = vld [vmem:[#allocation10_spill] sm:$0xff] }
  0x77   : > { %966 = vmatpush1.msra.mxu0 %v5801_v31  ;;  %927 = vmatprep.subr.mxu1 %v926_v2  ;;  %v11506_v2 = vld [vmem:[#allocation25_spill] sm:$0xff]  ;;  %v11516_v43 = vld [vmem:[#allocation35_spill] sm:$0xff] }
  0x78   : > { %969 = vmatprep.subr.mxu0 %v5810_v35  ;;  %933 = vmatpush2.msra.mxu1 %v932_v7  ;;  %v938_v52 = vand.u32 4294901760, %v937_v21  ;;  %v944_v56 = vand.u32 4294901760, %v943_v29  ;;  %v11507_v7 = vld [vmem:[#allocation7_spill] sm:$0xff]  ;;  %v11509_v29 = vld [vmem:[#allocation8_spill] sm:$0xff] }
  0x79   : > { %972 = vmatpush1.msra.mxu0 %v5823_v40  ;;  %v11508_v21 = vld [vmem:[#allocation27_spill] sm:$0xff] }
  0x7a   : > { %939 = vmatprep.subr.mxu1 %v938_v52  ;;  %975 = vmatprep.subr.mxu0 %v5837_v45  ;;  %v11510_v52 = vld [vmem:[#allocation29_spill] sm:$0xff] }
  0x7b   : > { %945 = vmatpush2.msra.mxu1 %v944_v56  ;;  %978 = vmatpush1.msra.mxu0 %v5863_v59  ;;  %v11511_v56 = vld [vmem:[#allocation9_spill] sm:$0xff] }
  0x7c   : > { %949 = vmatmul.mubr.f32.vlgmr.msra.gmra.mxu1 %v6554_v37  ;;  %981 = vmatprep.subr.mxu0 %v5875_v0  ;;  %v11519_v37 = vld [vmem:[#allocation13_spill] sm:$0xff] }
  0x7d   : > { %1159 = vmatprep.subr.mxu1 %v5748_v3  ;;  %984 = vmatpush1.msra.mxu0 %v5886_v8 }
  0x7e   : > { %1161 = vmatpush1.msra.mxu1 %v5750_v4  ;;  %987 = vmatprep.subr.mxu0 %v5897_v42 }
  0x7f   : > { %1163 = vmatprep.subr.mxu1 %v5752_v5  ;;  %990 = vmatpush1.msra.mxu0 %v5909_v48 }
  0x80   : > { %1165 = vmatpush1.msra.mxu1 %v5754_v9  ;;  %993 = vmatprep.subr.mxu0 %v5923_v57 }
  0x81   : > { %1167 = vmatprep.subr.mxu1 %v5756_v10  ;;  %996 = vmatpush1.msra.mxu0 %v5935_v6 }
  0x82   : > { %1169 = vmatpush1.msra.mxu1 %v5758_v11  ;;  %999 = vmatprep.subr.mxu0 %v5956_v54 }
  0x83   : > { %1171 = vmatprep.subr.mxu1 %v5761_v15  ;;  %1002 = vmatpush1.msra.mxu0 %v5969_v63 }
  0x84   : > { %1173 = vmatpush1.msra.mxu1 %v5763_v16  ;;  %1005 = vmatprep.subr.mxu0 %v5987_v55 }
  0x85   : > { %1175 = vmatprep.subr.mxu1 %v5765_v17  ;;  %1008 = vmatpush1.msra.mxu0 %v6000_v58 }
  0x86   : > { %1177 = vmatpush1.msra.mxu1 %v5778_v22  ;;  %1011 = vmatprep.subr.mxu0 %v6012_v60 }
  0x87   : > { %1179 = vmatprep.subr.mxu1 %v11503_v41  ;;  %1014 = vmatpush1.msra.mxu0 %v11504_v34 }
  0x88   : > { %1181 = vmatpush1.msra.mxu1 %v11505_v24  ;;  %1017 = vmatprep.subr.mxu0 %v11506_v2 }
  0x89   : > { %1183 = vmatprep.subr.mxu1 %v11507_v7  ;;  %1020 = vmatpush1.msra.mxu0 %v11508_v21 }
  0x8a   : > { %1185 = vmatpush1.msra.mxu1 %v11509_v29  ;;  %1023 = vmatprep.subr.mxu0 %v11510_v52  ;;  %v11520_v29 = vld [vmem:[#allocation39_spill] sm:$0xff]  ;;  %v11521_v52 = vld [vmem:[#allocation14_spill] sm:$0xff] }
  0x8b   : > { %1187 = vmatprep.subr.mxu1 %v11511_v56  ;;  %1026 = vmatpush1.msra.mxu0 %v11512_v19  ;;  %v11522_v56 = vld [vmem:[#allocation41_spill] sm:$0xff]  ;;  %v11523_v19 = vld [vmem:[#allocation15_spill] sm:$0xff] }
  0x8c   : > { %1189 = vmatpush1.msra.mxu1 %v11513_v12  ;;  %1029 = vmatprep.subr.mxu0 %v11514_v61  ;;  %v11524_v12 = vld [vmem:[#allocation43_spill] sm:$0xff]  ;;  %v11525_v61 = vld [vmem:[#allocation16_spill] sm:$0xff] }
  0x8d   : > { %1191 = vmatprep.subr.mxu1 %v11515_v39  ;;  %1032 = vmatpush1.msra.mxu0 %v11516_v43  ;;  %v11526_v39 = vld [vmem:[#allocation45_spill] sm:$0xff] }
  0x8e   : > { %1193 = vmatpush1.msra.mxu1 %v11517_v49  ;;  %1035 = vmatprep.subr.mxu0 %v11518_v47  ;;  %v11527_v43 = vld [vmem:[#allocation17_spill] sm:$0xff]  ;;  %v11528_v49 = vld [vmem:[#allocation47_spill] sm:$0xff]  ;;  %v11529_v47 = vld [vmem:[#allocation18_spill] sm:$0xff] }
  0x8f   : > { %1195 = vmatprep.subr.mxu1 %v11519_v37  ;;  %1038 = vmatpush1.msra.mxu0 %v11520_v29  ;;  %v11530_v37 = vld [vmem:[#allocation49_spill] sm:$0xff]  ;;  %v11531_v29 = vld [vmem:[#allocation19_spill] sm:$0xff] }
  0x90   : > { %1197 = vmatpush1.msra.mxu1 %v11521_v52  ;;  %1041 = vmatprep.subr.mxu0 %v11522_v56  ;;  %v11532_v52 = vld [vmem:[#allocation51_spill] sm:$0xff]  ;;  %v11533_v56 = vld [vmem:[#allocation20_spill] sm:$0xff] }
  0x91   : > { %1199 = vmatprep.subr.mxu1 %v11523_v19  ;;  %1044 = vmatpush1.msra.mxu0 %v11524_v12  ;;  %v11534_v19 = vld [vmem:[#allocation53_spill] sm:$0xff] }
  0x92   : > { %1201 = vmatpush1.msra.mxu1 %v11525_v61  ;;  %1047 = vmatprep.subr.mxu0 %v11526_v39  ;;  %v11535_v12 = vld [vmem:[#allocation21_spill] sm:$0xff]  ;;  %v11536_v61 = vld [vmem:[#allocation55_spill] sm:$0xff]  ;;  %v11537_v39 = vld [vmem:[#allocation22_spill] sm:$0xff] }
  0x93   : > { %1203 = vmatprep.subr.mxu1 %v11527_v43  ;;  %1050 = vmatpush1.msra.mxu0 %v11528_v49  ;;  %v11538_v43 = vld [vmem:[#allocation57_spill] sm:$0xff]  ;;  %v11539_v49 = vld [vmem:[#allocation24_spill] sm:$0xff] }
  0x94   : > { %1205 = vmatpush1.msra.mxu1 %v11529_v47  ;;  %1053 = vmatprep.subr.mxu0 %v11530_v37  ;;  %v11540_v47 = vld [vmem:[#allocation59_spill] sm:$0xff]  ;;  %v11541_v37 = vld [vmem:[#allocation26_spill] sm:$0xff] }
  0x95   : > { %1207 = vmatprep.subr.mxu1 %v11531_v29  ;;  %1056 = vmatpush2.msra.mxu0 %v11532_v52  ;;  %v11542_v29 = vld [vmem:[#allocation61_spill] sm:$0xff]  ;;  %v11543_v52 = vld [vmem:[#allocation28_spill] sm:$0xff] }
  0x96   : > { %1209 = vmatpush1.msra.mxu1 %v11533_v56  ;;  %1059 = vmatprep.subr.mxu0 %v11534_v19  ;;  %v11544_v56 = vld [vmem:[#allocation63_spill] sm:$0xff]  ;;  %v11545_v19 = vld [vmem:[#allocation30_spill] sm:$0xff] }
  0x97   : > { %1211 = vmatprep.subr.mxu1 %v11535_v12  ;;  %1062 = vmatpush2.msra.mxu0 %v11536_v61  ;;  %v11546_v12 = vld [vmem:[#allocation65_spill] sm:$0xff]  ;;  %v11547_v61 = vld [vmem:[#allocation32_spill] sm:$0xff] }
  0x98   : > { %1213 = vmatpush1.msra.mxu1 %v11537_v39  ;;  %1065 = vmatprep.subr.mxu0 %v11538_v43  ;;  %v11548_v39 = vld [vmem:[#allocation67_spill] sm:$0xff]  ;;  %v11549_v43 = vld [vmem:[#allocation34_spill] sm:$0xff] }
  0x99   : > { %1215 = vmatprep.subr.mxu1 %v11539_v49  ;;  %1068 = vmatpush2.msra.mxu0 %v11540_v47  ;;  %v11550_v49 = vld [vmem:[#allocation69_spill] sm:$0xff]  ;;  %v11551_v47 = vld [vmem:[#allocation36_spill] sm:$0xff] }
  0x9a   : > { %1217 = vmatpush1.msra.mxu1 %v11541_v37  ;;  %1071 = vmatprep.subr.mxu0 %v11542_v29  ;;  %v11552_v37 = vld [vmem:[#allocation71_spill] sm:$0xff]  ;;  %v11553_v29 = vld [vmem:[#allocation38_spill] sm:$0xff] }
  0x9b   : > { %1219 = vmatprep.subr.mxu1 %v11543_v52  ;;  %1074 = vmatpush2.msra.mxu0 %v11544_v56  ;;  %v11554_v52 = vld [vmem:[#allocation73_spill] sm:$0xff]  ;;  %v11555_v56 = vld [vmem:[#allocation40_spill] sm:$0xff] }
  0x9c   : > { %1221 = vmatpush1.msra.mxu1 %v11545_v19  ;;  %1077 = vmatprep.subr.mxu0 %v11546_v12  ;;  %v11556_v19 = vld [vmem:[#allocation75_spill] sm:$0xff]  ;;  %v11557_v12 = vld [vmem:[#allocation42_spill] sm:$0xff] }
  0x9d   : > { %1223 = vmatprep.subr.mxu1 %v11547_v61  ;;  %1080 = vmatpush2.msra.mxu0 %v11548_v39  ;;  %v11558_v61 = vld [vmem:[#allocation77_spill] sm:$0xff]  ;;  %v11559_v39 = vld [vmem:[#allocation44_spill] sm:$0xff] }
  0x9e   : > { %1225 = vmatpush2.msra.mxu1 %v11549_v43  ;;  %1083 = vmatprep.subr.mxu0 %v11550_v49  ;;  %v11560_v43 = vld [vmem:[#allocation79_spill] sm:$0xff]  ;;  %v11561_v49 = vld [vmem:[#allocation46_spill] sm:$0xff] }
  0x9f   : > { %1227 = vmatprep.subr.mxu1 %v11551_v47  ;;  %1086 = vmatpush2.msra.mxu0 %v11552_v37  ;;  %v11562_v47 = vld [vmem:[#allocation80_spill] sm:$0xff] }
  0xa0   : > { %1229 = vmatpush2.msra.mxu1 %v11553_v29  ;;  %1089 = vmatprep.subr.mxu0 %v11554_v52  ;;  %v11563_v37 = vld [vmem:[#allocation48_spill] sm:$0xff]  ;;  %v11564_v29 = vld [vmem:[#allocation81_spill] sm:$0xff]  ;;  %v11565_v52 = vld [vmem:[#allocation50_spill] sm:$0xff] }
  0xa1   : > { %1231 = vmatprep.subr.mxu1 %v11555_v56  ;;  %1092 = vmatpush2.msra.mxu0 %v11556_v19  ;;  %v11566_v56 = vld [vmem:[#allocation83_spill] sm:$0xff]  ;;  %v11567_v19 = vld [vmem:[#allocation52_spill] sm:$0xff] }
  0xa2   : > { %1233 = vmatpush2.msra.mxu1 %v11557_v12  ;;  %1095 = vmatprep.subr.mxu0 %v11558_v61  ;;  %v11568_v61 = vld [vmem:[#allocation54_spill] sm:$0xff] }
  0xa3   : > { %1235 = vmatprep.subr.mxu1 %v11559_v39  ;;  %1098 = vmatpush2.msra.mxu0 %v11560_v43  ;;  %v11569_v39 = vld [vmem:[#allocation87_spill] sm:$0xff]  ;;  %v11570_v43 = vld [vmem:[#allocation56_spill] sm:$0xff] }
  0xa4   : > { %1237 = vmatpush2.msra.mxu1 %v11561_v49  ;;  %1101 = vmatprep.subr.mxu0 %v11562_v47  ;;  %v11571_v47 = vld [vmem:[#allocation58_spill] sm:$0xff] }
  0xa5   : > { %1239 = vmatprep.subr.mxu1 %v11563_v37  ;;  %1104 = vmatpush2.msra.mxu0 %v11564_v29  ;;  %v11572_v29 = vld [vmem:[#allocation60_spill] sm:$0xff] }
  0xa6   : > { %1241 = vmatpush2.msra.mxu1 %v11565_v52  ;;  %1107 = vmatprep.subr.mxu0 %v11566_v56  ;;  %v11573_v56 = vld [vmem:[#allocation62_spill] sm:$0xff] }
  0xa7   : > { %1243 = vmatprep.subr.mxu1 %v11567_v19  ;;  %1110 = vmatpush2.msra.mxu0 %v6482_v50  ;;  %v11574_v50 = vld [vmem:[#allocation64_spill] sm:$0xff] }
  0xa8   : > { %1245 = vmatpush2.msra.mxu1 %v11568_v61  ;;  %1113 = vmatprep.subr.mxu0 %v11569_v39  ;;  %v11575_v39 = vld [vmem:[#allocation66_spill] sm:$0xff] }
  0xa9   : > { %1247 = vmatprep.subr.mxu1 %v11570_v43  ;;  %1116 = vmatpush2.msra.mxu0 %v6511_v28  ;;  %v11576_v28 = vld [vmem:[#allocation68_spill] sm:$0xff] }
  0xaa   : > { %1249 = vmatpush2.msra.mxu1 %v11571_v47  ;;  %1119 = vmatprep.subr.mxu0 %v6529_v51  ;;  %v11577_v51 = vld [vmem:[#allocation70_spill] sm:$0xff] }
  0xab   : > { %1251 = vmatprep.subr.mxu1 %v11572_v29  ;;  %1122 = vmatpush2.msra.mxu0 %v6540_v20  ;;  %v11578_v20 = vld [vmem:[#allocation72_spill] sm:$0xff] }
  0xac   : > { %1253 = vmatpush2.msra.mxu1 %v11573_v56  ;;  %1125 = vmatprep.subr.mxu0 %v6552_v26  ;;  %v11579_v26 = vld [vmem:[#allocation74_spill] sm:$0xff] }
  0xad   : > { %1255 = vmatprep.subr.mxu1 %v11574_v50  ;;  %1128 = vmatpush2.msra.mxu0 %v6565_v27  ;;  %v11580_v27 = vld [vmem:[#allocation76_spill] sm:$0xff] }
  0xae   : > { %1257 = vmatpush2.msra.mxu1 %v11575_v39  ;;  %1131 = vmatprep.subr.mxu0 %v6576_v44  ;;  %v11581_v44 = vld [vmem:[#allocation78_spill] sm:$0xff] }
  0xaf   : > { %1259 = vmatprep.subr.mxu1 %v11576_v28  ;;  %1134 = vmatpush2.msra.mxu0 %v6585_v38 }
  0xb0   : > { %1261 = vmatpush2.msra.mxu1 %v11577_v51  ;;  %1137 = vmatprep.subr.mxu0 %v6602_v1  ;;  %v11582_v1 = vand.u32 4294901760, %v5768_v18  ;;  %v11589_v18 = vand.u32 4294901760, %v5810_v35  ;;  %v11595_v35 = vand.u32 4294901760, %v5875_v0  ;;  %v11599_v0 = vand.u32 4294901760, %v5923_v57  ;;  %v11615_v57 = vld [vmem:[#allocation10_spill] sm:$0xff] }
  0xb1   : > { %1263 = vmatprep.subr.mxu1 %v11578_v20  ;;  %1140 = vmatpush2.msra.mxu0 %v6611_v53  ;;  %v11583_v53 = vand.u32 4294901760, %v5781_v23  ;;  %v11590_v23 = vand.u32 4294901760, %v5823_v40  ;;  %v11596_v40 = vand.u32 4294901760, %v5886_v8  ;;  %v11609_v8 = vld [vmem:[#allocation8_spill] sm:$0xff] }
  0xb2   : > { %1265 = vmatpush2.msra.mxu1 %v11579_v26  ;;  %1143 = vmatprep.subr.mxu0 %v6624_v33  ;;  %v11584_v26 = vld [vmem:[#allocation82_spill] sm:$0xff] }
  0xb3   : > { %1267 = vmatprep.subr.mxu1 %v11580_v27  ;;  %1146 = vmatpush2.msra.mxu0 %v6632_v62  ;;  %v11585_v27 = vand.u32 4294901760, %v5787_v25  ;;  %v11586_v62 = vld [vmem:[#allocation84_spill] sm:$0xff]  ;;  %v11591_v25 = vand.u32 4294901760, %v5837_v45  ;;  %v11597_v45 = vand.u32 4294901760, %v5897_v42  ;;  %v11612_v42 = vld [vmem:[#allocation9_spill] sm:$0xff] }
  0xb4   : > { %1269 = vmatpush2.msra.mxu1 %v11581_v44  ;;  %1152 = vmatmul.mubr.f32.vlgmr.msra.gmra.mxu0 %v6572_v32  ;;  %v11587_v44 = vand.u32 4294901760, %v5801_v31  ;;  %v11588_v32 = vld [vmem:[#allocation86_spill] sm:$0xff]  ;;  %v11593_v31 = vand.u32 4294901760, %v5863_v59  ;;  %v11598_v59 = vand.u32 4294901760, %v5909_v48  ;;  %v11613_v48 = vld [vmem:[#allocation31_spill] sm:$0xff] }
  0xb5   : > { %1271 = vmatprep.subr.mxu1 %v6437_v30  ;;  %1302 = vmatprep.subr.mxu0 %v11582_v1  ;;  %v11621_v1 = vld [vmem:[#allocation12_spill] sm:$0xff] }
  0xb6   : > { %1273 = vmatpush2.msra.mxu1 %v6448_v36  ;;  %1306 = vmatpush1.msra.mxu0 %v11583_v53 }
  0xb7   : > { %1275 = vmatprep.subr.mxu1 %v11584_v26  ;;  %1310 = vmatprep.subr.mxu0 %v11585_v27  ;;  %v11592_v27 = vld [vmem:[#allocation98_spill] sm:$0xff] }
  0xb8   : > { %1277 = vmatpush2.msra.mxu1 %v11586_v62  ;;  %1314 = vmatpush1.msra.mxu0 %v11587_v44  ;;  %v11594_v44 = vld [vmem:[#allocation99_spill] sm:$0xff] }
  0xb9   : > { %1279 = vmatprep.subr.mxu1 %v11588_v32  ;;  %1318 = vmatprep.subr.mxu0 %v11589_v18  ;;  %v11628_v18 = vld [vmem:[#allocation41_spill] sm:$0xff] }
  0xba   : > { %1281 = vmatpush2.msra.mxu1 %v6507_v14  ;;  %1322 = vmatpush1.msra.mxu0 %v11590_v23  ;;  %v11629_v23 = vand.u32 4294901760, %v11628_v18  ;;  %v11663_v18 = vld [vmem:[#allocation30_spill] sm:$0xff] }
  0xbb   : > { %1283 = vmatprep.subr.mxu1 %v6520_v13  ;;  %1326 = vmatprep.subr.mxu0 %v11591_v25  ;;  %v11630_v25 = vld [vmem:[#allocation15_spill] sm:$0xff] }
  0xbc   : > { %1285 = vmatpush2.msra.mxu1 %v6536_v46  ;;  %1289 = vmatprep.mubr.f32.mxu1 %v11592_v27 }
  0xbd   : > { %1330 = vmatpush1.msra.mxu0 %v11593_v31  ;;  %1293 = vmatmul.mubr.f32.vlgmr.msra.gmra.mxu1 %v11594_v44  ;;  %v11631_v31 = vld [vmem:[#allocation43_spill] sm:$0xff]  ;;  %v11742_v44 = vld [vmem:[#allocation104_spill] sm:$0xff] }
  0xbe   : > { %1334 = vmatprep.subr.mxu0 %v11595_v35  ;;  %1565 = vmatprep.subr.mxu1 %v5748_v3  ;;  %v11600_v3 = vand.u32 4294901760, %v5935_v6  ;;  %v11632_v35 = vand.u32 4294901760, %v11631_v31  ;;  %v11666_v31 = vld [vmem:[#allocation32_spill] sm:$0xff]  ;;  %v11743_v27 = vand.u32 4294901760, %v11742_v44  ;;  %v11750_v44 = vld [vmem:[#allocation93_spill] sm:$0xff] }
  0xbf   : > { %1338 = vmatpush1.msra.mxu0 %v11596_v40  ;;  %1567 = vmatpush1.msra.mxu1 %v5750_v4  ;;  %v11601_v4 = vand.u32 4294901760, %v5956_v54  ;;  %v11614_v54 = vand.u32 4294901760, %v11613_v48  ;;  %v11633_v40 = vld [vmem:[#allocation16_spill] sm:$0xff] }
  0xc0   : > { %1342 = vmatprep.subr.mxu0 %v11597_v45  ;;  %1569 = vmatprep.subr.mxu1 %v5752_v5  ;;  %v11602_v5 = vand.u32 4294901760, %v5969_v63  ;;  %v11616_v63 = vld [vmem:[#allocation33_spill] sm:$0xff] }
  0xc1   : > { %1346 = vmatpush1.msra.mxu0 %v11598_v59  ;;  %1571 = vmatpush1.msra.mxu1 %v5754_v9  ;;  %v11603_v9 = vand.u32 4294901760, %v5987_v55  ;;  %v11617_v6 = vand.u32 4294901760, %v11616_v63  ;;  %v11618_v55 = vld [vmem:[#allocation11_spill] sm:$0xff]  ;;  %v11634_v45 = vld [vmem:[#allocation45_spill] sm:$0xff] }
  0xc2   : > { %1350 = vmatprep.subr.mxu0 %v11599_v0  ;;  %1573 = vmatprep.subr.mxu1 %v5756_v10  ;;  %v11604_v10 = vand.u32 4294901760, %v6000_v58  ;;  %v11619_v58 = vld [vmem:[#allocation35_spill] sm:$0xff]  ;;  %v11635_v59 = vand.u32 4294901760, %v11634_v45  ;;  %v11636_v0 = vld [vmem:[#allocation17_spill] sm:$0xff] }
  0xc3   : > { %1354 = vmatpush1.msra.mxu0 %v11600_v3  ;;  %1575 = vmatpush1.msra.mxu1 %v5758_v11  ;;  %v11605_v11 = vand.u32 4294901760, %v6012_v60  ;;  %v11620_v53 = vand.u32 4294901760, %v11619_v58  ;;  %v11637_v3 = vld [vmem:[#allocation47_spill] sm:$0xff] }
  0xc4   : > { %1358 = vmatprep.subr.mxu0 %v11601_v4  ;;  %1577 = vmatprep.subr.mxu1 %v5761_v15  ;;  %v11606_v15 = vand.u32 4294901760, %v11504_v34  ;;  %v11638_v4 = vand.u32 4294901760, %v11637_v3 }
  0xc5   : > { %1362 = vmatpush1.msra.mxu0 %v11602_v5  ;;  %1579 = vmatpush1.msra.mxu1 %v5763_v16  ;;  %v11607_v16 = vand.u32 4294901760, %v11506_v2  ;;  %v11625_v2 = vld [vmem:[#allocation39_spill] sm:$0xff]  ;;  %v11639_v5 = vld [vmem:[#allocation18_spill] sm:$0xff] }
  0xc6   : > { %1366 = vmatprep.subr.mxu0 %v11603_v9  ;;  %1581 = vmatprep.subr.mxu1 %v5765_v17  ;;  %v11608_v17 = vand.u32 4294901760, %v11508_v21  ;;  %v11627_v21 = vld [vmem:[#allocation14_spill] sm:$0xff]  ;;  %v11640_v9 = vld [vmem:[#allocation49_spill] sm:$0xff] }
  0xc7   : > { %1370 = vmatpush1.msra.mxu0 %v11604_v10  ;;  %1583 = vmatpush1.msra.mxu1 %v5778_v22  ;;  %v11610_v22 = vld [vmem:[#allocation29_spill] sm:$0xff]  ;;  %v11641_v10 = vand.u32 4294901760, %v11640_v9 }
  0xc8   : > { %1374 = vmatprep.subr.mxu0 %v11605_v11  ;;  %1585 = vmatprep.subr.mxu1 %v11503_v41  ;;  %v11611_v60 = vand.u32 4294901760, %v11610_v22  ;;  %v11622_v41 = vld [vmem:[#allocation37_spill] sm:$0xff]  ;;  %v11642_v11 = vld [vmem:[#allocation19_spill] sm:$0xff] }
  0xc9   : > { %1378 = vmatpush1.msra.mxu0 %v11606_v15  ;;  %1587 = vmatpush1.msra.mxu1 %v11505_v24  ;;  %v11623_v34 = vand.u32 4294901760, %v11622_v41  ;;  %v11624_v24 = vld [vmem:[#allocation13_spill] sm:$0xff]  ;;  %v11643_v15 = vld [vmem:[#allocation51_spill] sm:$0xff] }
  0xca   : > { %1382 = vmatprep.subr.mxu0 %v11607_v16  ;;  %1589 = vmatprep.subr.mxu1 %v11507_v7  ;;  %v11626_v7 = vand.u32 4294901760, %v11625_v2  ;;  %v11644_v16 = vand.u32 4294901760, %v11643_v15  ;;  %v283_v2 = vld [vmem:[#allocation2 + $0x3d0] sm:$0xff] }
  0xcb   : > { %1386 = vmatpush1.msra.mxu0 %v11608_v17  ;;  %1591 = vmatpush1.msra.mxu1 %v11609_v8  ;;  %v11645_v17 = vld [vmem:[#allocation20_spill] sm:$0xff]  ;;  %v11646_v8 = vld [vmem:[#allocation53_spill] sm:$0xff]  ;;  %v6898_v3 = vand.u32 4294901760, %v283_v2 }
  0xcc   : > { %1390 = vmatprep.subr.mxu0 %v11611_v60  ;;  %1593 = vmatprep.subr.mxu1 %v11612_v42  ;;  %v11647_v22 = vand.u32 4294901760, %v11646_v8  ;;  %v11648_v60 = vld [vmem:[#allocation21_spill] sm:$0xff]  ;;  %v11649_v42 = vld [vmem:[#allocation55_spill] sm:$0xff]  ;;  %v268_v8 = vld [vmem:[#allocation2 + $0x358] sm:$0xff] }
  0xcd   : > { %1394 = vmatpush1.msra.mxu0 %v11614_v54  ;;  %1595 = vmatpush1.msra.mxu1 %v11615_v57  ;;  %v11650_v48 = vand.u32 4294901760, %v11649_v42  ;;  %v11651_v54 = vld [vmem:[#allocation22_spill] sm:$0xff]  ;;  %v11652_v57 = vld [vmem:[#allocation57_spill] sm:$0xff] }
  0xce   : > { %1398 = vmatprep.subr.mxu0 %v11617_v6  ;;  %1597 = vmatprep.subr.mxu1 %v11618_v55  ;;  %v11653_v63 = vand.u32 4294901760, %v11652_v57  ;;  %v11654_v6 = vld [vmem:[#allocation24_spill] sm:$0xff]  ;;  %v11655_v55 = vld [vmem:[#allocation59_spill] sm:$0xff] }
  0xcf   : > { %1402 = vmatpush1.msra.mxu0 %v11620_v53  ;;  %1599 = vmatpush1.msra.mxu1 %v11621_v1  ;;  %v11656_v58 = vand.u32 4294901760, %v11655_v55  ;;  %v11657_v53 = vld [vmem:[#allocation26_spill] sm:$0xff]  ;;  %v11658_v1 = vld [vmem:[#allocation61_spill] sm:$0xff]  ;;  %v11681_v57 = vld [vmem:[#allocation75_spill] sm:$0xff] }
  0xd0   : > { %1406 = vmatprep.subr.mxu0 %v11623_v34  ;;  %1601 = vmatprep.subr.mxu1 %v11624_v24  ;;  %v11659_v41 = vand.u32 4294901760, %v11658_v1  ;;  %v11660_v34 = vld [vmem:[#allocation28_spill] sm:$0xff] }
  0xd1   : > { %1410 = vmatpush1.msra.mxu0 %v11626_v7  ;;  %1603 = vmatpush1.msra.mxu1 %v11627_v21  ;;  %v284_v24 = vld [vmem:[#allocation2 + $0x3d8] sm:$0xff]  ;;  %v11661_v7 = vld [vmem:[#allocation63_spill] sm:$0xff] }
  0xd2   : > { %1414 = vmatprep.subr.mxu0 %v11629_v23  ;;  %1605 = vmatprep.subr.mxu1 %v11630_v25  ;;  %v11662_v21 = vand.u32 4294901760, %v11661_v7  ;;  %v11664_v23 = vld [vmem:[#allocation65_spill] sm:$0xff]  ;;  %v260_v55 = vld [vmem:[#allocation2 + $0x318] sm:$0xff] }
  0xd3   : > { %1418 = vmatpush1.msra.mxu0 %v11632_v35  ;;  %1607 = vmatpush1.msra.mxu1 %v11633_v40  ;;  %v11665_v25 = vand.u32 4294901760, %v11664_v23  ;;  %v276_v35 = vld [vmem:[#allocation2 + $0x398] sm:$0xff]  ;;  %v11667_v40 = vld [vmem:[#allocation67_spill] sm:$0xff] }
  0xd4   : > { %1422 = vmatprep.subr.mxu0 %v11635_v59  ;;  %1609 = vmatprep.subr.mxu1 %v11636_v0  ;;  %v11668_v45 = vand.u32 4294901760, %v11667_v40  ;;  %v11669_v59 = vld [vmem:[#allocation34_spill] sm:$0xff]  ;;  %v6896_v0 = vand.u32 4294901760, %v284_v24  ;;  %v252_v40 = vld [vmem:[#allocation2 + $0x2d8] sm:$0xff] }
  0xd5   : > { %1426 = vmatpush1.msra.mxu0 %v11638_v4  ;;  %1611 = vmatpush1.msra.mxu1 %v11639_v5  ;;  %v275_v4 = vld [vmem:[#allocation2 + $0x390] sm:$0xff]  ;;  %v11670_v5 = vld [vmem:[#allocation69_spill] sm:$0xff] }
  0xd6   : > { %1430 = vmatprep.subr.mxu0 %v11641_v10  ;;  %1613 = vmatprep.subr.mxu1 %v11642_v11  ;;  %v11671_v9 = vand.u32 4294901760, %v11670_v5  ;;  %v11672_v10 = vld [vmem:[#allocation36_spill] sm:$0xff]  ;;  %v11673_v11 = vld [vmem:[#allocation71_spill] sm:$0xff] }
  0xd7   : > { %1434 = vmatpush2.msra.mxu0 %v11644_v16  ;;  %1615 = vmatpush1.msra.mxu1 %v11645_v17  ;;  %v11674_v15 = vand.u32 4294901760, %v11673_v11  ;;  %v11675_v16 = vld [vmem:[#allocation38_spill] sm:$0xff]  ;;  %v6906_v17 = vand.u32 4294901760, %v276_v35  ;;  %v243_v11 = vld [vmem:[#allocation2 + $0x290] sm:$0xff] }
  0xd8   : > { %1438 = vmatprep.subr.mxu0 %v11647_v22  ;;  %1617 = vmatprep.subr.mxu1 %v11648_v60  ;;  %v267_v22 = vld [vmem:[#allocation2 + $0x350] sm:$0xff]  ;;  %v11677_v60 = vld [vmem:[#allocation73_spill] sm:$0xff] }
  0xd9   : > { %1442 = vmatpush2.msra.mxu0 %v11650_v48  ;;  %1619 = vmatpush1.msra.mxu1 %v11651_v54  ;;  %11676 = vst [vmem:[#allocation5_spill] sm:$0xff] %v6906_v17  ;;  %v11678_v42 = vand.u32 4294901760, %v11677_v60  ;;  %v11679_v48 = vld [vmem:[#allocation40_spill] sm:$0xff]  ;;  %v6911_v54 = vand.u32 4294901760, %v275_v4  ;;  %v6927_v7 = vand.u32 4294901760, %v267_v22  ;;  %v6962_v60 = vand.u32 4294901760, %v252_v40 }
  0xda   : > { %1446 = vmatprep.subr.mxu0 %v11653_v63  ;;  %1621 = vmatprep.subr.mxu1 %v11654_v6  ;;  %v11682_v63 = vand.u32 4294901760, %v11681_v57  ;;  %v6917_v6 = vsub.f32 %v283_v2, %v6898_v3 }
  0xdb   : > { %1450 = vmatpush2.msra.mxu0 %v11656_v58  ;;  %1623 = vmatpush1.msra.mxu1 %v11657_v53  ;;  %11680 = vst [vmem:[#allocation23_spill] sm:$0xff] %v6911_v54  ;;  %v6920_v58 = vsub.f32 %v284_v24, %v6896_v0  ;;  %v11683_v53 = vld [vmem:[#allocation77_spill] sm:$0xff]  ;;  %11687 = vst [vmem:[#allocation25_spill] sm:$0xff] %v6927_v7  ;;  %v11690_v24 = vld [vmem:[#allocation80_spill] sm:$0xff] }
  0xdc   : > { %1454 = vmatprep.subr.mxu0 %v11659_v41  ;;  %1625 = vmatprep.subr.mxu1 %v11660_v34  ;;  %v11684_v1 = vand.u32 4294901760, %v11683_v53  ;;  %v11685_v41 = vld [vmem:[#allocation44_spill] sm:$0xff]  ;;  %v6925_v34 = vand.u32 4294901760, %v268_v8  ;;  %v11691_v2 = vand.u32 4294901760, %v11690_v24  ;;  %11702 = vst [vmem:[#allocation48_spill] sm:$0xff] %v6962_v60  ;;  %v11711_v24 = vld [vmem:[#allocation89_spill] sm:$0xff] }
  0xdd   : > { %1458 = vmatpush2.msra.mxu0 %v11662_v21  ;;  %1627 = vmatpush1.msra.mxu1 %v11663_v18  ;;  %v259_v21 = vld [vmem:[#allocation2 + $0x310] sm:$0xff]  ;;  %v11707_v53 = vld [vmem:[#allocation88_spill] sm:$0xff] }
  0xde   : > { %1462 = vmatprep.subr.mxu0 %v11665_v25  ;;  %1629 = vmatprep.subr.mxu1 %v11666_v31  ;;  %11686 = vst [vmem:[#allocation6_spill] sm:$0xff] %v6925_v34  ;;  %v11688_v18 = vld [vmem:[#allocation79_spill] sm:$0xff]  ;;  %v6939_v25 = vsub.f32 %v275_v4, %v6911_v54  ;;  %v6941_v31 = vand.u32 4294901760, %v260_v55  ;;  %v6954_v4 = vsub.f32 %v267_v22, %v6927_v7 }
  0xdf   : > { %1466 = vmatpush2.msra.mxu0 %v11668_v45  ;;  %1631 = vmatpush2.msra.mxu1 %v11669_v59  ;;  %v11689_v23 = vand.u32 4294901760, %v11688_v18  ;;  %v251_v45 = vld [vmem:[#allocation2 + $0x2d0] sm:$0xff]  ;;  %v11693_v59 = vld [vmem:[#allocation81_spill] sm:$0xff]  ;;  %v236_v18 = vld [vmem:[#allocation2 + $0x258] sm:$0xff] }
  0xe0   : > { %1470 = vmatprep.subr.mxu0 %v11671_v9  ;;  %1633 = vmatprep.subr.mxu1 %v11672_v10  ;;  %11692 = vst [vmem:[#allocation7_spill] sm:$0xff] %v6941_v31  ;;  %v11694_v5 = vand.u32 4294901760, %v11693_v59  ;;  %v10765_v9 = vand.u32 4294901760, %v6917_v6  ;;  %v11696_v10 = vld [vmem:[#allocation83_spill] sm:$0xff]  ;;  %11698 = vst [vmem:[#allocation42_spill] sm:$0xff] %v6954_v4  ;;  %v6972_v22 = vsub.f32 %v260_v55, %v6941_v31  ;;  %v6990_v55 = vand.u32 4294901760, %v243_v11 }
  0xe1   : > { %1474 = vmatpush2.msra.mxu0 %v11674_v15  ;;  %1635 = vmatpush2.msra.mxu1 %v11675_v16  ;;  %v6957_v15 = vsub.f32 %v268_v8, %v6925_v34  ;;  %v11700_v16 = vld [vmem:[#allocation85_spill] sm:$0xff]  ;;  %v10763_v8 = vand.u32 4294901760, %v6939_v25  ;;  %v10767_v59 = vand.u32 4294901760, %v6954_v4 }
  0xe2   : > { %1478 = vmatprep.subr.mxu0 %v11678_v42  ;;  %1637 = vmatprep.subr.mxu1 %v11679_v48  ;;  %v6964_v42 = vand.u32 4294901760, %v251_v45  ;;  %v244_v48 = vld [vmem:[#allocation2 + $0x298] sm:$0xff]  ;;  %11706 = vst [vmem:[#allocation52_spill] sm:$0xff] %v6972_v22  ;;  %11710 = vst [vmem:[#allocation56_spill] sm:$0xff] %v6990_v55 }
  0xe3   : > { %1482 = vmatpush2.msra.mxu0 %v11682_v63  ;;  %1639 = vmatpush2.msra.mxu1 %v11557_v12  ;;  %v6933_v12 = vsub.f32 %v276_v35, %v6906_v17  ;;  %v10768_v35 = vand.u32 4294901760, %v6920_v58  ;;  %11699 = vst [vmem:[#allocation46_spill] sm:$0xff] %v6957_v15 }
  0xe4   : > { %1486 = vmatprep.subr.mxu0 %v11684_v1  ;;  %1641 = vmatprep.subr.mxu1 %v11685_v41  ;;  %11703 = vst [vmem:[#allocation50_spill] sm:$0xff] %v6964_v42  ;;  %v11708_v1 = vand.u32 4294901760, %v11707_v53 }
  0xe5   : > { %1490 = vmatpush2.msra.mxu0 %v11689_v23  ;;  %1643 = vmatpush2.msra.mxu1 %v11561_v49  ;;  %v6946_v49 = vand.u32 4294901760, %v259_v21  ;;  %v10764_v57 = vand.u32 4294901760, %v6933_v12  ;;  %v6983_v41 = vsub.f32 %v6920_v58, %v10768_v35  ;;  %v235_v23 = vld [vmem:[#allocation2 + $0x250] sm:$0xff]  ;;  %v11730_v35 = vld [vmem:[#allocation100_spill] sm:$0xff] }
  0xe6   : > { %1494 = vmatprep.subr.mxu0 %v11691_v2  ;;  %1645 = vmatprep.subr.mxu1 %v11563_v37  ;;  %v11697_v37 = vand.u32 4294901760, %v11696_v10  ;;  %v11712_v2 = vand.u32 4294901760, %v11711_v24  ;;  %v7023_v53 = vand.u32 4294901760, %v235_v23  ;;  %v10769_v24 = vand.u32 4294901760, %v6972_v22 }
  0xe7   : > { %1498 = vmatpush2.msra.mxu0 %v11694_v5  ;;  %1647 = vmatpush2.msra.mxu1 %v11565_v52  ;;  %11695 = vst [vmem:[#allocation27_spill] sm:$0xff] %v6946_v49  ;;  %v11701_v52 = vand.u32 4294901760, %v11700_v16  ;;  %v11714_v5 = vld [vmem:[#allocation90_spill] sm:$0xff]  ;;  %v7008_v16 = vsub.f32 %v6933_v12, %v10764_v57  ;;  %v219_v57 = vld [vmem:[#allocation2 + $0x1d0] sm:$0xff] }
  0xe8   : > { %1502 = vmatprep.subr.mxu0 %v11697_v37  ;;  %1649 = vmatprep.subr.mxu1 %v11567_v19  ;;  %v11704_v19 = vld [vmem:[#allocation87_spill] sm:$0xff]  ;;  %v11715_v10 = vand.u32 4294901760, %v11714_v5  ;;  %v7003_v37 = vsub.f32 %v251_v45, %v6964_v42  ;;  %v7021_v45 = vand.u32 4294901760, %v236_v18  ;;  %11721 = vst [vmem:[#allocation66_spill] sm:$0xff] %v7023_v53  ;;  %v11734_v5 = vld [vmem:[#allocation101_spill] sm:$0xff] }
  0xe9   : > { %1506 = vmatpush2.msra.mxu0 %v11701_v52  ;;  %1651 = vmatpush2.msra.mxu1 %v11568_v61  ;;  %v11705_v63 = vand.u32 4294901760, %v11704_v19  ;;  %v6978_v61 = vsub.f32 %v259_v21, %v6946_v49  ;;  %v10766_v21 = vand.u32 4294901760, %v6957_v15  ;;  %v7011_v52 = vsub.f32 %v252_v40, %v6962_v60  ;;  %v11718_v19 = vld [vmem:[#allocation92_spill] sm:$0xff] }
  0xea   : > { %1653 = vmatprep.subr.mxu1 %v11570_v43  ;;  %v6988_v43 = vsub.f32 %v6917_v6, %v10765_v9  ;;  %11716 = vst [vmem:[#allocation60_spill] sm:$0xff] %v7003_v37  ;;  %11720 = vst [vmem:[#allocation64_spill] sm:$0xff] %v7021_v45 }
  0xeb   : > { %1510 = vmatprep.subr.mxu0 %v11705_v63  ;;  %1655 = vmatpush2.msra.mxu1 %v11571_v47  ;;  %11709 = vst [vmem:[#allocation54_spill] sm:$0xff] %v6978_v61  ;;  %v6995_v47 = vand.u32 4294901760, %v244_v48  ;;  %11717 = vst [vmem:[#allocation62_spill] sm:$0xff] %v7011_v52  ;;  %v11719_v63 = vand.u32 4294901760, %v11718_v19  ;;  %v10770_v19 = vand.u32 4294901760, %v6978_v61 }
  0xec   : > { %1514 = vmatpush2.msra.mxu0 %v11708_v1  ;;  %1657 = vmatprep.subr.mxu1 %v11572_v29  ;;  %v227_v29 = vld [vmem:[#allocation2 + $0x210] sm:$0xff]  ;;  %v228_v1 = vld [vmem:[#allocation2 + $0x218] sm:$0xff] }
  0xed   : > { %1518 = vmatprep.subr.mxu0 %v11712_v2  ;;  %11713 = vst [vmem:[#allocation58_spill] sm:$0xff] %v6995_v47  ;;  %1659 = vmatpush2.msra.mxu1 %v11573_v56  ;;  %v7019_v56 = vsub.f32 %v6939_v25, %v10763_v8  ;;  %v11722_v2 = vld [vmem:[#allocation95_spill] sm:$0xff]  ;;  %v7051_v9 = vsub.f32 %v244_v48, %v6995_v47  ;;  %v11745_v48 = vand.u32 4294901760, %v7011_v52 }
  0xee   : > { %1522 = vmatpush2.msra.mxu0 %v11715_v10  ;;  %1661 = vmatprep.subr.mxu1 %v11574_v50  ;;  %v11723_v40 = vand.u32 4294901760, %v11722_v2  ;;  %v7032_v10 = vsub.f32 %v243_v11, %v6990_v55  ;;  %v7041_v2 = vsub.f32 %v6957_v15, %v10766_v21  ;;  %v220_v11 = vld [vmem:[#allocation2 + $0x1d8] sm:$0xff]  ;;  %v11731_v50 = vand.u32 4294901760, %v11730_v35  ;;  %v11736_v35 = vld [vmem:[#allocation74_spill] sm:$0xff] }
  0xef   : > { %1526 = vmatprep.subr.mxu0 %v11719_v63  ;;  %1663 = vmatpush2.msra.mxu1 %v11575_v39  ;;  %v11725_v63 = vld [vmem:[#allocation97_spill] sm:$0xff]  ;;  %v7046_v39 = vsub.f32 %v6954_v4, %v10767_v59  ;;  %11728 = vst [vmem:[#allocation72_spill] sm:$0xff] %v7051_v9  ;;  %v11735_v59 = vand.u32 4294901760, %v11734_v5  ;;  %v11740_v21 = vld [vmem:[#allocation76_spill] sm:$0xff] }
  0xf0   : > { %1530 = vmatpush2.msra.mxu0 %v11723_v40  ;;  %11724 = vst [vmem:[#allocation68_spill] sm:$0xff] %v7032_v10  ;;  %v11726_v8 = vand.u32 4294901760, %v11725_v63  ;;  %1665 = vmatprep.subr.mxu1 %v11576_v28  ;;  %v7048_v40 = vand.u32 4294901760, %v227_v29  ;;  %v7057_v63 = vand.u32 4294901760, %v228_v1  ;;  %v7074_v28 = vsub.f32 %v236_v18, %v7021_v45 }
  0xf1   : > { %1667 = vmatpush2.msra.mxu1 %v11577_v51  ;;  %v7071_v51 = vsub.f32 %v6972_v22, %v10769_v24  ;;  %v212_v24 = vld [vmem:[#allocation2 + $0x198] sm:$0xff]  ;;  %v11739_v18 = vand.u32 4294901760, %v6624_v33  ;;  %v7104_v33 = vsub.f32 %v7011_v52, %v11745_v48  ;;  %v195_v22 = vld [vmem:[#allocation2 + $0x110] sm:$0xff] }
  0xf2   : > { %1534 = vmatprep.subr.mxu0 %v11726_v8  ;;  %11727 = vst [vmem:[#allocation70_spill] sm:$0xff] %v7048_v40  ;;  %v11729_v8 = vand.u32 4294901760, %v6585_v38  ;;  %1669 = vmatprep.subr.mxu1 %v11578_v20  ;;  %v7066_v38 = vsub.f32 %v235_v23, %v7023_v53  ;;  %11733 = vst [vmem:[#allocation84_spill] sm:$0xff] %v7074_v28  ;;  %v7082_v20 = vsub.f32 %v6978_v61, %v10770_v19  ;;  %v11744_v61 = vld [vmem:[#allocation91_spill] sm:$0xff]  ;;  %v196_v52 = vld [vmem:[#allocation2 + $0x118] sm:$0xff] }
  0xf3   : > { %1671 = vmatpush2.msra.mxu1 %v11736_v35  ;;  %v7084_v23 = vand.u32 4294901760, %v220_v11  ;;  %v7095_v35 = vsub.f32 %v227_v29, %v7048_v40  ;;  %1556 = vmatprep.mubr.f32.mxu0 %v11744_v61  ;;  %v204_v29 = vld [vmem:[#allocation2 + $0x158] sm:$0xff]  ;;  %v7114_v19 = vsub.f32 %v228_v1, %v7057_v63  ;;  %v7119_v48 = vand.u32 4294901760, %v212_v24 }
  0xf4   : > { %1538 = vmatpush2.msra.mxu0 %v11729_v8  ;;  %11732 = vst [vmem:[#allocation82_spill] sm:$0xff] %v7066_v38  ;;  %v211_v8 = vld [vmem:[#allocation2 + $0x190] sm:$0xff]  ;;  %1673 = vmatprep.subr.mxu1 %v11740_v21  ;;  %v11746_v21 = vand.u32 4294901760, %v7003_v37 }
  0xf5   : > { %1542 = vmatprep.subr.mxu0 %v11731_v50  ;;  %11737 = vst [vmem:[#allocation86_spill] sm:$0xff] %v7084_v23  ;;  %v7086_v50 = vand.u32 4294901760, %v219_v57  ;;  %11741 = vst [vmem:[#allocation29_spill] sm:$0xff] %v7095_v35  ;;  %v7111_v5 = vand.u32 4294901760, %v211_v8  ;;  %v7135_v15 = vsub.f32 %v220_v11, %v7084_v23  ;;  %v7169_v11 = vand.u32 4294901760, %v195_v22  ;;  %1693 = vmatprep.mubr.f32.mxu1 %v11744_v61 }
  0xf6   : > { %1546 = vmatpush2.msra.mxu0 %v11735_v59  ;;  %v203_v59 = vld [vmem:[#allocation2 + $0x150] sm:$0xff]  ;;  %11748 = vst [vmem:[#allocation31_spill] sm:$0xff] %v7114_v19  ;;  %11751 = vst [vmem:[#allocation10_spill] sm:$0xff] %v7119_v48 }
  0xf7   : > { %11738 = vst [vmem:[#allocation8_spill] sm:$0xff] %v7086_v50  ;;  %1550 = vmatprep.subr.mxu0 %v11739_v18  ;;  %v7109_v18 = vsub.f32 %v7003_v37, %v11746_v21  ;;  %11747 = vst [vmem:[#allocation9_spill] sm:$0xff] %v7111_v5  ;;  %v7127_v1 = vsub.f32 %v219_v57, %v7086_v50  ;;  %v7144_v57 = vand.u32 4294901760, %v204_v29  ;;  %v7146_v21 = vand.u32 4294901760, %v203_v59 }
  0xf8   : > { %1554 = vmatpush2.msra.mxu0 %v11743_v27  ;;  %v11749_v27 = vld [vmem:[#allocation78_spill] sm:$0xff]  ;;  %11754 = vst [vmem:[#allocation11_spill] sm:$0xff] %v7135_v15  ;;  %11761 = vst [vmem:[#allocation13_spill] sm:$0xff] %v7169_v11 }
  0xf9   : > { %1675 = vmatpush2.msra.mxu1 %v11749_v27  ;;  %1558 = vmatmul.mubr.f32.vlgmr.msra.gmra.mxu0 %v11750_v44  ;;  %11752 = vst [vmem:[#allocation33_spill] sm:$0xff] %v7127_v1  ;;  %v11753_v27 = vand.u32 4294901760, %v7032_v10  ;;  %11756 = vst [vmem:[#allocation35_spill] sm:$0xff] %v7144_v57 }
  0xfa   : > { %1677 = vmatprep.subr.mxu1 %v6437_v30  ;;  %1702 = vmatprep.subr.mxu0 %v6896_v0  ;;  %v11755_v30 = vand.u32 4294901760, %v7051_v9  ;;  %11757 = vst [vmem:[#allocation12_spill] sm:$0xff] %v7146_v21 }
  0xfb   : > { %v7132_v4 = vsub.f32 %v7032_v10, %v11753_v27  ;;  %1679 = vmatpush2.msra.mxu1 %v6448_v36  ;;  %1704 = vmatpush1.msra.mxu0 %v6898_v3  ;;  %v7154_v10 = vsub.f32 %v211_v8, %v7111_v5  ;;  %v188_v8 = vld [vmem:[#allocation2 + $0xd8] sm:$0xff] }
  0xfc   : > { %v7142_v37 = vsub.f32 %v7051_v9, %v11755_v30  ;;  %1681 = vmatprep.subr.mxu1 %v11584_v26  ;;  %1706 = vmatprep.subr.mxu0 %v6906_v17  ;;  %v11759_v9 = vand.u32 4294901760, %v7074_v28  ;;  %v11760_v26 = vand.u32 4294901760, %v7066_v38  ;;  %v187_v17 = vld [vmem:[#allocation2 + $0xd0] sm:$0xff]  ;;  %v7172_v30 = vsub.f32 %v212_v24, %v7119_v48 }
  0xfd   : > { %11758 = vst [vmem:[#allocation37_spill] sm:$0xff] %v7154_v10  ;;  %1683 = vmatpush2.msra.mxu1 %v11586_v62  ;;  %1708 = vmatpush1.msra.mxu0 %v6911_v54  ;;  %v7185_v24 = vsub.f32 %v203_v59, %v7146_v21  ;;  %v179_v62 = vld [vmem:[#allocation2 + $0x90] sm:$0xff]  ;;  %v7193_v54 = vsub.f32 %v204_v29, %v7144_v57  ;;  %v7202_v59 = vand.u32 4294901760, %v188_v8 }
  0xfe   : > { %v7162_v27 = vsub.f32 %v7074_v28, %v11759_v9  ;;  %v7167_v36 = vsub.f32 %v7066_v38, %v11760_v26  ;;  %11762 = vst [vmem:[#allocation39_spill] sm:$0xff] %v7172_v30  ;;  %1685 = vmatprep.subr.mxu1 %v11588_v32  ;;  %1710 = vmatprep.subr.mxu0 %v6925_v34  ;;  %v7177_v9 = vand.u32 4294901760, %v196_v52  ;;  %v11765_v32 = vand.u32 4294901760, %v7095_v35  ;;  %v180_v28 = vld [vmem:[#allocation2 + $0x98] sm:$0xff] }
  0xff   : > { %1687 = vmatpush2.msra.mxu1 %v6507_v14  ;;  %1712 = vmatpush1.msra.mxu0 %v6927_v7  ;;  %11764 = vst [vmem:[#allocation41_spill] sm:$0xff] %v7185_v24  ;;  %11766 = vst [vmem:[#allocation15_spill] sm:$0xff] %v7193_v54  ;;  %v11767_v14 = vand.u32 4294901760, %v7114_v19  ;;  %v7204_v26 = vand.u32 4294901760, %v187_v17  ;;  %v7227_v29 = vand.u32 4294901760, %v179_v62  ;;  %v7253_v7 = vsub.f32 %v188_v8, %v7202_v59 }
 0x100   : > { %11763 = vst [vmem:[#allocation14_spill] sm:$0xff] %v7177_v9  ;;  %v7190_v34 = vsub.f32 %v7095_v35, %v11765_v32  ;;  %1689 = vmatprep.subr.mxu1 %v6520_v13  ;;  %1714 = vmatprep.subr.mxu0 %v6941_v31  ;;  %11768 = vst [vmem:[#allocation43_spill] sm:$0xff] %v7202_v59  ;;  %v7212_v35 = vsub.f32 %v195_v22, %v7169_v11  ;;  %v11771_v31 = vand.u32 4294901760, %v7135_v15  ;;  %v172_v22 = vld [vmem:[#allocation2 + $0x58] sm:$0xff] }
 0x101   : > { %v7200_v38 = vsub.f32 %v7114_v19, %v11767_v14  ;;  %11769 = vst [vmem:[#allocation16_spill] sm:$0xff] %v7204_v26  ;;  %1691 = vmatpush2.msra.mxu1 %v6536_v46  ;;  %1716 = vmatpush1.msra.mxu0 %v6946_v49  ;;  %v11772_v46 = vand.u32 4294901760, %v7127_v1  ;;  %11773 = vst [vmem:[#allocation17_spill] sm:$0xff] %v7227_v29  ;;  %v171_v19 = vld [vmem:[#allocation2 + $0x50] sm:$0xff]  ;;  %v7230_v14 = vsub.f32 %v196_v52, %v7177_v9 }
 0x102   : > { %11770 = vst [vmem:[#allocation45_spill] sm:$0xff] %v7212_v35  ;;  %1695 = vmatmul.mubr.f32.vlgmr.msra.gmra.mxu1 %v11750_v44  ;;  %v7220_v32 = vsub.f32 %v7135_v15, %v11771_v31  ;;  %1718 = vmatprep.subr.mxu0 %v6962_v60  ;;  %v11775_v49 = vand.u32 4294901760, %v6983_v41  ;;  %v7236_v15 = vand.u32 4294901760, %v180_v28  ;;  %v7245_v60 = vsub.f32 %v187_v17, %v7204_v26  ;;  %v163_v31 = vld [vmem:[#allocation2 + $0x10] sm:$0xff] }
 0x103   : > { %v7225_v13 = vsub.f32 %v7127_v1, %v11772_v46  ;;  %11774 = vst [vmem:[#allocation47_spill] sm:$0xff] %v7230_v14  ;;  %1720 = vmatpush1.msra.mxu0 %v6964_v42  ;;  %v11777_v1 = vand.u32 4294901760, %v6988_v43  ;;  %11780 = vst [vmem:[#allocation19_spill] sm:$0xff] %v7253_v7  ;;  %v11781_v46 = vand.u32 4294901760, %v7008_v16  ;;  %v11782_v43 = vand.u32 4294901760, %v7172_v30  ;;  %v411_v16 = vld [vmem:[#allocation2 + $0x7d0] sm:$0xff]  ;;  %2231 = vmatprep.mubr.f32.mxu1 %v11744_v61 }
 0x104   : > { %1851 = vmatprep.subr.mxu1 %v11775_v49  ;;  %11776 = vst [vmem:[#allocation18_spill] sm:$0xff] %v7236_v15  ;;  %11778 = vst [vmem:[#allocation49_spill] sm:$0xff] %v7245_v60  ;;  %v11779_v49 = vand.u32 4294901760, %v7154_v10  ;;  %1722 = vmatprep.subr.mxu0 %v6995_v47  ;;  %v7263_v17 = vand.u32 4294901760, %v172_v22  ;;  %v7265_v52 = vand.u32 4294901760, %v171_v19  ;;  %v11785_v8 = vand.u32 4294901760, %v7019_v56 }
 0x105   : > { %1857 = vmatpush1.msra.mxu1 %v11777_v1  ;;  %v7261_v1 = vsub.f32 %v7172_v30, %v11782_v43  ;;  %1724 = vmatpush1.msra.mxu0 %v6990_v55  ;;  %v7274_v47 = vsub.f32 %v179_v62, %v7227_v29  ;;  %v11787_v30 = vand.u32 4294901760, %v7041_v2  ;;  %v11789_v56 = vand.u32 4294901760, %v7185_v24  ;;  %v412_v62 = vld [vmem:[#allocation2 + $0x7d8] sm:$0xff]  ;;  %v11932_v61 = vld [vmem:[#allocation27_spill] sm:$0xff] }
 0x106   : > { %v7250_v41 = vsub.f32 %v7154_v10, %v11779_v49  ;;  %1863 = vmatprep.subr.mxu1 %v11781_v46  ;;  %11783 = vst [vmem:[#allocation51_spill] sm:$0xff] %v7263_v17  ;;  %11784 = vst [vmem:[#allocation20_spill] sm:$0xff] %v7265_v52  ;;  %v164_v49 = vld [vmem:[#allocation2 + $0x18] sm:$0xff]  ;;  %1726 = vmatprep.subr.mxu0 %v7021_v45  ;;  %v11788_v10 = vand.u32 4294901760, %v7193_v54  ;;  %v7290_v46 = vand.u32 4294901760, %v163_v31  ;;  %v11792_v2 = vand.u32 4294901760, %v7046_v39 }
 0x107   : > { %1869 = vmatpush1.msra.mxu1 %v11785_v8  ;;  %11786 = vst [vmem:[#allocation53_spill] sm:$0xff] %v7274_v47  ;;  %v7288_v8 = vsub.f32 %v7185_v24, %v11789_v56  ;;  %v7293_v43 = vsub.f32 %v180_v28, %v7236_v15  ;;  %1728 = vmatpush1.msra.mxu0 %v7023_v53  ;;  %v11794_v24 = vand.u32 4294901760, %v7071_v51  ;;  %v11796_v39 = vand.u32 4294901760, %v7212_v35 }
 0x108   : > { %1875 = vmatprep.subr.mxu1 %v11787_v30  ;;  %v7283_v55 = vsub.f32 %v7193_v54, %v11788_v10  ;;  %11790 = vst [vmem:[#allocation21_spill] sm:$0xff] %v7290_v46  ;;  %v7299_v30 = vand.u32 4294901760, %v164_v49  ;;  %1730 = vmatprep.subr.mxu0 %v7057_v63  ;;  %v7308_v53 = vsub.f32 %v171_v19, %v7265_v52  ;;  %v404_v10 = vld [vmem:[#allocation2 + $0x798] sm:$0xff]  ;;  %v403_v54 = vld [vmem:[#allocation2 + $0x790] sm:$0xff]  ;;  %v11798_v51 = vand.u32 4294901760, %v7082_v20 }
 0x109   : > { %11791 = vst [vmem:[#allocation55_spill] sm:$0xff] %v7293_v43  ;;  %1881 = vmatpush1.msra.mxu1 %v11792_v2  ;;  %v7313_v2 = vsub.f32 %v7212_v35, %v11796_v39  ;;  %v7316_v45 = vsub.f32 %v172_v22, %v7263_v17  ;;  %1732 = vmatpush1.msra.mxu0 %v7048_v40  ;;  %v7326_v28 = vand.u32 4294901760, %v412_v62  ;;  %v7328_v56 = vand.u32 4294901760, %v411_v16  ;;  %v396_v40 = vld [vmem:[#allocation2 + $0x758] sm:$0xff] }
 0x10a   : > { %11793 = vst [vmem:[#allocation22_spill] sm:$0xff] %v7299_v30  ;;  %1887 = vmatprep.subr.mxu1 %v11794_v24  ;;  %11795 = vst [vmem:[#allocation57_spill] sm:$0xff] %v7308_v53  ;;  %v11799_v24 = vand.u32 4294901760, %v7230_v14  ;;  %1734 = vmatprep.subr.mxu0 %v7084_v23  ;;  %v11802_v22 = vand.u32 4294901760, %v7104_v33  ;;  %v11804_v35 = vand.u32 4294901760, %v7109_v18  ;;  %v11805_v39 = vand.u32 4294901760, %v7253_v7 }
 0x10b   : > { %11797 = vst [vmem:[#allocation24_spill] sm:$0xff] %v7316_v45  ;;  %1893 = vmatpush1.msra.mxu1 %v11798_v51  ;;  %11800 = vst [vmem:[#allocation59_spill] sm:$0xff] %v7326_v28  ;;  %v7337_v51 = vsub.f32 %v163_v31, %v7290_v46  ;;  %1736 = vmatpush1.msra.mxu0 %v7086_v50  ;;  %v11806_v33 = vand.u32 4294901760, %v7245_v60  ;;  %v7353_v20 = vand.u32 4294901760, %v404_v10  ;;  %v7355_v31 = vand.u32 4294901760, %v403_v54  ;;  %v388_v50 = vld [vmem:[#allocation2 + $0x718] sm:$0xff] }
 0x10c   : > { %v7324_v19 = vsub.f32 %v7230_v14, %v11799_v24  ;;  %11801 = vst [vmem:[#allocation26_spill] sm:$0xff] %v7328_v56  ;;  %1899 = vmatprep.subr.mxu1 %v11802_v22  ;;  %v7346_v23 = vsub.f32 %v7253_v7, %v11805_v39  ;;  %v395_v24 = vld [vmem:[#allocation2 + $0x750] sm:$0xff]  ;;  %1738 = vmatprep.subr.mxu0 %v7119_v48  ;;  %v11811_v7 = vand.u32 4294901760, %v7132_v4  ;;  %v11815_v39 = vand.u32 4294901760, %v7162_v27 }
 0x10d   : > { %11803 = vst [vmem:[#allocation61_spill] sm:$0xff] %v7337_v51  ;;  %1905 = vmatpush1.msra.mxu1 %v11804_v35  ;;  %v7351_v22 = vsub.f32 %v7245_v60, %v11806_v33  ;;  %11807 = vst [vmem:[#allocation28_spill] sm:$0xff] %v7353_v20  ;;  %v11809_v35 = vand.u32 4294901760, %v7142_v37  ;;  %v7364_v33 = vsub.f32 %v164_v49, %v7299_v30  ;;  %v387_v60 = vld [vmem:[#allocation2 + $0x710] sm:$0xff]  ;;  %1740 = vmatpush1.msra.mxu0 %v7111_v5 }
 0x10e   : > { %11808 = vst [vmem:[#allocation63_spill] sm:$0xff] %v7355_v31  ;;  %v7371_v37 = vsub.f32 %v411_v16, %v7328_v56  ;;  %v7379_v49 = vsub.f32 %v412_v62, %v7326_v28  ;;  %1742 = vmatprep.subr.mxu0 %v7144_v57  ;;  %v7389_v16 = vand.u32 4294901760, %v396_v40  ;;  %v7391_v48 = vand.u32 4294901760, %v395_v24  ;;  %v380_v57 = vld [vmem:[#allocation2 + $0x6d8] sm:$0xff] }
 0x10f   : > { %1911 = vmatprep.subr.mxu1 %v11809_v35  ;;  %11810 = vst [vmem:[#allocation30_spill] sm:$0xff] %v7364_v33  ;;  %v11813_v35 = vand.u32 4294901760, %v7274_v47  ;;  %1744 = vmatpush1.msra.mxu0 %v7146_v21  ;;  %v11819_v62 = vand.u32 4294901760, %v7167_v36  ;;  %v11822_v5 = vand.u32 4294901760, %v7200_v38  ;;  %v11824_v36 = vand.u32 4294901760, %v7308_v53 }
 0x110   : > { %1917 = vmatpush1.msra.mxu1 %v11811_v7  ;;  %11812 = vst [vmem:[#allocation65_spill] sm:$0xff] %v7371_v37  ;;  %11814 = vst [vmem:[#allocation32_spill] sm:$0xff] %v7379_v49  ;;  %v11816_v7 = vand.u32 4294901760, %v7293_v43  ;;  %1746 = vmatprep.subr.mxu0 %v7177_v9  ;;  %v7417_v27 = vand.u32 4294901760, %v388_v50  ;;  %v11826_v38 = vand.u32 4294901760, %v7190_v34  ;;  %v7434_v34 = vsub.f32 %v395_v24, %v7391_v48  ;;  %v372_v9 = vld [vmem:[#allocation2 + $0x698] sm:$0xff] }
 0x111   : > { %v7376_v18 = vsub.f32 %v7274_v47, %v11813_v35  ;;  %1923 = vmatprep.subr.mxu1 %v11815_v39  ;;  %11817 = vst [vmem:[#allocation67_spill] sm:$0xff] %v7389_v16  ;;  %11818 = vst [vmem:[#allocation34_spill] sm:$0xff] %v7391_v48  ;;  %v7400_v39 = vsub.f32 %v403_v54, %v7355_v31  ;;  %v11823_v35 = vand.u32 4294901760, %v7316_v45  ;;  %v379_v47 = vld [vmem:[#allocation2 + $0x6d0] sm:$0xff]  ;;  %1748 = vmatpush1.msra.mxu0 %v7169_v11 }
 0x112   : > { %v7387_v4 = vsub.f32 %v7293_v43, %v11816_v7  ;;  %1929 = vmatpush1.msra.mxu1 %v11819_v62  ;;  %v7402_v7 = vand.u32 4294901760, %v387_v60  ;;  %v7415_v62 = vsub.f32 %v7308_v53, %v11824_v36  ;;  %11825 = vst [vmem:[#allocation71_spill] sm:$0xff] %v7417_v27  ;;  %v7427_v36 = vsub.f32 %v404_v10, %v7353_v20  ;;  %v371_v53 = vld [vmem:[#allocation2 + $0x690] sm:$0xff] }
 0x113   : > { %11820 = vst [vmem:[#allocation69_spill] sm:$0xff] %v7400_v39  ;;  %1935 = vmatprep.subr.mxu1 %v11822_v5  ;;  %v7410_v21 = vsub.f32 %v7316_v45, %v11823_v35  ;;  %1750 = vmatprep.subr.mxu0 %v7202_v59  ;;  %v11828_v54 = vand.u32 4294901760, %v7220_v32  ;;  %11829 = vst [vmem:[#allocation73_spill] sm:$0xff] %v7434_v34  ;;  %v7442_v10 = vsub.f32 %v396_v40, %v7389_v16  ;;  %v363_v59 = vld [vmem:[#allocation2 + $0x650] sm:$0xff] }
 0x114   : > { %11821 = vst [vmem:[#allocation36_spill] sm:$0xff] %v7402_v7  ;;  %1941 = vmatpush1.msra.mxu1 %v11826_v38  ;;  %11827 = vst [vmem:[#allocation38_spill] sm:$0xff] %v7427_v36  ;;  %v11830_v38 = vand.u32 4294901760, %v7337_v51  ;;  %1752 = vmatpush1.msra.mxu0 %v7204_v26  ;;  %v11832_v35 = vand.u32 4294901760, %v7225_v13  ;;  %v7448_v32 = vsub.f32 %v387_v60, %v7402_v7  ;;  %v7452_v24 = vand.u32 4294901760, %v379_v47 }
 0x115   : > { %1947 = vmatprep.subr.mxu1 %v11828_v54  ;;  %11831 = vst [vmem:[#allocation40_spill] sm:$0xff] %v7442_v10  ;;  %v7450_v54 = vand.u32 4294901760, %v380_v57  ;;  %1754 = vmatprep.subr.mxu0 %v7236_v15  ;;  %v11837_v13 = vand.u32 4294901760, %v7364_v33  ;;  %v11839_v11 = vand.u32 4294901760, %v7250_v41  ;;  %v11841_v26 = vand.u32 4294901760, %v7371_v37 }
 0x116   : > { %v7439_v5 = vsub.f32 %v7337_v51, %v11830_v38  ;;  %1953 = vmatpush1.msra.mxu1 %v11832_v35  ;;  %11833 = vst [vmem:[#allocation75_spill] sm:$0xff] %v7448_v32  ;;  %11835 = vst [vmem:[#allocation44_spill] sm:$0xff] %v7452_v24  ;;  %v11836_v38 = vand.u32 4294901760, %v7261_v1  ;;  %v7465_v35 = vand.u32 4294901760, %v371_v53  ;;  %1756 = vmatpush1.msra.mxu0 %v7227_v29  ;;  %v11840_v1 = vand.u32 4294901760, %v7379_v49  ;;  %v364_v51 = vld [vmem:[#allocation2 + $0x658] sm:$0xff] }
 0x117   : > { %11834 = vst [vmem:[#allocation77_spill] sm:$0xff] %v7450_v54  ;;  %v7463_v60 = vsub.f32 %v7364_v33, %v11837_v13  ;;  %v7478_v40 = vsub.f32 %v7371_v37, %v11841_v26  ;;  %v7480_v13 = vand.u32 4294901760, %v372_v9  ;;  %1758 = vmatprep.subr.mxu0 %v7263_v17  ;;  %v11843_v41 = vand.u32 4294901760, %v7283_v55  ;;  %v355_v26 = vld [vmem:[#allocation2 + $0x610] sm:$0xff]  ;;  %v356_v29 = vld [vmem:[#allocation2 + $0x618] sm:$0xff] }
 0x118   : > { %1959 = vmatprep.subr.mxu1 %v11836_v38  ;;  %11838 = vst [vmem:[#allocation79_spill] sm:$0xff] %v7465_v35  ;;  %v7473_v38 = vsub.f32 %v7379_v49, %v11840_v1  ;;  %v7490_v49 = vsub.f32 %v388_v50, %v7417_v27  ;;  %1760 = vmatpush1.msra.mxu0 %v7265_v52  ;;  %v11845_v15 = vand.u32 4294901760, %v7288_v8  ;;  %v11847_v55 = vand.u32 4294901760, %v7400_v39 }
 0x119   : > { %1965 = vmatpush1.msra.mxu1 %v11839_v11  ;;  %11842 = vst [vmem:[#allocation80_spill] sm:$0xff] %v7480_v13  ;;  %v7496_v17 = vsub.f32 %v379_v47, %v7452_v24  ;;  %v7503_v11 = vand.u32 4294901760, %v363_v59  ;;  %v7506_v50 = vsub.f32 %v380_v57, %v7450_v54  ;;  %1762 = vmatprep.subr.mxu0 %v7299_v30  ;;  %v11850_v1 = vand.u32 4294901760, %v7324_v19 }
 0x11a   : > { %1971 = vmatprep.subr.mxu1 %v11843_v41  ;;  %11844 = vst [vmem:[#allocation81_spill] sm:$0xff] %v7490_v49  ;;  %v7501_v41 = vsub.f32 %v7400_v39, %v11847_v55  ;;  %v7513_v47 = vsub.f32 %v371_v53, %v7465_v35  ;;  %v7515_v8 = vand.u32 4294901760, %v364_v51  ;;  %1764 = vmatpush1.msra.mxu0 %v7290_v46  ;;  %v11853_v52 = vand.u32 4294901760, %v7313_v2  ;;  %v348_v39 = vld [vmem:[#allocation2 + $0x5d8] sm:$0xff] }
 0x11b   : > { %1977 = vmatpush1.msra.mxu1 %v11845_v15  ;;  %11846 = vst [vmem:[#allocation83_spill] sm:$0xff] %v7496_v17  ;;  %11848 = vst [vmem:[#allocation85_spill] sm:$0xff] %v7503_v11  ;;  %v2030_v15 = vand.u32 4294901760, %v7463_v60  ;;  %v2042_v57 = vand.u32 4294901760, %v7473_v38  ;;  %v11854_v19 = vand.u32 4294901760, %v7427_v36  ;;  %v7528_v53 = vand.u32 4294901760, %v355_v26  ;;  %1766 = vmatprep.subr.mxu0 %v7326_v28 }
 0x11c   : > { %11849 = vst [vmem:[#allocation87_spill] sm:$0xff] %v7506_v50  ;;  %1983 = vmatprep.subr.mxu1 %v11850_v1  ;;  %11851 = vst [vmem:[#allocation88_spill] sm:$0xff] %v7513_v47  ;;  %v347_v1 = vld [vmem:[#allocation2 + $0x5d0] sm:$0xff]  ;;  %v11856_v55 = vand.u32 4294901760, %v7346_v23  ;;  %v11857_v2 = vand.u32 4294901760, %v7442_v10  ;;  %v11858_v38 = vand.u32 4294901760, %v7434_v34  ;;  %1768 = vmatpush2.msra.mxu0 %v7328_v56  ;;  %v7569_v28 = vsub.f32 %v364_v51, %v7515_v8 }
 0x11d   : > { %11852 = vst [vmem:[#allocation89_spill] sm:$0xff] %v7515_v8  ;;  %1989 = vmatpush1.msra.mxu1 %v11853_v52  ;;  %v7526_v60 = vsub.f32 %v7427_v36, %v11854_v19  ;;  %11855 = vst [vmem:[#allocation90_spill] sm:$0xff] %v7528_v53  ;;  %v7543_v19 = vand.u32 4294901760, %v356_v29  ;;  %v11860_v23 = vand.u32 4294901760, %v7351_v22  ;;  %1770 = vmatprep.subr.mxu0 %v7353_v20  ;;  %v11863_v46 = vand.u32 4294901760, %v7387_v4 }
 0x11e   : > { %1995 = vmatprep.subr.mxu1 %v11856_v55  ;;  %v7536_v52 = vsub.f32 %v7442_v10, %v11857_v2  ;;  %v7541_v30 = vsub.f32 %v7434_v34, %v11858_v38  ;;  %v7551_v2 = vsub.f32 %v363_v59, %v7503_v11  ;;  %v7555_v38 = vsub.f32 %v372_v9, %v7480_v13  ;;  %v339_v34 = vld [vmem:[#allocation2 + $0x590] sm:$0xff]  ;;  %v340_v55 = vld [vmem:[#allocation2 + $0x598] sm:$0xff] }
 0x11f   : > { %11859 = vst [vmem:[#allocation92_spill] sm:$0xff] %v7543_v19  ;;  %2001 = vmatpush1.msra.mxu1 %v11860_v23  ;;  %v11864_v56 = vand.u32 4294901760, %v7448_v32  ;;  %v7565_v23 = vand.u32 4294901760, %v347_v1  ;;  %11866 = vst [vmem:[#allocation101_spill] sm:$0xff] %v7569_v28  ;;  %1772 = vmatpush2.msra.mxu0 %v7355_v31  ;;  %v11867_v9 = vand.u32 4294901760, %v7376_v18  ;;  %v7576_v4 = vsub.f32 %v355_v26, %v7528_v53 }
 0x120   : > { %11861 = vst [vmem:[#allocation95_spill] sm:$0xff] %v7551_v2  ;;  %11862 = vst [vmem:[#allocation97_spill] sm:$0xff] %v7555_v38  ;;  %2007 = vmatprep.subr.mxu1 %v11863_v46  ;;  %v2054_v46 = vand.u32 4294901760, %v7526_v60  ;;  %1774 = vmatprep.subr.mxu0 %v7389_v16  ;;  %v11870_v59 = vand.u32 4294901760, %v7410_v21  ;;  %v2066_v51 = vand.u32 4294901760, %v7536_v52  ;;  %v2072_v31 = vand.u32 4294901760, %v7541_v30 }
 0x121   : > { %v7563_v22 = vsub.f32 %v7448_v32, %v11864_v56  ;;  %11865 = vst [vmem:[#allocation100_spill] sm:$0xff] %v7565_v23  ;;  %2013 = vmatpush1.msra.mxu1 %v11867_v9  ;;  %11868 = vst [vmem:[#allocation74_spill] sm:$0xff] %v7576_v4  ;;  %v7578_v56 = vand.u32 4294901760, %v348_v39  ;;  %v11871_v18 = vand.u32 4294901760, %v7490_v49  ;;  %v7591_v26 = vand.u32 4294901760, %v339_v34  ;;  %v331_v9 = vld [vmem:[#allocation2 + $0x550] sm:$0xff]  ;;  %1776 = vmatpush2.msra.mxu0 %v7391_v48 }
 0x122   : > { %2019 = vmatprep.subr.mxu1 %v11870_v59  ;;  %v11873_v20 = vand.u32 4294901760, %v7415_v62  ;;  %v11874_v21 = vand.u32 4294901760, %v7506_v50  ;;  %v7601_v52 = vand.u32 4294901760, %v340_v55  ;;  %v332_v16 = vld [vmem:[#allocation2 + $0x558] sm:$0xff]  ;;  %1778 = vmatprep.subr.mxu0 %v7417_v27  ;;  %v11878_v62 = vand.u32 4294901760, %v7496_v17  ;;  %v323_v30 = vld [vmem:[#allocation2 + $0x510] sm:$0xff] }
 0x123   : > { %11869 = vst [vmem:[#allocation76_spill] sm:$0xff] %v7578_v56  ;;  %v7589_v60 = vsub.f32 %v7490_v49, %v11871_v18  ;;  %11872 = vst [vmem:[#allocation104_spill] sm:$0xff] %v7591_v26  ;;  %v7605_v18 = vsub.f32 %v356_v29, %v7543_v19  ;;  %v2084_v48 = vand.u32 4294901760, %v7563_v22  ;;  %1780 = vmatpush2.msra.mxu0 %v7402_v7  ;;  %v11879_v29 = vand.u32 4294901760, %v7439_v5  ;;  %v324_v32 = vld [vmem:[#allocation2 + $0x518] sm:$0xff] }
 0x124   : > { %2025 = vmatpush1.msra.mxu1 %v11873_v20  ;;  %v7599_v59 = vsub.f32 %v7506_v50, %v11874_v21  ;;  %11875 = vst [vmem:[#allocation78_spill] sm:$0xff] %v7601_v52  ;;  %v7610_v20 = vsub.f32 %v347_v1, %v7565_v23  ;;  %v7615_v21 = vsub.f32 %v7496_v17, %v11878_v62  ;;  %v7626_v1 = vand.u32 4294901760, %v331_v9  ;;  %v316_v7 = vld [vmem:[#allocation2 + $0x4d8] sm:$0xff] }
 0x125   : > { %11876 = vst [vmem:[#allocation105_spill] sm:$0xff] %v7605_v18  ;;  %2031 = vmatprep.subr.mxu1 %v2030_v15  ;;  %v11880_v15 = vand.u32 4294901760, %v7513_v47  ;;  %1782 = vmatprep.subr.mxu0 %v7450_v54  ;;  %v2078_v50 = vand.u32 4294901760, %v7589_v60  ;;  %v7633_v5 = vsub.f32 %v339_v34, %v7591_v26  ;;  %v11885_v27 = vand.u32 4294901760, %v7478_v40 }
 0x126   : > { %11877 = vst [vmem:[#allocation106_spill] sm:$0xff] %v7610_v20  ;;  %2037 = vmatpush1.msra.mxu1 %v11879_v29  ;;  %11881 = vst [vmem:[#allocation107_spill] sm:$0xff] %v7626_v1  ;;  %v7635_v29 = vand.u32 4294901760, %v332_v16  ;;  %1784 = vmatpush2.msra.mxu0 %v7452_v24  ;;  %v2090_v62 = vand.u32 4294901760, %v7599_v59  ;;  %v11886_v54 = vand.u32 4294901760, %v7555_v38  ;;  %v7648_v34 = vand.u32 4294901760, %v323_v30 }
 0x127   : > { %v7624_v22 = vsub.f32 %v7513_v47, %v11880_v15  ;;  %2043 = vmatprep.subr.mxu1 %v2042_v57  ;;  %11882 = vst [vmem:[#allocation108_spill] sm:$0xff] %v7633_v5  ;;  %v7638_v15 = vsub.f32 %v348_v39, %v7578_v56  ;;  %v315_v47 = vld [vmem:[#allocation2 + $0x4d0] sm:$0xff]  ;;  %1786 = vmatprep.subr.mxu0 %v7480_v13  ;;  %v2096_v39 = vand.u32 4294901760, %v7615_v21  ;;  %v11887_v40 = vand.u32 4294901760, %v7569_v28 }
 0x128   : > { %11883 = vst [vmem:[#allocation109_spill] sm:$0xff] %v7635_v29  ;;  %2049 = vmatpush2.msra.mxu1 %v11885_v27  ;;  %v2101_v57 = vsub.f32 %v7555_v38, %v11886_v54  ;;  %v7657_v59 = vand.u32 4294901760, %v324_v32  ;;  %v7660_v54 = vsub.f32 %v340_v55, %v7601_v52  ;;  %1788 = vmatpush2.msra.mxu0 %v7465_v35  ;;  %v11889_v60 = vand.u32 4294901760, %v7501_v41 }
 0x129   : > { %11884 = vst [vmem:[#allocation110_spill] sm:$0xff] %v7638_v15  ;;  %2055 = vmatprep.subr.mxu1 %v2054_v46  ;;  %v7655_v27 = vsub.f32 %v7569_v28, %v11887_v40  ;;  %v2108_v13 = vand.u32 4294901760, %v7624_v22  ;;  %v7667_v46 = vsub.f32 %v331_v9, %v7626_v1  ;;  %v11891_v21 = vand.u32 4294901760, %v7551_v2  ;;  %v307_v28 = vld [vmem:[#allocation2 + $0x490] sm:$0xff]  ;;  %1790 = vmatprep.subr.mxu0 %v7515_v8 }
 0x12a   : > { %11888 = vst [vmem:[#allocation111_spill] sm:$0xff] %v7660_v54  ;;  %2061 = vmatpush2.msra.mxu1 %v11889_v60  ;;  %v11892_v24 = vand.u32 4294901760, %v7576_v4  ;;  %v7680_v41 = vand.u32 4294901760, %v316_v7  ;;  %v7683_v9 = vand.u32 4294901760, %v315_v47  ;;  %v308_v60 = vld [vmem:[#allocation2 + $0x498] sm:$0xff]  ;;  %v7686_v35 = vsub.f32 %v332_v16, %v7635_v29  ;;  %1792 = vmatpush2.msra.mxu0 %v7503_v11 }
 0x12b   : > { %11890 = vst [vmem:[#allocation112_spill] sm:$0xff] %v7667_v46  ;;  %v7672_v40 = vsub.f32 %v7551_v2, %v11891_v21  ;;  %2067 = vmatprep.subr.mxu1 %v2066_v51  ;;  %v2102_v21 = vand.u32 4294901760, %v2101_v57  ;;  %v7693_v51 = vsub.f32 %v323_v30, %v7648_v34  ;;  %1794 = vmatprep.subr.mxu0 %v7543_v19  ;;  %v2114_v22 = vand.u32 4294901760, %v7655_v27  ;;  %v299_v27 = vld [vmem:[#allocation2 + $0x450] sm:$0xff] }
 0x12c   : > { %v7677_v55 = vsub.f32 %v7576_v4, %v11892_v24  ;;  %11893 = vst [vmem:[#allocation113_spill] sm:$0xff] %v7686_v35  ;;  %2073 = vmatpush2.msra.mxu1 %v2072_v31  ;;  %v11894_v24 = vand.u32 4294901760, %v7605_v18  ;;  %v7699_v2 = vand.u32 4294901760, %v307_v28  ;;  %v300_v31 = vld [vmem:[#allocation2 + $0x458] sm:$0xff]  ;;  %v7702_v57 = vsub.f32 %v324_v32, %v7657_v59  ;;  %1796 = vmatpush2.msra.mxu0 %v7528_v53 }
 0x12d   : > { %11895 = vst [vmem:[#allocation114_spill] sm:$0xff] %v7693_v51  ;;  %2079 = vmatprep.subr.mxu1 %v2078_v50  ;;  %v2120_v30 = vand.u32 4294901760, %v7672_v40  ;;  %v7707_v8 = vand.u32 4294901760, %v308_v60  ;;  %1798 = vmatprep.subr.mxu0 %v7578_v56  ;;  %v11897_v16 = vand.u32 4294901760, %v7638_v15  ;;  %v7715_v19 = vsub.f32 %v315_v47, %v7683_v9  ;;  %v292_v40 = vld [vmem:[#allocation2 + $0x418] sm:$0xff]  ;;  %v291_v47 = vld [vmem:[#allocation2 + $0x410] sm:$0xff] }
 0x12e   : > { %v2125_v4 = vsub.f32 %v7605_v18, %v11894_v24  ;;  %11896 = vst [vmem:[#allocation115_spill] sm:$0xff] %v7702_v57  ;;  %2085 = vmatpush2.msra.mxu1 %v2084_v48  ;;  %v2132_v24 = vand.u32 4294901760, %v7677_v55  ;;  %v7719_v55 = vsub.f32 %v316_v7, %v7680_v41  ;;  %1800 = vmatpush2.msra.mxu0 %v7565_v23  ;;  %v11898_v56 = vand.u32 4294901760, %v7610_v20 }
 0x12f   : > { %2091 = vmatprep.subr.mxu1 %v2090_v62  ;;  %v2137_v32 = vsub.f32 %v7638_v15, %v11897_v16  ;;  %v7725_v53 = vand.u32 4294901760, %v300_v31  ;;  %1802 = vmatprep.subr.mxu0 %v7601_v52  ;;  %v11899_v48 = vand.u32 4294901760, %v7660_v54  ;;  %v7733_v23 = vsub.f32 %v307_v28, %v7699_v2 }
 0x130   : > { %2097 = vmatpush2.msra.mxu1 %v2096_v39  ;;  %v2126_v50 = vand.u32 4294901760, %v2125_v4  ;;  %v2143_v62 = vsub.f32 %v7610_v20, %v11898_v56  ;;  %v7735_v4 = vand.u32 4294901760, %v299_v27  ;;  %1804 = vmatpush2.msra.mxu0 %v7591_v26  ;;  %v11901_v56 = vand.u32 4294901760, %v7633_v5 }
 0x131   : > { %2103 = vmatprep.subr.mxu1 %v2102_v21  ;;  %v2149_v7 = vsub.f32 %v7660_v54, %v11899_v48  ;;  %11900 = vst [vmem:[#allocation116_spill] sm:$0xff] %v7733_v23  ;;  %v7742_v52 = vand.u32 4294901760, %v292_v40  ;;  %v7746_v48 = vsub.f32 %v308_v60, %v7707_v8  ;;  %1806 = vmatprep.subr.mxu0 %v7635_v29  ;;  %v2138_v28 = vand.u32 4294901760, %v2137_v32 }
 0x132   : > { %2109 = vmatpush2.msra.mxu1 %v2108_v13  ;;  %v2155_v16 = vsub.f32 %v7633_v5, %v11901_v56  ;;  %v11903_v39 = vand.u32 4294901760, %v7686_v35  ;;  %v7752_v13 = vand.u32 4294901760, %v291_v47  ;;  %1808 = vmatpush2.msra.mxu0 %v7626_v1  ;;  %v2144_v56 = vand.u32 4294901760, %v2143_v62 }
 0x133   : > { %11902 = vst [vmem:[#allocation117_spill] sm:$0xff] %v7746_v48  ;;  %2115 = vmatprep.subr.mxu1 %v2114_v22  ;;  %v11904_v21 = vand.u32 4294901760, %v7667_v46  ;;  %v7760_v29 = vsub.f32 %v300_v31, %v7725_v53  ;;  %1810 = vmatprep.subr.mxu0 %v7657_v59  ;;  %v2150_v22 = vand.u32 4294901760, %v2149_v7  ;;  %v7764_v32 = vsub.f32 %v299_v27, %v7735_v4 }
 0x134   : > { %v2161_v26 = vsub.f32 %v7686_v35, %v11903_v39  ;;  %2121 = vmatpush2.msra.mxu1 %v2120_v30  ;;  %v11905_v39 = vand.u32 4294901760, %v7702_v57  ;;  %1812 = vmatpush2.msra.mxu0 %v7648_v34  ;;  %v2156_v62 = vand.u32 4294901760, %v2155_v16  ;;  %v11906_v31 = vand.u32 4294901760, %v7693_v51 }
 0x135   : > { %v2167_v60 = vsub.f32 %v7667_v46, %v11904_v21  ;;  %2127 = vmatprep.subr.mxu1 %v2126_v50  ;;  %v7776_v7 = vsub.f32 %v292_v40, %v7742_v52  ;;  %1814 = vmatprep.subr.mxu0 %v7680_v41  ;;  %v11908_v30 = vand.u32 4294901760, %v7719_v55  ;;  %v10935_v40 = vand.u32 4294901760, %v7760_v29 }
 0x136   : > { %v2173_v11 = vsub.f32 %v7702_v57, %v11905_v39  ;;  %2133 = vmatpush2.msra.mxu1 %v2132_v24  ;;  %v2179_v21 = vsub.f32 %v7693_v51, %v11906_v31  ;;  %v2162_v27 = vand.u32 4294901760, %v2161_v26  ;;  %v7780_v39 = vsub.f32 %v291_v47, %v7752_v13  ;;  %1816 = vmatpush2.msra.mxu0 %v7683_v9 }
 0x137   : > { %2139 = vmatprep.subr.mxu1 %v2138_v28  ;;  %v2185_v24 = vsub.f32 %v7719_v55, %v11908_v30  ;;  %v2168_v31 = vand.u32 4294901760, %v2167_v60  ;;  %1818 = vmatprep.subr.mxu0 %v7707_v8  ;;  %v11909_v26 = vand.u32 4294901760, %v7715_v19  ;;  %v11910_v16 = vand.u32 4294901760, %v7746_v48 }
 0x138   : > { %11907 = vst [vmem:[#allocation118_spill] sm:$0xff] %v7780_v39  ;;  %2145 = vmatpush2.msra.mxu1 %v2144_v56  ;;  %v2174_v28 = vand.u32 4294901760, %v2173_v11  ;;  %1820 = vmatpush2.msra.mxu0 %v7699_v2  ;;  %v2180_v30 = vand.u32 4294901760, %v2179_v21  ;;  %v10937_v60 = vand.u32 4294901760, %v7776_v7  ;;  %v10936_v50 = vand.u32 4294901760, %v7780_v39 }
 0x139   : > { %2151 = vmatprep.subr.mxu1 %v2150_v22  ;;  %v2191_v47 = vsub.f32 %v7715_v19, %v11909_v26  ;;  %v2197_v56 = vsub.f32 %v7746_v48, %v11910_v16  ;;  %1822 = vmatprep.subr.mxu0 %v7725_v53  ;;  %v2186_v11 = vand.u32 4294901760, %v2185_v24  ;;  %v11911_v22 = vand.u32 4294901760, %v7733_v23 }
 0x13a   : > { %2157 = vmatpush2.msra.mxu1 %v2156_v62  ;;  %1824 = vmatpush2.msra.mxu0 %v7735_v4  ;;  %v2209_v62 = vsub.f32 %v7760_v29, %v10935_v40 }
 0x13b   : > { %2163 = vmatprep.subr.mxu1 %v2162_v27  ;;  %v2203_v26 = vsub.f32 %v7733_v23, %v11911_v22  ;;  %1826 = vmatprep.subr.mxu0 %v7742_v52  ;;  %v2192_v21 = vand.u32 4294901760, %v2191_v47  ;;  %v11912_v27 = vand.u32 4294901760, %v7764_v32  ;;  %v2198_v16 = vand.u32 4294901760, %v2197_v56  ;;  %v11913_v22 = vld [vmem:[#allocation102_spill] sm:$0xff]  ;;  %v11914_v47 = vld [vmem:[#allocation103_spill] sm:$0xff] }
 0x13c   : > { %2169 = vmatpush2.msra.mxu1 %v2168_v31  ;;  %1828 = vmatpush2.msra.mxu0 %v7752_v13  ;;  %v2221_v31 = vsub.f32 %v7776_v7, %v10937_v60  ;;  %v11928_v60 = vld [vmem:[#allocation25_spill] sm:$0xff] }
 0x13d   : > { %2175 = vmatprep.subr.mxu1 %v2174_v28  ;;  %v2215_v24 = vsub.f32 %v7764_v32, %v11912_v27  ;;  %1834 = vmatprep.mubr.f32.mxu0 %v11913_v22  ;;  %v2204_v40 = vand.u32 4294901760, %v2203_v26  ;;  %v2227_v28 = vsub.f32 %v7780_v39, %v10936_v50  ;;  %v2210_v27 = vand.u32 4294901760, %v2209_v62  ;;  %v11915_v26 = vld [vmem:[#allocation46_spill] sm:$0xff]  ;;  %v11917_v62 = vld [vmem:[#allocation52_spill] sm:$0xff]  ;;  %v11930_v22 = vld [vmem:[#allocation7_spill] sm:$0xff] }
 0x13e   : > { %2181 = vmatpush2.msra.mxu1 %v2180_v30  ;;  %2241 = vmatprep.subr.mxu0 %v6920_v58  ;;  %v2222_v56 = vand.u32 4294901760, %v2221_v31  ;;  %v11916_v50 = vld [vmem:[#allocation42_spill] sm:$0xff]  ;;  %v11922_v31 = vld [vmem:[#allocation5_spill] sm:$0xff] }
 0x13f   : > { %2187 = vmatprep.subr.mxu1 %v2186_v11  ;;  %1840 = vmatmul.mubr.f32.vlgmr.msra.gmra.mxu0 %v11914_v47  ;;  %v2216_v30 = vand.u32 4294901760, %v2215_v24  ;;  %v2228_v11 = vand.u32 4294901760, %v2227_v28  ;;  %v11920_v24 = vld [vmem:[#allocation60_spill] sm:$0xff]  ;;  %v11929_v47 = vld [vmem:[#allocation31_spill] sm:$0xff] }
 0x140   : > { %2193 = vmatpush2.msra.mxu1 %v2192_v21  ;;  %2244 = vmatpush1.msra.mxu0 %v6917_v6  ;;  %v11918_v21 = vld [vmem:[#allocation54_spill] sm:$0xff]  ;;  %v11923_v28 = vld [vmem:[#allocation68_spill] sm:$0xff] }
 0x141   : > { %2199 = vmatprep.subr.mxu1 %v2198_v16  ;;  %2247 = vmatprep.subr.mxu0 %v6933_v12  ;;  %v11921_v16 = vld [vmem:[#allocation72_spill] sm:$0xff] }
 0x142   : > { %2205 = vmatpush2.msra.mxu1 %v2204_v40  ;;  %2250 = vmatpush1.msra.mxu0 %v6939_v25  ;;  %v11919_v40 = vld [vmem:[#allocation62_spill] sm:$0xff] }
 0x143   : > { %2211 = vmatprep.subr.mxu1 %v2210_v27  ;;  %2253 = vmatprep.subr.mxu0 %v11915_v26  ;;  %v11924_v27 = vld [vmem:[#allocation23_spill] sm:$0xff] }
 0x144   : > { %2217 = vmatpush2.msra.mxu1 %v2216_v30  ;;  %2256 = vmatpush1.msra.mxu0 %v11916_v50  ;;  %v11925_v30 = vld [vmem:[#allocation84_spill] sm:$0xff] }
 0x145   : > { %2223 = vmatprep.subr.mxu1 %v2222_v56  ;;  %2259 = vmatprep.subr.mxu0 %v11917_v62  ;;  %v11926_v56 = vld [vmem:[#allocation6_spill] sm:$0xff] }
 0x146   : > { %2229 = vmatpush2.msra.mxu1 %v2228_v11  ;;  %2262 = vmatpush1.msra.mxu0 %v11918_v21  ;;  %v11927_v11 = vld [vmem:[#allocation82_spill] sm:$0xff] }
 0x147   : > { %2233 = vmatmul.mubr.f32.vlgmr.msra.gmra.mxu1 %v11750_v44  ;;  %2265 = vmatprep.subr.mxu0 %v11919_v40  ;;  %v11931_v44 = vld [vmem:[#allocation29_spill] sm:$0xff] }
 0x148   : > { %2443 = vmatprep.subr.mxu1 %v6896_v0  ;;  %2268 = vmatpush1.msra.mxu0 %v11920_v24 }
 0x149   : > { %2445 = vmatpush1.msra.mxu1 %v6898_v3  ;;  %2271 = vmatprep.subr.mxu0 %v11921_v16 }
 0x14a   : > { %2447 = vmatprep.subr.mxu1 %v11922_v31  ;;  %2274 = vmatpush1.msra.mxu0 %v11923_v28  ;;  %v11933_v31 = vld [vmem:[#allocation11_spill] sm:$0xff]  ;;  %v11934_v28 = vld [vmem:[#allocation48_spill] sm:$0xff] }
 0x14b   : > { %2449 = vmatpush1.msra.mxu1 %v11924_v27  ;;  %2277 = vmatprep.subr.mxu0 %v11925_v30  ;;  %v11935_v27 = vld [vmem:[#allocation33_spill] sm:$0xff] }
 0x14c   : > { %2451 = vmatprep.subr.mxu1 %v11926_v56  ;;  %2280 = vmatpush1.msra.mxu0 %v11927_v11  ;;  %v11936_v56 = vld [vmem:[#allocation39_spill] sm:$0xff]  ;;  %v11937_v11 = vld [vmem:[#allocation58_spill] sm:$0xff] }
 0x14d   : > { %2453 = vmatpush1.msra.mxu1 %v11928_v60  ;;  %2283 = vmatprep.subr.mxu0 %v11929_v47  ;;  %v11938_v60 = vld [vmem:[#allocation37_spill] sm:$0xff]  ;;  %v11939_v47 = vld [vmem:[#allocation56_spill] sm:$0xff] }
 0x14e   : > { %2455 = vmatprep.subr.mxu1 %v11930_v22  ;;  %2286 = vmatpush1.msra.mxu0 %v11931_v44  ;;  %v11940_v22 = vld [vmem:[#allocation15_spill] sm:$0xff]  ;;  %v11941_v44 = vld [vmem:[#allocation64_spill] sm:$0xff] }
 0x14f   : > { %2457 = vmatpush1.msra.mxu1 %v11932_v61  ;;  %2289 = vmatprep.subr.mxu0 %v11933_v31  ;;  %v11942_v61 = vld [vmem:[#allocation41_spill] sm:$0xff]  ;;  %v11943_v31 = vld [vmem:[#allocation66_spill] sm:$0xff] }
 0x150   : > { %2459 = vmatprep.subr.mxu1 %v11934_v28  ;;  %2292 = vmatpush1.msra.mxu0 %v11935_v27 }
 0x151   : > { %2461 = vmatpush1.msra.mxu1 %v6964_v42  ;;  %2295 = vmatprep.subr.mxu0 %v11936_v56  ;;  %v11944_v42 = vld [vmem:[#allocation45_spill] sm:$0xff]  ;;  %v11945_v56 = vld [vmem:[#allocation70_spill] sm:$0xff] }
 0x152   : > { %2463 = vmatprep.subr.mxu1 %v11937_v11  ;;  %2298 = vmatpush1.msra.mxu0 %v11938_v60  ;;  %v11946_v11 = vld [vmem:[#allocation19_spill] sm:$0xff]  ;;  %v11947_v60 = vld [vmem:[#allocation86_spill] sm:$0xff] }
 0x153   : > { %2465 = vmatpush1.msra.mxu1 %v11939_v47  ;;  %2301 = vmatprep.subr.mxu0 %v11940_v22  ;;  %v11948_v47 = vld [vmem:[#allocation49_spill] sm:$0xff]  ;;  %v11949_v22 = vld [vmem:[#allocation8_spill] sm:$0xff] }
 0x154   : > { %2467 = vmatprep.subr.mxu1 %v11941_v44  ;;  %2304 = vmatpush1.msra.mxu0 %v11942_v61  ;;  %v11950_v61 = vld [vmem:[#allocation10_spill] sm:$0xff] }
 0x155   : > { %2469 = vmatpush1.msra.mxu1 %v11943_v31  ;;  %2307 = vmatprep.subr.mxu0 %v7230_v14  ;;  %v11951_v31 = vld [vmem:[#allocation53_spill] sm:$0xff] }
 0x156   : > { %2471 = vmatprep.subr.mxu1 %v7057_v63  ;;  %2310 = vmatpush1.msra.mxu0 %v11944_v42  ;;  %v11952_v14 = vld [vmem:[#allocation9_spill] sm:$0xff]  ;;  %v11953_v42 = vld [vmem:[#allocation35_spill] sm:$0xff] }
 0x157   : > { %2473 = vmatpush1.msra.mxu1 %v11945_v56  ;;  %2313 = vmatprep.subr.mxu0 %v11946_v11  ;;  %v11954_v56 = vld [vmem:[#allocation57_spill] sm:$0xff]  ;;  %v11955_v11 = vld [vmem:[#allocation12_spill] sm:$0xff] }
 0x158   : > { %2475 = vmatprep.subr.mxu1 %v11947_v60  ;;  %2316 = vmatpush1.msra.mxu0 %v11948_v47  ;;  %v11956_v47 = vld [vmem:[#allocation14_spill] sm:$0xff] }
 0x159   : > { %2477 = vmatpush1.msra.mxu1 %v11949_v22  ;;  %2319 = vmatprep.subr.mxu0 %v7293_v43  ;;  %v11957_v22 = vld [vmem:[#allocation61_spill] sm:$0xff] }
 0x15a   : > { %2479 = vmatprep.subr.mxu1 %v11950_v61  ;;  %2322 = vmatpush1.msra.mxu0 %v11951_v31  ;;  %v11958_v43 = vld [vmem:[#allocation13_spill] sm:$0xff]  ;;  %v11959_v61 = vld [vmem:[#allocation32_spill] sm:$0xff]  ;;  %v11960_v31 = vld [vmem:[#allocation43_spill] sm:$0xff] }
 0x15b   : > { %2481 = vmatpush1.msra.mxu1 %v11952_v14  ;;  %2325 = vmatprep.subr.mxu0 %v7316_v45  ;;  %v11961_v45 = vld [vmem:[#allocation16_spill] sm:$0xff] }
 0x15c   : > { %2483 = vmatprep.subr.mxu1 %v11953_v42  ;;  %2328 = vmatpush1.msra.mxu0 %v11954_v56  ;;  %v11962_v56 = vld [vmem:[#allocation18_spill] sm:$0xff] }
 0x15d   : > { %2485 = vmatpush1.msra.mxu1 %v11955_v11  ;;  %2331 = vmatprep.subr.mxu0 %v7364_v33  ;;  %v11963_v11 = vld [vmem:[#allocation69_spill] sm:$0xff] }
 0x15e   : > { %2487 = vmatprep.subr.mxu1 %v11956_v47  ;;  %2334 = vmatpush1.msra.mxu0 %v11957_v22  ;;  %v11964_v33 = vld [vmem:[#allocation17_spill] sm:$0xff]  ;;  %v11965_v22 = vld [vmem:[#allocation51_spill] sm:$0xff] }
 0x15f   : > { %2489 = vmatpush1.msra.mxu1 %v11958_v43  ;;  %2337 = vmatprep.subr.mxu0 %v11959_v61  ;;  %v11966_v43 = vld [vmem:[#allocation73_spill] sm:$0xff]  ;;  %v11967_v61 = vld [vmem:[#allocation20_spill] sm:$0xff] }
 0x160   : > { %2491 = vmatprep.subr.mxu1 %v11960_v31  ;;  %2340 = vmatpush2.msra.mxu0 %v7371_v37  ;;  %v11968_v37 = vld [vmem:[#allocation22_spill] sm:$0xff] }
 0x161   : > { %2493 = vmatpush1.msra.mxu1 %v11961_v45  ;;  %2343 = vmatprep.subr.mxu0 %v7427_v36  ;;  %v11969_v45 = vld [vmem:[#allocation75_spill] sm:$0xff]  ;;  %v11970_v36 = vld [vmem:[#allocation21_spill] sm:$0xff] }
 0x162   : > { %2495 = vmatprep.subr.mxu1 %v11962_v56  ;;  %2346 = vmatpush2.msra.mxu0 %v11963_v11  ;;  %v11971_v56 = vld [vmem:[#allocation87_spill] sm:$0xff] }
 0x163   : > { %2497 = vmatpush1.msra.mxu1 %v11964_v33  ;;  %2349 = vmatprep.subr.mxu0 %v7442_v10  ;;  %v11972_v11 = vld [vmem:[#allocation59_spill] sm:$0xff]  ;;  %v11973_v10 = vld [vmem:[#allocation26_spill] sm:$0xff] }
 0x164   : > { %2499 = vmatprep.subr.mxu1 %v11965_v22  ;;  %2352 = vmatpush2.msra.mxu0 %v11966_v43  ;;  %v11974_v43 = vld [vmem:[#allocation28_spill] sm:$0xff] }
 0x165   : > { %2501 = vmatpush1.msra.mxu1 %v11967_v61  ;;  %2355 = vmatprep.subr.mxu0 %v7490_v49  ;;  %v11975_v61 = vld [vmem:[#allocation88_spill] sm:$0xff]  ;;  %v11976_v49 = vld [vmem:[#allocation63_spill] sm:$0xff] }
 0x166   : > { %2503 = vmatprep.subr.mxu1 %v11968_v37  ;;  %2358 = vmatpush2.msra.mxu0 %v11969_v45  ;;  %v11977_v37 = vld [vmem:[#allocation101_spill] sm:$0xff]  ;;  %v11978_v45 = vld [vmem:[#allocation67_spill] sm:$0xff] }
 0x167   : > { %2505 = vmatpush1.msra.mxu1 %v11970_v36  ;;  %2361 = vmatprep.subr.mxu0 %v11971_v56  ;;  %v11979_v36 = vld [vmem:[#allocation95_spill] sm:$0xff]  ;;  %v11980_v56 = vld [vmem:[#allocation34_spill] sm:$0xff] }
 0x168   : > { %2507 = vmatprep.subr.mxu1 %v11972_v11  ;;  %2364 = vmatpush2.msra.mxu0 %v7496_v17  ;;  %v11981_v17 = vld [vmem:[#allocation71_spill] sm:$0xff] }
 0x169   : > { %2509 = vmatpush2.msra.mxu1 %v11973_v10  ;;  %2367 = vmatprep.subr.mxu0 %v7555_v38  ;;  %v11982_v10 = vld [vmem:[#allocation74_spill] sm:$0xff]  ;;  %v11983_v38 = vld [vmem:[#allocation36_spill] sm:$0xff] }
 0x16a   : > { %2511 = vmatprep.subr.mxu1 %v11974_v43  ;;  %2370 = vmatpush2.msra.mxu0 %v11975_v61  ;;  %v11984_v61 = vld [vmem:[#allocation77_spill] sm:$0xff] }
 0x16b   : > { %2513 = vmatpush2.msra.mxu1 %v11976_v49  ;;  %2373 = vmatprep.subr.mxu0 %v11977_v37  ;;  %v11985_v37 = vld [vmem:[#allocation44_spill] sm:$0xff] }
 0x16c   : > { %2515 = vmatprep.subr.mxu1 %v11978_v45  ;;  %2376 = vmatpush2.msra.mxu0 %v11979_v36  ;;  %v11986_v36 = vld [vmem:[#allocation80_spill] sm:$0xff] }
 0x16d   : > { %2517 = vmatpush2.msra.mxu1 %v11980_v56  ;;  %2379 = vmatprep.subr.mxu0 %v7605_v18  ;;  %v11987_v18 = vld [vmem:[#allocation79_spill] sm:$0xff] }
 0x16e   : > { %2519 = vmatprep.subr.mxu1 %v11981_v17  ;;  %2382 = vmatpush2.msra.mxu0 %v11982_v10  ;;  %v11988_v10 = vld [vmem:[#allocation89_spill] sm:$0xff] }
 0x16f   : > { %2521 = vmatpush2.msra.mxu1 %v11983_v38  ;;  %2385 = vmatprep.subr.mxu0 %v7638_v15  ;;  %v11989_v15 = vld [vmem:[#allocation85_spill] sm:$0xff] }
 0x170   : > { %2523 = vmatprep.subr.mxu1 %v11984_v61  ;;  %2388 = vmatpush2.msra.mxu0 %v7610_v20  ;;  %v11990_v20 = vld [vmem:[#allocation92_spill] sm:$0xff] }
 0x171   : > { %2525 = vmatpush2.msra.mxu1 %v11985_v37  ;;  %2391 = vmatprep.subr.mxu0 %v7660_v54  ;;  %v11991_v54 = vld [vmem:[#allocation90_spill] sm:$0xff] }
 0x172   : > { %2527 = vmatprep.subr.mxu1 %v11986_v36  ;;  %2394 = vmatpush2.msra.mxu0 %v7633_v5  ;;  %v11992_v5 = vld [vmem:[#allocation76_spill] sm:$0xff] }
 0x173   : > { %2529 = vmatpush2.msra.mxu1 %v11987_v18  ;;  %2397 = vmatprep.subr.mxu0 %v7686_v35  ;;  %v11993_v35 = vld [vmem:[#allocation100_spill] sm:$0xff] }
 0x174   : > { %2531 = vmatprep.subr.mxu1 %v11988_v10  ;;  %2400 = vmatpush2.msra.mxu0 %v7667_v46  ;;  %v11994_v46 = vld [vmem:[#allocation78_spill] sm:$0xff] }
 0x175   : > { %2533 = vmatpush2.msra.mxu1 %v11989_v15  ;;  %2403 = vmatprep.subr.mxu0 %v7702_v57  ;;  %v11995_v57 = vld [vmem:[#allocation104_spill] sm:$0xff] }
 0x176   : > { %2535 = vmatprep.subr.mxu1 %v11990_v20  ;;  %2406 = vmatpush2.msra.mxu0 %v7693_v51  ;;  %v11996_v51 = vld [vmem:[#allocation109_spill] sm:$0xff] }
 0x177   : > { %2537 = vmatpush2.msra.mxu1 %v11991_v54  ;;  %2409 = vmatprep.subr.mxu0 %v7719_v55 }
 0x178   : > { %2539 = vmatprep.subr.mxu1 %v11992_v5  ;;  %2412 = vmatpush2.msra.mxu0 %v7715_v19 }
 0x179   : > { %2541 = vmatpush2.msra.mxu1 %v11993_v35  ;;  %2415 = vmatprep.subr.mxu0 %v7746_v48  ;;  %v11997_v48 = vld [vmem:[#allocation94_spill] sm:$0xff] }
 0x17a   : > { %2543 = vmatprep.subr.mxu1 %v11994_v46  ;;  %2418 = vmatpush2.msra.mxu0 %v7733_v23  ;;  %v11998_v23 = vld [vmem:[#allocation96_spill] sm:$0xff] }
 0x17b   : > { %2545 = vmatpush2.msra.mxu1 %v11995_v57  ;;  %2421 = vmatprep.subr.mxu0 %v7760_v29 }
 0x17c   : > { %2547 = vmatprep.subr.mxu1 %v11996_v51  ;;  %2424 = vmatpush2.msra.mxu0 %v7764_v32  ;;  %v11999_v51 = vand.u32 4294901760, %v6920_v58  ;;  %v12003_v58 = vand.u32 4294901760, %v11915_v26  ;;  %v12012_v26 = vld [vmem:[#allocation5_spill] sm:$0xff] }
 0x17d   : > { %2549 = vmatpush2.msra.mxu1 %v7626_v1  ;;  %2427 = vmatprep.subr.mxu0 %v7776_v7  ;;  %v12000_v1 = vand.u32 4294901760, %v6917_v6  ;;  %v12004_v6 = vand.u32 4294901760, %v11916_v50  ;;  %v12010_v50 = vand.u32 4294901760, %v11920_v24 }
 0x17e   : > { %2551 = vmatprep.subr.mxu1 %v7657_v59  ;;  %2430 = vmatpush2.msra.mxu0 %v7780_v39  ;;  %v12001_v39 = vand.u32 4294901760, %v6933_v12  ;;  %v12005_v12 = vand.u32 4294901760, %v11917_v62  ;;  %v12013_v62 = vld [vmem:[#allocation68_spill] sm:$0xff] }
 0x17f   : > { %2433 = vmatprep.mubr.f32.mxu0 %v11997_v48  ;;  %2553 = vmatpush2.msra.mxu1 %v7648_v34  ;;  %v12002_v48 = vand.u32 4294901760, %v6939_v25  ;;  %v12007_v25 = vand.u32 4294901760, %v11918_v21  ;;  %v12014_v21 = vand.u32 4294901760, %v12013_v62  ;;  %v12029_v62 = vand.u32 4294901760, %v11935_v27 }
 0x180   : > { %2436 = vmatmul.mubr.f32.vlgmr.msra.gmra.mxu0 %v11998_v23  ;;  %2555 = vmatprep.subr.mxu1 %v7680_v41 }
 0x181   : > { %2586 = vmatprep.subr.mxu0 %v11999_v51  ;;  %2557 = vmatpush2.msra.mxu1 %v7683_v9  ;;  %v12008_v51 = vld [vmem:[#allocation99_spill] sm:$0xff] }
 0x182   : > { %2590 = vmatpush1.msra.mxu0 %v12000_v1  ;;  %2559 = vmatprep.subr.mxu1 %v7707_v8  ;;  %v12006_v1 = vld [vmem:[#allocation98_spill] sm:$0xff] }
 0x183   : > { %2594 = vmatprep.subr.mxu0 %v12001_v39  ;;  %2561 = vmatpush2.msra.mxu1 %v7699_v2  ;;  %v12011_v39 = vand.u32 4294901760, %v11921_v16 }
 0x184   : > { %2598 = vmatpush1.msra.mxu0 %v12002_v48  ;;  %2563 = vmatprep.subr.mxu1 %v7725_v53  ;;  %v12009_v48 = vand.u32 4294901760, %v11919_v40  ;;  %v12016_v40 = vand.u32 4294901760, %v11925_v30 }
 0x185   : > { %2602 = vmatprep.subr.mxu0 %v12003_v58  ;;  %2565 = vmatpush2.msra.mxu1 %v7735_v4  ;;  %v12015_v58 = vld [vmem:[#allocation23_spill] sm:$0xff] }
 0x186   : > { %2606 = vmatpush1.msra.mxu0 %v12004_v6  ;;  %2567 = vmatprep.subr.mxu1 %v7742_v52  ;;  %v12017_v6 = vld [vmem:[#allocation6_spill] sm:$0xff] }
 0x187   : > { %2610 = vmatprep.subr.mxu0 %v12005_v12  ;;  %2569 = vmatpush2.msra.mxu1 %v7752_v13  ;;  %v12020_v12 = vld [vmem:[#allocation25_spill] sm:$0xff] }
 0x188   : > { %2573 = vmatprep.mubr.f32.mxu1 %v12006_v1  ;;  %2614 = vmatpush1.msra.mxu0 %v12007_v25  ;;  %v12023_v25 = vld [vmem:[#allocation7_spill] sm:$0xff] }
 0x189   : > { %2577 = vmatmul.mubr.f32.vlgmr.msra.gmra.mxu1 %v12008_v51  ;;  %2618 = vmatprep.subr.mxu0 %v12009_v48  ;;  %v12024_v48 = vld [vmem:[#allocation29_spill] sm:$0xff] }
 0x18a   : > { %2849 = vmatprep.subr.mxu1 %v6896_v0  ;;  %2622 = vmatpush1.msra.mxu0 %v12010_v50  ;;  %v12018_v0 = vld [vmem:[#allocation82_spill] sm:$0xff]  ;;  %v12025_v50 = vand.u32 4294901760, %v12024_v48  ;;  %v12042_v48 = vld [vmem:[#allocation47_spill] sm:$0xff] }
 0x18b   : > { %2851 = vmatpush1.msra.mxu1 %v6898_v3  ;;  %2626 = vmatprep.subr.mxu0 %v12011_v39  ;;  %v12019_v24 = vand.u32 4294901760, %v12018_v0  ;;  %v12021_v3 = vld [vmem:[#allocation31_spill] sm:$0xff]  ;;  %v12034_v0 = vld [vmem:[#allocation37_spill] sm:$0xff] }
 0x18c   : > { %2853 = vmatprep.subr.mxu1 %v12012_v26  ;;  %2630 = vmatpush1.msra.mxu0 %v12014_v21  ;;  %v12022_v16 = vand.u32 4294901760, %v12021_v3  ;;  %v12026_v39 = vld [vmem:[#allocation27_spill] sm:$0xff]  ;;  %v12030_v21 = vld [vmem:[#allocation50_spill] sm:$0xff] }
 0x18d   : > { %2855 = vmatpush1.msra.mxu1 %v12015_v58  ;;  %2634 = vmatprep.subr.mxu0 %v12016_v40  ;;  %v12027_v26 = vld [vmem:[#allocation11_spill] sm:$0xff] }
 0x18e   : > { %2857 = vmatprep.subr.mxu1 %v12017_v6  ;;  %2638 = vmatpush1.msra.mxu0 %v12019_v24  ;;  %v12028_v30 = vand.u32 4294901760, %v12027_v26  ;;  %v12031_v58 = vld [vmem:[#allocation39_spill] sm:$0xff]  ;;  %v12033_v6 = vld [vmem:[#allocation58_spill] sm:$0xff]  ;;  %v12035_v24 = vand.u32 4294901760, %v12034_v0 }
 0x18f   : > { %2859 = vmatpush1.msra.mxu1 %v12020_v12  ;;  %2642 = vmatprep.subr.mxu0 %v12022_v16  ;;  %v12032_v40 = vand.u32 4294901760, %v12031_v58  ;;  %v12036_v12 = vld [vmem:[#allocation56_spill] sm:$0xff]  ;;  %v12037_v3 = vld [vmem:[#allocation15_spill] sm:$0xff] }
 0x190   : > { %2861 = vmatprep.subr.mxu1 %v12023_v25  ;;  %2646 = vmatpush1.msra.mxu0 %v12025_v50  ;;  %v12038_v16 = vand.u32 4294901760, %v12037_v3  ;;  %v12041_v25 = vld [vmem:[#allocation66_spill] sm:$0xff]  ;;  %v12043_v50 = vand.u32 4294901760, %v12042_v48  ;;  %v12057_v3 = vld [vmem:[#allocation24_spill] sm:$0xff] }
 0x191   : > { %2863 = vmatpush1.msra.mxu1 %v12026_v39  ;;  %2650 = vmatprep.subr.mxu0 %v12028_v30  ;;  %v12044_v39 = vld [vmem:[#allocation45_spill] sm:$0xff]  ;;  %v12046_v30 = vld [vmem:[#allocation70_spill] sm:$0xff] }
 0x192   : > { %2865 = vmatprep.subr.mxu1 %v11934_v28  ;;  %2654 = vmatpush1.msra.mxu0 %v12029_v62  ;;  %v12039_v28 = vld [vmem:[#allocation41_spill] sm:$0xff]  ;;  %v12045_v26 = vand.u32 4294901760, %v12044_v39  ;;  %v12047_v62 = vld [vmem:[#allocation19_spill] sm:$0xff] }
 0x193   : > { %2867 = vmatpush1.msra.mxu1 %v12030_v21  ;;  %2658 = vmatprep.subr.mxu0 %v12032_v40  ;;  %v12040_v27 = vand.u32 4294901760, %v12039_v28  ;;  %v12048_v21 = vand.u32 4294901760, %v12047_v62  ;;  %v12051_v40 = vld [vmem:[#allocation8_spill] sm:$0xff] }
 0x194   : > { %2869 = vmatprep.subr.mxu1 %v12033_v6  ;;  %2662 = vmatpush1.msra.mxu0 %v12035_v24  ;;  %v12052_v6 = vld [vmem:[#allocation55_spill] sm:$0xff]  ;;  %v12054_v24 = vld [vmem:[#allocation10_spill] sm:$0xff] }
 0x195   : > { %2871 = vmatpush1.msra.mxu1 %v12036_v12  ;;  %2666 = vmatprep.subr.mxu0 %v12038_v16  ;;  %v12053_v0 = vand.u32 4294901760, %v12052_v6  ;;  %v12058_v16 = vand.u32 4294901760, %v12057_v3  ;;  %v286_v3 = vld [vmem:[#allocation2 + $0x3e8] sm:$0xff] }
 0x196   : > { %2873 = vmatprep.subr.mxu1 %v11941_v44  ;;  %2670 = vmatpush1.msra.mxu0 %v12040_v27  ;;  %v12049_v44 = vld [vmem:[#allocation49_spill] sm:$0xff]  ;;  %v12061_v27 = vld [vmem:[#allocation12_spill] sm:$0xff] }
 0x197   : > { %2875 = vmatpush1.msra.mxu1 %v12041_v25  ;;  %2674 = vmatprep.subr.mxu0 %v12043_v50  ;;  %v12050_v58 = vand.u32 4294901760, %v12049_v44  ;;  %v12062_v25 = vld [vmem:[#allocation30_spill] sm:$0xff]  ;;  %v12064_v50 = vld [vmem:[#allocation61_spill] sm:$0xff] }
 0x198   : > { %2877 = vmatprep.subr.mxu1 %v7057_v63  ;;  %2678 = vmatpush1.msra.mxu0 %v12045_v26  ;;  %v12055_v63 = vld [vmem:[#allocation53_spill] sm:$0xff]  ;;  %v12063_v48 = vand.u32 4294901760, %v12062_v25  ;;  %v12065_v39 = vand.u32 4294901760, %v12064_v50  ;;  %v12072_v44 = vld [vmem:[#allocation38_spill] sm:$0xff]  ;;  %v12085_v25 = vld [vmem:[#allocation75_spill] sm:$0xff] }
 0x199   : > { %2879 = vmatpush1.msra.mxu1 %v12046_v30  ;;  %2682 = vmatprep.subr.mxu0 %v12048_v21  ;;  %v12056_v12 = vand.u32 4294901760, %v12055_v63  ;;  %v12066_v26 = vld [vmem:[#allocation13_spill] sm:$0xff]  ;;  %v12071_v21 = vld [vmem:[#allocation16_spill] sm:$0xff]  ;;  %v278_v50 = vld [vmem:[#allocation2 + $0x3a8] sm:$0xff] }
 0x19a   : > { %2881 = vmatprep.subr.mxu1 %v11947_v60  ;;  %2686 = vmatpush1.msra.mxu0 %v12050_v58  ;;  %v12059_v60 = vld [vmem:[#allocation57_spill] sm:$0xff]  ;;  %v12073_v58 = vand.u32 4294901760, %v12072_v44 }
 0x19b   : > { %2883 = vmatpush1.msra.mxu1 %v12051_v40  ;;  %2690 = vmatprep.subr.mxu0 %v12053_v0  ;;  %v12060_v28 = vand.u32 4294901760, %v12059_v60  ;;  %v12074_v40 = vld [vmem:[#allocation18_spill] sm:$0xff]  ;;  %v12077_v0 = vld [vmem:[#allocation40_spill] sm:$0xff] }
 0x19c   : > { %2885 = vmatprep.subr.mxu1 %v12054_v24  ;;  %2694 = vmatpush1.msra.mxu0 %v12056_v12  ;;  %v12078_v24 = vand.u32 4294901760, %v12077_v0  ;;  %v12081_v12 = vld [vmem:[#allocation20_spill] sm:$0xff]  ;;  %v8079_v0 = vand.u32 4294901760, %v278_v50 }
 0x19d   : > { %2887 = vmatpush1.msra.mxu1 %v11952_v14  ;;  %2698 = vmatprep.subr.mxu0 %v12058_v16  ;;  %v12067_v14 = vld [vmem:[#allocation32_spill] sm:$0xff]  ;;  %v12082_v16 = vld [vmem:[#allocation81_spill] sm:$0xff] }
 0x19e   : > { %2889 = vmatprep.subr.mxu1 %v11953_v42  ;;  %2702 = vmatpush1.msra.mxu0 %v12060_v28  ;;  %v12068_v30 = vand.u32 4294901760, %v12067_v14  ;;  %v12069_v42 = vld [vmem:[#allocation65_spill] sm:$0xff]  ;;  %v12083_v60 = vand.u32 4294901760, %v12082_v16  ;;  %v12084_v28 = vld [vmem:[#allocation22_spill] sm:$0xff] }
 0x19f   : > { %2891 = vmatpush1.msra.mxu1 %v12061_v27  ;;  %2706 = vmatprep.subr.mxu0 %v12063_v48  ;;  %v12070_v62 = vand.u32 4294901760, %v12069_v42  ;;  %v285_v27 = vld [vmem:[#allocation2 + $0x3e0] sm:$0xff]  ;;  %v12086_v48 = vand.u32 4294901760, %v12085_v25  ;;  %v12090_v42 = vld [vmem:[#allocation83_spill] sm:$0xff]  ;;  %v254_v16 = vld [vmem:[#allocation2 + $0x2e8] sm:$0xff] }
 0x1a0   : > { %2893 = vmatprep.subr.mxu1 %v11956_v47  ;;  %2710 = vmatpush1.msra.mxu0 %v12065_v39  ;;  %v12075_v47 = vld [vmem:[#allocation69_spill] sm:$0xff]  ;;  %v8074_v44 = vand.u32 4294901760, %v285_v27 }
 0x1a1   : > { %2895 = vmatpush1.msra.mxu1 %v12066_v26  ;;  %2714 = vmatprep.subr.mxu0 %v12068_v30  ;;  %v12076_v6 = vand.u32 4294901760, %v12075_v47  ;;  %v277_v39 = vld [vmem:[#allocation2 + $0x3a0] sm:$0xff]  ;;  %v12088_v26 = vld [vmem:[#allocation87_spill] sm:$0xff]  ;;  %v8069_v30 = vand.u32 4294901760, %v286_v3 }
 0x1a2   : > { %2897 = vmatprep.subr.mxu1 %v11960_v31  ;;  %2718 = vmatpush2.msra.mxu0 %v12070_v62  ;;  %v12079_v31 = vld [vmem:[#allocation73_spill] sm:$0xff]  ;;  %v12089_v14 = vand.u32 4294901760, %v12088_v26  ;;  %v12091_v62 = vand.u32 4294901760, %v12090_v42 }
 0x1a3   : > { %2899 = vmatpush1.msra.mxu1 %v12071_v21  ;;  %2722 = vmatprep.subr.mxu0 %v12073_v58  ;;  %v12080_v63 = vand.u32 4294901760, %v12079_v31  ;;  %v12092_v21 = vld [vmem:[#allocation26_spill] sm:$0xff]  ;;  %v269_v58 = vld [vmem:[#allocation2 + $0x360] sm:$0xff] }
 0x1a4   : > { %2901 = vmatprep.subr.mxu1 %v12074_v40  ;;  %2726 = vmatpush2.msra.mxu0 %v12076_v6  ;;  %v262_v40 = vld [vmem:[#allocation2 + $0x328] sm:$0xff]  ;;  %v12093_v47 = vld [vmem:[#allocation97_spill] sm:$0xff]  ;;  %v8091_v25 = vand.u32 4294901760, %v269_v58 }
 0x1a5   : > { %2903 = vmatpush1.msra.mxu1 %v11964_v33  ;;  %2730 = vmatprep.subr.mxu0 %v12078_v24  ;;  %v12087_v33 = vld [vmem:[#allocation21_spill] sm:$0xff]  ;;  %v12094_v6 = vand.u32 4294901760, %v12093_v47  ;;  %v8081_v24 = vand.u32 4294901760, %v277_v39  ;;  %v8115_v47 = vsub.f32 %v278_v50, %v8079_v0 }
 0x1a6   : > { %2905 = vmatprep.subr.mxu1 %v11965_v22  ;;  %2734 = vmatpush2.msra.mxu0 %v12080_v63  ;;  %v270_v22 = vld [vmem:[#allocation2 + $0x368] sm:$0xff]  ;;  %v261_v31 = vld [vmem:[#allocation2 + $0x320] sm:$0xff]  ;;  %v12096_v63 = vld [vmem:[#allocation88_spill] sm:$0xff]  ;;  %12100 = vst [vmem:[#allocation42_spill] sm:$0xff] %v8091_v25 }
 0x1a7   : > { %2907 = vmatpush1.msra.mxu1 %v12081_v12  ;;  %2738 = vmatprep.subr.mxu0 %v12083_v60  ;;  %v12097_v12 = vand.u32 4294901760, %v12096_v63  ;;  %v12098_v60 = vld [vmem:[#allocation101_spill] sm:$0xff]  ;;  %12111 = vst [vmem:[#allocation48_spill] sm:$0xff] %v8115_v47  ;;  %v950_v63 = vpop.f32.mrf.mxu1 }
 0x1a8   : > { %2909 = vmatprep.subr.mxu1 %v12084_v28  ;;  %2742 = vmatpush2.msra.mxu0 %v12086_v48  ;;  %v12099_v28 = vand.u32 4294901760, %v12098_v60  ;;  %v8096_v48 = vsub.f32 %v286_v3, %v8069_v30  ;;  %v253_v42 = vld [vmem:[#allocation2 + $0x2e0] sm:$0xff]  ;;  %v8112_v3 = vand.u32 4294901760, %v254_v16 }
 0x1a9   : > { %2911 = vmatpush1.msra.mxu1 %v12087_v33  ;;  %2746 = vmatprep.subr.mxu0 %v12089_v14  ;;  %v12103_v33 = vld [vmem:[#allocation95_spill] sm:$0xff]  ;;  %v8104_v14 = vand.u32 4294901760, %v261_v31 }
 0x1aa   : > { %2913 = vmatprep.subr.mxu1 %v11972_v11  ;;  %2750 = vmatpush2.msra.mxu0 %v12091_v62  ;;  %v8083_v11 = vand.u32 4294901760, %v270_v22  ;;  %12102 = vst [vmem:[#allocation54_spill] sm:$0xff] %v8096_v48  ;;  %v12104_v26 = vand.u32 4294901760, %v12103_v33  ;;  %v12107_v62 = vld [vmem:[#allocation105_spill] sm:$0xff]  ;;  %12110 = vst [vmem:[#allocation84_spill] sm:$0xff] %v8112_v3  ;;  %v10964_v50 = vand.u32 4294901760, %v8096_v48  ;;  %v557_v33 = vpop.f32.mrf.mxu0 }
 0x1ab   : > { %2915 = vmatpush2.msra.mxu1 %v12092_v21  ;;  %2754 = vmatprep.subr.mxu0 %v12094_v6  ;;  %12106 = vst [vmem:[#allocation60_spill] sm:$0xff] %v8104_v14  ;;  %v8110_v21 = vsub.f32 %v277_v39, %v8081_v24  ;;  %v8130_v39 = vand.u32 4294901760, %v253_v42 }
 0x1ac   : > { %2917 = vmatprep.subr.mxu1 %v11974_v43  ;;  %12095 = vst [vmem:[#allocation46_spill] sm:$0xff] %v8083_v11  ;;  %2758 = vmatpush2.msra.mxu0 %v12097_v12  ;;  %v8093_v43 = vand.u32 4294901760, %v262_v40  ;;  %v12115_v12 = vld [vmem:[#allocation110_spill] sm:$0xff] }
 0x1ad   : > { %2919 = vmatpush2.msra.mxu1 %v11976_v49  ;;  %2762 = vmatprep.subr.mxu0 %v12099_v28  ;;  %v8102_v49 = vsub.f32 %v285_v27, %v8074_v44  ;;  %12109 = vst [vmem:[#allocation72_spill] sm:$0xff] %v8110_v21  ;;  %v12113_v27 = vld [vmem:[#allocation74_spill] sm:$0xff]  ;;  %v12116_v60 = vand.u32 4294901760, %v12115_v12  ;;  %12118 = vst [vmem:[#allocation86_spill] sm:$0xff] %v8130_v39 }
 0x1ae   : > { %2921 = vmatprep.subr.mxu1 %v11978_v45  ;;  %12101 = vst [vmem:[#allocation52_spill] sm:$0xff] %v8093_v43  ;;  %2766 = vmatpush2.msra.mxu0 %v12104_v26  ;;  %v12108_v45 = vand.u32 4294901760, %v12107_v62  ;;  %v12114_v6 = vand.u32 4294901760, %v12113_v27  ;;  %v8133_v28 = vsub.f32 %v262_v40, %v8093_v43  ;;  %v12120_v26 = vld [vmem:[#allocation106_spill] sm:$0xff]  ;;  %v8139_v62 = vsub.f32 %v261_v31, %v8104_v14 }
 0x1af   : > { %2923 = vmatpush2.msra.mxu1 %v11980_v56  ;;  %12105 = vst [vmem:[#allocation62_spill] sm:$0xff] %v8102_v49  ;;  %v8118_v56 = vsub.f32 %v270_v22, %v8083_v11  ;;  %v245_v22 = vld [vmem:[#allocation2 + $0x2a0] sm:$0xff]  ;;  %v246_v27 = vld [vmem:[#allocation2 + $0x2a8] sm:$0xff]  ;;  %v8169_v40 = vadd.f32 %v950_v63, %v557_v33  ;;  %v12137_v63 = vand.u32 4294901760, %v8115_v47 }
 0x1b0   : > { %2770 = vmatprep.subr.mxu0 %v12108_v45  ;;  %2925 = vmatprep.subr.mxu1 %v11981_v17  ;;  %v8127_v17 = vsub.f32 %v269_v58, %v8091_v25  ;;  %12119 = vst [vmem:[#allocation9_spill] sm:$0xff] %v8133_v28  ;;  %12122 = vst [vmem:[#allocation35_spill] sm:$0xff] %v8139_v62  ;;  %v12123_v58 = vld [vmem:[#allocation111_spill] sm:$0xff]  ;;  %v12140_v12 = vld [vmem:[#allocation114_spill] sm:$0xff] }
 0x1b1   : > { %12112 = vst [vmem:[#allocation33_spill] sm:$0xff] %v8118_v56  ;;  %2774 = vmatpush2.msra.mxu0 %v12114_v6  ;;  %2927 = vmatpush2.msra.mxu1 %v11983_v38  ;;  %v12121_v38 = vand.u32 4294901760, %v12120_v26  ;;  %v12124_v45 = vand.u32 4294901760, %v12123_v58  ;;  %v8154_v26 = vand.u32 4294901760, %v245_v22  ;;  %v12129_v58 = vld [vmem:[#allocation113_spill] sm:$0xff]  ;;  %v559_v6 = vpop.f32.mrf.mxu0  ;;  %v8188_v33 = vsub.f32 %v8115_v47, %v12137_v63 }
 0x1b2   : > { %2778 = vmatprep.subr.mxu0 %v12116_v60  ;;  %2929 = vmatprep.subr.mxu1 %v11984_v61  ;;  %12117 = vst [vmem:[#allocation64_spill] sm:$0xff] %v8127_v17  ;;  %v10965_v61 = vand.u32 4294901760, %v8102_v49  ;;  %v8149_v60 = vsub.f32 %v254_v16, %v8112_v3  ;;  %v8165_v16 = vsub.f32 %v253_v42, %v8130_v39  ;;  %v8179_v42 = vand.u32 4294901760, %v246_v27 }
 0x1b3   : > { %2782 = vmatpush2.msra.mxu0 %v12121_v38  ;;  %2931 = vmatpush2.msra.mxu1 %v11985_v37  ;;  %v12126_v37 = vld [vmem:[#allocation108_spill] sm:$0xff]  ;;  %12128 = vst [vmem:[#allocation43_spill] sm:$0xff] %v8154_v26  ;;  %v952_v38 = vpop.f32.mrf.mxu1  ;;  %v12141_v1 = vand.u32 4294901760, %v12140_v12  ;;  %v8207_v63 = vsub.f32 %v245_v22, %v8154_v26  ;;  %v12147_v22 = vand.u32 4294901760, %v8133_v28 }
 0x1b4   : > { %2786 = vmatprep.subr.mxu0 %v12124_v45  ;;  %2933 = vmatprep.subr.mxu1 %v11986_v36  ;;  %12125 = vst [vmem:[#allocation14_spill] sm:$0xff] %v8149_v60  ;;  %v12127_v31 = vand.u32 4294901760, %v12126_v37  ;;  %v12130_v36 = vand.u32 4294901760, %v12129_v58  ;;  %v8162_v45 = vsub.f32 %v8096_v48, %v10964_v50  ;;  %12131 = vst [vmem:[#allocation17_spill] sm:$0xff] %v8165_v16  ;;  %v238_v37 = vld [vmem:[#allocation2 + $0x268] sm:$0xff]  ;;  %v12132_v58 = vld [vmem:[#allocation112_spill] sm:$0xff] }
 0x1b5   : > { %2935 = vmatpush2.msra.mxu1 %v11987_v18  ;;  %12134 = vst [vmem:[#allocation51_spill] sm:$0xff] %v8179_v42  ;;  %v12135_v18 = vld [vmem:[#allocation115_spill] sm:$0xff]  ;;  %v229_v50 = vld [vmem:[#allocation2 + $0x220] sm:$0xff]  ;;  %12142 = vst [vmem:[#allocation59_spill] sm:$0xff] %v8207_v63  ;;  %v8225_v12 = vsub.f32 %v8133_v28, %v12147_v22  ;;  %v8240_v22 = vsub.f32 %v246_v27, %v8179_v42  ;;  %v1294_v27 = vpop.f32.mrf.mxu1 }
 0x1b6   : > { %2790 = vmatpush2.msra.mxu0 %v12127_v31  ;;  %2937 = vmatprep.subr.mxu1 %v11988_v10  ;;  %v237_v31 = vld [vmem:[#allocation2 + $0x260] sm:$0xff]  ;;  %v8177_v10 = vsub.f32 %v8102_v49, %v10965_v61  ;;  %v12136_v51 = vand.u32 4294901760, %v12135_v18  ;;  %v8201_v18 = vadd.f32 %v952_v38, %v559_v6  ;;  %v12146_v38 = vand.u32 4294901760, %v8127_v17 }
 0x1b7   : > { %2794 = vmatprep.subr.mxu0 %v12130_v36  ;;  %v12133_v36 = vand.u32 4294901760, %v12132_v58  ;;  %2939 = vmatpush2.msra.mxu1 %v11989_v15  ;;  %v12138_v15 = vand.u32 4294901760, %v8110_v21  ;;  %v8211_v23 = vand.u32 4294901760, %v237_v31  ;;  %v12152_v28 = vld [vmem:[#allocation117_spill] sm:$0xff] }
 0x1b8   : > { %2941 = vmatprep.subr.mxu1 %v11990_v20  ;;  %v1153_v20 = vpop.f32.mrf.mxu0 }
 0x1b9   : > { %2798 = vmatpush2.msra.mxu0 %v12133_v36  ;;  %v8193_v58 = vsub.f32 %v8110_v21, %v12138_v15  ;;  %v12139_v36 = vand.u32 4294901760, %v8118_v56  ;;  %2943 = vmatpush2.msra.mxu1 %v11991_v54  ;;  %v8209_v15 = vand.u32 4294901760, %v238_v37  ;;  %12144 = vst [vmem:[#allocation63_spill] sm:$0xff] %v8211_v23  ;;  %v230_v54 = vld [vmem:[#allocation2 + $0x228] sm:$0xff]  ;;  %v12156_v21 = vld [vmem:[#allocation116_spill] sm:$0xff]  ;;  %v1154_v48 = vadd.f32 %v1153_v20, %v8169_v40  ;;  %v12174_v40 = vld [vmem:[#allocation91_spill] sm:$0xff] }
 0x1ba   : > { %2802 = vmatprep.subr.mxu0 %v12136_v51  ;;  %2945 = vmatprep.subr.mxu1 %v11992_v5  ;;  %v12153_v51 = vand.u32 4294901760, %v12152_v28  ;;  %v222_v5 = vld [vmem:[#allocation2 + $0x1e8] sm:$0xff]  ;;  %v12157_v47 = vand.u32 4294901760, %v12156_v21  ;;  %v8259_v28 = vand.u32 4294901760, %v230_v54  ;;  %v12162_v21 = vld [vmem:[#allocation109_spill] sm:$0xff] }
 0x1bb   : > { %v8198_v61 = vsub.f32 %v8118_v56, %v12139_v36  ;;  %2806 = vmatpush2.msra.mxu0 %v12141_v1  ;;  %12143 = vst [vmem:[#allocation28_spill] sm:$0xff] %v8209_v15  ;;  %v12145_v36 = vand.u32 4294901760, %v7719_v55  ;;  %v8220_v1 = vsub.f32 %v8127_v17, %v12146_v38  ;;  %v12148_v55 = vand.u32 4294901760, %v7715_v19  ;;  %2947 = vmatpush2.msra.mxu1 %v11993_v35  ;;  %v221_v17 = vld [vmem:[#allocation2 + $0x1e0] sm:$0xff] }
 0x1bc   : > { %v12150_v38 = vand.u32 4294901760, %v8139_v62  ;;  %2949 = vmatprep.subr.mxu1 %v11994_v46  ;;  %v12154_v56 = vand.u32 4294901760, %v8149_v60  ;;  %v8257_v46 = vsub.f32 %v237_v31, %v8211_v23  ;;  %12159 = vst [vmem:[#allocation77_spill] sm:$0xff] %v8259_v28  ;;  %v12161_v35 = vand.u32 4294901760, %v7760_v29  ;;  %2840 = vmatprep.mubr.f32.mxu0 %v12174_v40 }
 0x1bd   : > { %2810 = vmatprep.subr.mxu0 %v12145_v36  ;;  %v8232_v36 = vand.u32 4294901760, %v229_v50  ;;  %2951 = vmatpush2.msra.mxu1 %v11995_v57  ;;  %v8272_v31 = vand.u32 4294901760, %v221_v17  ;;  %v12165_v19 = vand.u32 4294901760, %v7764_v32  ;;  %v8286_v57 = vand.u32 4294901760, %v222_v5 }
 0x1be   : > { %2814 = vmatpush2.msra.mxu0 %v12148_v55  ;;  %v8237_v6 = vsub.f32 %v8139_v62, %v12150_v38  ;;  %v8251_v38 = vsub.f32 %v8149_v60, %v12154_v56  ;;  %v1155_v62 = vpop.f32.mrf.mxu0  ;;  %12158 = vst [vmem:[#allocation36_spill] sm:$0xff] %v8257_v46  ;;  %v213_v55 = vld [vmem:[#allocation2 + $0x1a0] sm:$0xff]  ;;  %v8265_v56 = vsub.f32 %v238_v37, %v8209_v15  ;;  %v12164_v60 = vand.u32 4294901760, %v8165_v16  ;;  %v12166_v37 = vld [vmem:[#allocation107_spill] sm:$0xff] }
 0x1bf   : > { %12149 = vst [vmem:[#allocation67_spill] sm:$0xff] %v8232_v36  ;;  %2818 = vmatprep.subr.mxu0 %v12153_v51  ;;  %v8261_v51 = vld [vmem:[#allocation2 + $0x1a8] sm:$0xff]  ;;  %2953 = vmatprep.subr.mxu1 %v12162_v21  ;;  %12163 = vst [vmem:[#allocation80_spill] sm:$0xff] %v8272_v31  ;;  %v205_v21 = vld [vmem:[#allocation2 + $0x160] sm:$0xff]  ;;  %v8310_v32 = vsub.f32 %v230_v54, %v8259_v28  ;;  %v12179_v54 = vand.u32 4294901760, %v8240_v22 }
 0x1c0   : > { %12151 = vst [vmem:[#allocation34_spill] sm:$0xff] %v8237_v6  ;;  %12155 = vst [vmem:[#allocation71_spill] sm:$0xff] %v8251_v38  ;;  %2822 = vmatpush2.msra.mxu0 %v12157_v47  ;;  %v8277_v49 = vsub.f32 %v8165_v16, %v12164_v60  ;;  %2955 = vmatpush2.msra.mxu1 %v12166_v37  ;;  %v1559_v29 = vpop.f32.mrf.mxu0  ;;  %v12169_v60 = vand.u32 4294901760, %v7776_v7  ;;  %v206_v37 = vld [vmem:[#allocation2 + $0x168] sm:$0xff]  ;;  %v1296_v16 = vpop.f32.mrf.mxu1  ;;  %v12175_v7 = vand.u32 4294901760, %v8207_v63  ;;  %v10992_v20 = vand.u32 4294901760, %v8265_v56 }
 0x1c1   : > { %12160 = vst [vmem:[#allocation44_spill] sm:$0xff] %v8265_v56  ;;  %2826 = vmatprep.subr.mxu0 %v12161_v35  ;;  %v8283_v35 = vsub.f32 %v229_v50, %v8232_v36  ;;  %12168 = vst [vmem:[#allocation89_spill] sm:$0xff] %v8286_v57  ;;  %2957 = vmatprep.subr.mxu1 %v7657_v59  ;;  %v8297_v50 = vand.u32 4294901760, %v213_v55  ;;  %v12172_v6 = vld [vmem:[#allocation118_spill] sm:$0xff]  ;;  %v1156_v38 = vadd.f32 %v1155_v62, %v8201_v18  ;;  %v197_v18 = vld [vmem:[#allocation2 + $0x120] sm:$0xff] }
 0x1c2   : > { %2830 = vmatpush2.msra.mxu0 %v12165_v19  ;;  %v8295_v19 = vand.u32 4294901760, %v8261_v51  ;;  %v12173_v47 = vand.u32 4294901760, %v12172_v6  ;;  %v8305_v59 = vsub.f32 %v8207_v63, %v12175_v7  ;;  %12176 = vst [vmem:[#allocation90_spill] sm:$0xff] %v8310_v32  ;;  %v1295_v36 = vadd.f32 %v1294_v27, %v1154_v48  ;;  %2959 = vmatpush2.msra.mxu1 %v7648_v34  ;;  %v12177_v6 = vld [vmem:[#allocation93_spill] sm:$0xff]  ;;  %v190_v63 = vld [vmem:[#allocation2 + $0xe8] sm:$0xff] }
 0x1c3   : > { %12167 = vst [vmem:[#allocation79_spill] sm:$0xff] %v8283_v35  ;;  %2834 = vmatprep.subr.mxu0 %v12169_v60  ;;  %12171 = vst [vmem:[#allocation92_spill] sm:$0xff] %v8297_v50  ;;  %2961 = vmatprep.subr.mxu1 %v7680_v41  ;;  %v1561_v60 = vpop.f32.mrf.mxu0  ;;  %v8325_v62 = vsub.f32 %v8240_v22, %v12179_v54  ;;  %v8327_v48 = vand.u32 4294901760, %v206_v37  ;;  %v8329_v34 = vand.u32 4294901760, %v205_v21  ;;  %v8361_v54 = vand.u32 4294901760, %v197_v18 }
 0x1c4   : > { %12170 = vst [vmem:[#allocation85_spill] sm:$0xff] %v8295_v19  ;;  %2838 = vmatpush2.msra.mxu0 %v12173_v47  ;;  %v8317_v47 = vsub.f32 %v221_v17, %v8272_v31  ;;  %v8332_v17 = vsub.f32 %v222_v5, %v8286_v57  ;;  %v1297_v27 = vadd.f32 %v1296_v16, %v1156_v38  ;;  %v1696_v16 = vpop.f32.mrf.mxu1  ;;  %v181_v38 = vld [vmem:[#allocation2 + $0xa0] sm:$0xff] }
 0x1c5   : > { %2842 = vmatmul.mubr.f32.vlgmr.msra.gmra.mxu0 %v12177_v6  ;;  %2986 = vmatprep.subr.mxu0 %v8069_v30  ;;  %12180 = vst [vmem:[#allocation100_spill] sm:$0xff] %v8327_v48  ;;  %12181 = vst [vmem:[#allocation78_spill] sm:$0xff] %v8329_v34  ;;  %v1560_v7 = vadd.f32 %v1559_v29, %v1295_v36  ;;  %v8337_v41 = vsub.f32 %v213_v55, %v8297_v50  ;;  %v12184_v36 = vand.u32 4294901760, %v8257_v46 }
 0x1c6   : > { %12178 = vst [vmem:[#allocation76_spill] sm:$0xff] %v8317_v47  ;;  %12182 = vst [vmem:[#allocation104_spill] sm:$0xff] %v8332_v17  ;;  %2963 = vmatpush2.msra.mxu1 %v7683_v9  ;;  %2988 = vmatpush1.msra.mxu0 %v8074_v44  ;;  %v8351_v9 = vsub.f32 %v8265_v56, %v10992_v20  ;;  %v1562_v29 = vadd.f32 %v1561_v60, %v1297_v27  ;;  %v189_v20 = vld [vmem:[#allocation2 + $0xe0] sm:$0xff] }
 0x1c7   : > { %12183 = vst [vmem:[#allocation5_spill] sm:$0xff] %v8337_v41  ;;  %2965 = vmatprep.subr.mxu1 %v7707_v8  ;;  %2990 = vmatprep.subr.mxu0 %v8079_v0  ;;  %v8356_v55 = vsub.f32 %v8257_v46, %v12184_v36  ;;  %v198_v8 = vld [vmem:[#allocation2 + $0x128] sm:$0xff]  ;;  %v1697_v5 = vadd.f32 %v1696_v16, %v1560_v7  ;;  %12185 = vst [vmem:[#allocation68_spill] sm:$0xff] %v8361_v54  ;;  %v1698_v36 = vpop.f32.mrf.mxu1  ;;  %v12189_v16 = vand.u32 4294901760, %v8283_v35 }
 0x1c8   : > { %2967 = vmatpush2.msra.mxu1 %v7699_v2  ;;  %2992 = vmatpush1.msra.mxu0 %v8081_v24  ;;  %v8365_v56 = vsub.f32 %v8261_v51, %v8295_v19  ;;  %v8371_v2 = vsub.f32 %v205_v21, %v8329_v34  ;;  %v1699_v51 = vadd.f32 %v1698_v36, %v1562_v29  ;;  %v8385_v21 = vld [vmem:[#allocation2 + $0xa8] sm:$0xff]  ;;  %v8397_v29 = vand.u32 4294901760, %v190_v63 }
 0x1c9   : > { %2969 = vmatprep.subr.mxu1 %v7725_v53  ;;  %2994 = vmatprep.subr.mxu0 %v8083_v11  ;;  %5553 = vst [vmem:[%s8345_s26] sm:$0xff] %v1697_v5  ;;  %v8378_v53 = vand.u32 4294901760, %v198_v8  ;;  %v8383_v60 = vsub.f32 %v8283_v35, %v12189_v16  ;;  %v8388_v7 = vsub.f32 %v206_v37, %v8327_v48  ;;  %v8399_v36 = vand.u32 4294901760, %v189_v20  ;;  %v173_v35 = vld [vmem:[#allocation2 + $0x60] sm:$0xff] }
 0x1ca   : > { %12186 = vst [vmem:[#allocation23_spill] sm:$0xff] %v8365_v56  ;;  %12187 = vst [vmem:[#allocation6_spill] sm:$0xff] %v8371_v2  ;;  %2971 = vmatpush2.msra.mxu1 %v7735_v4  ;;  %2996 = vmatpush1.msra.mxu0 %v8091_v25  ;;  %v12191_v4 = vand.u32 4294901760, %v8310_v32  ;;  %v8408_v27 = vsub.f32 %v197_v18, %v8361_v54  ;;  %v12195_v16 = vand.u32 4294901760, %v8332_v17  ;;  %v8424_v37 = vand.u32 4294901760, %v8385_v21 }
 0x1cb   : > { %12188 = vst [vmem:[#allocation82_spill] sm:$0xff] %v8378_v53  ;;  %12190 = vst [vmem:[#allocation25_spill] sm:$0xff] %v8388_v7  ;;  %2973 = vmatprep.subr.mxu1 %v7742_v52  ;;  %2998 = vmatprep.subr.mxu0 %v8093_v43  ;;  %v8426_v18 = vand.u32 4294901760, %v181_v38  ;;  %v166_v43 = vld [vmem:[#allocation2 + $0x28] sm:$0xff] }
 0x1cc   : > { %v8395_v5 = vsub.f32 %v8310_v32, %v12191_v4  ;;  %12192 = vst [vmem:[#allocation31_spill] sm:$0xff] %v8397_v29  ;;  %12193 = vst [vmem:[#allocation7_spill] sm:$0xff] %v8399_v36  ;;  %2975 = vmatpush2.msra.mxu1 %v7752_v13  ;;  %2977 = vmatprep.mubr.f32.mxu1 %v12174_v40  ;;  %v8416_v13 = vsub.f32 %v8332_v17, %v12195_v16  ;;  %v174_v4 = vld [vmem:[#allocation2 + $0x68] sm:$0xff]  ;;  %v12201_v32 = vand.u32 4294901760, %v8177_v10 }
 0x1cd   : > { %5554 = vst [vmem:[%s8345_s26 + $0x8] sm:$0xff] %v1699_v51  ;;  %12194 = vst [vmem:[#allocation29_spill] sm:$0xff] %v8408_v27  ;;  %3000 = vmatpush1.msra.mxu0 %v8104_v14  ;;  %2979 = vmatmul.mubr.f32.vlgmr.msra.gmra.mxu1 %v12177_v6  ;;  %v12196_v51 = vand.u32 4294901760, %v8317_v47  ;;  %v12199_v14 = vand.u32 4294901760, %v8162_v45  ;;  %v8442_v45 = vsub.f32 %v189_v20, %v8399_v36  ;;  %v12205_v17 = vand.u32 4294901760, %v8188_v33 }
 0x1ce   : > { %12197 = vst [vmem:[#allocation27_spill] sm:$0xff] %v8424_v37  ;;  %12198 = vst [vmem:[#allocation11_spill] sm:$0xff] %v8426_v18  ;;  %3002 = vmatprep.subr.mxu0 %v8112_v3  ;;  %v12206_v10 = vand.u32 4294901760, %v8365_v56  ;;  %v8460_v20 = vand.u32 4294901760, %v174_v4  ;;  %v8462_v3 = vand.u32 4294901760, %v173_v35  ;;  %v8488_v33 = vand.u32 4294901760, %v166_v43  ;;  %3515 = vmatprep.mubr.f32.mxu1 %v12174_v40 }
 0x1cf   : > { %v8421_v52 = vsub.f32 %v8317_v47, %v12196_v51  ;;  %3135 = vmatprep.subr.mxu1 %v12199_v14  ;;  %v8435_v51 = vsub.f32 %v198_v8, %v8378_v53  ;;  %v165_v47 = vld [vmem:[#allocation2 + $0x20] sm:$0xff]  ;;  %3004 = vmatpush1.msra.mxu0 %v8130_v39  ;;  %12202 = vst [vmem:[#allocation39_spill] sm:$0xff] %v8442_v45  ;;  %v12203_v14 = vand.u32 4294901760, %v8337_v41  ;;  %v12360_v40 = vld [vmem:[#allocation86_spill] sm:$0xff] }
 0x1d0   : > { %3141 = vmatpush1.msra.mxu1 %v12201_v32  ;;  %v8450_v8 = vsub.f32 %v190_v63, %v8397_v29  ;;  %3006 = vmatprep.subr.mxu0 %v8179_v42  ;;  %v8458_v32 = vsub.f32 %v8365_v56, %v12206_v10  ;;  %12207 = vst [vmem:[#allocation37_spill] sm:$0xff] %v8460_v20  ;;  %12208 = vst [vmem:[#allocation56_spill] sm:$0xff] %v8462_v3  ;;  %v12209_v63 = vand.u32 4294901760, %v8193_v58  ;;  %v413_v56 = vld [vmem:[#allocation2 + $0x7e0] sm:$0xff] }
 0x1d1   : > { %12200 = vst [vmem:[#allocation50_spill] sm:$0xff] %v8435_v51  ;;  %v8447_v16 = vsub.f32 %v8337_v41, %v12203_v14  ;;  %3147 = vmatprep.subr.mxu1 %v12205_v17  ;;  %3008 = vmatpush1.msra.mxu0 %v8154_v26  ;;  %v8471_v17 = vsub.f32 %v181_v38, %v8426_v18  ;;  %v8473_v10 = vand.u32 4294901760, %v165_v47  ;;  %v12212_v42 = vand.u32 4294901760, %v8198_v61  ;;  %v414_v41 = vld [vmem:[#allocation2 + $0x7e8] sm:$0xff]  ;;  %v397_v39 = vld [vmem:[#allocation2 + $0x760] sm:$0xff] }
 0x1d2   : > { %12204 = vst [vmem:[#allocation58_spill] sm:$0xff] %v8450_v8  ;;  %3153 = vmatpush1.msra.mxu1 %v12209_v63  ;;  %3010 = vmatprep.subr.mxu0 %v8209_v15  ;;  %v12213_v14 = vand.u32 4294901760, %v8388_v7  ;;  %v12214_v58 = vand.u32 4294901760, %v8371_v2  ;;  %12215 = vst [vmem:[#allocation66_spill] sm:$0xff] %v8488_v33  ;;  %v12216_v61 = vand.u32 4294901760, %v8220_v1  ;;  %v12218_v38 = vand.u32 4294901760, %v8225_v12 }
 0x1d3   : > { %12210 = vst [vmem:[#allocation15_spill] sm:$0xff] %v8471_v17  ;;  %12211 = vst [vmem:[#allocation41_spill] sm:$0xff] %v8473_v10  ;;  %3159 = vmatprep.subr.mxu1 %v12212_v42  ;;  %3012 = vmatpush1.msra.mxu0 %v8211_v23  ;;  %v8506_v1 = vsub.f32 %v173_v35, %v8462_v3  ;;  %v8514_v15 = vsub.f32 %v174_v4, %v8460_v20  ;;  %v8524_v35 = vand.u32 4294901760, %v413_v56  ;;  %v406_v23 = vld [vmem:[#allocation2 + $0x7a8] sm:$0xff] }
 0x1d4   : > { %v8481_v26 = vsub.f32 %v8388_v7, %v12213_v14  ;;  %v8486_v63 = vsub.f32 %v8371_v2, %v12214_v58  ;;  %3165 = vmatpush1.msra.mxu1 %v12216_v61  ;;  %v8499_v58 = vsub.f32 %v8385_v21, %v8424_v37  ;;  %v405_v2 = vld [vmem:[#allocation2 + $0x7a0] sm:$0xff]  ;;  %3014 = vmatprep.subr.mxu0 %v8259_v28  ;;  %v12220_v61 = vand.u32 4294901760, %v8408_v27  ;;  %v12222_v21 = vld [vmem:[#allocation67_spill] sm:$0xff]  ;;  %v12223_v14 = vld [vmem:[#allocation34_spill] sm:$0xff] }
 0x1d5   : > { %3171 = vmatprep.subr.mxu1 %v12218_v38  ;;  %12219 = vst [vmem:[#allocation45_spill] sm:$0xff] %v8506_v1  ;;  %12221 = vst [vmem:[#allocation70_spill] sm:$0xff] %v8514_v15  ;;  %3016 = vmatpush1.msra.mxu0 %v12222_v21  ;;  %v12224_v28 = vand.u32 4294901760, %v12223_v14  ;;  %v8520_v12 = vsub.f32 %v165_v47, %v8473_v10  ;;  %v8522_v38 = vand.u32 4294901760, %v414_v41  ;;  %v12232_v7 = vand.u32 4294901760, %v8277_v49 }
 0x1d6   : > { %12217 = vst [vmem:[#allocation47_spill] sm:$0xff] %v8499_v58  ;;  %v8511_v42 = vsub.f32 %v8408_v27, %v12220_v61  ;;  %12227 = vst [vmem:[#allocation8_spill] sm:$0xff] %v8524_v35  ;;  %3018 = vmatprep.subr.mxu0 %v8286_v57  ;;  %v12228_v61 = vld [vmem:[#allocation71_spill] sm:$0xff]  ;;  %v8537_v27 = vand.u32 4294901760, %v405_v2  ;;  %v12234_v14 = vand.u32 4294901760, %v8442_v45  ;;  %v398_v57 = vld [vmem:[#allocation2 + $0x768] sm:$0xff] }
 0x1d7   : > { %3177 = vmatpush1.msra.mxu1 %v12224_v28  ;;  %12225 = vst [vmem:[#allocation19_spill] sm:$0xff] %v8520_v12  ;;  %12226 = vst [vmem:[#allocation49_spill] sm:$0xff] %v8522_v38  ;;  %v12229_v4 = vand.u32 4294901760, %v12228_v61  ;;  %v12230_v28 = vand.u32 4294901760, %v8435_v51  ;;  %3020 = vmatpush1.msra.mxu0 %v8272_v31  ;;  %v12233_v61 = vand.u32 4294901760, %v8450_v8  ;;  %v12236_v49 = vand.u32 4294901760, %v8325_v62 }
 0x1d8   : > { %12231 = vst [vmem:[#allocation55_spill] sm:$0xff] %v8537_v27  ;;  %v8550_v21 = vsub.f32 %v8442_v45, %v12234_v14  ;;  %3022 = vmatprep.subr.mxu0 %v8295_v19  ;;  %v12240_v19 = vand.u32 4294901760, %v8471_v17  ;;  %v389_v45 = vld [vmem:[#allocation2 + $0x720] sm:$0xff]  ;;  %v8578_v31 = vsub.f32 %v414_v41, %v8522_v38  ;;  %v8587_v14 = vand.u32 4294901760, %v398_v57 }
 0x1d9   : > { %3183 = vmatprep.subr.mxu1 %v12229_v4  ;;  %v8535_v47 = vsub.f32 %v8435_v51, %v12230_v28  ;;  %v8545_v4 = vsub.f32 %v8450_v8, %v12233_v61  ;;  %v8554_v51 = vsub.f32 %v166_v43, %v8488_v33  ;;  %v8560_v61 = vand.u32 4294901760, %v406_v23  ;;  %3024 = vmatpush1.msra.mxu0 %v8297_v50 }
 0x1da   : > { %3189 = vmatpush1.msra.mxu1 %v12232_v7  ;;  %v12238_v28 = vand.u32 4294901760, %v8305_v59  ;;  %v8568_v43 = vsub.f32 %v413_v56, %v8524_v35  ;;  %v8573_v62 = vsub.f32 %v8471_v17, %v12240_v19  ;;  %v390_v7 = vld [vmem:[#allocation2 + $0x728] sm:$0xff]  ;;  %12242 = vst [vmem:[#allocation12_spill] sm:$0xff] %v8578_v31  ;;  %3026 = vmatprep.subr.mxu0 %v8327_v48  ;;  %v12243_v59 = vand.u32 4294901760, %v8351_v9  ;;  %v381_v17 = vld [vmem:[#allocation2 + $0x6e0] sm:$0xff] }
 0x1db   : > { %12235 = vst [vmem:[#allocation10_spill] sm:$0xff] %v8554_v51  ;;  %3195 = vmatprep.subr.mxu1 %v12236_v49  ;;  %12237 = vst [vmem:[#allocation53_spill] sm:$0xff] %v8560_v61  ;;  %v8575_v49 = vand.u32 4294901760, %v397_v39  ;;  %3028 = vmatpush1.msra.mxu0 %v8329_v34  ;;  %v12246_v50 = vand.u32 4294901760, %v8356_v55  ;;  %v12247_v9 = vand.u32 4294901760, %v8499_v58  ;;  %v382_v56 = vld [vmem:[#allocation2 + $0x6e8] sm:$0xff]  ;;  %v8627_v34 = vsub.f32 %v406_v23, %v8560_v61 }
 0x1dc   : > { %3201 = vmatpush1.msra.mxu1 %v12238_v28  ;;  %12239 = vst [vmem:[#allocation24_spill] sm:$0xff] %v8568_v43  ;;  %v8585_v28 = vsub.f32 %v405_v2, %v8537_v27  ;;  %12245 = vst [vmem:[#allocation61_spill] sm:$0xff] %v8587_v14  ;;  %3030 = vmatprep.subr.mxu0 %v8378_v53  ;;  %v12248_v19 = vand.u32 4294901760, %v8395_v5  ;;  %v12250_v48 = vand.u32 4294901760, %v8506_v1  ;;  %v8616_v2 = vand.u32 4294901760, %v389_v45 }
 0x1dd   : > { %12241 = vst [vmem:[#allocation57_spill] sm:$0xff] %v8575_v49  ;;  %3207 = vmatprep.subr.mxu1 %v12243_v59  ;;  %v8598_v59 = vsub.f32 %v8499_v58, %v12247_v9  ;;  %v8614_v9 = vand.u32 4294901760, %v390_v7  ;;  %3032 = vmatpush1.msra.mxu0 %v8361_v54  ;;  %v12253_v53 = vand.u32 4294901760, %v8383_v60  ;;  %12255 = vst [vmem:[#allocation16_spill] sm:$0xff] %v8627_v34  ;;  %v12257_v54 = vand.u32 4294901760, %v8520_v12 }
 0x1de   : > { %12244 = vst [vmem:[#allocation30_spill] sm:$0xff] %v8585_v28  ;;  %3213 = vmatpush1.msra.mxu1 %v12246_v50  ;;  %v12249_v50 = vand.u32 4294901760, %v8514_v15  ;;  %v8612_v41 = vsub.f32 %v8506_v1, %v12250_v48  ;;  %12252 = vst [vmem:[#allocation32_spill] sm:$0xff] %v8616_v2  ;;  %v373_v48 = vld [vmem:[#allocation2 + $0x6a0] sm:$0xff]  ;;  %3034 = vmatprep.subr.mxu0 %v8397_v29  ;;  %v12256_v1 = vand.u32 4294901760, %v8416_v13  ;;  %v12260_v23 = vand.u32 4294901760, %v8421_v52 }
 0x1df   : > { %3219 = vmatprep.subr.mxu1 %v12248_v19  ;;  %12251 = vst [vmem:[#allocation13_spill] sm:$0xff] %v8614_v9  ;;  %v8623_v19 = vsub.f32 %v397_v39, %v8575_v49  ;;  %v8635_v60 = vsub.f32 %v8520_v12, %v12257_v54  ;;  %v8639_v39 = vand.u32 4294901760, %v381_v17  ;;  %3036 = vmatpush1.msra.mxu0 %v8399_v36  ;;  %v3290_v13 = vand.u32 4294901760, %v8598_v59  ;;  %v365_v52 = vld [vmem:[#allocation2 + $0x660] sm:$0xff] }
 0x1e0   : > { %v8607_v55 = vsub.f32 %v8514_v15, %v12249_v50  ;;  %3225 = vmatpush1.msra.mxu1 %v12253_v53  ;;  %v8637_v53 = vand.u32 4294901760, %v382_v56  ;;  %v374_v50 = vld [vmem:[#allocation2 + $0x6a8] sm:$0xff]  ;;  %v8653_v12 = vsub.f32 %v398_v57, %v8587_v14  ;;  %3038 = vmatprep.subr.mxu0 %v8424_v37  ;;  %v12263_v5 = vand.u32 4294901760, %v8458_v32 }
 0x1e1   : > { %12254 = vst [vmem:[#allocation65_spill] sm:$0xff] %v8623_v19  ;;  %3231 = vmatprep.subr.mxu1 %v12256_v1  ;;  %12259 = vst [vmem:[#allocation18_spill] sm:$0xff] %v8639_v39  ;;  %v12261_v1 = vand.u32 4294901760, %v8554_v51  ;;  %v8661_v59 = vsub.f32 %v389_v45, %v8616_v2  ;;  %v8663_v36 = vand.u32 4294901760, %v373_v48  ;;  %3040 = vmatpush1.msra.mxu0 %v8426_v18  ;;  %v12267_v57 = vand.u32 4294901760, %v8578_v31 }
 0x1e2   : > { %12258 = vst [vmem:[#allocation38_spill] sm:$0xff] %v8637_v53  ;;  %3237 = vmatpush1.msra.mxu1 %v12260_v23  ;;  %12262 = vst [vmem:[#allocation69_spill] sm:$0xff] %v8653_v12  ;;  %v8673_v32 = vand.u32 4294901760, %v374_v50  ;;  %v366_v23 = vld [vmem:[#allocation2 + $0x668] sm:$0xff]  ;;  %v8677_v45 = vsub.f32 %v390_v7, %v8614_v9  ;;  %3042 = vmatprep.subr.mxu0 %v8460_v20  ;;  %v12270_v18 = vand.u32 4294901760, %v8481_v26  ;;  %v12274_v7 = vand.u32 4294901760, %v8486_v63 }
 0x1e3   : > { %v8649_v29 = vsub.f32 %v8554_v51, %v12261_v1  ;;  %3243 = vmatprep.subr.mxu1 %v12263_v5  ;;  %12264 = vst [vmem:[#allocation40_spill] sm:$0xff] %v8661_v59  ;;  %12265 = vst [vmem:[#allocation73_spill] sm:$0xff] %v8663_v36  ;;  %v12266_v1 = vand.u32 4294901760, %v8447_v16  ;;  %v8671_v54 = vsub.f32 %v8578_v31, %v12267_v57  ;;  %v12272_v57 = vand.u32 4294901760, %v8568_v43  ;;  %v358_v20 = vld [vmem:[#allocation2 + $0x628] sm:$0xff] }
 0x1e4   : > { %12268 = vst [vmem:[#allocation20_spill] sm:$0xff] %v8673_v32  ;;  %12269 = vst [vmem:[#allocation81_spill] sm:$0xff] %v8677_v45  ;;  %v8692_v5 = vsub.f32 %v382_v56, %v8637_v53  ;;  %3044 = vmatpush1.msra.mxu0 %v8462_v3  ;;  %v12276_v56 = vand.u32 4294901760, %v8535_v47  ;;  %v8709_v63 = vsub.f32 %v373_v48, %v8663_v36  ;;  %v349_v3 = vld [vmem:[#allocation2 + $0x5e0] sm:$0xff]  ;;  %v12286_v48 = vand.u32 4294901760, %v8550_v21 }
 0x1e5   : > { %3249 = vmatpush1.msra.mxu1 %v12266_v1  ;;  %v8684_v1 = vsub.f32 %v381_v17, %v8639_v39  ;;  %v8689_v37 = vsub.f32 %v8568_v43, %v12272_v57  ;;  %v3314_v26 = vand.u32 4294901760, %v8649_v29  ;;  %v357_v43 = vld [vmem:[#allocation2 + $0x620] sm:$0xff]  ;;  %3046 = vmatprep.subr.mxu0 %v8488_v33  ;;  %v8711_v29 = vand.u32 4294901760, %v366_v23 }
 0x1e6   : > { %3255 = vmatprep.subr.mxu1 %v12270_v18  ;;  %12273 = vst [vmem:[#allocation75_spill] sm:$0xff] %v8692_v5  ;;  %v12275_v18 = vand.u32 4294901760, %v8585_v28  ;;  %12277 = vst [vmem:[#allocation21_spill] sm:$0xff] %v8709_v63  ;;  %3048 = vmatpush1.msra.mxu0 %v8473_v10  ;;  %v12280_v57 = vand.u32 4294901760, %v8511_v42  ;;  %v3326_v16 = vand.u32 4294901760, %v8671_v54  ;;  %v12281_v33 = vand.u32 4294901760, %v8627_v34 }
 0x1e7   : > { %12271 = vst [vmem:[#allocation22_spill] sm:$0xff] %v8684_v1  ;;  %3261 = vmatpush1.msra.mxu1 %v12274_v7  ;;  %12278 = vst [vmem:[#allocation87_spill] sm:$0xff] %v8711_v29  ;;  %v8713_v7 = vand.u32 4294901760, %v365_v52  ;;  %3050 = vmatprep.subr.mxu0 %v8522_v38  ;;  %v3332_v42 = vand.u32 4294901760, %v8689_v37  ;;  %v8733_v54 = vand.u32 4294901760, %v358_v20  ;;  %v12287_v38 = vand.u32 4294901760, %v8653_v12 }
 0x1e8   : > { %v8701_v17 = vsub.f32 %v8585_v28, %v12275_v18  ;;  %3267 = vmatprep.subr.mxu1 %v12276_v56  ;;  %v8723_v47 = vsub.f32 %v8627_v34, %v12281_v33  ;;  %v350_v56 = vld [vmem:[#allocation2 + $0x5e8] sm:$0xff]  ;;  %v8727_v28 = vsub.f32 %v374_v50, %v8673_v32  ;;  %v12283_v18 = vand.u32 4294901760, %v8545_v4  ;;  %3052 = vmatpush2.msra.mxu0 %v8524_v35 }
 0x1e9   : > { %12279 = vst [vmem:[#allocation83_spill] sm:$0xff] %v8713_v7  ;;  %3273 = vmatpush1.msra.mxu1 %v12280_v57  ;;  %12284 = vst [vmem:[#allocation97_spill] sm:$0xff] %v8733_v54  ;;  %v8735_v57 = vand.u32 4294901760, %v357_v43  ;;  %v8745_v4 = vsub.f32 %v8653_v12, %v12287_v38  ;;  %v12288_v37 = vand.u32 4294901760, %v8623_v19  ;;  %3054 = vmatprep.subr.mxu0 %v8560_v61  ;;  %v8762_v38 = vand.u32 4294901760, %v350_v56  ;;  %v342_v35 = vld [vmem:[#allocation2 + $0x5a8] sm:$0xff] }
 0x1ea   : > { %12282 = vst [vmem:[#allocation26_spill] sm:$0xff] %v8727_v28  ;;  %3279 = vmatprep.subr.mxu1 %v12283_v18  ;;  %v8755_v21 = vsub.f32 %v365_v52, %v8713_v7  ;;  %v8764_v33 = vand.u32 4294901760, %v349_v3  ;;  %3056 = vmatpush2.msra.mxu0 %v8537_v27  ;;  %v12294_v52 = vand.u32 4294901760, %v8677_v45  ;;  %v8777_v61 = vsub.f32 %v366_v23, %v8711_v29  ;;  %v334_v27 = vld [vmem:[#allocation2 + $0x568] sm:$0xff] }
 0x1eb   : > { %12285 = vst [vmem:[#allocation88_spill] sm:$0xff] %v8735_v57  ;;  %3285 = vmatpush1.msra.mxu1 %v12286_v48  ;;  %v8750_v18 = vsub.f32 %v8623_v19, %v12288_v37  ;;  %v12290_v48 = vand.u32 4294901760, %v8661_v59  ;;  %12291 = vst [vmem:[#allocation95_spill] sm:$0xff] %v8762_v38  ;;  %v12293_v37 = vand.u32 4294901760, %v8573_v62  ;;  %3058 = vmatprep.subr.mxu0 %v8587_v14  ;;  %v12300_v23 = vand.u32 4294901760, %v8612_v41 }
 0x1ec   : > { %3291 = vmatprep.subr.mxu1 %v3290_v13  ;;  %12289 = vst [vmem:[#allocation101_spill] sm:$0xff] %v8755_v21  ;;  %12292 = vst [vmem:[#allocation105_spill] sm:$0xff] %v8764_v33  ;;  %v3338_v13 = vand.u32 4294901760, %v8723_v47  ;;  %v8773_v10 = vsub.f32 %v8677_v45, %v12294_v52  ;;  %v8783_v62 = vsub.f32 %v357_v43, %v8735_v57  ;;  %v12298_v47 = vand.u32 4294901760, %v8692_v5  ;;  %v341_v52 = vld [vmem:[#allocation2 + $0x5a0] sm:$0xff] }
 0x1ed   : > { %v8760_v50 = vsub.f32 %v8661_v59, %v12290_v48  ;;  %3297 = vmatpush1.msra.mxu1 %v12293_v37  ;;  %12295 = vst [vmem:[#allocation74_spill] sm:$0xff] %v8777_v61  ;;  %v12296_v59 = vand.u32 4294901760, %v8607_v55  ;;  %v8792_v48 = vsub.f32 %v358_v20, %v8733_v54  ;;  %3060 = vmatpush2.msra.mxu0 %v8575_v49  ;;  %v3350_v55 = vand.u32 4294901760, %v8745_v4 }
 0x1ee   : > { %12297 = vst [vmem:[#allocation110_spill] sm:$0xff] %v8783_v62  ;;  %v8788_v37 = vsub.f32 %v8692_v5, %v12298_v47  ;;  %v3356_v43 = vand.u32 4294901760, %v8750_v18  ;;  %v8804_v14 = vand.u32 4294901760, %v342_v35  ;;  %3062 = vmatprep.subr.mxu0 %v8614_v9  ;;  %v8809_v41 = vsub.f32 %v349_v3, %v8764_v33  ;;  %v325_v18 = vld [vmem:[#allocation2 + $0x520] sm:$0xff] }
 0x1ef   : > { %3303 = vmatprep.subr.mxu1 %v12296_v59  ;;  %12299 = vst [vmem:[#allocation106_spill] sm:$0xff] %v8792_v48  ;;  %v12301_v59 = vand.u32 4294901760, %v8684_v1  ;;  %v3368_v20 = vand.u32 4294901760, %v8760_v50  ;;  %v8813_v49 = vsub.f32 %v350_v56, %v8762_v38  ;;  %3064 = vmatpush2.msra.mxu0 %v8616_v2  ;;  %v3362_v9 = vand.u32 4294901760, %v8773_v10  ;;  %v317_v2 = vld [vmem:[#allocation2 + $0x4e0] sm:$0xff] }
 0x1f0   : > { %3309 = vmatpush1.msra.mxu1 %v12300_v23  ;;  %12302 = vst [vmem:[#allocation111_spill] sm:$0xff] %v8809_v41  ;;  %v333_v23 = vld [vmem:[#allocation2 + $0x560] sm:$0xff]  ;;  %v8824_v3 = vand.u32 4294901760, %v341_v52  ;;  %3066 = vmatprep.subr.mxu0 %v8637_v53  ;;  %v3374_v56 = vand.u32 4294901760, %v8788_v37  ;;  %v8834_v10 = vand.u32 4294901760, %v334_v27  ;;  %v318_v53 = vld [vmem:[#allocation2 + $0x4e8] sm:$0xff] }
 0x1f1   : > { %v8802_v47 = vsub.f32 %v8684_v1, %v12301_v59  ;;  %3315 = vmatprep.subr.mxu1 %v3314_v26  ;;  %12303 = vst [vmem:[#allocation108_spill] sm:$0xff] %v8813_v49  ;;  %v12304_v59 = vand.u32 4294901760, %v8635_v60  ;;  %v12305_v26 = vand.u32 4294901760, %v8727_v28  ;;  %v326_v1 = vld [vmem:[#allocation2 + $0x528] sm:$0xff]  ;;  %v12307_v60 = vand.u32 4294901760, %v8709_v63  ;;  %3068 = vmatpush2.msra.mxu0 %v8639_v39 }
 0x1f2   : > { %12306 = vst [vmem:[#allocation113_spill] sm:$0xff] %v8824_v3  ;;  %12308 = vst [vmem:[#allocation112_spill] sm:$0xff] %v8834_v10  ;;  %3070 = vmatprep.subr.mxu0 %v8673_v32  ;;  %v12312_v37 = vand.u32 4294901760, %v8701_v17 }
 0x1f3   : > { %3321 = vmatpush1.msra.mxu1 %v12304_v59  ;;  %v8822_v50 = vsub.f32 %v8727_v28, %v12305_v26  ;;  %v8832_v59 = vsub.f32 %v8709_v63, %v12307_v60  ;;  %v3380_v4 = vand.u32 4294901760, %v8802_v47  ;;  %v8839_v28 = vand.u32 4294901760, %v333_v23  ;;  %3072 = vmatpush2.msra.mxu0 %v8663_v36  ;;  %v309_v36 = vld [vmem:[#allocation2 + $0x4a0] sm:$0xff] }
 0x1f4   : > { %3327 = vmatprep.subr.mxu1 %v3326_v16  ;;  %v8841_v16 = vand.u32 4294901760, %v325_v18  ;;  %v12310_v60 = vand.u32 4294901760, %v8755_v21  ;;  %v8850_v63 = vand.u32 4294901760, %v326_v1  ;;  %v8854_v47 = vsub.f32 %v342_v35, %v8804_v14  ;;  %3074 = vmatprep.subr.mxu0 %v8711_v29 }
 0x1f5   : > { %3333 = vmatpush2.msra.mxu1 %v3332_v42  ;;  %12309 = vst [vmem:[#allocation115_spill] sm:$0xff] %v8839_v28  ;;  %v3386_v32 = vand.u32 4294901760, %v8822_v50  ;;  %v3392_v35 = vand.u32 4294901760, %v8832_v59  ;;  %v12315_v42 = vand.u32 4294901760, %v8792_v48  ;;  %v8875_v50 = vand.u32 4294901760, %v318_v53  ;;  %3076 = vmatpush2.msra.mxu0 %v8713_v7 }
 0x1f6   : > { %3339 = vmatprep.subr.mxu1 %v3338_v13  ;;  %v8848_v26 = vsub.f32 %v8755_v21, %v12310_v60  ;;  %12311 = vst [vmem:[#allocation114_spill] sm:$0xff] %v8854_v47  ;;  %v8861_v13 = vsub.f32 %v341_v52, %v8824_v3  ;;  %v12314_v60 = vand.u32 4294901760, %v8777_v61  ;;  %v8866_v21 = vand.u32 4294901760, %v317_v2  ;;  %v310_v52 = vld [vmem:[#allocation2 + $0x4a8] sm:$0xff]  ;;  %3078 = vmatprep.subr.mxu0 %v8733_v54  ;;  %v301_v54 = vld [vmem:[#allocation2 + $0x460] sm:$0xff] }
 0x1f7   : > { %3345 = vmatpush2.msra.mxu1 %v12312_v37  ;;  %v8873_v17 = vsub.f32 %v8792_v48, %v12315_v42  ;;  %v8878_v37 = vsub.f32 %v334_v27, %v8834_v10  ;;  %v12318_v59 = vand.u32 4294901760, %v8783_v62  ;;  %v8898_v48 = vsub.f32 %v326_v1, %v8850_v63  ;;  %3080 = vmatpush2.msra.mxu0 %v8735_v57  ;;  %v294_v57 = vld [vmem:[#allocation2 + $0x428] sm:$0xff] }
 0x1f8   : > { %12313 = vst [vmem:[#allocation117_spill] sm:$0xff] %v8861_v13  ;;  %v3397_v39 = vsub.f32 %v8777_v61, %v12314_v60  ;;  %3351 = vmatprep.subr.mxu1 %v3350_v55  ;;  %v8882_v60 = vsub.f32 %v333_v23, %v8839_v28  ;;  %v8885_v55 = vsub.f32 %v325_v18, %v8841_v16  ;;  %v3404_v27 = vand.u32 4294901760, %v8848_v26  ;;  %v302_v18 = vld [vmem:[#allocation2 + $0x468] sm:$0xff] }
 0x1f9   : > { %12316 = vst [vmem:[#allocation116_spill] sm:$0xff] %v8878_v37  ;;  %3357 = vmatpush2.msra.mxu1 %v3356_v43  ;;  %v3415_v42 = vsub.f32 %v8783_v62, %v12318_v59  ;;  %v12319_v43 = vand.u32 4294901760, %v8813_v49  ;;  %12320 = vst [vmem:[#allocation107_spill] sm:$0xff] %v8898_v48  ;;  %v8902_v29 = vsub.f32 %v317_v2, %v8866_v21  ;;  %3082 = vmatprep.subr.mxu0 %v8762_v38 }
 0x1fa   : > { %12317 = vst [vmem:[#allocation109_spill] sm:$0xff] %v8885_v55  ;;  %3363 = vmatprep.subr.mxu1 %v3362_v9  ;;  %v3398_v59 = vand.u32 4294901760, %v3397_v39  ;;  %v8904_v9 = vand.u32 4294901760, %v310_v52  ;;  %v8909_v7 = vand.u32 4294901760, %v309_v36  ;;  %v8913_v39 = vsub.f32 %v318_v53, %v8875_v50  ;;  %3084 = vmatpush2.msra.mxu0 %v8764_v33 }
 0x1fb   : > { %v3421_v23 = vsub.f32 %v8813_v49, %v12319_v43  ;;  %3369 = vmatpush2.msra.mxu1 %v3368_v20  ;;  %v3410_v43 = vand.u32 4294901760, %v8873_v17  ;;  %v3416_v2 = vand.u32 4294901760, %v3415_v42  ;;  %v12322_v20 = vand.u32 4294901760, %v8809_v41  ;;  %v293_v17 = vld [vmem:[#allocation2 + $0x420] sm:$0xff]  ;;  %3086 = vmatprep.subr.mxu0 %v8804_v14 }
 0x1fc   : > { %3375 = vmatprep.subr.mxu1 %v3374_v56  ;;  %12321 = vst [vmem:[#allocation118_spill] sm:$0xff] %v8913_v39  ;;  %v8919_v38 = vand.u32 4294901760, %v302_v18  ;;  %v12323_v53 = vand.u32 4294901760, %v8854_v47  ;;  %v8926_v33 = vand.u32 4294901760, %v301_v54  ;;  %3088 = vmatpush2.msra.mxu0 %v8824_v3  ;;  %v12324_v42 = vand.u32 4294901760, %v8861_v13 }
 0x1fd   : > { %3381 = vmatpush2.msra.mxu1 %v3380_v4  ;;  %v3427_v26 = vsub.f32 %v8809_v41, %v12322_v20  ;;  %v3422_v1 = vand.u32 4294901760, %v3421_v23  ;;  %v8933_v56 = vand.u32 4294901760, %v294_v57  ;;  %v8937_v23 = vsub.f32 %v310_v52, %v8904_v9  ;;  %3090 = vmatprep.subr.mxu0 %v8834_v10 }
 0x1fe   : > { %3387 = vmatprep.subr.mxu1 %v3386_v32  ;;  %v3433_v49 = vsub.f32 %v8854_v47, %v12323_v53  ;;  %v3439_v20 = vsub.f32 %v8861_v13, %v12324_v42  ;;  %v8941_v53 = vsub.f32 %v309_v36, %v8909_v7  ;;  %v12328_v4 = vand.u32 4294901760, %v8878_v37  ;;  %3092 = vmatpush2.msra.mxu0 %v8839_v28 }
 0x1ff   : > { %3393 = vmatpush2.msra.mxu1 %v3392_v35  ;;  %12325 = vst [vmem:[#allocation34_spill] sm:$0xff] %v8933_v56  ;;  %12326 = vst [vmem:[#allocation71_spill] sm:$0xff] %v8937_v23  ;;  %v8946_v3 = vand.u32 4294901760, %v293_v17  ;;  %v3428_v32 = vand.u32 4294901760, %v3427_v26  ;;  %v12330_v52 = vand.u32 4294901760, %v8882_v60  ;;  %3094 = vmatprep.subr.mxu0 %v8850_v63  ;;  %v12331_v42 = vand.u32 4294901760, %v8898_v48 }
 0x200   : > { %3399 = vmatprep.subr.mxu1 %v3398_v59  ;;  %12327 = vst [vmem:[#allocation119_spill] sm:$0xff] %v8941_v53  ;;  %v3445_v35 = vsub.f32 %v8878_v37, %v12328_v4  ;;  %v8954_v59 = vsub.f32 %v302_v18, %v8919_v38  ;;  %v3434_v36 = vand.u32 4294901760, %v3433_v49  ;;  %v8958_v4 = vsub.f32 %v301_v54, %v8926_v33 }
 0x201   : > { %12329 = vst [vmem:[#allocation120_spill] sm:$0xff] %v8946_v3  ;;  %3405 = vmatpush2.msra.mxu1 %v3404_v27  ;;  %v3451_v10 = vsub.f32 %v8882_v60, %v12330_v52  ;;  %v3457_v28 = vsub.f32 %v8898_v48, %v12331_v42  ;;  %3096 = vmatpush2.msra.mxu0 %v8841_v16  ;;  %v3440_v26 = vand.u32 4294901760, %v3439_v20  ;;  %v12332_v18 = vand.u32 4294901760, %v8885_v55 }
 0x202   : > { %3411 = vmatprep.subr.mxu1 %v3410_v43  ;;  %v8970_v49 = vsub.f32 %v294_v57, %v8933_v56  ;;  %3098 = vmatprep.subr.mxu0 %v8875_v50  ;;  %v3446_v54 = vand.u32 4294901760, %v3445_v35  ;;  %v8974_v42 = vsub.f32 %v293_v17, %v8946_v3  ;;  %v12334_v27 = vand.u32 4294901760, %v8913_v39 }
 0x203   : > { %3417 = vmatpush2.msra.mxu1 %v3416_v2  ;;  %v3463_v52 = vsub.f32 %v8885_v55, %v12332_v18  ;;  %3100 = vmatpush2.msra.mxu0 %v8866_v21  ;;  %v3452_v18 = vand.u32 4294901760, %v3451_v10  ;;  %v11133_v57 = vand.u32 4294901760, %v8954_v59  ;;  %v12335_v35 = vand.u32 4294901760, %v8902_v29 }
 0x204   : > { %3423 = vmatprep.subr.mxu1 %v3422_v1  ;;  %12333 = vst [vmem:[#allocation121_spill] sm:$0xff] %v8974_v42  ;;  %v3469_v2 = vsub.f32 %v8913_v39, %v12334_v27  ;;  %3102 = vmatprep.subr.mxu0 %v8904_v9  ;;  %v3458_v1 = vand.u32 4294901760, %v3457_v28  ;;  %v12336_v20 = vand.u32 4294901760, %v8937_v23  ;;  %v11139_v43 = vand.u32 4294901760, %v8974_v42 }
 0x205   : > { %3429 = vmatpush2.msra.mxu1 %v3428_v32  ;;  %v3475_v17 = vsub.f32 %v8902_v29, %v12335_v35  ;;  %3104 = vmatpush2.msra.mxu0 %v8909_v7  ;;  %v3464_v27 = vand.u32 4294901760, %v3463_v52  ;;  %v11138_v32 = vand.u32 4294901760, %v8970_v49 }
 0x206   : > { %3435 = vmatprep.subr.mxu1 %v3434_v36  ;;  %v3481_v10 = vsub.f32 %v8937_v23, %v12336_v20  ;;  %3106 = vmatprep.subr.mxu0 %v8919_v38  ;;  %v3470_v28 = vand.u32 4294901760, %v3469_v2  ;;  %v12337_v36 = vand.u32 4294901760, %v8941_v53 }
 0x207   : > { %3441 = vmatpush2.msra.mxu1 %v3440_v26  ;;  %3108 = vmatpush2.msra.mxu0 %v8926_v33  ;;  %v3493_v26 = vsub.f32 %v8954_v59, %v11133_v57  ;;  %v3476_v52 = vand.u32 4294901760, %v3475_v17  ;;  %v12340_v17 = vld [vmem:[#allocation54_spill] sm:$0xff] }
 0x208   : > { %3447 = vmatprep.subr.mxu1 %v3446_v54  ;;  %v3487_v35 = vsub.f32 %v8941_v53, %v12337_v36  ;;  %3110 = vmatprep.subr.mxu0 %v8933_v56  ;;  %v12338_v54 = vand.u32 4294901760, %v8958_v4  ;;  %v3482_v20 = vand.u32 4294901760, %v3481_v10  ;;  %v12339_v36 = vld [vmem:[#allocation102_spill] sm:$0xff]  ;;  %v12341_v56 = vld [vmem:[#allocation103_spill] sm:$0xff] }
 0x209   : > { %3453 = vmatpush2.msra.mxu1 %v3452_v18  ;;  %3112 = vmatpush2.msra.mxu0 %v8946_v3  ;;  %v3505_v18 = vsub.f32 %v8970_v49, %v11138_v32  ;;  %v12343_v3 = vld [vmem:[#allocation48_spill] sm:$0xff] }
 0x20a   : > { %3459 = vmatprep.subr.mxu1 %v3458_v1  ;;  %v3499_v2 = vsub.f32 %v8958_v4, %v12338_v54  ;;  %3118 = vmatprep.mubr.f32.mxu0 %v12339_v36  ;;  %v3488_v57 = vand.u32 4294901760, %v3487_v35  ;;  %v3511_v1 = vsub.f32 %v8974_v42, %v11139_v43  ;;  %v3494_v54 = vand.u32 4294901760, %v3493_v26  ;;  %v12345_v36 = vld [vmem:[#allocation33_spill] sm:$0xff]  ;;  %v12346_v43 = vld [vmem:[#allocation64_spill] sm:$0xff] }
 0x20b   : > { %3465 = vmatpush2.msra.mxu1 %v3464_v27  ;;  %3525 = vmatprep.subr.mxu0 %v12340_v17  ;;  %v12342_v27 = vld [vmem:[#allocation62_spill] sm:$0xff]  ;;  %v3506_v32 = vand.u32 4294901760, %v3505_v18  ;;  %v12347_v26 = vld [vmem:[#allocation9_spill] sm:$0xff] }
 0x20c   : > { %3471 = vmatprep.subr.mxu1 %v3470_v28  ;;  %3124 = vmatmul.mubr.f32.vlgmr.msra.gmra.mxu0 %v12341_v56  ;;  %v3500_v10 = vand.u32 4294901760, %v3499_v2  ;;  %v12344_v28 = vld [vmem:[#allocation72_spill] sm:$0xff]  ;;  %v3512_v35 = vand.u32 4294901760, %v3511_v1  ;;  %v12350_v2 = vld [vmem:[#allocation17_spill] sm:$0xff]  ;;  %v12353_v18 = vld [vmem:[#allocation90_spill] sm:$0xff] }
 0x20d   : > { %3477 = vmatpush2.msra.mxu1 %v3476_v52  ;;  %3528 = vmatpush1.msra.mxu0 %v12342_v27  ;;  %v12348_v52 = vld [vmem:[#allocation35_spill] sm:$0xff]  ;;  %v12354_v1 = vld [vmem:[#allocation52_spill] sm:$0xff] }
 0x20e   : > { %3483 = vmatprep.subr.mxu1 %v3482_v20  ;;  %3531 = vmatprep.subr.mxu0 %v12343_v3  ;;  %v12352_v20 = vld [vmem:[#allocation44_spill] sm:$0xff] }
 0x20f   : > { %3489 = vmatpush2.msra.mxu1 %v3488_v57  ;;  %3534 = vmatpush1.msra.mxu0 %v12344_v28  ;;  %v12349_v57 = vld [vmem:[#allocation14_spill] sm:$0xff]  ;;  %v12358_v56 = vld [vmem:[#allocation84_spill] sm:$0xff] }
 0x210   : > { %3495 = vmatprep.subr.mxu1 %v3494_v54  ;;  %3537 = vmatprep.subr.mxu0 %v12345_v36  ;;  %v12355_v54 = vld [vmem:[#allocation79_spill] sm:$0xff] }
 0x211   : > { %3501 = vmatpush2.msra.mxu1 %v3500_v10  ;;  %3540 = vmatpush1.msra.mxu0 %v12346_v43  ;;  %v12356_v10 = vld [vmem:[#allocation60_spill] sm:$0xff] }
 0x212   : > { %3507 = vmatprep.subr.mxu1 %v3506_v32  ;;  %3543 = vmatprep.subr.mxu0 %v12347_v26  ;;  %v12351_v32 = vld [vmem:[#allocation59_spill] sm:$0xff] }
 0x213   : > { %3513 = vmatpush2.msra.mxu1 %v3512_v35  ;;  %3546 = vmatpush1.msra.mxu0 %v12348_v52  ;;  %v12357_v35 = vld [vmem:[#allocation104_spill] sm:$0xff] }
 0x214   : > { %3517 = vmatmul.mubr.f32.vlgmr.msra.gmra.mxu1 %v12177_v6  ;;  %3549 = vmatprep.subr.mxu0 %v12349_v57  ;;  %v12359_v6 = vld [vmem:[#allocation76_spill] sm:$0xff] }
 0x215   : > { %3727 = vmatprep.subr.mxu1 %v8069_v30  ;;  %3552 = vmatpush1.msra.mxu0 %v12350_v2 }
 0x216   : > { %3729 = vmatpush1.msra.mxu1 %v8074_v44  ;;  %3555 = vmatprep.subr.mxu0 %v8240_v22 }
 0x217   : > { %3731 = vmatprep.subr.mxu1 %v8079_v0  ;;  %3558 = vmatpush1.msra.mxu0 %v12351_v32 }
 0x218   : > { %3733 = vmatpush1.msra.mxu1 %v8081_v24  ;;  %3561 = vmatprep.subr.mxu0 %v12352_v20 }
 0x219   : > { %3735 = vmatprep.subr.mxu1 %v8083_v11  ;;  %3564 = vmatpush1.msra.mxu0 %v8257_v46  ;;  %v12361_v11 = vld [vmem:[#allocation23_spill] sm:$0xff] }
 0x21a   : > { %3737 = vmatpush1.msra.mxu1 %v8091_v25  ;;  %3567 = vmatprep.subr.mxu0 %v12353_v18  ;;  %v12362_v46 = vld [vmem:[#allocation51_spill] sm:$0xff]  ;;  %v12363_v25 = vld [vmem:[#allocation5_spill] sm:$0xff] }
 0x21b   : > { %3739 = vmatprep.subr.mxu1 %v12354_v1  ;;  %3570 = vmatpush1.msra.mxu0 %v12355_v54  ;;  %v12364_v18 = vld [vmem:[#allocation43_spill] sm:$0xff]  ;;  %v12365_v1 = vld [vmem:[#allocation25_spill] sm:$0xff]  ;;  %v12366_v54 = vld [vmem:[#allocation28_spill] sm:$0xff] }
 0x21c   : > { %3741 = vmatpush1.msra.mxu1 %v12356_v10  ;;  %3573 = vmatprep.subr.mxu0 %v12357_v35  ;;  %v12367_v10 = vld [vmem:[#allocation6_spill] sm:$0xff]  ;;  %v12368_v35 = vld [vmem:[#allocation63_spill] sm:$0xff] }
 0x21d   : > { %3743 = vmatprep.subr.mxu1 %v12358_v56  ;;  %3576 = vmatpush1.msra.mxu0 %v12359_v6  ;;  %v12369_v56 = vld [vmem:[#allocation50_spill] sm:$0xff]  ;;  %v12370_v6 = vld [vmem:[#allocation77_spill] sm:$0xff] }
 0x21e   : > { %3745 = vmatpush1.msra.mxu1 %v12360_v40  ;;  %3579 = vmatprep.subr.mxu0 %v12361_v11  ;;  %v12371_v40 = vld [vmem:[#allocation29_spill] sm:$0xff]  ;;  %v12372_v11 = vld [vmem:[#allocation67_spill] sm:$0xff] }
 0x21f   : > { %3747 = vmatprep.subr.mxu1 %v12362_v46  ;;  %3582 = vmatpush1.msra.mxu0 %v12363_v25  ;;  %v12373_v25 = vld [vmem:[#allocation89_spill] sm:$0xff] }
 0x220   : > { %3749 = vmatpush1.msra.mxu1 %v12364_v18  ;;  %3585 = vmatprep.subr.mxu0 %v12365_v1  ;;  %v12374_v18 = vld [vmem:[#allocation39_spill] sm:$0xff]  ;;  %v12375_v1 = vld [vmem:[#allocation80_spill] sm:$0xff] }
 0x221   : > { %3751 = vmatprep.subr.mxu1 %v12366_v54  ;;  %3588 = vmatpush1.msra.mxu0 %v12367_v10  ;;  %v12376_v10 = vld [vmem:[#allocation85_spill] sm:$0xff] }
 0x222   : > { %3753 = vmatpush1.msra.mxu1 %v12368_v35  ;;  %3591 = vmatprep.subr.mxu0 %v12369_v56  ;;  %v12377_v35 = vld [vmem:[#allocation15_spill] sm:$0xff]  ;;  %v12378_v56 = vld [vmem:[#allocation92_spill] sm:$0xff] }
 0x223   : > { %3755 = vmatprep.subr.mxu1 %v12370_v6  ;;  %3594 = vmatpush1.msra.mxu0 %v12371_v40  ;;  %v12379_v40 = vld [vmem:[#allocation100_spill] sm:$0xff] }
 0x224   : > { %3757 = vmatpush1.msra.mxu1 %v12372_v11  ;;  %3597 = vmatprep.subr.mxu0 %v8450_v8  ;;  %v12380_v11 = vld [vmem:[#allocation45_spill] sm:$0xff]  ;;  %v12381_v8 = vld [vmem:[#allocation78_spill] sm:$0xff] }
 0x225   : > { %3759 = vmatprep.subr.mxu1 %v12373_v25  ;;  %3600 = vmatpush1.msra.mxu0 %v12374_v18  ;;  %v12382_v18 = vld [vmem:[#allocation82_spill] sm:$0xff] }
 0x226   : > { %3761 = vmatpush1.msra.mxu1 %v12375_v1  ;;  %3603 = vmatprep.subr.mxu0 %v8499_v58  ;;  %v12383_v1 = vld [vmem:[#allocation19_spill] sm:$0xff]  ;;  %v12384_v58 = vld [vmem:[#allocation68_spill] sm:$0xff] }
 0x227   : > { %3763 = vmatprep.subr.mxu1 %v12376_v10  ;;  %3606 = vmatpush1.msra.mxu0 %v12377_v35  ;;  %v12385_v35 = vld [vmem:[#allocation31_spill] sm:$0xff] }
 0x228   : > { %3765 = vmatpush1.msra.mxu1 %v12378_v56  ;;  %3609 = vmatprep.subr.mxu0 %v8514_v15  ;;  %v12386_v56 = vld [vmem:[#allocation24_spill] sm:$0xff]  ;;  %v12387_v15 = vld [vmem:[#allocation7_spill] sm:$0xff] }
 0x229   : > { %3767 = vmatprep.subr.mxu1 %v12379_v40  ;;  %3612 = vmatpush1.msra.mxu0 %v12380_v11  ;;  %v12388_v11 = vld [vmem:[#allocation27_spill] sm:$0xff] }
 0x22a   : > { %3769 = vmatpush1.msra.mxu1 %v12381_v8  ;;  %3615 = vmatprep.subr.mxu0 %v8554_v51  ;;  %v12389_v8 = vld [vmem:[#allocation30_spill] sm:$0xff]  ;;  %v12390_v51 = vld [vmem:[#allocation11_spill] sm:$0xff] }
 0x22b   : > { %3771 = vmatprep.subr.mxu1 %v12382_v18  ;;  %3618 = vmatpush1.msra.mxu0 %v12383_v1  ;;  %v12391_v1 = vld [vmem:[#allocation37_spill] sm:$0xff] }
 0x22c   : > { %3773 = vmatpush1.msra.mxu1 %v12384_v58  ;;  %3621 = vmatprep.subr.mxu0 %v8578_v31  ;;  %v12392_v31 = vld [vmem:[#allocation56_spill] sm:$0xff] }
 0x22d   : > { %3775 = vmatprep.subr.mxu1 %v12385_v35  ;;  %3624 = vmatpush2.msra.mxu0 %v12386_v56  ;;  %v12393_v56 = vld [vmem:[#allocation66_spill] sm:$0xff] }
 0x22e   : > { %3777 = vmatpush1.msra.mxu1 %v12387_v15  ;;  %3627 = vmatprep.subr.mxu0 %v8627_v34  ;;  %v12394_v15 = vld [vmem:[#allocation40_spill] sm:$0xff]  ;;  %v12395_v34 = vld [vmem:[#allocation41_spill] sm:$0xff] }
 0x22f   : > { %3779 = vmatprep.subr.mxu1 %v12388_v11  ;;  %3630 = vmatpush2.msra.mxu0 %v12389_v8  ;;  %v12396_v8 = vld [vmem:[#allocation49_spill] sm:$0xff] }
 0x230   : > { %3781 = vmatpush1.msra.mxu1 %v12390_v51  ;;  %3633 = vmatprep.subr.mxu0 %v8653_v12  ;;  %v12397_v51 = vld [vmem:[#allocation22_spill] sm:$0xff]  ;;  %v12398_v12 = vld [vmem:[#allocation8_spill] sm:$0xff] }
 0x231   : > { %3783 = vmatprep.subr.mxu1 %v12391_v1  ;;  %3636 = vmatpush2.msra.mxu0 %v8623_v19  ;;  %v12399_v1 = vld [vmem:[#allocation26_spill] sm:$0xff]  ;;  %v12400_v19 = vld [vmem:[#allocation53_spill] sm:$0xff] }
 0x232   : > { %3785 = vmatpush1.msra.mxu1 %v12392_v31  ;;  %3639 = vmatprep.subr.mxu0 %v8677_v45  ;;  %v12401_v31 = vld [vmem:[#allocation21_spill] sm:$0xff]  ;;  %v12402_v45 = vld [vmem:[#allocation55_spill] sm:$0xff] }
 0x233   : > { %3787 = vmatprep.subr.mxu1 %v12393_v56  ;;  %3642 = vmatpush2.msra.mxu0 %v12394_v15  ;;  %v12403_v15 = vld [vmem:[#allocation61_spill] sm:$0xff] }
 0x234   : > { %3789 = vmatpush1.msra.mxu1 %v12395_v34  ;;  %3645 = vmatprep.subr.mxu0 %v8692_v5  ;;  %v12404_v34 = vld [vmem:[#allocation101_spill] sm:$0xff] }
 0x235   : > { %3791 = vmatprep.subr.mxu1 %v12396_v8  ;;  %3648 = vmatpush2.msra.mxu0 %v12397_v51  ;;  %v12405_v5 = vld [vmem:[#allocation57_spill] sm:$0xff]  ;;  %v12406_v8 = vld [vmem:[#allocation106_spill] sm:$0xff] }
 0x236   : > { %3793 = vmatpush2.msra.mxu1 %v12398_v12  ;;  %3651 = vmatprep.subr.mxu0 %v12399_v1  ;;  %v12407_v51 = vld [vmem:[#allocation13_spill] sm:$0xff]  ;;  %v12408_v1 = vld [vmem:[#allocation32_spill] sm:$0xff] }
 0x237   : > { %3795 = vmatprep.subr.mxu1 %v12400_v19  ;;  %3654 = vmatpush2.msra.mxu0 %v12401_v31  ;;  %v12409_v19 = vld [vmem:[#allocation108_spill] sm:$0xff]  ;;  %v12410_v31 = vld [vmem:[#allocation38_spill] sm:$0xff] }
 0x238   : > { %3797 = vmatpush2.msra.mxu1 %v12402_v45  ;;  %3657 = vmatprep.subr.mxu0 %v8777_v61  ;;  %v12411_v61 = vld [vmem:[#allocation18_spill] sm:$0xff] }
 0x239   : > { %3799 = vmatprep.subr.mxu1 %v12403_v15  ;;  %3660 = vmatpush2.msra.mxu0 %v12404_v34  ;;  %v12412_v34 = vld [vmem:[#allocation20_spill] sm:$0xff] }
 0x23a   : > { %3801 = vmatpush2.msra.mxu1 %v12405_v5  ;;  %3663 = vmatprep.subr.mxu0 %v12406_v8  ;;  %v12413_v8 = vld [vmem:[#allocation73_spill] sm:$0xff] }
 0x23b   : > { %3803 = vmatprep.subr.mxu1 %v12407_v51  ;;  %3666 = vmatpush2.msra.mxu0 %v8783_v62  ;;  %v12414_v62 = vld [vmem:[#allocation87_spill] sm:$0xff] }
 0x23c   : > { %3805 = vmatpush2.msra.mxu1 %v12408_v1  ;;  %3669 = vmatprep.subr.mxu0 %v12409_v19  ;;  %v12415_v19 = vld [vmem:[#allocation83_spill] sm:$0xff] }
 0x23d   : > { %3807 = vmatprep.subr.mxu1 %v12410_v31  ;;  %3672 = vmatpush2.msra.mxu0 %v8809_v41  ;;  %v12416_v41 = vld [vmem:[#allocation97_spill] sm:$0xff] }
 0x23e   : > { %3809 = vmatpush2.msra.mxu1 %v12411_v61  ;;  %3675 = vmatprep.subr.mxu0 %v8854_v47  ;;  %v12417_v47 = vld [vmem:[#allocation88_spill] sm:$0xff] }
 0x23f   : > { %3811 = vmatprep.subr.mxu1 %v12412_v34  ;;  %3678 = vmatpush2.msra.mxu0 %v8861_v13  ;;  %v12418_v13 = vld [vmem:[#allocation95_spill] sm:$0xff] }
 0x240   : > { %3813 = vmatpush2.msra.mxu1 %v12413_v8  ;;  %3681 = vmatprep.subr.mxu0 %v8878_v37  ;;  %v12419_v37 = vld [vmem:[#allocation105_spill] sm:$0xff] }
 0x241   : > { %3815 = vmatprep.subr.mxu1 %v12414_v62  ;;  %3684 = vmatpush2.msra.mxu0 %v8882_v60 }
 0x242   : > { %3817 = vmatpush2.msra.mxu1 %v12415_v19  ;;  %3687 = vmatprep.subr.mxu0 %v8898_v48  ;;  %v12420_v48 = vld [vmem:[#allocation113_spill] sm:$0xff] }
 0x243   : > { %3819 = vmatprep.subr.mxu1 %v12416_v41  ;;  %3690 = vmatpush2.msra.mxu0 %v8885_v55  ;;  %v12421_v55 = vld [vmem:[#allocation112_spill] sm:$0xff] }
 0x244   : > { %3821 = vmatpush2.msra.mxu1 %v12417_v47  ;;  %3693 = vmatprep.subr.mxu0 %v8913_v39  ;;  %v12422_v39 = vld [vmem:[#allocation115_spill] sm:$0xff] }
 0x245   : > { %3823 = vmatprep.subr.mxu1 %v12418_v13  ;;  %3696 = vmatpush2.msra.mxu0 %v8902_v29 }
 0x246   : > { %3825 = vmatpush2.msra.mxu1 %v12419_v37  ;;  %3699 = vmatprep.subr.mxu0 %v8937_v23  ;;  %v12423_v23 = vld [vmem:[#allocation94_spill] sm:$0xff] }
 0x247   : > { %3827 = vmatprep.subr.mxu1 %v8804_v14  ;;  %3702 = vmatpush2.msra.mxu0 %v8941_v53  ;;  %v12424_v53 = vld [vmem:[#allocation96_spill] sm:$0xff] }
 0x248   : > { %3829 = vmatpush2.msra.mxu1 %v12420_v48  ;;  %3705 = vmatprep.subr.mxu0 %v8954_v59 }
 0x249   : > { %3831 = vmatprep.subr.mxu1 %v12421_v55  ;;  %3708 = vmatpush2.msra.mxu0 %v8958_v4  ;;  %v12425_v55 = vand.u32 4294901760, %v12340_v17  ;;  %v12429_v17 = vand.u32 4294901760, %v12345_v36  ;;  %v12437_v36 = vand.u32 4294901760, %v12349_v57  ;;  %v12441_v57 = vand.u32 4294901760, %v12352_v20 }
 0x24a   : > { %3833 = vmatpush2.msra.mxu1 %v12422_v39  ;;  %3711 = vmatprep.subr.mxu0 %v8970_v49  ;;  %v12426_v39 = vand.u32 4294901760, %v12342_v27  ;;  %v12434_v27 = vld [vmem:[#allocation98_spill] sm:$0xff] }
 0x24b   : > { %3835 = vmatprep.subr.mxu1 %v8850_v63  ;;  %3714 = vmatpush2.msra.mxu0 %v8974_v42  ;;  %v12427_v42 = vand.u32 4294901760, %v12343_v3  ;;  %v12432_v3 = vand.u32 4294901760, %v12347_v26  ;;  %v12439_v26 = vand.u32 4294901760, %v8240_v22 }
 0x24c   : > { %3717 = vmatprep.mubr.f32.mxu0 %v12423_v23  ;;  %3837 = vmatpush2.msra.mxu1 %v8841_v16  ;;  %v12428_v23 = vand.u32 4294901760, %v12344_v28  ;;  %v12436_v28 = vld [vmem:[#allocation99_spill] sm:$0xff] }
 0x24d   : > { %3720 = vmatmul.mubr.f32.vlgmr.msra.gmra.mxu0 %v12424_v53  ;;  %3839 = vmatprep.subr.mxu1 %v8875_v50 }
 0x24e   : > { %3870 = vmatprep.subr.mxu0 %v12425_v55  ;;  %3841 = vmatpush2.msra.mxu1 %v8866_v21  ;;  %v12430_v55 = vand.u32 4294901760, %v12346_v43  ;;  %v12438_v43 = vand.u32 4294901760, %v12350_v2 }
 0x24f   : > { %3874 = vmatpush1.msra.mxu0 %v12426_v39  ;;  %3843 = vmatprep.subr.mxu1 %v8904_v9  ;;  %v12431_v39 = vld [vmem:[#allocation34_spill] sm:$0xff] }
 0x250   : > { %3878 = vmatprep.subr.mxu0 %v12427_v42  ;;  %3845 = vmatpush2.msra.mxu1 %v8909_v7  ;;  %v12433_v42 = vld [vmem:[#allocation120_spill] sm:$0xff] }
 0x251   : > { %3882 = vmatpush1.msra.mxu0 %v12428_v23  ;;  %3847 = vmatprep.subr.mxu1 %v8919_v38  ;;  %v12435_v23 = vand.u32 4294901760, %v12348_v52  ;;  %v12440_v52 = vand.u32 4294901760, %v12351_v32 }
 0x252   : > { %3886 = vmatprep.subr.mxu0 %v12429_v17  ;;  %3849 = vmatpush2.msra.mxu1 %v8926_v33  ;;  %v12442_v17 = vld [vmem:[#allocation46_spill] sm:$0xff] }
 0x253   : > { %3890 = vmatpush1.msra.mxu0 %v12430_v55  ;;  %3851 = vmatprep.subr.mxu1 %v12431_v39  ;;  %v12445_v55 = vld [vmem:[#allocation42_spill] sm:$0xff] }
 0x254   : > { %3894 = vmatprep.subr.mxu0 %v12432_v3  ;;  %3853 = vmatpush2.msra.mxu1 %v12433_v42  ;;  %v12448_v3 = vld [vmem:[#allocation52_spill] sm:$0xff] }
 0x255   : > { %3857 = vmatprep.mubr.f32.mxu1 %v12434_v27  ;;  %3898 = vmatpush1.msra.mxu0 %v12435_v23  ;;  %v12451_v23 = vld [vmem:[#allocation60_spill] sm:$0xff] }
 0x256   : > { %3861 = vmatmul.mubr.f32.vlgmr.msra.gmra.mxu1 %v12436_v28  ;;  %3902 = vmatprep.subr.mxu0 %v12437_v36  ;;  %v12454_v36 = vld [vmem:[#allocation84_spill] sm:$0xff] }
 0x257   : > { %4133 = vmatprep.subr.mxu1 %v8069_v30  ;;  %3906 = vmatpush1.msra.mxu0 %v12438_v43  ;;  %v12443_v30 = vld [vmem:[#allocation36_spill] sm:$0xff] }
 0x258   : > { %4135 = vmatpush1.msra.mxu1 %v8074_v44  ;;  %3910 = vmatprep.subr.mxu0 %v12439_v26  ;;  %v12444_v2 = vand.u32 4294901760, %v12443_v30  ;;  %v12446_v44 = vld [vmem:[#allocation90_spill] sm:$0xff]  ;;  %v12455_v43 = vld [vmem:[#allocation76_spill] sm:$0xff]  ;;  %v12460_v30 = vld [vmem:[#allocation5_spill] sm:$0xff] }
 0x259   : > { %4137 = vmatprep.subr.mxu1 %v8079_v0  ;;  %3914 = vmatpush1.msra.mxu0 %v12440_v52  ;;  %v12447_v22 = vand.u32 4294901760, %v12446_v44  ;;  %v12449_v0 = vld [vmem:[#allocation79_spill] sm:$0xff]  ;;  %v12456_v26 = vand.u32 4294901760, %v12455_v43  ;;  %v12457_v52 = vld [vmem:[#allocation86_spill] sm:$0xff]  ;;  %v12463_v44 = vld [vmem:[#allocation25_spill] sm:$0xff] }
 0x25a   : > { %4139 = vmatpush1.msra.mxu1 %v8081_v24  ;;  %3918 = vmatprep.subr.mxu0 %v12441_v57  ;;  %v12450_v32 = vand.u32 4294901760, %v12449_v0  ;;  %v12452_v24 = vld [vmem:[#allocation104_spill] sm:$0xff]  ;;  %v12458_v57 = vld [vmem:[#allocation23_spill] sm:$0xff]  ;;  %v12473_v43 = vld [vmem:[#allocation58_spill] sm:$0xff] }
 0x25b   : > { %4141 = vmatprep.subr.mxu1 %v12442_v17  ;;  %3922 = vmatpush1.msra.mxu0 %v12444_v2  ;;  %v12453_v20 = vand.u32 4294901760, %v12452_v24  ;;  %v12459_v17 = vand.u32 4294901760, %v12458_v57  ;;  %v12461_v2 = vand.u32 4294901760, %v12460_v30  ;;  %v12477_v57 = vld [vmem:[#allocation80_spill] sm:$0xff] }
 0x25c   : > { %4143 = vmatpush1.msra.mxu1 %v12445_v55  ;;  %3926 = vmatprep.subr.mxu0 %v12447_v22  ;;  %v12462_v55 = vld [vmem:[#allocation43_spill] sm:$0xff]  ;;  %v12464_v22 = vand.u32 4294901760, %v12463_v44  ;;  %v12483_v44 = vld [vmem:[#allocation70_spill] sm:$0xff] }
 0x25d   : > { %4145 = vmatprep.subr.mxu1 %v12448_v3  ;;  %3930 = vmatpush1.msra.mxu0 %v12450_v32  ;;  %v12465_v3 = vld [vmem:[#allocation6_spill] sm:$0xff]  ;;  %v12467_v32 = vld [vmem:[#allocation63_spill] sm:$0xff] }
 0x25e   : > { %4147 = vmatpush1.msra.mxu1 %v12451_v23  ;;  %3934 = vmatprep.subr.mxu0 %v12453_v20  ;;  %v12466_v0 = vand.u32 4294901760, %v12465_v3  ;;  %v12468_v23 = vld [vmem:[#allocation50_spill] sm:$0xff] }
 0x25f   : > { %4149 = vmatprep.subr.mxu1 %v12454_v36  ;;  %3938 = vmatpush1.msra.mxu0 %v12456_v26  ;;  %v12469_v24 = vand.u32 4294901760, %v12468_v23  ;;  %v12472_v36 = vld [vmem:[#allocation67_spill] sm:$0xff]  ;;  %v12474_v26 = vand.u32 4294901760, %v12473_v43 }
 0x260   : > { %4151 = vmatpush1.msra.mxu1 %v12457_v52  ;;  %3942 = vmatprep.subr.mxu0 %v12459_v17  ;;  %v12478_v17 = vld [vmem:[#allocation47_spill] sm:$0xff] }
 0x261   : > { %4153 = vmatprep.subr.mxu1 %v12362_v46  ;;  %3946 = vmatpush1.msra.mxu0 %v12461_v2  ;;  %v12470_v46 = vld [vmem:[#allocation29_spill] sm:$0xff]  ;;  %v12479_v30 = vand.u32 4294901760, %v12478_v17  ;;  %v12496_v43 = vld [vmem:[#allocation7_spill] sm:$0xff] }
 0x262   : > { %4155 = vmatpush1.msra.mxu1 %v12462_v55  ;;  %3950 = vmatprep.subr.mxu0 %v12464_v22  ;;  %v12471_v20 = vand.u32 4294901760, %v12470_v46  ;;  %v12482_v55 = vld [vmem:[#allocation92_spill] sm:$0xff]  ;;  %v12484_v22 = vand.u32 4294901760, %v12483_v44  ;;  %v12508_v44 = vld [vmem:[#allocation81_spill] sm:$0xff] }
 0x263   : > { %4157 = vmatprep.subr.mxu1 %v12366_v54  ;;  %3954 = vmatpush1.msra.mxu0 %v12466_v0  ;;  %v12475_v54 = vld [vmem:[#allocation39_spill] sm:$0xff]  ;;  %v12487_v0 = vld [vmem:[#allocation78_spill] sm:$0xff]  ;;  %v12492_v46 = vld [vmem:[#allocation12_spill] sm:$0xff] }
 0x264   : > { %4159 = vmatpush1.msra.mxu1 %v12467_v32  ;;  %3958 = vmatprep.subr.mxu0 %v12469_v24  ;;  %v12476_v52 = vand.u32 4294901760, %v12475_v54  ;;  %v12488_v32 = vld [vmem:[#allocation10_spill] sm:$0xff] }
 0x265   : > { %4161 = vmatprep.subr.mxu1 %v12370_v6  ;;  %3962 = vmatpush1.msra.mxu0 %v12471_v20  ;;  %v12480_v6 = vld [vmem:[#allocation15_spill] sm:$0xff]  ;;  %v12489_v23 = vand.u32 4294901760, %v12488_v32  ;;  %v12493_v20 = vand.u32 4294901760, %v12492_v46  ;;  %v280_v32 = vld [vmem:[#allocation2 + $0x3b8] sm:$0xff] }
 0x266   : > { %4163 = vmatpush1.msra.mxu1 %v12472_v36  ;;  %3966 = vmatprep.subr.mxu0 %v12474_v26  ;;  %v12481_v2 = vand.u32 4294901760, %v12480_v6  ;;  %v12497_v26 = vld [vmem:[#allocation16_spill] sm:$0xff] }
 0x267   : > { %4165 = vmatprep.subr.mxu1 %v12373_v25  ;;  %3970 = vmatpush1.msra.mxu0 %v12476_v52  ;;  %v12485_v25 = vld [vmem:[#allocation45_spill] sm:$0xff]  ;;  %v12498_v54 = vand.u32 4294901760, %v12497_v26  ;;  %v271_v26 = vld [vmem:[#allocation2 + $0x370] sm:$0xff] }
 0x268   : > { %4167 = vmatpush1.msra.mxu1 %v12477_v57  ;;  %3974 = vmatprep.subr.mxu0 %v12479_v30  ;;  %v12486_v3 = vand.u32 4294901760, %v12485_v25  ;;  %v12501_v57 = vld [vmem:[#allocation11_spill] sm:$0xff]  ;;  %v12504_v30 = vld [vmem:[#allocation37_spill] sm:$0xff]  ;;  %v12510_v25 = vld [vmem:[#allocation40_spill] sm:$0xff] }
 0x269   : > { %4169 = vmatprep.subr.mxu1 %v12376_v10  ;;  %3978 = vmatpush1.msra.mxu0 %v12481_v2  ;;  %v12490_v10 = vld [vmem:[#allocation19_spill] sm:$0xff]  ;;  %v12507_v2 = vld [vmem:[#allocation56_spill] sm:$0xff] }
 0x26a   : > { %4171 = vmatpush1.msra.mxu1 %v12482_v55  ;;  %3982 = vmatprep.subr.mxu0 %v12484_v22  ;;  %v12491_v24 = vand.u32 4294901760, %v12490_v10  ;;  %v288_v55 = vld [vmem:[#allocation2 + $0x3f8] sm:$0xff]  ;;  %v12509_v22 = vand.u32 4294901760, %v12508_v44  ;;  %v12524_v44 = vld [vmem:[#allocation74_spill] sm:$0xff] }
 0x26b   : > { %4173 = vmatprep.subr.mxu1 %v12379_v40  ;;  %3986 = vmatpush1.msra.mxu0 %v12486_v3  ;;  %v12494_v40 = vld [vmem:[#allocation24_spill] sm:$0xff]  ;;  %v12511_v3 = vand.u32 4294901760, %v12510_v25  ;;  %v9285_v25 = vand.u32 4294901760, %v271_v26 }
 0x26c   : > { %4175 = vmatpush1.msra.mxu1 %v12487_v0  ;;  %3990 = vmatprep.subr.mxu0 %v12489_v23  ;;  %v12495_v36 = vand.u32 4294901760, %v12494_v40  ;;  %v12512_v0 = vld [vmem:[#allocation41_spill] sm:$0xff]  ;;  %v279_v23 = vld [vmem:[#allocation2 + $0x3b0] sm:$0xff]  ;;  %v272_v10 = vld [vmem:[#allocation2 + $0x378] sm:$0xff]  ;;  %v9263_v40 = vand.u32 4294901760, %v288_v55 }
 0x26d   : > { %4177 = vmatprep.subr.mxu1 %v12382_v18  ;;  %3994 = vmatpush1.msra.mxu0 %v12491_v24  ;;  %v12499_v18 = vld [vmem:[#allocation30_spill] sm:$0xff]  ;;  %v12513_v24 = vld [vmem:[#allocation75_spill] sm:$0xff]  ;;  %12526 = vst [vmem:[#allocation62_spill] sm:$0xff] %v9285_v25 }
 0x26e   : > { %4179 = vmatpush1.msra.mxu1 %v12384_v58  ;;  %3998 = vmatprep.subr.mxu0 %v12493_v20  ;;  %v12500_v52 = vand.u32 4294901760, %v12499_v18  ;;  %v12502_v58 = vld [vmem:[#allocation69_spill] sm:$0xff]  ;;  %v12514_v46 = vand.u32 4294901760, %v12513_v24  ;;  %v12518_v18 = vld [vmem:[#allocation26_spill] sm:$0xff] }
 0x26f   : > { %4181 = vmatprep.subr.mxu1 %v12385_v35  ;;  %4002 = vmatpush2.msra.mxu0 %v12495_v36  ;;  %v12503_v17 = vand.u32 4294901760, %v12502_v58  ;;  %v12505_v35 = vld [vmem:[#allocation65_spill] sm:$0xff]  ;;  %v12516_v36 = vld [vmem:[#allocation22_spill] sm:$0xff]  ;;  %v9273_v58 = vand.u32 4294901760, %v280_v32 }
 0x270   : > { %4183 = vmatpush1.msra.mxu1 %v12496_v43  ;;  %4006 = vmatprep.subr.mxu0 %v12498_v54  ;;  %v12506_v6 = vand.u32 4294901760, %v12505_v35  ;;  %v12515_v20 = vld [vmem:[#allocation49_spill] sm:$0xff]  ;;  %v12517_v43 = vand.u32 4294901760, %v12516_v36  ;;  %v264_v54 = vld [vmem:[#allocation2 + $0x338] sm:$0xff]  ;;  %v263_v35 = vld [vmem:[#allocation2 + $0x330] sm:$0xff] }
 0x271   : > { %4185 = vmatprep.subr.mxu1 %v12388_v11  ;;  %4010 = vmatpush2.msra.mxu0 %v12500_v52  ;;  %v287_v11 = vld [vmem:[#allocation2 + $0x3f0] sm:$0xff]  ;;  %v12519_v52 = vand.u32 4294901760, %v12518_v18  ;;  %v12529_v24 = vld [vmem:[#allocation101_spill] sm:$0xff] }
 0x272   : > { %4187 = vmatpush1.msra.mxu1 %v12501_v57  ;;  %4014 = vmatprep.subr.mxu0 %v12503_v17  ;;  %v12520_v57 = vld [vmem:[#allocation53_spill] sm:$0xff]  ;;  %v9275_v17 = vand.u32 4294901760, %v279_v23  ;;  %v255_v36 = vld [vmem:[#allocation2 + $0x2f0] sm:$0xff] }
 0x273   : > { %4189 = vmatprep.subr.mxu1 %v12504_v30  ;;  %4018 = vmatpush2.msra.mxu0 %v12506_v6  ;;  %v9277_v30 = vand.u32 4294901760, %v272_v10  ;;  %v12522_v6 = vld [vmem:[#allocation21_spill] sm:$0xff] }
 0x274   : > { %4191 = vmatpush1.msra.mxu1 %v12507_v2  ;;  %4022 = vmatprep.subr.mxu0 %v12509_v22  ;;  %v12523_v2 = vand.u32 4294901760, %v12522_v6  ;;  %v12525_v22 = vand.u32 4294901760, %v12524_v44  ;;  %v9304_v18 = vsub.f32 %v279_v23, %v9275_v17  ;;  %v2234_v6 = vpop.f32.mrf.mxu1  ;;  %v9324_v23 = vand.u32 4294901760, %v255_v36 }
 0x275   : > { %4193 = vmatprep.subr.mxu1 %v12393_v56  ;;  %4026 = vmatpush2.msra.mxu0 %v12511_v3  ;;  %v9268_v56 = vand.u32 4294901760, %v287_v11  ;;  %12521 = vst [vmem:[#allocation54_spill] sm:$0xff] %v9277_v30  ;;  %v9287_v3 = vand.u32 4294901760, %v264_v54 }
 0x276   : > { %4195 = vmatpush1.msra.mxu1 %v12512_v0  ;;  %4030 = vmatprep.subr.mxu0 %v12514_v46  ;;  %v9290_v0 = vsub.f32 %v288_v55, %v9263_v40  ;;  %v12530_v46 = vand.u32 4294901760, %v12529_v24  ;;  %12535 = vst [vmem:[#allocation9_spill] sm:$0xff] %v9304_v18  ;;  %12544 = vst [vmem:[#allocation44_spill] sm:$0xff] %v9324_v23  ;;  %v1841_v24 = vpop.f32.mrf.mxu0 }
 0x277   : > { %4197 = vmatprep.subr.mxu1 %v12515_v20  ;;  %4034 = vmatpush2.msra.mxu0 %v12517_v43  ;;  %12527 = vst [vmem:[#allocation48_spill] sm:$0xff] %v9287_v3  ;;  %v9298_v20 = vand.u32 4294901760, %v263_v35  ;;  %v12533_v43 = vld [vmem:[#allocation106_spill] sm:$0xff] }
 0x278   : > { %4199 = vmatpush2.msra.mxu1 %v12398_v12  ;;  %4038 = vmatprep.subr.mxu0 %v12519_v52  ;;  %v256_v12 = vld [vmem:[#allocation2 + $0x2f8] sm:$0xff]  ;;  %12528 = vst [vmem:[#allocation72_spill] sm:$0xff] %v9290_v0  ;;  %v9309_v52 = vsub.f32 %v280_v32, %v9273_v58  ;;  %v11167_v32 = vand.u32 4294901760, %v9290_v0 }
 0x279   : > { %4201 = vmatprep.subr.mxu1 %v12520_v57  ;;  %4042 = vmatpush2.msra.mxu0 %v12523_v2  ;;  %12532 = vst [vmem:[#allocation64_spill] sm:$0xff] %v9298_v20  ;;  %v9306_v55 = vand.u32 4294901760, %v256_v12  ;;  %v12541_v2 = vld [vmem:[#allocation108_spill] sm:$0xff] }
 0x27a   : > { %4203 = vmatpush2.msra.mxu1 %v12402_v45  ;;  %4046 = vmatprep.subr.mxu0 %v12525_v22  ;;  %v9296_v45 = vsub.f32 %v287_v11, %v9268_v56  ;;  %12537 = vst [vmem:[#allocation14_spill] sm:$0xff] %v9309_v52  ;;  %v12539_v11 = vld [vmem:[#allocation110_spill] sm:$0xff]  ;;  %v12542_v44 = vand.u32 4294901760, %v12541_v2  ;;  %v9327_v22 = vsub.f32 %v264_v54, %v9287_v3  ;;  %v12565_v2 = vld [vmem:[#allocation109_spill] sm:$0xff] }
 0x27b   : > { %4205 = vmatprep.subr.mxu1 %v12403_v15  ;;  %4050 = vmatpush2.msra.mxu0 %v12530_v46  ;;  %v12534_v15 = vand.u32 4294901760, %v12533_v43  ;;  %12536 = vst [vmem:[#allocation35_spill] sm:$0xff] %v9306_v55  ;;  %v12540_v57 = vand.u32 4294901760, %v12539_v11  ;;  %v12546_v46 = vld [vmem:[#allocation111_spill] sm:$0xff]  ;;  %v9333_v43 = vsub.f32 %v263_v35, %v9298_v20  ;;  %v248_v11 = vld [vmem:[#allocation2 + $0x2b8] sm:$0xff]  ;;  %v9363_v54 = vadd.f32 %v2234_v6, %v1841_v24 }
 0x27c   : > { %4207 = vmatpush2.msra.mxu1 %v12405_v5  ;;  %12531 = vst [vmem:[#allocation33_spill] sm:$0xff] %v9296_v45  ;;  %v9312_v5 = vsub.f32 %v272_v10, %v9277_v30  ;;  %v247_v10 = vld [vmem:[#allocation2 + $0x2b0] sm:$0xff]  ;;  %12545 = vst [vmem:[#allocation51_spill] sm:$0xff] %v9327_v22  ;;  %v12562_v6 = vand.u32 4294901760, %v9309_v52  ;;  %v12566_v28 = vand.u32 4294901760, %v12565_v2 }
 0x27d   : > { %4054 = vmatprep.subr.mxu0 %v12534_v15  ;;  %4209 = vmatprep.subr.mxu1 %v12407_v51  ;;  %v9321_v51 = vsub.f32 %v271_v26, %v9285_v25  ;;  %12548 = vst [vmem:[#allocation28_spill] sm:$0xff] %v9333_v43  ;;  %v12549_v26 = vld [vmem:[#allocation114_spill] sm:$0xff] }
 0x27e   : > { %12538 = vst [vmem:[#allocation17_spill] sm:$0xff] %v9312_v5  ;;  %4058 = vmatpush2.msra.mxu0 %v12540_v57  ;;  %4211 = vmatpush2.msra.mxu1 %v12408_v1  ;;  %v12547_v1 = vand.u32 4294901760, %v12546_v46  ;;  %v12550_v15 = vand.u32 4294901760, %v12549_v26  ;;  %v9348_v46 = vand.u32 4294901760, %v247_v10  ;;  %v12555_v26 = vld [vmem:[#allocation116_spill] sm:$0xff]  ;;  %v1843_v57 = vpop.f32.mrf.mxu0 }
 0x27f   : > { %4062 = vmatprep.subr.mxu0 %v12542_v44  ;;  %4213 = vmatprep.subr.mxu1 %v12410_v31  ;;  %12543 = vst [vmem:[#allocation59_spill] sm:$0xff] %v9321_v51  ;;  %v11168_v31 = vand.u32 4294901760, %v9296_v45  ;;  %v9343_v44 = vsub.f32 %v256_v12, %v9306_v55  ;;  %v9359_v12 = vsub.f32 %v255_v36, %v9324_v23  ;;  %v9373_v36 = vand.u32 4294901760, %v248_v11 }
 0x280   : > { %4066 = vmatpush2.msra.mxu0 %v12547_v1  ;;  %4215 = vmatpush2.msra.mxu1 %v12411_v61  ;;  %v12552_v61 = vld [vmem:[#allocation117_spill] sm:$0xff]  ;;  %12554 = vst [vmem:[#allocation89_spill] sm:$0xff] %v9348_v46  ;;  %v2236_v1 = vpop.f32.mrf.mxu1 }
 0x281   : > { %4070 = vmatprep.subr.mxu0 %v12550_v15  ;;  %4217 = vmatprep.subr.mxu1 %v12412_v34  ;;  %12551 = vst [vmem:[#allocation77_spill] sm:$0xff] %v9343_v44  ;;  %v12553_v35 = vand.u32 4294901760, %v12552_v61  ;;  %v12556_v34 = vand.u32 4294901760, %v12555_v26  ;;  %v9356_v15 = vsub.f32 %v9290_v0, %v11167_v32  ;;  %12557 = vst [vmem:[#allocation85_spill] sm:$0xff] %v9359_v12  ;;  %v240_v61 = vld [vmem:[#allocation2 + $0x278] sm:$0xff]  ;;  %v12558_v26 = vand.u32 4294901760, %v8882_v60 }
 0x282   : > { %4219 = vmatpush2.msra.mxu1 %v12413_v8  ;;  %12559 = vst [vmem:[#allocation100_spill] sm:$0xff] %v9373_v36  ;;  %v12560_v32 = vld [vmem:[#allocation107_spill] sm:$0xff]  ;;  %v9382_v60 = vsub.f32 %v9309_v52, %v12562_v6  ;;  %v9401_v6 = vsub.f32 %v247_v10, %v9348_v46  ;;  %v12573_v10 = vand.u32 4294901760, %v9327_v22 }
 0x283   : > { %4074 = vmatpush2.msra.mxu0 %v12553_v35  ;;  %4221 = vmatprep.subr.mxu1 %v12414_v62  ;;  %v239_v35 = vld [vmem:[#allocation2 + $0x270] sm:$0xff]  ;;  %v9371_v62 = vsub.f32 %v9296_v45, %v11168_v31  ;;  %v12561_v8 = vand.u32 4294901760, %v12560_v32 }
 0x284   : > { %4078 = vmatprep.subr.mxu0 %v12556_v34  ;;  %4223 = vmatpush2.msra.mxu1 %v12415_v19  ;;  %v12563_v19 = vand.u32 4294901760, %v9304_v18  ;;  %v231_v34 = vld [vmem:[#allocation2 + $0x230] sm:$0xff]  ;;  %12567 = vst [vmem:[#allocation82_spill] sm:$0xff] %v9401_v6  ;;  %v9405_v27 = vand.u32 4294901760, %v239_v35  ;;  %v9419_v2 = vsub.f32 %v9327_v22, %v12573_v10  ;;  %v9434_v10 = vsub.f32 %v248_v11, %v9373_v36  ;;  %v2578_v11 = vpop.f32.mrf.mxu1 }
 0x285   : > { %4082 = vmatpush2.msra.mxu0 %v12558_v26  ;;  %4225 = vmatprep.subr.mxu1 %v12416_v41  ;;  %v12564_v26 = vand.u32 4294901760, %v9312_v5  ;;  %v2437_v41 = vpop.f32.mrf.mxu0  ;;  %v12578_v22 = vld [vmem:[#allocation71_spill] sm:$0xff] }
 0x286   : > { %4086 = vmatprep.subr.mxu0 %v12561_v8  ;;  %v9387_v24 = vsub.f32 %v9304_v18, %v12563_v19  ;;  %v9395_v8 = vadd.f32 %v2236_v1, %v1843_v57  ;;  %4227 = vmatpush2.msra.mxu1 %v12417_v47  ;;  %v9403_v19 = vand.u32 4294901760, %v240_v61  ;;  %12569 = vst [vmem:[#allocation31_spill] sm:$0xff] %v9405_v27  ;;  %v12572_v1 = vand.u32 4294901760, %v9321_v51  ;;  %v232_v47 = vld [vmem:[#allocation2 + $0x238] sm:$0xff]  ;;  %v12582_v18 = vld [vmem:[#allocation119_spill] sm:$0xff] }
 0x287   : > { %v9392_v31 = vsub.f32 %v9312_v5, %v12564_v26  ;;  %4090 = vmatpush2.msra.mxu0 %v12566_v28  ;;  %v12570_v26 = vld [vmem:[#allocation118_spill] sm:$0xff]  ;;  %4229 = vmatprep.subr.mxu1 %v12418_v13  ;;  %v12579_v32 = vand.u32 4294901760, %v12578_v22  ;;  %v224_v13 = vld [vmem:[#allocation2 + $0x1f8] sm:$0xff]  ;;  %v12580_v5 = vand.u32 4294901760, %v9343_v44  ;;  %v12583_v52 = vand.u32 4294901760, %v12582_v18 }
 0x288   : > { %12568 = vst [vmem:[#allocation68_spill] sm:$0xff] %v9403_v19  ;;  %v12571_v53 = vand.u32 4294901760, %v12570_v26  ;;  %v9414_v28 = vsub.f32 %v9321_v51, %v12572_v1  ;;  %v12574_v26 = vand.u32 4294901760, %v8902_v29  ;;  %4231 = vmatpush2.msra.mxu1 %v12419_v37  ;;  %v12576_v1 = vand.u32 4294901760, %v9333_v43  ;;  %v223_v51 = vld [vmem:[#allocation2 + $0x1f0] sm:$0xff]  ;;  %v12588_v18 = vld [vmem:[#allocation112_spill] sm:$0xff] }
 0x289   : > { %4233 = vmatprep.subr.mxu1 %v8804_v14  ;;  %v9451_v14 = vsub.f32 %v239_v35, %v9405_v27  ;;  %v9453_v22 = vand.u32 4294901760, %v232_v47  ;;  %v12587_v29 = vand.u32 4294901760, %v8954_v59  ;;  %v9466_v35 = vand.u32 4294901760, %v223_v51 }
 0x28a   : > { %4094 = vmatprep.subr.mxu0 %v12571_v53  ;;  %v9426_v53 = vand.u32 4294901760, %v231_v34  ;;  %v9431_v57 = vsub.f32 %v9333_v43, %v12576_v1  ;;  %v9445_v1 = vsub.f32 %v9343_v44, %v12580_v5  ;;  %v2439_v43 = vpop.f32.mrf.mxu0  ;;  %4235 = vmatpush2.msra.mxu1 %v12420_v48  ;;  %v9459_v5 = vsub.f32 %v240_v61, %v9403_v19  ;;  %v12592_v61 = vld [vmem:[#allocation115_spill] sm:$0xff] }
 0x28b   : > { %4098 = vmatpush2.msra.mxu0 %v12574_v26  ;;  %12584 = vst [vmem:[#allocation55_spill] sm:$0xff] %v9451_v14  ;;  %12585 = vst [vmem:[#allocation61_spill] sm:$0xff] %v9453_v22  ;;  %v215_v26 = vld [vmem:[#allocation2 + $0x1b0] sm:$0xff]  ;;  %4237 = vmatprep.subr.mxu1 %v12588_v18  ;;  %v12590_v44 = vand.u32 4294901760, %v9359_v12  ;;  %v12591_v37 = vand.u32 4294901760, %v8958_v4  ;;  %v9480_v48 = vand.u32 4294901760, %v224_v13  ;;  %v2438_v0 = vadd.f32 %v2437_v41, %v9363_v54 }
 0x28c   : > { %12575 = vst [vmem:[#allocation27_spill] sm:$0xff] %v9426_v53  ;;  %12577 = vst [vmem:[#allocation66_spill] sm:$0xff] %v9431_v57  ;;  %4102 = vmatprep.subr.mxu0 %v12579_v32  ;;  %v9455_v32 = vld [vmem:[#allocation2 + $0x1b8] sm:$0xff]  ;;  %4239 = vmatpush2.msra.mxu1 %v12592_v61  ;;  %v2843_v59 = vpop.f32.mrf.mxu0  ;;  %v207_v18 = vld [vmem:[#allocation2 + $0x170] sm:$0xff]  ;;  %v2440_v4 = vadd.f32 %v2439_v43, %v9395_v8 }
 0x28d   : > { %12581 = vst [vmem:[#allocation8_spill] sm:$0xff] %v9445_v1  ;;  %4106 = vmatpush2.msra.mxu0 %v12583_v52  ;;  %12586 = vst [vmem:[#allocation57_spill] sm:$0xff] %v9459_v5  ;;  %v9471_v45 = vsub.f32 %v9359_v12, %v12590_v44  ;;  %v12595_v44 = vand.u32 4294901760, %v8970_v49  ;;  %4241 = vmatprep.subr.mxu1 %v8850_v63  ;;  %v208_v61 = vld [vmem:[#allocation2 + $0x178] sm:$0xff]  ;;  %v2580_v12 = vpop.f32.mrf.mxu1  ;;  %v12598_v57 = vld [vmem:[#allocation121_spill] sm:$0xff]  ;;  %v12601_v49 = vand.u32 4294901760, %v9401_v6 }
 0x28e   : > { %4110 = vmatprep.subr.mxu0 %v12587_v29  ;;  %12589 = vst [vmem:[#allocation13_spill] sm:$0xff] %v9466_v35  ;;  %v9477_v29 = vsub.f32 %v231_v34, %v9426_v53  ;;  %12594 = vst [vmem:[#allocation38_spill] sm:$0xff] %v9480_v48  ;;  %v9491_v34 = vand.u32 4294901760, %v215_v26  ;;  %v12599_v53 = vand.u32 4294901760, %v12598_v57  ;;  %v12600_v52 = vld [vmem:[#allocation91_spill] sm:$0xff]  ;;  %v2579_v1 = vadd.f32 %v2578_v11, %v2438_v0  ;;  %v12603_v57 = vld [vmem:[#allocation93_spill] sm:$0xff]  ;;  %v2845_v41 = vpop.f32.mrf.mxu0 }
 0x28f   : > { %4114 = vmatpush2.msra.mxu0 %v12591_v37  ;;  %v9489_v37 = vand.u32 4294901760, %v9455_v32  ;;  %4124 = vmatprep.mubr.f32.mxu0 %v12600_v52  ;;  %v9499_v54 = vsub.f32 %v9401_v6, %v12601_v49  ;;  %v9520_v0 = vand.u32 4294901760, %v208_v61  ;;  %v199_v43 = vld [vmem:[#allocation2 + $0x130] sm:$0xff]  ;;  %v2581_v8 = vadd.f32 %v2580_v12, %v2440_v4  ;;  %v2980_v49 = vpop.f32.mrf.mxu1 }
 0x290   : > { %12593 = vst [vmem:[#allocation32_spill] sm:$0xff] %v9477_v29  ;;  %4118 = vmatprep.subr.mxu0 %v12595_v44  ;;  %12597 = vst [vmem:[#allocation20_spill] sm:$0xff] %v9491_v34  ;;  %v9504_v44 = vsub.f32 %v232_v47, %v9453_v22  ;;  %4243 = vmatpush2.msra.mxu1 %v8841_v16  ;;  %v12605_v47 = vand.u32 4294901760, %v9434_v10  ;;  %v9522_v16 = vand.u32 4294901760, %v207_v18  ;;  %v9549_v6 = vand.u32 4294901760, %v199_v43 }
 0x291   : > { %12596 = vst [vmem:[#allocation18_spill] sm:$0xff] %v9489_v37  ;;  %4122 = vmatpush2.msra.mxu0 %v12599_v53  ;;  %v9510_v53 = vsub.f32 %v223_v51, %v9466_v35  ;;  %4245 = vmatprep.subr.mxu1 %v8875_v50  ;;  %12606 = vst [vmem:[#allocation83_spill] sm:$0xff] %v9520_v0  ;;  %v9525_v51 = vsub.f32 %v224_v13, %v9480_v48  ;;  %v12610_v13 = vand.u32 4294901760, %v9459_v5 }
 0x292   : > { %12602 = vst [vmem:[#allocation73_spill] sm:$0xff] %v9504_v44  ;;  %4126 = vmatmul.mubr.f32.vlgmr.msra.gmra.mxu0 %v12603_v57  ;;  %4270 = vmatprep.subr.mxu0 %v9263_v40  ;;  %v9518_v63 = vsub.f32 %v9434_v10, %v12605_v47  ;;  %12607 = vst [vmem:[#allocation97_spill] sm:$0xff] %v9522_v16  ;;  %v2844_v11 = vadd.f32 %v2843_v59, %v2579_v1  ;;  %v192_v47 = vld [vmem:[#allocation2 + $0xf8] sm:$0xff]  ;;  %v183_v59 = vld [vmem:[#allocation2 + $0xb0] sm:$0xff] }
 0x293   : > { %12604 = vst [vmem:[#allocation87_spill] sm:$0xff] %v9510_v53  ;;  %12608 = vst [vmem:[#allocation88_spill] sm:$0xff] %v9525_v51  ;;  %4247 = vmatpush2.msra.mxu1 %v8866_v21  ;;  %4272 = vmatpush1.msra.mxu0 %v9268_v56  ;;  %v9530_v50 = vsub.f32 %v215_v26, %v9491_v34  ;;  %v9539_v12 = vsub.f32 %v9459_v5, %v12610_v13  ;;  %v12611_v21 = vand.u32 4294901760, %v9451_v14  ;;  %v200_v26 = vld [vmem:[#allocation2 + $0x138] sm:$0xff]  ;;  %v191_v13 = vld [vmem:[#allocation2 + $0xf0] sm:$0xff] }
 0x294   : > { %4249 = vmatprep.subr.mxu1 %v8904_v9  ;;  %4274 = vmatprep.subr.mxu0 %v9273_v58  ;;  %v2846_v4 = vadd.f32 %v2845_v41, %v2581_v8  ;;  %v2981_v9 = vadd.f32 %v2980_v49, %v2844_v11  ;;  %12612 = vst [vmem:[#allocation105_spill] sm:$0xff] %v9549_v6  ;;  %v12616_v11 = vand.u32 4294901760, %v9477_v29 }
 0x295   : > { %12609 = vst [vmem:[#allocation95_spill] sm:$0xff] %v9530_v50  ;;  %v9544_v1 = vsub.f32 %v9451_v14, %v12611_v21  ;;  %4251 = vmatpush2.msra.mxu1 %v8909_v7  ;;  %4276 = vmatpush1.msra.mxu0 %v9275_v17  ;;  %v9553_v5 = vsub.f32 %v9455_v32, %v9489_v37  ;;  %v2982_v21 = vpop.f32.mrf.mxu1 }
 0x296   : > { %4253 = vmatprep.subr.mxu1 %v8919_v38  ;;  %4278 = vmatprep.subr.mxu0 %v9277_v30  ;;  %v9559_v7 = vsub.f32 %v207_v18, %v9522_v16  ;;  %5555 = vst [vmem:[%s8345_s26 + $0x10] sm:$0xff] %v2981_v9  ;;  %v2983_v32 = vadd.f32 %v2982_v21, %v2846_v4  ;;  %v9566_v38 = vand.u32 4294901760, %v200_v26  ;;  %v9573_v18 = vld [vmem:[#allocation2 + $0xb8] sm:$0xff]  ;;  %v9585_v9 = vand.u32 4294901760, %v192_v47 }
 0x297   : > { %12613 = vst [vmem:[#allocation113_spill] sm:$0xff] %v9553_v5  ;;  %4255 = vmatpush2.msra.mxu1 %v8926_v33  ;;  %4280 = vmatpush1.msra.mxu0 %v9285_v25  ;;  %v9571_v41 = vsub.f32 %v9477_v29, %v12616_v11  ;;  %v9576_v49 = vsub.f32 %v208_v61, %v9520_v0  ;;  %v12618_v33 = vand.u32 4294901760, %v9504_v44  ;;  %v9587_v21 = vand.u32 4294901760, %v191_v13  ;;  %v175_v29 = vld [vmem:[#allocation2 + $0x70] sm:$0xff] }
 0x298   : > { %12614 = vst [vmem:[#allocation34_spill] sm:$0xff] %v9559_v7  ;;  %12615 = vst [vmem:[#allocation120_spill] sm:$0xff] %v9566_v38  ;;  %4257 = vmatprep.subr.mxu1 %v12431_v39  ;;  %4282 = vmatprep.subr.mxu0 %v9287_v3  ;;  %v9596_v8 = vsub.f32 %v199_v43, %v9549_v6  ;;  %v12622_v11 = vand.u32 4294901760, %v9525_v51  ;;  %v9612_v61 = vand.u32 4294901760, %v9573_v18  ;;  %v9614_v43 = vand.u32 4294901760, %v183_v59  ;;  %v168_v3 = vld [vmem:[#allocation2 + $0x38] sm:$0xff] }
 0x299   : > { %12617 = vst [vmem:[#allocation46_spill] sm:$0xff] %v9576_v49  ;;  %v9583_v4 = vsub.f32 %v9504_v44, %v12618_v33  ;;  %12619 = vst [vmem:[#allocation36_spill] sm:$0xff] %v9585_v9  ;;  %4259 = vmatpush2.msra.mxu1 %v12433_v42  ;;  %4261 = vmatprep.mubr.f32.mxu1 %v12600_v52  ;;  %v176_v33 = vld [vmem:[#allocation2 + $0x78] sm:$0xff]  ;;  %v12628_v44 = vand.u32 4294901760, %v9371_v62  ;;  %v12633_v62 = vand.u32 4294901760, %v9553_v5 }
 0x29a   : > { %12620 = vst [vmem:[#allocation42_spill] sm:$0xff] %v9587_v21  ;;  %5556 = vst [vmem:[%s8345_s26 + $0x18] sm:$0xff] %v2983_v32  ;;  %4284 = vmatpush1.msra.mxu0 %v9298_v20  ;;  %4263 = vmatmul.mubr.f32.vlgmr.msra.gmra.mxu1 %v12603_v57  ;;  %v9604_v42 = vsub.f32 %v9525_v51, %v12622_v11  ;;  %v12623_v32 = vand.u32 4294901760, %v9510_v53  ;;  %v12626_v20 = vand.u32 4294901760, %v9356_v15  ;;  %v12632_v51 = vand.u32 4294901760, %v9382_v60 }
 0x29b   : > { %12621 = vst [vmem:[#allocation90_spill] sm:$0xff] %v9596_v8  ;;  %12624 = vst [vmem:[#allocation52_spill] sm:$0xff] %v9612_v61  ;;  %4286 = vmatprep.subr.mxu0 %v9306_v55  ;;  %v9630_v15 = vsub.f32 %v191_v13, %v9587_v21  ;;  %v9648_v13 = vand.u32 4294901760, %v176_v33  ;;  %v9650_v55 = vand.u32 4294901760, %v175_v29  ;;  %v9676_v60 = vand.u32 4294901760, %v168_v3  ;;  %4799 = vmatprep.mubr.f32.mxu1 %v12600_v52  ;;  %v12787_v52 = vld [vmem:[#allocation44_spill] sm:$0xff] }
 0x29c   : > { %v9609_v39 = vsub.f32 %v9510_v53, %v12623_v32  ;;  %12625 = vst [vmem:[#allocation79_spill] sm:$0xff] %v9614_v43  ;;  %4419 = vmatprep.subr.mxu1 %v12626_v20  ;;  %v9623_v32 = vsub.f32 %v200_v26, %v9566_v38  ;;  %v167_v53 = vld [vmem:[#allocation2 + $0x30] sm:$0xff]  ;;  %4288 = vmatpush1.msra.mxu0 %v9324_v23  ;;  %v12630_v20 = vand.u32 4294901760, %v9530_v50 }
 0x29d   : > { %4425 = vmatpush1.msra.mxu1 %v12628_v44  ;;  %12629 = vst [vmem:[#allocation104_spill] sm:$0xff] %v9630_v15  ;;  %v9638_v26 = vsub.f32 %v192_v47, %v9585_v9  ;;  %4290 = vmatprep.subr.mxu0 %v9373_v36  ;;  %v9646_v44 = vsub.f32 %v9553_v5, %v12633_v62  ;;  %12634 = vst [vmem:[#allocation76_spill] sm:$0xff] %v9648_v13  ;;  %v12636_v47 = vand.u32 4294901760, %v9387_v24  ;;  %v415_v5 = vld [vmem:[#allocation2 + $0x7f0] sm:$0xff] }
 0x29e   : > { %12627 = vst [vmem:[#allocation60_spill] sm:$0xff] %v9623_v32  ;;  %v9635_v11 = vsub.f32 %v9530_v50, %v12630_v20  ;;  %4431 = vmatprep.subr.mxu1 %v12632_v51  ;;  %12635 = vst [vmem:[#allocation86_spill] sm:$0xff] %v9650_v55  ;;  %4292 = vmatpush1.msra.mxu0 %v9348_v46  ;;  %v9659_v51 = vsub.f32 %v183_v59, %v9614_v43  ;;  %v9661_v62 = vand.u32 4294901760, %v167_v53  ;;  %v416_v50 = vld [vmem:[#allocation2 + $0x7f8] sm:$0xff]  ;;  %v399_v23 = vld [vmem:[#allocation2 + $0x770] sm:$0xff] }
 0x29f   : > { %12631 = vst [vmem:[#allocation84_spill] sm:$0xff] %v9638_v26  ;;  %4437 = vmatpush1.msra.mxu1 %v12636_v47  ;;  %4294 = vmatprep.subr.mxu0 %v9403_v19  ;;  %v12639_v36 = vand.u32 4294901760, %v9392_v31  ;;  %v12640_v20 = vand.u32 4294901760, %v9576_v49  ;;  %v12641_v24 = vand.u32 4294901760, %v9559_v7  ;;  %12642 = vst [vmem:[#allocation43_spill] sm:$0xff] %v9676_v60  ;;  %v12643_v31 = vand.u32 4294901760, %v9414_v28 }
 0x2a0   : > { %12637 = vst [vmem:[#allocation23_spill] sm:$0xff] %v9659_v51  ;;  %12638 = vst [vmem:[#allocation5_spill] sm:$0xff] %v9661_v62  ;;  %4296 = vmatpush1.msra.mxu0 %v9405_v27  ;;  %v12645_v59 = vand.u32 4294901760, %v9419_v2  ;;  %v9694_v28 = vsub.f32 %v175_v29, %v9650_v55  ;;  %v9702_v19 = vsub.f32 %v176_v33, %v9648_v13  ;;  %v9712_v29 = vand.u32 4294901760, %v415_v5  ;;  %v408_v27 = vld [vmem:[#allocation2 + $0x7b8] sm:$0xff] }
 0x2a1   : > { %4443 = vmatprep.subr.mxu1 %v12639_v36  ;;  %v9669_v46 = vsub.f32 %v9576_v49, %v12640_v20  ;;  %v9674_v47 = vsub.f32 %v9559_v7, %v12641_v24  ;;  %v9687_v24 = vsub.f32 %v9573_v18, %v9612_v61  ;;  %v407_v7 = vld [vmem:[#allocation2 + $0x7b0] sm:$0xff]  ;;  %4298 = vmatprep.subr.mxu0 %v9453_v22  ;;  %v12650_v20 = vld [vmem:[#allocation66_spill] sm:$0xff]  ;;  %v12659_v49 = vand.u32 4294901760, %v9471_v45 }
 0x2a2   : > { %4449 = vmatpush1.msra.mxu1 %v12643_v31  ;;  %12646 = vst [vmem:[#allocation6_spill] sm:$0xff] %v9694_v28  ;;  %v12647_v31 = vand.u32 4294901760, %v9596_v8  ;;  %12648 = vst [vmem:[#allocation63_spill] sm:$0xff] %v9702_v19  ;;  %v12649_v18 = vld [vmem:[#allocation27_spill] sm:$0xff]  ;;  %v12651_v22 = vand.u32 4294901760, %v12650_v20  ;;  %v9708_v2 = vsub.f32 %v167_v53, %v9661_v62  ;;  %v12661_v20 = vand.u32 4294901760, %v9630_v15 }
 0x2a3   : > { %12644 = vst [vmem:[#allocation25_spill] sm:$0xff] %v9687_v24  ;;  %4455 = vmatprep.subr.mxu1 %v12645_v59  ;;  %4300 = vmatpush1.msra.mxu0 %v12649_v18  ;;  %v9710_v59 = vand.u32 4294901760, %v416_v50  ;;  %12654 = vst [vmem:[#allocation67_spill] sm:$0xff] %v9712_v29  ;;  %v12663_v45 = vand.u32 4294901760, %v9518_v63 }
 0x2a4   : > { %v9699_v36 = vsub.f32 %v9596_v8, %v12647_v31  ;;  %4461 = vmatpush1.msra.mxu1 %v12651_v22  ;;  %12652 = vst [vmem:[#allocation50_spill] sm:$0xff] %v9708_v2  ;;  %4302 = vmatprep.subr.mxu0 %v9480_v48  ;;  %v12655_v31 = vld [vmem:[#allocation8_spill] sm:$0xff]  ;;  %v12657_v22 = vand.u32 4294901760, %v9623_v32  ;;  %v9725_v8 = vand.u32 4294901760, %v407_v7  ;;  %v9738_v18 = vsub.f32 %v9630_v15, %v12661_v20  ;;  %v391_v15 = vld [vmem:[#allocation2 + $0x730] sm:$0xff] }
 0x2a5   : > { %12653 = vst [vmem:[#allocation29_spill] sm:$0xff] %v9710_v59  ;;  %v12656_v33 = vand.u32 4294901760, %v12655_v31  ;;  %4304 = vmatpush1.msra.mxu0 %v9466_v35  ;;  %v12660_v31 = vand.u32 4294901760, %v9638_v26  ;;  %v400_v48 = vld [vmem:[#allocation2 + $0x778] sm:$0xff]  ;;  %v9766_v35 = vsub.f32 %v416_v50, %v9710_v59 }
 0x2a6   : > { %v9723_v53 = vsub.f32 %v9623_v32, %v12657_v22  ;;  %12658 = vst [vmem:[#allocation58_spill] sm:$0xff] %v9725_v8  ;;  %v9742_v32 = vsub.f32 %v168_v3, %v9676_v60  ;;  %4306 = vmatprep.subr.mxu0 %v9489_v37  ;;  %v12665_v22 = vand.u32 4294901760, %v9499_v54  ;;  %v9756_v3 = vsub.f32 %v415_v5, %v9712_v29  ;;  %v384_v5 = vld [vmem:[#allocation2 + $0x6f8] sm:$0xff] }
 0x2a7   : > { %4467 = vmatprep.subr.mxu1 %v12656_v33  ;;  %v9733_v33 = vsub.f32 %v9638_v26, %v12660_v31  ;;  %v9748_v31 = vand.u32 4294901760, %v408_v27  ;;  %4308 = vmatpush1.msra.mxu0 %v9491_v34  ;;  %v12667_v37 = vand.u32 4294901760, %v9659_v51  ;;  %12669 = vst [vmem:[#allocation92_spill] sm:$0xff] %v9766_v35  ;;  %v12670_v54 = vand.u32 4294901760, %v9539_v12 }
 0x2a8   : > { %4473 = vmatpush1.msra.mxu1 %v12659_v49  ;;  %12662 = vst [vmem:[#allocation39_spill] sm:$0xff] %v9742_v32  ;;  %12666 = vst [vmem:[#allocation47_spill] sm:$0xff] %v9756_v3  ;;  %v392_v49 = vld [vmem:[#allocation2 + $0x738] sm:$0xff]  ;;  %4310 = vmatprep.subr.mxu0 %v9520_v0  ;;  %v9775_v20 = vand.u32 4294901760, %v400_v48  ;;  %v12673_v34 = vand.u32 4294901760, %v9544_v1  ;;  %v12674_v12 = vand.u32 4294901760, %v9687_v24 }
 0x2a9   : > { %4479 = vmatprep.subr.mxu1 %v12663_v45  ;;  %12664 = vst [vmem:[#allocation80_spill] sm:$0xff] %v9748_v31  ;;  %v9761_v63 = vsub.f32 %v9659_v51, %v12667_v37  ;;  %v9763_v45 = vand.u32 4294901760, %v399_v23  ;;  %4312 = vmatpush1.msra.mxu0 %v9522_v16  ;;  %v383_v51 = vld [vmem:[#allocation2 + $0x6f0] sm:$0xff]  ;;  %v12675_v37 = vand.u32 4294901760, %v9583_v4  ;;  %v12677_v0 = vand.u32 4294901760, %v9694_v28 }
 0x2aa   : > { %4485 = vmatpush1.msra.mxu1 %v12665_v22  ;;  %v9773_v22 = vsub.f32 %v407_v7, %v9725_v8  ;;  %12672 = vst [vmem:[#allocation45_spill] sm:$0xff] %v9775_v20  ;;  %4314 = vmatprep.subr.mxu0 %v9566_v38  ;;  %v9804_v7 = vand.u32 4294901760, %v391_v15  ;;  %v12680_v38 = vand.u32 4294901760, %v9571_v41  ;;  %v9815_v16 = vsub.f32 %v408_v27, %v9748_v31 }
 0x2ab   : > { %12668 = vst [vmem:[#allocation15_spill] sm:$0xff] %v9763_v45  ;;  %4491 = vmatprep.subr.mxu1 %v12670_v54  ;;  %v9786_v54 = vsub.f32 %v9687_v24, %v12674_v12  ;;  %v9800_v50 = vsub.f32 %v9694_v28, %v12677_v0  ;;  %v9802_v12 = vand.u32 4294901760, %v392_v49  ;;  %4316 = vmatpush1.msra.mxu0 %v9549_v6  ;;  %v375_v0 = vld [vmem:[#allocation2 + $0x6b0] sm:$0xff]  ;;  %v12683_v28 = vand.u32 4294901760, %v9604_v42 }
 0x2ac   : > { %12671 = vst [vmem:[#allocation70_spill] sm:$0xff] %v9773_v22  ;;  %4497 = vmatpush1.msra.mxu1 %v12673_v34  ;;  %v12676_v34 = vand.u32 4294901760, %v9702_v19  ;;  %12679 = vst [vmem:[#allocation10_spill] sm:$0xff] %v9804_v7  ;;  %4318 = vmatprep.subr.mxu0 %v9585_v9  ;;  %v12684_v6 = vand.u32 4294901760, %v9708_v2  ;;  %v12687_v27 = vand.u32 4294901760, %v9609_v39  ;;  %v12690_v4 = vand.u32 4294901760, %v9646_v44 }
 0x2ad   : > { %4503 = vmatprep.subr.mxu1 %v12675_v37  ;;  %12678 = vst [vmem:[#allocation78_spill] sm:$0xff] %v9802_v12  ;;  %v9811_v37 = vsub.f32 %v399_v23, %v9763_v45  ;;  %12682 = vst [vmem:[#allocation12_spill] sm:$0xff] %v9815_v16  ;;  %v9827_v23 = vand.u32 4294901760, %v383_v51  ;;  %4320 = vmatpush1.msra.mxu0 %v9587_v21  ;;  %v4574_v42 = vand.u32 4294901760, %v9786_v54  ;;  %v9851_v21 = vand.u32 4294901760, %v375_v0  ;;  %v367_v39 = vld [vmem:[#allocation2 + $0x670] sm:$0xff] }
 0x2ae   : > { %v9795_v1 = vsub.f32 %v9702_v19, %v12676_v34  ;;  %4509 = vmatpush1.msra.mxu1 %v12680_v38  ;;  %v9823_v41 = vsub.f32 %v9708_v2, %v12684_v6  ;;  %v9825_v38 = vand.u32 4294901760, %v384_v5  ;;  %v376_v34 = vld [vmem:[#allocation2 + $0x6b8] sm:$0xff]  ;;  %v9841_v2 = vsub.f32 %v400_v48, %v9775_v20  ;;  %4322 = vmatprep.subr.mxu0 %v9612_v61 }
 0x2af   : > { %12681 = vst [vmem:[#allocation19_spill] sm:$0xff] %v9811_v37  ;;  %4515 = vmatprep.subr.mxu1 %v12683_v28  ;;  %12686 = vst [vmem:[#allocation7_spill] sm:$0xff] %v9827_v23  ;;  %v12688_v28 = vand.u32 4294901760, %v9742_v32  ;;  %v9849_v54 = vsub.f32 %v391_v15, %v9804_v7  ;;  %4324 = vmatpush1.msra.mxu0 %v9614_v43  ;;  %v12694_v48 = vand.u32 4294901760, %v9766_v35  ;;  %v9861_v44 = vand.u32 4294901760, %v376_v34 }
 0x2b0   : > { %12685 = vst [vmem:[#allocation24_spill] sm:$0xff] %v9825_v38  ;;  %4521 = vmatpush1.msra.mxu1 %v12687_v27  ;;  %12689 = vst [vmem:[#allocation16_spill] sm:$0xff] %v9841_v2  ;;  %v368_v27 = vld [vmem:[#allocation2 + $0x678] sm:$0xff]  ;;  %v9865_v15 = vsub.f32 %v392_v49, %v9802_v12  ;;  %4326 = vmatprep.subr.mxu0 %v9648_v13  ;;  %v12697_v43 = vand.u32 4294901760, %v9669_v46  ;;  %v12701_v49 = vand.u32 4294901760, %v9674_v47 }
 0x2b1   : > { %v9837_v9 = vsub.f32 %v9742_v32, %v12688_v28  ;;  %4527 = vmatprep.subr.mxu1 %v12690_v4  ;;  %12691 = vst [vmem:[#allocation30_spill] sm:$0xff] %v9849_v54  ;;  %12692 = vst [vmem:[#allocation11_spill] sm:$0xff] %v9851_v21  ;;  %v12693_v28 = vand.u32 4294901760, %v9635_v11  ;;  %v9859_v6 = vsub.f32 %v9766_v35, %v12694_v48  ;;  %v12699_v48 = vand.u32 4294901760, %v9756_v3  ;;  %v360_v13 = vld [vmem:[#allocation2 + $0x638] sm:$0xff] }
 0x2b2   : > { %12695 = vst [vmem:[#allocation69_spill] sm:$0xff] %v9861_v44  ;;  %12696 = vst [vmem:[#allocation37_spill] sm:$0xff] %v9865_v15  ;;  %v9880_v4 = vsub.f32 %v384_v5, %v9825_v38  ;;  %4328 = vmatpush1.msra.mxu0 %v9650_v55  ;;  %v12703_v5 = vand.u32 4294901760, %v9723_v53  ;;  %v9897_v47 = vsub.f32 %v375_v0, %v9851_v21  ;;  %v351_v55 = vld [vmem:[#allocation2 + $0x5f0] sm:$0xff]  ;;  %v12713_v0 = vand.u32 4294901760, %v9738_v18 }
 0x2b3   : > { %4533 = vmatpush1.msra.mxu1 %v12693_v28  ;;  %v9872_v28 = vsub.f32 %v383_v51, %v9827_v23  ;;  %v9877_v61 = vsub.f32 %v9756_v3, %v12699_v48  ;;  %v4598_v46 = vand.u32 4294901760, %v9837_v9  ;;  %v359_v3 = vld [vmem:[#allocation2 + $0x630] sm:$0xff]  ;;  %4330 = vmatprep.subr.mxu0 %v9676_v60  ;;  %v9899_v9 = vand.u32 4294901760, %v368_v27 }
 0x2b4   : > { %4539 = vmatprep.subr.mxu1 %v12697_v43  ;;  %12700 = vst [vmem:[#allocation56_spill] sm:$0xff] %v9880_v4  ;;  %v12702_v43 = vand.u32 4294901760, %v9773_v22  ;;  %12704 = vst [vmem:[#allocation81_spill] sm:$0xff] %v9897_v47  ;;  %4332 = vmatpush1.msra.mxu0 %v9661_v62  ;;  %v12707_v48 = vand.u32 4294901760, %v9699_v36  ;;  %v4610_v11 = vand.u32 4294901760, %v9859_v6  ;;  %v12708_v60 = vand.u32 4294901760, %v9815_v16 }
 0x2b5   : > { %12698 = vst [vmem:[#allocation65_spill] sm:$0xff] %v9872_v28  ;;  %4545 = vmatpush1.msra.mxu1 %v12701_v49  ;;  %12705 = vst [vmem:[#allocation40_spill] sm:$0xff] %v9899_v9  ;;  %v9901_v49 = vand.u32 4294901760, %v367_v39  ;;  %4334 = vmatprep.subr.mxu0 %v9710_v59  ;;  %v4616_v36 = vand.u32 4294901760, %v9877_v61  ;;  %v9921_v6 = vand.u32 4294901760, %v360_v13  ;;  %v12714_v59 = vand.u32 4294901760, %v9841_v2 }
 0x2b6   : > { %v9889_v51 = vsub.f32 %v9773_v22, %v12702_v43  ;;  %4551 = vmatprep.subr.mxu1 %v12703_v5  ;;  %v9911_v53 = vsub.f32 %v9815_v16, %v12708_v60  ;;  %v352_v5 = vld [vmem:[#allocation2 + $0x5f8] sm:$0xff]  ;;  %v9915_v22 = vsub.f32 %v376_v34, %v9861_v44  ;;  %v12710_v43 = vand.u32 4294901760, %v9733_v33  ;;  %4336 = vmatpush2.msra.mxu0 %v9712_v29 }
 0x2b7   : > { %12706 = vst [vmem:[#allocation41_spill] sm:$0xff] %v9901_v49  ;;  %4557 = vmatpush1.msra.mxu1 %v12707_v48  ;;  %12711 = vst [vmem:[#allocation49_spill] sm:$0xff] %v9921_v6  ;;  %v9923_v48 = vand.u32 4294901760, %v359_v3  ;;  %v9933_v33 = vsub.f32 %v9841_v2, %v12714_v59  ;;  %v12715_v61 = vand.u32 4294901760, %v9811_v37  ;;  %4338 = vmatprep.subr.mxu0 %v9748_v31  ;;  %v9950_v59 = vand.u32 4294901760, %v352_v5  ;;  %v344_v29 = vld [vmem:[#allocation2 + $0x5b8] sm:$0xff] }
 0x2b8   : > { %12709 = vst [vmem:[#allocation75_spill] sm:$0xff] %v9915_v22  ;;  %4563 = vmatprep.subr.mxu1 %v12710_v43  ;;  %v9943_v18 = vsub.f32 %v367_v39, %v9901_v49  ;;  %v9952_v60 = vand.u32 4294901760, %v351_v55  ;;  %4340 = vmatpush2.msra.mxu0 %v9725_v8  ;;  %v12721_v39 = vand.u32 4294901760, %v9865_v15  ;;  %v9965_v31 = vsub.f32 %v368_v27, %v9899_v9  ;;  %v336_v8 = vld [vmem:[#allocation2 + $0x578] sm:$0xff] }
 0x2b9   : > { %12712 = vst [vmem:[#allocation22_spill] sm:$0xff] %v9923_v48  ;;  %4569 = vmatpush1.msra.mxu1 %v12713_v0  ;;  %v9938_v43 = vsub.f32 %v9811_v37, %v12715_v61  ;;  %v12717_v0 = vand.u32 4294901760, %v9849_v54  ;;  %12718 = vst [vmem:[#allocation53_spill] sm:$0xff] %v9950_v59  ;;  %v12720_v61 = vand.u32 4294901760, %v9761_v63  ;;  %4342 = vmatprep.subr.mxu0 %v9775_v20  ;;  %v12727_v27 = vand.u32 4294901760, %v9800_v50 }
 0x2ba   : > { %4575 = vmatprep.subr.mxu1 %v4574_v42  ;;  %12716 = vst [vmem:[#allocation26_spill] sm:$0xff] %v9943_v18  ;;  %12719 = vst [vmem:[#allocation21_spill] sm:$0xff] %v9952_v60  ;;  %v4622_v42 = vand.u32 4294901760, %v9911_v53  ;;  %v9961_v62 = vsub.f32 %v9865_v15, %v12721_v39  ;;  %v9971_v63 = vsub.f32 %v359_v3, %v9923_v48  ;;  %v12725_v53 = vand.u32 4294901760, %v9880_v4  ;;  %v343_v39 = vld [vmem:[#allocation2 + $0x5b0] sm:$0xff] }
 0x2bb   : > { %v9948_v34 = vsub.f32 %v9849_v54, %v12717_v0  ;;  %4581 = vmatpush1.msra.mxu1 %v12720_v61  ;;  %12722 = vst [vmem:[#allocation74_spill] sm:$0xff] %v9965_v31  ;;  %v12723_v54 = vand.u32 4294901760, %v9795_v1  ;;  %v9980_v0 = vsub.f32 %v360_v13, %v9921_v6  ;;  %4344 = vmatpush2.msra.mxu0 %v9763_v45  ;;  %v4634_v1 = vand.u32 4294901760, %v9933_v33 }
 0x2bc   : > { %12724 = vst [vmem:[#allocation101_spill] sm:$0xff] %v9971_v63  ;;  %v9976_v61 = vsub.f32 %v9880_v4, %v12725_v53  ;;  %v4640_v3 = vand.u32 4294901760, %v9938_v43  ;;  %v9992_v20 = vand.u32 4294901760, %v344_v29  ;;  %4346 = vmatprep.subr.mxu0 %v9802_v12  ;;  %v9997_v50 = vsub.f32 %v351_v55, %v9952_v60  ;;  %v327_v43 = vld [vmem:[#allocation2 + $0x530] sm:$0xff] }
 0x2bd   : > { %4587 = vmatprep.subr.mxu1 %v12723_v54  ;;  %12726 = vst [vmem:[#allocation106_spill] sm:$0xff] %v9980_v0  ;;  %v12728_v54 = vand.u32 4294901760, %v9872_v28  ;;  %v4652_v13 = vand.u32 4294901760, %v9948_v34  ;;  %v10001_v45 = vsub.f32 %v352_v5, %v9950_v59  ;;  %4348 = vmatpush2.msra.mxu0 %v9804_v7  ;;  %v4646_v12 = vand.u32 4294901760, %v9961_v62  ;;  %v319_v7 = vld [vmem:[#allocation2 + $0x4f0] sm:$0xff] }
 0x2be   : > { %4593 = vmatpush1.msra.mxu1 %v12727_v27  ;;  %12729 = vst [vmem:[#allocation110_spill] sm:$0xff] %v9997_v50  ;;  %v335_v27 = vld [vmem:[#allocation2 + $0x570] sm:$0xff]  ;;  %v10012_v55 = vand.u32 4294901760, %v343_v39  ;;  %4350 = vmatprep.subr.mxu0 %v9825_v38  ;;  %v4658_v5 = vand.u32 4294901760, %v9976_v61  ;;  %v10022_v62 = vand.u32 4294901760, %v336_v8  ;;  %v320_v38 = vld [vmem:[#allocation2 + $0x4f8] sm:$0xff] }
 0x2bf   : > { %v9990_v53 = vsub.f32 %v9872_v28, %v12728_v54  ;;  %4599 = vmatprep.subr.mxu1 %v4598_v46  ;;  %12730 = vst [vmem:[#allocation108_spill] sm:$0xff] %v10001_v45  ;;  %v12731_v54 = vand.u32 4294901760, %v9823_v41  ;;  %v12732_v46 = vand.u32 4294901760, %v9915_v22  ;;  %v328_v28 = vld [vmem:[#allocation2 + $0x538] sm:$0xff]  ;;  %v12734_v41 = vand.u32 4294901760, %v9897_v47  ;;  %4352 = vmatpush2.msra.mxu0 %v9827_v23 }
 0x2c0   : > { %12733 = vst [vmem:[#allocation111_spill] sm:$0xff] %v10012_v55  ;;  %12735 = vst [vmem:[#allocation114_spill] sm:$0xff] %v10022_v62  ;;  %4354 = vmatprep.subr.mxu0 %v9861_v44  ;;  %v12739_v61 = vand.u32 4294901760, %v9889_v51 }
 0x2c1   : > { %4605 = vmatpush1.msra.mxu1 %v12731_v54  ;;  %v10010_v34 = vsub.f32 %v9915_v22, %v12732_v46  ;;  %v10020_v54 = vsub.f32 %v9897_v47, %v12734_v41  ;;  %v4664_v33 = vand.u32 4294901760, %v9990_v53  ;;  %v10027_v22 = vand.u32 4294901760, %v335_v27  ;;  %4356 = vmatpush2.msra.mxu0 %v9851_v21  ;;  %v311_v21 = vld [vmem:[#allocation2 + $0x4b0] sm:$0xff] }
 0x2c2   : > { %4611 = vmatprep.subr.mxu1 %v4610_v11  ;;  %v10029_v11 = vand.u32 4294901760, %v327_v43  ;;  %v12737_v41 = vand.u32 4294901760, %v9943_v18  ;;  %v10038_v47 = vand.u32 4294901760, %v328_v28  ;;  %v10042_v53 = vsub.f32 %v344_v29, %v9992_v20  ;;  %4358 = vmatprep.subr.mxu0 %v9899_v9 }
 0x2c3   : > { %4617 = vmatpush2.msra.mxu1 %v4616_v36  ;;  %12736 = vst [vmem:[#allocation117_spill] sm:$0xff] %v10027_v22  ;;  %v4670_v44 = vand.u32 4294901760, %v10010_v34  ;;  %v4676_v29 = vand.u32 4294901760, %v10020_v54  ;;  %v12742_v36 = vand.u32 4294901760, %v9980_v0  ;;  %v10063_v34 = vand.u32 4294901760, %v320_v38  ;;  %4360 = vmatpush2.msra.mxu0 %v9901_v49 }
 0x2c4   : > { %4623 = vmatprep.subr.mxu1 %v4622_v42  ;;  %v10036_v46 = vsub.f32 %v9943_v18, %v12737_v41  ;;  %12738 = vst [vmem:[#allocation116_spill] sm:$0xff] %v10042_v53  ;;  %v10049_v42 = vsub.f32 %v343_v39, %v10012_v55  ;;  %v12741_v41 = vand.u32 4294901760, %v9965_v31  ;;  %v10054_v18 = vand.u32 4294901760, %v319_v7  ;;  %v312_v39 = vld [vmem:[#allocation2 + $0x4b8] sm:$0xff]  ;;  %4362 = vmatprep.subr.mxu0 %v9921_v6  ;;  %v303_v6 = vld [vmem:[#allocation2 + $0x470] sm:$0xff] }
 0x2c5   : > { %4629 = vmatpush2.msra.mxu1 %v12739_v61  ;;  %v10061_v51 = vsub.f32 %v9980_v0, %v12742_v36  ;;  %v10066_v61 = vsub.f32 %v336_v8, %v10022_v62  ;;  %v12745_v54 = vand.u32 4294901760, %v9971_v63  ;;  %v10086_v0 = vsub.f32 %v328_v28, %v10038_v47  ;;  %4364 = vmatpush2.msra.mxu0 %v9923_v48  ;;  %v296_v48 = vld [vmem:[#allocation2 + $0x438] sm:$0xff] }
 0x2c6   : > { %12740 = vst [vmem:[#allocation107_spill] sm:$0xff] %v10049_v42  ;;  %v4681_v23 = vsub.f32 %v9965_v31, %v12741_v41  ;;  %4635 = vmatprep.subr.mxu1 %v4634_v1  ;;  %v10070_v41 = vsub.f32 %v335_v27, %v10027_v22  ;;  %v10073_v1 = vsub.f32 %v327_v43, %v10029_v11  ;;  %v4688_v8 = vand.u32 4294901760, %v10036_v46  ;;  %v304_v43 = vld [vmem:[#allocation2 + $0x478] sm:$0xff] }
 0x2c7   : > { %12743 = vst [vmem:[#allocation109_spill] sm:$0xff] %v10066_v61  ;;  %4641 = vmatpush2.msra.mxu1 %v4640_v3  ;;  %v4699_v36 = vsub.f32 %v9971_v63, %v12745_v54  ;;  %v12746_v3 = vand.u32 4294901760, %v10001_v45  ;;  %12747 = vst [vmem:[#allocation71_spill] sm:$0xff] %v10086_v0  ;;  %v10090_v9 = vsub.f32 %v319_v7, %v10054_v18  ;;  %4366 = vmatprep.subr.mxu0 %v9950_v59 }
 0x2c8   : > { %12744 = vst [vmem:[#allocation118_spill] sm:$0xff] %v10073_v1  ;;  %4647 = vmatprep.subr.mxu1 %v4646_v12  ;;  %v4682_v54 = vand.u32 4294901760, %v4681_v23  ;;  %v10092_v12 = vand.u32 4294901760, %v312_v39  ;;  %v10097_v49 = vand.u32 4294901760, %v311_v21  ;;  %v10101_v23 = vsub.f32 %v320_v38, %v10063_v34  ;;  %4368 = vmatpush2.msra.mxu0 %v9952_v60 }
 0x2c9   : > { %v4705_v27 = vsub.f32 %v10001_v45, %v12746_v3  ;;  %4653 = vmatpush2.msra.mxu1 %v4652_v13  ;;  %v4694_v3 = vand.u32 4294901760, %v10061_v51  ;;  %v4700_v7 = vand.u32 4294901760, %v4699_v36  ;;  %v12749_v13 = vand.u32 4294901760, %v9997_v50  ;;  %v295_v51 = vld [vmem:[#allocation2 + $0x430] sm:$0xff]  ;;  %4370 = vmatprep.subr.mxu0 %v9992_v20 }
 0x2ca   : > { %4659 = vmatprep.subr.mxu1 %v4658_v5  ;;  %12748 = vst [vmem:[#allocation119_spill] sm:$0xff] %v10101_v23  ;;  %v10107_v59 = vand.u32 4294901760, %v304_v43  ;;  %v12750_v38 = vand.u32 4294901760, %v10042_v53  ;;  %v10114_v60 = vand.u32 4294901760, %v303_v6  ;;  %4372 = vmatpush2.msra.mxu0 %v10012_v55  ;;  %v12751_v36 = vand.u32 4294901760, %v10049_v42 }
 0x2cb   : > { %4665 = vmatpush2.msra.mxu1 %v4664_v33  ;;  %v4711_v46 = vsub.f32 %v9997_v50, %v12749_v13  ;;  %v4706_v28 = vand.u32 4294901760, %v4705_v27  ;;  %v10121_v5 = vand.u32 4294901760, %v296_v48  ;;  %v10125_v27 = vsub.f32 %v312_v39, %v10092_v12  ;;  %4374 = vmatprep.subr.mxu0 %v10022_v62 }
 0x2cc   : > { %4671 = vmatprep.subr.mxu1 %v4670_v44  ;;  %v4717_v45 = vsub.f32 %v10042_v53, %v12750_v38  ;;  %v4723_v13 = vsub.f32 %v10049_v42, %v12751_v36  ;;  %v10129_v38 = vsub.f32 %v311_v21, %v10097_v49  ;;  %v12755_v33 = vand.u32 4294901760, %v10066_v61  ;;  %4376 = vmatpush2.msra.mxu0 %v10027_v22 }
 0x2cd   : > { %4677 = vmatpush2.msra.mxu1 %v4676_v29  ;;  %12752 = vst [vmem:[#allocation112_spill] sm:$0xff] %v10121_v5  ;;  %12753 = vst [vmem:[#allocation115_spill] sm:$0xff] %v10125_v27  ;;  %v10134_v55 = vand.u32 4294901760, %v295_v51  ;;  %v4712_v44 = vand.u32 4294901760, %v4711_v46  ;;  %v12757_v39 = vand.u32 4294901760, %v10070_v41  ;;  %4378 = vmatprep.subr.mxu0 %v10038_v47  ;;  %v12758_v36 = vand.u32 4294901760, %v10086_v0 }
 0x2ce   : > { %4683 = vmatprep.subr.mxu1 %v4682_v54  ;;  %12754 = vst [vmem:[#allocation121_spill] sm:$0xff] %v10129_v38  ;;  %v4729_v29 = vsub.f32 %v10066_v61, %v12755_v33  ;;  %v10142_v54 = vsub.f32 %v304_v43, %v10107_v59  ;;  %v4718_v21 = vand.u32 4294901760, %v4717_v45  ;;  %v10146_v33 = vsub.f32 %v303_v6, %v10114_v60 }
 0x2cf   : > { %12756 = vst [vmem:[#allocation66_spill] sm:$0xff] %v10134_v55  ;;  %4689 = vmatpush2.msra.mxu1 %v4688_v8  ;;  %v4735_v62 = vsub.f32 %v10070_v41, %v12757_v39  ;;  %v4741_v22 = vsub.f32 %v10086_v0, %v12758_v36  ;;  %4380 = vmatpush2.msra.mxu0 %v10029_v11  ;;  %v4724_v46 = vand.u32 4294901760, %v4723_v13  ;;  %v12759_v43 = vand.u32 4294901760, %v10073_v1 }
 0x2d0   : > { %4695 = vmatprep.subr.mxu1 %v4694_v3  ;;  %v10158_v45 = vsub.f32 %v296_v48, %v10121_v5  ;;  %4382 = vmatprep.subr.mxu0 %v10063_v34  ;;  %v4730_v6 = vand.u32 4294901760, %v4729_v29  ;;  %v10162_v36 = vsub.f32 %v295_v51, %v10134_v55  ;;  %v12761_v8 = vand.u32 4294901760, %v10101_v23 }
 0x2d1   : > { %4701 = vmatpush2.msra.mxu1 %v4700_v7  ;;  %v4747_v39 = vsub.f32 %v10073_v1, %v12759_v43  ;;  %4384 = vmatpush2.msra.mxu0 %v10054_v18  ;;  %v4736_v43 = vand.u32 4294901760, %v4735_v62  ;;  %v11335_v48 = vand.u32 4294901760, %v10142_v54  ;;  %v12762_v29 = vand.u32 4294901760, %v10090_v9 }
 0x2d2   : > { %4707 = vmatprep.subr.mxu1 %v4706_v28  ;;  %12760 = vst [vmem:[#allocation8_spill] sm:$0xff] %v10162_v36  ;;  %v4753_v7 = vsub.f32 %v10101_v23, %v12761_v8  ;;  %4386 = vmatprep.subr.mxu0 %v10092_v12  ;;  %v4742_v28 = vand.u32 4294901760, %v4741_v22  ;;  %v12763_v13 = vand.u32 4294901760, %v10125_v27  ;;  %v11341_v3 = vand.u32 4294901760, %v10162_v36 }
 0x2d3   : > { %4713 = vmatpush2.msra.mxu1 %v4712_v44  ;;  %v4759_v51 = vsub.f32 %v10090_v9, %v12762_v29  ;;  %4388 = vmatpush2.msra.mxu0 %v10097_v49  ;;  %v4748_v8 = vand.u32 4294901760, %v4747_v39  ;;  %v11340_v44 = vand.u32 4294901760, %v10158_v45 }
 0x2d4   : > { %4719 = vmatprep.subr.mxu1 %v4718_v21  ;;  %v4765_v62 = vsub.f32 %v10125_v27, %v12763_v13  ;;  %4390 = vmatprep.subr.mxu0 %v10107_v59  ;;  %v4754_v22 = vand.u32 4294901760, %v4753_v7  ;;  %v12764_v21 = vand.u32 4294901760, %v10129_v38 }
 0x2d5   : > { %4725 = vmatpush2.msra.mxu1 %v4724_v46  ;;  %4392 = vmatpush2.msra.mxu0 %v10114_v60  ;;  %v4777_v46 = vsub.f32 %v10142_v54, %v11335_v48  ;;  %v4760_v39 = vand.u32 4294901760, %v4759_v51  ;;  %v12767_v51 = vld [vmem:[#allocation72_spill] sm:$0xff] }
 0x2d6   : > { %4731 = vmatprep.subr.mxu1 %v4730_v6  ;;  %v4771_v29 = vsub.f32 %v10129_v38, %v12764_v21  ;;  %4394 = vmatprep.subr.mxu0 %v10121_v5  ;;  %v12765_v6 = vand.u32 4294901760, %v10146_v33  ;;  %v4766_v13 = vand.u32 4294901760, %v4765_v62  ;;  %v12766_v21 = vld [vmem:[#allocation102_spill] sm:$0xff]  ;;  %v12768_v5 = vld [vmem:[#allocation103_spill] sm:$0xff] }
 0x2d7   : > { %4737 = vmatpush2.msra.mxu1 %v4736_v43  ;;  %4396 = vmatpush2.msra.mxu0 %v10134_v55  ;;  %v4789_v43 = vsub.f32 %v10158_v45, %v11340_v44  ;;  %v12770_v55 = vld [vmem:[#allocation14_spill] sm:$0xff] }
 0x2d8   : > { %4743 = vmatprep.subr.mxu1 %v4742_v28  ;;  %v4783_v7 = vsub.f32 %v10146_v33, %v12765_v6  ;;  %4402 = vmatprep.mubr.f32.mxu0 %v12766_v21  ;;  %v4772_v48 = vand.u32 4294901760, %v4771_v29  ;;  %v4795_v28 = vsub.f32 %v10162_v36, %v11341_v3  ;;  %v4778_v6 = vand.u32 4294901760, %v4777_v46  ;;  %v12772_v21 = vld [vmem:[#allocation17_spill] sm:$0xff]  ;;  %v12773_v3 = vld [vmem:[#allocation59_spill] sm:$0xff]  ;;  %v12775_v46 = vld [vmem:[#allocation28_spill] sm:$0xff] }
 0x2d9   : > { %4749 = vmatpush2.msra.mxu1 %v4748_v8  ;;  %4809 = vmatprep.subr.mxu0 %v12767_v51  ;;  %v12769_v8 = vld [vmem:[#allocation33_spill] sm:$0xff]  ;;  %v4790_v44 = vand.u32 4294901760, %v4789_v43  ;;  %v12781_v43 = vld [vmem:[#allocation48_spill] sm:$0xff] }
 0x2da   : > { %4755 = vmatprep.subr.mxu1 %v4754_v22  ;;  %4408 = vmatmul.mubr.f32.vlgmr.msra.gmra.mxu0 %v12768_v5  ;;  %v4784_v62 = vand.u32 4294901760, %v4783_v7  ;;  %v12771_v22 = vld [vmem:[#allocation9_spill] sm:$0xff]  ;;  %v4796_v29 = vand.u32 4294901760, %v4795_v28  ;;  %v12774_v5 = vld [vmem:[#allocation51_spill] sm:$0xff]  ;;  %v12782_v28 = vld [vmem:[#allocation32_spill] sm:$0xff] }
 0x2db   : > { %4761 = vmatpush2.msra.mxu1 %v4760_v39  ;;  %4812 = vmatpush1.msra.mxu0 %v12769_v8  ;;  %v12777_v39 = vld [vmem:[#allocation85_spill] sm:$0xff] }
 0x2dc   : > { %4767 = vmatprep.subr.mxu1 %v4766_v13  ;;  %4815 = vmatprep.subr.mxu0 %v12770_v55  ;;  %v12779_v7 = vld [vmem:[#allocation57_spill] sm:$0xff] }
 0x2dd   : > { %4773 = vmatpush2.msra.mxu1 %v4772_v48  ;;  %4818 = vmatpush1.msra.mxu0 %v12771_v22  ;;  %v12776_v48 = vld [vmem:[#allocation77_spill] sm:$0xff] }
 0x2de   : > { %4779 = vmatprep.subr.mxu1 %v4778_v6  ;;  %4821 = vmatprep.subr.mxu0 %v12772_v21  ;;  %v12780_v13 = vld [vmem:[#allocation73_spill] sm:$0xff]  ;;  %v12783_v6 = vld [vmem:[#allocation64_spill] sm:$0xff] }
 0x2df   : > { %4785 = vmatpush2.msra.mxu1 %v4784_v62  ;;  %4824 = vmatpush1.msra.mxu0 %v12773_v3  ;;  %v12784_v62 = vld [vmem:[#allocation88_spill] sm:$0xff] }
 0x2e0   : > { %4791 = vmatprep.subr.mxu1 %v4790_v44  ;;  %4827 = vmatprep.subr.mxu0 %v12774_v5  ;;  %v12778_v44 = vld [vmem:[#allocation82_spill] sm:$0xff] }
 0x2e1   : > { %4797 = vmatpush2.msra.mxu1 %v4796_v29  ;;  %4830 = vmatpush1.msra.mxu0 %v12775_v46  ;;  %v12785_v29 = vld [vmem:[#allocation35_spill] sm:$0xff] }
 0x2e2   : > { %4801 = vmatmul.mubr.f32.vlgmr.msra.gmra.mxu1 %v12603_v57  ;;  %4833 = vmatprep.subr.mxu0 %v12776_v48  ;;  %v12786_v57 = vld [vmem:[#allocation87_spill] sm:$0xff] }
 0x2e3   : > { %5011 = vmatprep.subr.mxu1 %v9263_v40  ;;  %4836 = vmatpush1.msra.mxu0 %v12777_v39 }
 0x2e4   : > { %5013 = vmatpush1.msra.mxu1 %v9268_v56  ;;  %4839 = vmatprep.subr.mxu0 %v9434_v10 }
 0x2e5   : > { %5015 = vmatprep.subr.mxu1 %v9273_v58  ;;  %4842 = vmatpush1.msra.mxu0 %v12778_v44 }
 0x2e6   : > { %5017 = vmatpush1.msra.mxu1 %v9275_v17  ;;  %4845 = vmatprep.subr.mxu0 %v12779_v7 }
 0x2e7   : > { %5019 = vmatprep.subr.mxu1 %v9277_v30  ;;  %4848 = vmatpush1.msra.mxu0 %v9451_v14  ;;  %v12788_v30 = vld [vmem:[#allocation113_spill] sm:$0xff]  ;;  %v12789_v14 = vld [vmem:[#allocation100_spill] sm:$0xff] }
 0x2e8   : > { %5021 = vmatpush1.msra.mxu1 %v9285_v25  ;;  %4851 = vmatprep.subr.mxu0 %v12780_v13  ;;  %v12790_v25 = vld [vmem:[#allocation95_spill] sm:$0xff]  ;;  %v12791_v13 = vld [vmem:[#allocation89_spill] sm:$0xff] }
 0x2e9   : > { %5023 = vmatprep.subr.mxu1 %v12781_v43  ;;  %4854 = vmatpush1.msra.mxu0 %v12782_v28  ;;  %v12792_v43 = vld [vmem:[#allocation46_spill] sm:$0xff]  ;;  %v12793_v28 = vld [vmem:[#allocation68_spill] sm:$0xff] }
 0x2ea   : > { %5025 = vmatpush1.msra.mxu1 %v12783_v6  ;;  %4857 = vmatprep.subr.mxu0 %v12784_v62  ;;  %v12794_v6 = vld [vmem:[#allocation34_spill] sm:$0xff]  ;;  %v12795_v62 = vld [vmem:[#allocation31_spill] sm:$0xff] }
 0x2eb   : > { %5027 = vmatprep.subr.mxu1 %v12785_v29  ;;  %4860 = vmatpush1.msra.mxu0 %v12786_v57  ;;  %v12796_v29 = vld [vmem:[#allocation60_spill] sm:$0xff]  ;;  %v12797_v57 = vld [vmem:[#allocation61_spill] sm:$0xff] }
 0x2ec   : > { %5029 = vmatpush1.msra.mxu1 %v12787_v52  ;;  %4863 = vmatprep.subr.mxu0 %v12788_v30  ;;  %v12798_v52 = vld [vmem:[#allocation90_spill] sm:$0xff]  ;;  %v12799_v30 = vld [vmem:[#allocation27_spill] sm:$0xff] }
 0x2ed   : > { %5031 = vmatprep.subr.mxu1 %v12789_v14  ;;  %4866 = vmatpush1.msra.mxu0 %v12790_v25  ;;  %v12800_v25 = vld [vmem:[#allocation38_spill] sm:$0xff] }
 0x2ee   : > { %5033 = vmatpush1.msra.mxu1 %v12791_v13  ;;  %4869 = vmatprep.subr.mxu0 %v12792_v43  ;;  %v12801_v13 = vld [vmem:[#allocation104_spill] sm:$0xff]  ;;  %v12802_v43 = vld [vmem:[#allocation13_spill] sm:$0xff] }
 0x2ef   : > { %5035 = vmatprep.subr.mxu1 %v12793_v28  ;;  %4872 = vmatpush1.msra.mxu0 %v12794_v6  ;;  %v12803_v6 = vld [vmem:[#allocation18_spill] sm:$0xff] }
 0x2f0   : > { %5037 = vmatpush1.msra.mxu1 %v12795_v62  ;;  %4875 = vmatprep.subr.mxu0 %v12796_v29  ;;  %v12804_v62 = vld [vmem:[#allocation23_spill] sm:$0xff]  ;;  %v12805_v29 = vld [vmem:[#allocation20_spill] sm:$0xff] }
 0x2f1   : > { %5039 = vmatprep.subr.mxu1 %v12797_v57  ;;  %4878 = vmatpush1.msra.mxu0 %v12798_v52  ;;  %v12806_v52 = vld [vmem:[#allocation83_spill] sm:$0xff] }
 0x2f2   : > { %5041 = vmatpush1.msra.mxu1 %v12799_v30  ;;  %4881 = vmatprep.subr.mxu0 %v9638_v26  ;;  %v12807_v30 = vld [vmem:[#allocation6_spill] sm:$0xff]  ;;  %v12808_v26 = vld [vmem:[#allocation97_spill] sm:$0xff] }
 0x2f3   : > { %5043 = vmatprep.subr.mxu1 %v12800_v25  ;;  %4884 = vmatpush1.msra.mxu0 %v12801_v13  ;;  %v12809_v13 = vld [vmem:[#allocation120_spill] sm:$0xff] }
 0x2f4   : > { %5045 = vmatpush1.msra.mxu1 %v12802_v43  ;;  %4887 = vmatprep.subr.mxu0 %v9687_v24  ;;  %v12810_v43 = vld [vmem:[#allocation50_spill] sm:$0xff]  ;;  %v12811_v24 = vld [vmem:[#allocation105_spill] sm:$0xff] }
 0x2f5   : > { %5047 = vmatprep.subr.mxu1 %v12803_v6  ;;  %4890 = vmatpush1.msra.mxu0 %v12804_v62  ;;  %v12812_v62 = vld [vmem:[#allocation36_spill] sm:$0xff] }
 0x2f6   : > { %5049 = vmatpush1.msra.mxu1 %v12805_v29  ;;  %4893 = vmatprep.subr.mxu0 %v9702_v19  ;;  %v12813_v29 = vld [vmem:[#allocation47_spill] sm:$0xff]  ;;  %v12814_v19 = vld [vmem:[#allocation42_spill] sm:$0xff] }
 0x2f7   : > { %5051 = vmatprep.subr.mxu1 %v12806_v52  ;;  %4896 = vmatpush1.msra.mxu0 %v12807_v30  ;;  %v12815_v30 = vld [vmem:[#allocation52_spill] sm:$0xff] }
 0x2f8   : > { %5053 = vmatpush1.msra.mxu1 %v12808_v26  ;;  %4899 = vmatprep.subr.mxu0 %v9742_v32  ;;  %v12816_v26 = vld [vmem:[#allocation70_spill] sm:$0xff]  ;;  %v12817_v32 = vld [vmem:[#allocation79_spill] sm:$0xff] }
 0x2f9   : > { %5055 = vmatprep.subr.mxu1 %v12809_v13  ;;  %4902 = vmatpush1.msra.mxu0 %v12810_v43  ;;  %v12818_v43 = vld [vmem:[#allocation76_spill] sm:$0xff] }
 0x2fa   : > { %5057 = vmatpush1.msra.mxu1 %v12811_v24  ;;  %4905 = vmatprep.subr.mxu0 %v9766_v35  ;;  %v12819_v35 = vld [vmem:[#allocation86_spill] sm:$0xff] }
 0x2fb   : > { %5059 = vmatprep.subr.mxu1 %v12812_v62  ;;  %4908 = vmatpush2.msra.mxu0 %v12813_v29  ;;  %v12820_v29 = vld [vmem:[#allocation43_spill] sm:$0xff] }
 0x2fc   : > { %5061 = vmatpush1.msra.mxu1 %v12814_v19  ;;  %4911 = vmatprep.subr.mxu0 %v9815_v16  ;;  %v12821_v19 = vld [vmem:[#allocation30_spill] sm:$0xff]  ;;  %v12822_v16 = vld [vmem:[#allocation5_spill] sm:$0xff] }
 0x2fd   : > { %5063 = vmatprep.subr.mxu1 %v12815_v30  ;;  %4914 = vmatpush2.msra.mxu0 %v12816_v26  ;;  %v12823_v26 = vld [vmem:[#allocation29_spill] sm:$0xff] }
 0x2fe   : > { %5065 = vmatpush1.msra.mxu1 %v12817_v32  ;;  %4917 = vmatprep.subr.mxu0 %v9841_v2  ;;  %v12824_v32 = vld [vmem:[#allocation65_spill] sm:$0xff]  ;;  %v12825_v2 = vld [vmem:[#allocation67_spill] sm:$0xff] }
 0x2ff   : > { %5067 = vmatprep.subr.mxu1 %v12818_v43  ;;  %4920 = vmatpush2.msra.mxu0 %v9811_v37  ;;  %v12826_v43 = vld [vmem:[#allocation75_spill] sm:$0xff]  ;;  %v12827_v37 = vld [vmem:[#allocation80_spill] sm:$0xff] }
 0x300   : > { %5069 = vmatpush1.msra.mxu1 %v12819_v35  ;;  %4923 = vmatprep.subr.mxu0 %v9865_v15  ;;  %v12828_v35 = vld [vmem:[#allocation81_spill] sm:$0xff]  ;;  %v12829_v15 = vld [vmem:[#allocation58_spill] sm:$0xff] }
 0x301   : > { %5071 = vmatprep.subr.mxu1 %v12820_v29  ;;  %4926 = vmatpush2.msra.mxu0 %v12821_v19  ;;  %v12830_v19 = vld [vmem:[#allocation45_spill] sm:$0xff] }
 0x302   : > { %5073 = vmatpush1.msra.mxu1 %v12822_v16  ;;  %4929 = vmatprep.subr.mxu0 %v9880_v4  ;;  %v12831_v16 = vld [vmem:[#allocation26_spill] sm:$0xff]  ;;  %v12832_v4 = vld [vmem:[#allocation15_spill] sm:$0xff] }
 0x303   : > { %5075 = vmatprep.subr.mxu1 %v12823_v26  ;;  %4932 = vmatpush2.msra.mxu0 %v12824_v32  ;;  %v12833_v26 = vld [vmem:[#allocation106_spill] sm:$0xff] }
 0x304   : > { %5077 = vmatpush2.msra.mxu1 %v12825_v2  ;;  %4935 = vmatprep.subr.mxu0 %v12826_v43  ;;  %v12834_v32 = vld [vmem:[#allocation78_spill] sm:$0xff] }
 0x305   : > { %5079 = vmatprep.subr.mxu1 %v12827_v37  ;;  %4938 = vmatpush2.msra.mxu0 %v12828_v35  ;;  %v12835_v43 = vld [vmem:[#allocation10_spill] sm:$0xff]  ;;  %v12836_v37 = vld [vmem:[#allocation108_spill] sm:$0xff] }
 0x306   : > { %5081 = vmatpush2.msra.mxu1 %v12829_v15  ;;  %4941 = vmatprep.subr.mxu0 %v9965_v31  ;;  %v12837_v35 = vld [vmem:[#allocation24_spill] sm:$0xff]  ;;  %v12838_v31 = vld [vmem:[#allocation7_spill] sm:$0xff] }
 0x307   : > { %5083 = vmatprep.subr.mxu1 %v12830_v19  ;;  %4944 = vmatpush2.msra.mxu0 %v12831_v16  ;;  %v12839_v16 = vld [vmem:[#allocation69_spill] sm:$0xff] }
 0x308   : > { %5085 = vmatpush2.msra.mxu1 %v12832_v4  ;;  %4947 = vmatprep.subr.mxu0 %v12833_v26  ;;  %v12840_v26 = vld [vmem:[#allocation11_spill] sm:$0xff] }
 0x309   : > { %5087 = vmatprep.subr.mxu1 %v12834_v32  ;;  %4950 = vmatpush2.msra.mxu0 %v9971_v63  ;;  %v12841_v63 = vld [vmem:[#allocation40_spill] sm:$0xff] }
 0x30a   : > { %5089 = vmatpush2.msra.mxu1 %v12835_v43  ;;  %4953 = vmatprep.subr.mxu0 %v12836_v37  ;;  %v12842_v37 = vld [vmem:[#allocation41_spill] sm:$0xff] }
 0x30b   : > { %5091 = vmatprep.subr.mxu1 %v12837_v35  ;;  %4956 = vmatpush2.msra.mxu0 %v9997_v50  ;;  %v12843_v50 = vld [vmem:[#allocation49_spill] sm:$0xff] }
 0x30c   : > { %5093 = vmatpush2.msra.mxu1 %v12838_v31  ;;  %4959 = vmatprep.subr.mxu0 %v10042_v53  ;;  %v12844_v53 = vld [vmem:[#allocation22_spill] sm:$0xff] }
 0x30d   : > { %5095 = vmatprep.subr.mxu1 %v12839_v16  ;;  %4962 = vmatpush2.msra.mxu0 %v10049_v42  ;;  %v12845_v42 = vld [vmem:[#allocation53_spill] sm:$0xff] }
 0x30e   : > { %5097 = vmatpush2.msra.mxu1 %v12840_v26  ;;  %4965 = vmatprep.subr.mxu0 %v10066_v61  ;;  %v12846_v61 = vld [vmem:[#allocation21_spill] sm:$0xff] }
 0x30f   : > { %5099 = vmatprep.subr.mxu1 %v12841_v63  ;;  %4968 = vmatpush2.msra.mxu0 %v10070_v41 }
 0x310   : > { %5101 = vmatpush2.msra.mxu1 %v12842_v37  ;;  %4971 = vmatprep.subr.mxu0 %v10086_v0  ;;  %v12847_v0 = vld [vmem:[#allocation111_spill] sm:$0xff] }
 0x311   : > { %5103 = vmatprep.subr.mxu1 %v12843_v50  ;;  %4974 = vmatpush2.msra.mxu0 %v10073_v1  ;;  %v12848_v1 = vld [vmem:[#allocation114_spill] sm:$0xff] }
 0x312   : > { %5105 = vmatpush2.msra.mxu1 %v12844_v53  ;;  %4977 = vmatprep.subr.mxu0 %v10101_v23  ;;  %v12849_v23 = vld [vmem:[#allocation117_spill] sm:$0xff] }
 0x313   : > { %5107 = vmatprep.subr.mxu1 %v12845_v42  ;;  %4980 = vmatpush2.msra.mxu0 %v10090_v9 }
 0x314   : > { %5109 = vmatpush2.msra.mxu1 %v12846_v61  ;;  %4983 = vmatprep.subr.mxu0 %v10125_v27  ;;  %v12850_v27 = vld [vmem:[#allocation94_spill] sm:$0xff] }
 0x315   : > { %5111 = vmatprep.subr.mxu1 %v9992_v20  ;;  %4986 = vmatpush2.msra.mxu0 %v10129_v38  ;;  %v12851_v38 = vld [vmem:[#allocation96_spill] sm:$0xff] }
 0x316   : > { %5113 = vmatpush2.msra.mxu1 %v12847_v0  ;;  %4989 = vmatprep.subr.mxu0 %v10142_v54 }
 0x317   : > { %5115 = vmatprep.subr.mxu1 %v12848_v1  ;;  %4992 = vmatpush2.msra.mxu0 %v10146_v33  ;;  %v12852_v1 = vand.u32 4294901760, %v12767_v51  ;;  %v12861_v51 = vld [vmem:[#allocation98_spill] sm:$0xff] }
 0x318   : > { %5117 = vmatpush2.msra.mxu1 %v12849_v23  ;;  %4995 = vmatprep.subr.mxu0 %v10158_v45  ;;  %v12853_v23 = vand.u32 4294901760, %v12769_v8  ;;  %v12862_v8 = vand.u32 4294901760, %v12775_v46  ;;  %v12867_v46 = vand.u32 4294901760, %v12778_v44 }
 0x319   : > { %5119 = vmatprep.subr.mxu1 %v10038_v47  ;;  %4998 = vmatpush2.msra.mxu0 %v10162_v36  ;;  %v12854_v36 = vand.u32 4294901760, %v12770_v55  ;;  %v12859_v55 = vand.u32 4294901760, %v12774_v5  ;;  %v12866_v5 = vand.u32 4294901760, %v9434_v10 }
 0x31a   : > { %5001 = vmatprep.mubr.f32.mxu0 %v12850_v27  ;;  %5121 = vmatpush2.msra.mxu1 %v10029_v11  ;;  %v12855_v27 = vand.u32 4294901760, %v12771_v22  ;;  %v12863_v22 = vld [vmem:[#allocation99_spill] sm:$0xff] }
 0x31b   : > { %5004 = vmatmul.mubr.f32.vlgmr.msra.gmra.mxu0 %v12851_v38  ;;  %5123 = vmatprep.subr.mxu1 %v10063_v34  ;;  %v12856_v38 = vand.u32 4294901760, %v12772_v21  ;;  %v12864_v21 = vand.u32 4294901760, %v12776_v48  ;;  %v12868_v48 = vand.u32 4294901760, %v12779_v7 }
 0x31c   : > { %5154 = vmatprep.subr.mxu0 %v12852_v1  ;;  %5125 = vmatpush2.msra.mxu1 %v10054_v18  ;;  %v12857_v1 = vand.u32 4294901760, %v12773_v3  ;;  %v12865_v3 = vand.u32 4294901760, %v12777_v39 }
 0x31d   : > { %5158 = vmatpush1.msra.mxu0 %v12853_v23  ;;  %5127 = vmatprep.subr.mxu1 %v10092_v12  ;;  %v12858_v23 = vld [vmem:[#allocation112_spill] sm:$0xff] }
 0x31e   : > { %5162 = vmatprep.subr.mxu0 %v12854_v36  ;;  %5129 = vmatpush2.msra.mxu1 %v10097_v49  ;;  %v12860_v36 = vld [vmem:[#allocation66_spill] sm:$0xff] }
 0x31f   : > { %5166 = vmatpush1.msra.mxu0 %v12855_v27  ;;  %5131 = vmatprep.subr.mxu1 %v10107_v59  ;;  %v12869_v27 = vld [vmem:[#allocation54_spill] sm:$0xff] }
 0x320   : > { %5170 = vmatprep.subr.mxu0 %v12856_v38  ;;  %5133 = vmatpush2.msra.mxu1 %v10114_v60  ;;  %v12872_v38 = vld [vmem:[#allocation62_spill] sm:$0xff] }
 0x321   : > { %5174 = vmatpush1.msra.mxu0 %v12857_v1  ;;  %5135 = vmatprep.subr.mxu1 %v12858_v23  ;;  %v12875_v1 = vld [vmem:[#allocation48_spill] sm:$0xff] }
 0x322   : > { %5178 = vmatprep.subr.mxu0 %v12859_v55  ;;  %5137 = vmatpush2.msra.mxu1 %v12860_v36  ;;  %v12878_v55 = vld [vmem:[#allocation64_spill] sm:$0xff] }
 0x323   : > { %5141 = vmatprep.mubr.f32.mxu1 %v12861_v51  ;;  %5182 = vmatpush1.msra.mxu0 %v12862_v8  ;;  %v12881_v51 = vld [vmem:[#allocation35_spill] sm:$0xff] }
 0x324   : > { %5145 = vmatmul.mubr.f32.vlgmr.msra.gmra.mxu1 %v12863_v22  ;;  %5186 = vmatprep.subr.mxu0 %v12864_v21  ;;  %v12882_v8 = vld [vmem:[#allocation87_spill] sm:$0xff]  ;;  %v12884_v21 = vld [vmem:[#allocation44_spill] sm:$0xff] }
 0x325   : > { %5417 = vmatprep.subr.mxu1 %v9263_v40  ;;  %5190 = vmatpush1.msra.mxu0 %v12865_v3  ;;  %v12870_v40 = vld [vmem:[#allocation55_spill] sm:$0xff]  ;;  %v12883_v22 = vand.u32 4294901760, %v12882_v8  ;;  %v12885_v3 = vld [vmem:[#allocation113_spill] sm:$0xff] }
 0x326   : > { %5419 = vmatpush1.msra.mxu1 %v9268_v56  ;;  %5194 = vmatprep.subr.mxu0 %v12866_v5  ;;  %v12871_v39 = vand.u32 4294901760, %v12870_v40  ;;  %v12873_v56 = vld [vmem:[#allocation73_spill] sm:$0xff]  ;;  %v12886_v5 = vand.u32 4294901760, %v12885_v3  ;;  %v12890_v40 = vld [vmem:[#allocation46_spill] sm:$0xff] }
 0x327   : > { %5421 = vmatprep.subr.mxu1 %v9273_v58  ;;  %5198 = vmatpush1.msra.mxu0 %v12867_v46  ;;  %v12874_v10 = vand.u32 4294901760, %v12873_v56  ;;  %v12876_v58 = vld [vmem:[#allocation32_spill] sm:$0xff]  ;;  %v12887_v46 = vld [vmem:[#allocation95_spill] sm:$0xff]  ;;  %v12904_v8 = vld [vmem:[#allocation13_spill] sm:$0xff] }
 0x328   : > { %5423 = vmatpush1.msra.mxu1 %v9275_v17  ;;  %5202 = vmatprep.subr.mxu0 %v12868_v48  ;;  %v12877_v44 = vand.u32 4294901760, %v12876_v58  ;;  %v12879_v17 = vld [vmem:[#allocation88_spill] sm:$0xff]  ;;  %v12888_v48 = vand.u32 4294901760, %v12887_v46  ;;  %v12910_v46 = vld [vmem:[#allocation63_spill] sm:$0xff] }
 0x329   : > { %5425 = vmatprep.subr.mxu1 %v12869_v27  ;;  %5206 = vmatpush1.msra.mxu0 %v12871_v39  ;;  %v12880_v7 = vand.u32 4294901760, %v12879_v17  ;;  %v12889_v27 = vld [vmem:[#allocation89_spill] sm:$0xff]  ;;  %v12891_v39 = vand.u32 4294901760, %v12890_v40  ;;  %v12900_v17 = vld [vmem:[#allocation84_spill] sm:$0xff] }
 0x32a   : > { %5427 = vmatpush1.msra.mxu1 %v12872_v38  ;;  %5210 = vmatprep.subr.mxu0 %v12874_v10  ;;  %v12892_v38 = vld [vmem:[#allocation34_spill] sm:$0xff]  ;;  %v12894_v10 = vld [vmem:[#allocation31_spill] sm:$0xff]  ;;  %v12914_v40 = vld [vmem:[#allocation97_spill] sm:$0xff] }
 0x32b   : > { %5429 = vmatprep.subr.mxu1 %v12875_v1  ;;  %5214 = vmatpush1.msra.mxu0 %v12877_v44  ;;  %v12893_v56 = vand.u32 4294901760, %v12892_v38  ;;  %v12895_v1 = vld [vmem:[#allocation60_spill] sm:$0xff] }
 0x32c   : > { %5431 = vmatpush1.msra.mxu1 %v12878_v55  ;;  %5218 = vmatprep.subr.mxu0 %v12880_v7  ;;  %v12896_v58 = vand.u32 4294901760, %v12895_v1  ;;  %v12899_v55 = vld [vmem:[#allocation27_spill] sm:$0xff]  ;;  %v12901_v7 = vand.u32 4294901760, %v12900_v17 }
 0x32d   : > { %5433 = vmatprep.subr.mxu1 %v12881_v51  ;;  %5222 = vmatpush1.msra.mxu0 %v12883_v22  ;;  %v12905_v22 = vld [vmem:[#allocation25_spill] sm:$0xff] }
 0x32e   : > { %5435 = vmatpush1.msra.mxu1 %v12884_v21  ;;  %5226 = vmatprep.subr.mxu0 %v12886_v5  ;;  %v12906_v21 = vand.u32 4294901760, %v12905_v22  ;;  %v12909_v5 = vld [vmem:[#allocation20_spill] sm:$0xff]  ;;  %v12934_v22 = vld [vmem:[#allocation86_spill] sm:$0xff] }
 0x32f   : > { %5437 = vmatprep.subr.mxu1 %v12789_v14  ;;  %5230 = vmatpush1.msra.mxu0 %v12888_v48  ;;  %v12897_v14 = vld [vmem:[#allocation90_spill] sm:$0xff]  ;;  %v12911_v48 = vand.u32 4294901760, %v12910_v46  ;;  %v12940_v46 = vld [vmem:[#allocation56_spill] sm:$0xff] }
 0x330   : > { %5439 = vmatpush1.msra.mxu1 %v12889_v27  ;;  %5234 = vmatprep.subr.mxu0 %v12891_v39  ;;  %v12898_v44 = vand.u32 4294901760, %v12897_v14  ;;  %v12915_v39 = vld [vmem:[#allocation39_spill] sm:$0xff]  ;;  %v12923_v14 = vld [vmem:[#allocation42_spill] sm:$0xff] }
 0x331   : > { %5441 = vmatprep.subr.mxu1 %v12793_v28  ;;  %5238 = vmatpush1.msra.mxu0 %v12893_v56  ;;  %v12902_v28 = vld [vmem:[#allocation104_spill] sm:$0xff]  ;;  %v12916_v38 = vand.u32 4294901760, %v12915_v39  ;;  %v12945_v39 = vld [vmem:[#allocation75_spill] sm:$0xff] }
 0x332   : > { %5443 = vmatpush1.msra.mxu1 %v12894_v10  ;;  %5242 = vmatprep.subr.mxu0 %v12896_v58  ;;  %v12903_v51 = vand.u32 4294901760, %v12902_v28  ;;  %v12919_v10 = vld [vmem:[#allocation92_spill] sm:$0xff] }
 0x333   : > { %5445 = vmatprep.subr.mxu1 %v12797_v57  ;;  %5246 = vmatpush1.msra.mxu0 %v12898_v44  ;;  %v12907_v57 = vld [vmem:[#allocation23_spill] sm:$0xff]  ;;  %v12920_v1 = vand.u32 4294901760, %v12919_v10  ;;  %v12924_v44 = vld [vmem:[#allocation12_spill] sm:$0xff]  ;;  %v12950_v10 = vld [vmem:[#allocation74_spill] sm:$0xff] }
 0x334   : > { %5447 = vmatpush1.msra.mxu1 %v12899_v55  ;;  %5250 = vmatprep.subr.mxu0 %v12901_v7  ;;  %v12908_v3 = vand.u32 4294901760, %v12907_v57  ;;  %v12925_v55 = vand.u32 4294901760, %v12924_v44  ;;  %v12928_v7 = vld [vmem:[#allocation79_spill] sm:$0xff]  ;;  %v12956_v44 = vld [vmem:[#allocation101_spill] sm:$0xff] }
 0x335   : > { %5449 = vmatprep.subr.mxu1 %v12800_v25  ;;  %5254 = vmatpush1.msra.mxu0 %v12903_v51  ;;  %v12912_v25 = vld [vmem:[#allocation6_spill] sm:$0xff]  ;;  %v12931_v51 = vld [vmem:[#allocation76_spill] sm:$0xff] }
 0x336   : > { %5451 = vmatpush1.msra.mxu1 %v12904_v8  ;;  %5258 = vmatprep.subr.mxu0 %v12906_v21  ;;  %v12913_v27 = vand.u32 4294901760, %v12912_v25  ;;  %v12935_v21 = vld [vmem:[#allocation37_spill] sm:$0xff] }
 0x337   : > { %5453 = vmatprep.subr.mxu1 %v12803_v6  ;;  %5262 = vmatpush1.msra.mxu0 %v12908_v3  ;;  %v12917_v6 = vld [vmem:[#allocation50_spill] sm:$0xff]  ;;  %v12936_v57 = vand.u32 4294901760, %v12935_v21  ;;  %v12942_v25 = vld [vmem:[#allocation29_spill] sm:$0xff] }
 0x338   : > { %5455 = vmatpush1.msra.mxu1 %v12909_v5  ;;  %5266 = vmatprep.subr.mxu0 %v12911_v48  ;;  %v12918_v56 = vand.u32 4294901760, %v12917_v6  ;;  %v12939_v5 = vld [vmem:[#allocation5_spill] sm:$0xff]  ;;  %v12941_v48 = vand.u32 4294901760, %v12940_v46  ;;  %v12947_v6 = vld [vmem:[#allocation80_spill] sm:$0xff]  ;;  %v12971_v21 = vld [vmem:[#allocation118_spill] sm:$0xff] }
 0x339   : > { %5457 = vmatprep.subr.mxu1 %v12806_v52  ;;  %5270 = vmatpush1.msra.mxu0 %v12913_v27  ;;  %v12921_v52 = vld [vmem:[#allocation47_spill] sm:$0xff]  ;;  %v12943_v27 = vld [vmem:[#allocation65_spill] sm:$0xff] }
 0x33a   : > { %5459 = vmatpush1.msra.mxu1 %v12914_v40  ;;  %5274 = vmatprep.subr.mxu0 %v12916_v38  ;;  %v12922_v58 = vand.u32 4294901760, %v12921_v52  ;;  %v12944_v40 = vand.u32 4294901760, %v12943_v27  ;;  %v12946_v38 = vand.u32 4294901760, %v12945_v39  ;;  %v12952_v52 = vld [vmem:[#allocation26_spill] sm:$0xff]  ;;  %v12978_v46 = vld [vmem:[#allocation121_spill] sm:$0xff]  ;;  %v12984_v39 = vand.u32 4294901760, %v10158_v45 }
 0x33b   : > { %5461 = vmatprep.subr.mxu1 %v12809_v13  ;;  %5278 = vmatpush1.msra.mxu0 %v12918_v56  ;;  %v12926_v13 = vld [vmem:[#allocation70_spill] sm:$0xff] }
 0x33c   : > { %5463 = vmatpush1.msra.mxu1 %v12811_v24  ;;  %5282 = vmatprep.subr.mxu0 %v12920_v1  ;;  %v12927_v17 = vand.u32 4294901760, %v12926_v13  ;;  %v12929_v24 = vld [vmem:[#allocation16_spill] sm:$0xff]  ;;  %v12951_v1 = vand.u32 4294901760, %v12950_v10 }
 0x33d   : > { %5465 = vmatprep.subr.mxu1 %v12812_v62  ;;  %5286 = vmatpush2.msra.mxu0 %v12922_v58  ;;  %v12930_v28 = vand.u32 4294901760, %v12929_v24  ;;  %v12932_v62 = vld [vmem:[#allocation19_spill] sm:$0xff]  ;;  %v12953_v58 = vand.u32 4294901760, %v12952_v52 }
 0x33e   : > { %5467 = vmatpush1.msra.mxu1 %v12923_v14  ;;  %5290 = vmatprep.subr.mxu0 %v12925_v55  ;;  %v12933_v8 = vand.u32 4294901760, %v12932_v62  ;;  %v12957_v55 = vand.u32 4294901760, %v12956_v44  ;;  %v3518_v62 = vpop.f32.mrf.mxu1 }
 0x33f   : > { %5469 = vmatprep.subr.mxu1 %v12815_v30  ;;  %5294 = vmatpush2.msra.mxu0 %v12927_v17  ;;  %v12937_v30 = vld [vmem:[#allocation30_spill] sm:$0xff] }
 0x340   : > { %5471 = vmatpush1.msra.mxu1 %v12928_v7  ;;  %5298 = vmatprep.subr.mxu0 %v12930_v28  ;;  %v12938_v3 = vand.u32 4294901760, %v12937_v30  ;;  %v12960_v17 = vld [vmem:[#allocation110_spill] sm:$0xff]  ;;  %v12975_v30 = vand.u32 4294901760, %v10090_v9 }
 0x341   : > { %5473 = vmatprep.subr.mxu1 %v12931_v51  ;;  %5302 = vmatpush2.msra.mxu0 %v12933_v8  ;;  %v12961_v7 = vand.u32 4294901760, %v12960_v17  ;;  %v12968_v8 = vand.u32 4294901760, %v10070_v41  ;;  %v3520_v41 = vpop.f32.mrf.mxu1  ;;  %v12981_v9 = vld [vmem:[#allocation114_spill] sm:$0xff] }
 0x342   : > { %5475 = vmatpush1.msra.mxu1 %v12934_v22  ;;  %5306 = vmatprep.subr.mxu0 %v12936_v57  ;;  %v12973_v57 = vld [vmem:[#allocation119_spill] sm:$0xff] }
 0x343   : > { %5477 = vmatprep.subr.mxu1 %v12820_v29  ;;  %5310 = vmatpush2.msra.mxu0 %v12938_v3  ;;  %v12948_v29 = vld [vmem:[#allocation81_spill] sm:$0xff] }
 0x344   : > { %5479 = vmatpush1.msra.mxu1 %v12939_v5  ;;  %5314 = vmatprep.subr.mxu0 %v12941_v48  ;;  %v12949_v56 = vand.u32 4294901760, %v12948_v29  ;;  %v3862_v5 = vpop.f32.mrf.mxu1 }
 0x345   : > { %5481 = vmatprep.subr.mxu1 %v12942_v25  ;;  %5318 = vmatpush2.msra.mxu0 %v12944_v40  ;;  %v12983_v25 = vld [vmem:[#allocation117_spill] sm:$0xff] }
 0x346   : > { %5483 = vmatpush2.msra.mxu1 %v12825_v2  ;;  %5322 = vmatprep.subr.mxu0 %v12946_v38  ;;  %v12954_v2 = vld [vmem:[#allocation106_spill] sm:$0xff]  ;;  %v12985_v38 = vld [vmem:[#allocation8_spill] sm:$0xff] }
 0x347   : > { %5485 = vmatprep.subr.mxu1 %v12947_v6  ;;  %5326 = vmatpush2.msra.mxu0 %v12949_v56  ;;  %v12955_v14 = vand.u32 4294901760, %v12954_v2  ;;  %v12986_v6 = vand.u32 4294901760, %v12985_v38 }
 0x348   : > { %5487 = vmatpush2.msra.mxu1 %v12829_v15  ;;  %5330 = vmatprep.subr.mxu0 %v12951_v1  ;;  %v12958_v15 = vld [vmem:[#allocation108_spill] sm:$0xff] }
 0x349   : > { %5489 = vmatprep.subr.mxu1 %v12830_v19  ;;  %5334 = vmatpush2.msra.mxu0 %v12953_v58  ;;  %v12959_v13 = vand.u32 4294901760, %v12958_v15  ;;  %v3125_v19 = vpop.f32.mrf.mxu0 }
 0x34a   : > { %5491 = vmatpush2.msra.mxu1 %v12832_v4  ;;  %5338 = vmatprep.subr.mxu0 %v12955_v14  ;;  %v12962_v4 = vld [vmem:[#allocation116_spill] sm:$0xff]  ;;  %v3519_v48 = vadd.f32 %v3518_v62, %v3125_v19 }
 0x34b   : > { %5493 = vmatprep.subr.mxu1 %v12834_v32  ;;  %5342 = vmatpush2.msra.mxu0 %v12957_v55  ;;  %v12963_v24 = vand.u32 4294901760, %v12962_v4  ;;  %v12964_v32 = vld [vmem:[#allocation107_spill] sm:$0xff] }
 0x34c   : > { %5495 = vmatpush2.msra.mxu1 %v12835_v43  ;;  %5346 = vmatprep.subr.mxu0 %v12959_v13  ;;  %v12965_v28 = vand.u32 4294901760, %v12964_v32  ;;  %v12966_v43 = vld [vmem:[#allocation109_spill] sm:$0xff] }
 0x34d   : > { %5497 = vmatprep.subr.mxu1 %v12837_v35  ;;  %5350 = vmatpush2.msra.mxu0 %v12961_v7  ;;  %v12967_v51 = vand.u32 4294901760, %v12966_v43  ;;  %v3127_v35 = vpop.f32.mrf.mxu0 }
 0x34e   : > { %5499 = vmatpush2.msra.mxu1 %v12838_v31  ;;  %5354 = vmatprep.subr.mxu0 %v12963_v24  ;;  %v12969_v31 = vld [vmem:[#allocation71_spill] sm:$0xff] }
 0x34f   : > { %5501 = vmatprep.subr.mxu1 %v12839_v16  ;;  %5358 = vmatpush2.msra.mxu0 %v12965_v28  ;;  %v12970_v22 = vand.u32 4294901760, %v12969_v31  ;;  %v3721_v16 = vpop.f32.mrf.mxu0 }
 0x350   : > { %5503 = vmatpush2.msra.mxu1 %v12840_v26  ;;  %5362 = vmatprep.subr.mxu0 %v12967_v51  ;;  %v12972_v26 = vand.u32 4294901760, %v12971_v21  ;;  %v3722_v40 = vadd.f32 %v3721_v16, %v3519_v48 }
 0x351   : > { %5505 = vmatprep.subr.mxu1 %v12841_v63  ;;  %5366 = vmatpush2.msra.mxu0 %v12968_v8  ;;  %v12974_v63 = vand.u32 4294901760, %v12973_v57 }
 0x352   : > { %5507 = vmatpush2.msra.mxu1 %v12842_v37  ;;  %5370 = vmatprep.subr.mxu0 %v12970_v22  ;;  %v12976_v37 = vld [vmem:[#allocation115_spill] sm:$0xff]  ;;  %v3863_v56 = vadd.f32 %v3862_v5, %v3722_v40 }
 0x353   : > { %5509 = vmatprep.subr.mxu1 %v12843_v50  ;;  %5374 = vmatpush2.msra.mxu0 %v12972_v26  ;;  %v12977_v3 = vand.u32 4294901760, %v12976_v37  ;;  %v3723_v50 = vpop.f32.mrf.mxu0 }
 0x354   : > { %5511 = vmatpush2.msra.mxu1 %v12844_v53  ;;  %5378 = vmatprep.subr.mxu0 %v12974_v63  ;;  %v12979_v53 = vand.u32 4294901760, %v12978_v46 }
 0x355   : > { %5513 = vmatprep.subr.mxu1 %v12845_v42  ;;  %5382 = vmatpush2.msra.mxu0 %v12975_v30  ;;  %v12980_v42 = vand.u32 4294901760, %v10142_v54  ;;  %v4127_v27 = vpop.f32.mrf.mxu0  ;;  %v12987_v54 = vld [vmem:[#allocation91_spill] sm:$0xff] }
 0x356   : > { %5515 = vmatpush2.msra.mxu1 %v12846_v61  ;;  %5386 = vmatprep.subr.mxu0 %v12977_v3  ;;  %v12982_v61 = vand.u32 4294901760, %v10146_v33  ;;  %v12988_v33 = vld [vmem:[#allocation93_spill] sm:$0xff]  ;;  %v4128_v45 = vadd.f32 %v4127_v27, %v3863_v56 }
 0x357   : > { %5517 = vmatprep.subr.mxu1 %v9992_v20  ;;  %5390 = vmatpush2.msra.mxu0 %v12979_v53  ;;  %v3521_v20 = vadd.f32 %v3520_v41, %v3127_v35  ;;  %v4129_v10 = vpop.f32.mrf.mxu0 }
 0x358   : > { %5519 = vmatpush2.msra.mxu1 %v12847_v0  ;;  %5394 = vmatprep.subr.mxu0 %v12980_v42  ;;  %v3864_v0 = vpop.f32.mrf.mxu1 }
 0x359   : > { %5521 = vmatprep.subr.mxu1 %v12981_v9  ;;  %5398 = vmatpush2.msra.mxu0 %v12982_v61  ;;  %v3724_v29 = vadd.f32 %v3723_v50, %v3521_v20 }
 0x35a   : > { %5523 = vmatpush2.msra.mxu1 %v12983_v25  ;;  %5402 = vmatprep.subr.mxu0 %v12984_v39  ;;  %v4264_v1 = vpop.f32.mrf.mxu1 }
 0x35b   : > { %5525 = vmatprep.subr.mxu1 %v10038_v47  ;;  %5406 = vmatpush2.msra.mxu0 %v12986_v6  ;;  %v3865_v47 = vadd.f32 %v3864_v0, %v3724_v29 }
 0x35c   : > { %5408 = vmatprep.mubr.f32.mxu0 %v12987_v54  ;;  %5527 = vmatpush2.msra.mxu1 %v10029_v11  ;;  %v4265_v11 = vadd.f32 %v4264_v1, %v4128_v45  ;;  %v4266_v58 = vpop.f32.mrf.mxu1 }
 0x35d   : > { %5410 = vmatmul.mubr.f32.vlgmr.msra.gmra.mxu0 %v12988_v33  ;;  %5529 = vmatprep.subr.mxu1 %v10063_v34  ;;  %v4130_v52 = vadd.f32 %v4129_v10, %v3865_v47 }
 0x35e   : > { %5545 = vmatprep.mubr.f32.mxu1 %v12987_v54  ;;  %5531 = vmatpush2.msra.mxu1 %v10054_v18  ;;  %5557 = vst [vmem:[%s8345_s26 + $0x20] sm:$0xff] %v4265_v11 }
 0x35f   : > { %5533 = vmatprep.subr.mxu1 %v10092_v12  ;;  %v4267_v34 = vadd.f32 %v4266_v58, %v4130_v52 }
 0x360   : > { %5535 = vmatpush2.msra.mxu1 %v10097_v49 }
 0x361   : > { %5537 = vmatprep.subr.mxu1 %v10107_v59  ;;  %5558 = vst [vmem:[%s8345_s26 + $0x28] sm:$0xff] %v4267_v34 }
 0x362   : > { %5539 = vmatpush2.msra.mxu1 %v10114_v60 }
 0x363   : > { %5541 = vmatprep.subr.mxu1 %v12858_v23 }
 0x364   : > { %5543 = vmatpush2.msra.mxu1 %v12860_v36 }
 0x365   : > { %5547 = vmatmul.mubr.f32.vlgmr.msra.gmra.mxu1 %v12988_v33 }
 0x39a   : > { %v4409_v18 = vpop.f32.mrf.mxu0 }
 0x39c   : > { %v4411_v12 = vpop.f32.mrf.mxu0 }
 0x3a2   : > { %v4802_v2 = vpop.f32.mrf.mxu1 }
 0x3a3   : > { %v4803_v55 = vadd.f32 %v4802_v2, %v4409_v18 }
 0x3a4   : > { %v4804_v49 = vpop.f32.mrf.mxu1 }
 0x3a5   : > { %v4805_v15 = vadd.f32 %v4804_v49, %v4411_v12 }
 0x3db   : > { %v5005_v14 = vpop.f32.mrf.mxu0 }
 0x3dc   : > { %v5006_v13 = vadd.f32 %v5005_v14, %v4803_v55 }
 0x3dd   : > { %v5007_v44 = vpop.f32.mrf.mxu0 }
 0x3de   : > { %v5008_v23 = vadd.f32 %v5007_v44, %v4805_v15 }
 0x3e4   : > { %v5146_v59 = vpop.f32.mrf.mxu1 }
 0x3e5   : > { %v5147_v17 = vadd.f32 %v5146_v59, %v5006_v13 }
 0x3e6   : > { %v5148_v19 = vpop.f32.mrf.mxu1 }
 0x3e7   : > { %v5149_v7 = vadd.f32 %v5148_v19, %v5008_v23 }
 0x41d   : > { %v5411_v60 = vpop.f32.mrf.mxu0 }
 0x41e   : > { %v5412_v4 = vadd.f32 %v5411_v60, %v5147_v17 }
 0x41f   : > { %v5413_v36 = vpop.f32.mrf.mxu0 }
 0x420   : > { %v5414_v32 = vadd.f32 %v5413_v36, %v5149_v7 }
 0x425   : > { %v5548_v24 = vpop.f32.mrf.mxu1 }
 0x426   : > { %v5549_v28 = vadd.f32 %v5548_v24, %v5412_v4 }
 0x427   : > { %v5550_v43 = vpop.f32.mrf.mxu1 }
 0x428   : > { %5559 = vst [vmem:[%s8345_s26 + $0x30] sm:$0xff] %v5549_v28  ;;  %v5551_v51 = vadd.f32 %v5550_v43, %v5414_v32 }
 0x42a   : > { %5560 = vst [vmem:[%s8345_s26 + $0x38] sm:$0xff] %v5551_v51 }
 0x42b PF: > { %s13_s9 = sadd.s32 1, %s5700_s9  }
 0x42c   : > { %p10_p1 = scmp.ge.s32.totalorder %s13_s9, 4  }
 0x42e   :  { %12 = sbr.rel (!%p10_p1) target bundleno = 1 (0x1), region = 63 }
 0x433   :  { %5582 = vsyncpa [#allocation3], 1 }
 0x434   :  { %5584 = vsyncpa [#allocation3 + $0x1], 1 }

</bundles_post_ra>
